<compile_context>
chip_gen: v6e
topology: v6e:2x2x1
jax: 0.10.0
libtpu: 0.0.40
codegen_flags: <defaults>
</compile_context>

<pallas_src>
import numpy as np
import jax
import jax.numpy as jnp
from jax.experimental import pallas as pl

# --- model config (small shapes consistent with SimpleViT.__init__) ---
DIM = 64            # must be divisible by 4 (RandAPEv1)
DEPTH = 2
HEADS = 4
DIM_HEAD = 16
INNER = HEADS * DIM_HEAD        # 64
MLP_DIM = 128
NUM_CLASSES = 10
C_PAD = 128                     # lane-padded head output width
PATCH = 2                       # Conv2d(1, dim, 2, stride=2)
PATCH_DIM = 1 * PATCH * PATCH   # 4 (single input channel)
SCALE = DIM_HEAD ** (-0.5)
LN_EPS = 1e-5                   # nn.LayerNorm default

# --- row layout of the two coalesced parameter slabs (see pack_params) ---
R_CONVW = 0                         # rows 0..PATCH_DIM-1 : conv weight (P, D)
R_CONVB = R_CONVW + PATCH_DIM       # conv bias
R_PATCH_G = R_CONVB + 1             # patch LN gamma
R_PATCH_B = R_PATCH_G + 1           # patch LN beta
R_HEAD_G = R_PATCH_B + 1            # head LN gamma
R_HEAD_B = R_HEAD_G + 1             # head LN beta
R_LAYER = R_HEAD_B + 1              # per layer (stride 5): attn_g, attn_b, ffn_g, ffn_b, b2
ROWS64 = R_LAYER + 5 * DEPTH        # 19

R128_HEADW = 0                      # rows 0..DIM-1 : head weight (D, 128)
R128_B1 = DIM                       # rows DIM..DIM+DEPTH-1 : FFN bias1
R128_HEADB = DIM + DEPTH            # head bias (padded to 128)
ROWS128 = R128_HEADB + 1            # 67


def _layernorm(x, g, b):
    mu = jnp.mean(x, axis=-1, keepdims=True)
    var = jnp.mean((x - mu) ** 2, axis=-1, keepdims=True)
    return (x - mu) * jax.lax.rsqrt(var + LN_EPS) * g + b


# ---------------------------------------------------------------------------
# Fused Pallas kernel: whole forward pass, batch folded into the row axis
# ---------------------------------------------------------------------------

def make_kernel(batch, n_tokens):
    bn = batch * n_tokens

    def kernel(patches_ref,      # (B*N, P)
               pe_ref,           # (B*N, D)  positional embedding (pre-tiled)
               v64_ref,          # (ROWS64, D)   coalesced small vectors, width D
               v128_ref,         # (ROWS128, 128) coalesced small vectors, width 128
               wqkv_ref,         # (3*DEPTH*HEADS, D, DIM_HEAD) q|k|v per head
               wo_ref,           # (DEPTH*HEADS, DIM_HEAD, D)
               w1_ref,           # (DEPTH, D, MLP)
               w2_ref,           # (DEPTH, MLP, D)
               o_ref):           # (B, C_PAD)
        f32 = jnp.float32

        def vec64(r):            # (1, D) row of the narrow slab
            return v64_ref[r:r + 1, :]

        def vec128(r):           # (1, 128) row of the wide slab
            return v128_ref[r:r + 1, :]

        # ---- patch embedding: stride-2 conv as one K=4 MXU matmul ----
        w_patch = v64_ref[R_CONVW:R_CONVW + PATCH_DIM, :]          # (P, D)
        y = jnp.dot(patches_ref[...], w_patch, preferred_element_type=f32)
        y = y + vec64(R_CONVB)
        y = _layernorm(y, vec64(R_PATCH_G), vec64(R_PATCH_B))
        x = y + pe_ref[...]                                        # (B*N, D)

        # ---- transformer layers (statically unrolled) ----
        for l in range(DEPTH):
            base = R_LAYER + 5 * l

            # --- attention ---
            xn = _layernorm(x, vec64(base + 0), vec64(base + 1))
            attn_out = None
            for h in range(HEADS):                                 # static head loop
                # per-head projections via a leading weight axis: no lane slices
                qh = jnp.dot(xn, wqkv_ref[(0 * DEPTH + l) * HEADS + h],
                             preferred_element_type=f32)           # scale pre-folded
                kh = jnp.dot(xn, wqkv_ref[(1 * DEPTH + l) * HEADS + h],
                             preferred_element_type=f32)
                vh = jnp.dot(xn, wqkv_ref[(2 * DEPTH + l) * HEADS + h],
                             preferred_element_type=f32)           # (B*N, Dh)
                ov_parts = []
                for b in range(batch):                             # per-image softmax
                    r0 = b * n_tokens                              # sublane slices only
                    qb = qh[r0:r0 + n_tokens]
                    kb = kh[r0:r0 + n_tokens]
                    vb = vh[r0:r0 + n_tokens]
                    dots = jax.lax.dot_general(
                        qb, kb, (((1,), (1,)), ((), ())),
                        preferred_element_type=f32)                # (N, N)
                    mx = jnp.max(dots, axis=-1, keepdims=True)
                    e = jnp.exp(dots - mx)
                    a = e / jnp.sum(e, axis=-1, keepdims=True)     # exact softmax
                    ov_parts.append(jnp.dot(a, vb, preferred_element_type=f32))
                ov = (jnp.concatenate(ov_parts, axis=0)
                      if batch > 1 else ov_parts[0])               # (B*N, Dh)
                contrib = jnp.dot(ov, wo_ref[l * HEADS + h],
                                  preferred_element_type=f32)      # (B*N, D)
                attn_out = contrib if attn_out is None else attn_out + contrib
            x = x + attn_out                                       # residual

            # --- feed-forward ---
            xn = _layernorm(x, vec64(base + 2), vec64(base + 3))
            hdn = (jnp.dot(xn, w1_ref[l], preferred_element_type=f32)
                   + vec128(R128_B1 + l))                          # (B*N, MLP)
            # exact (erf-based) GELU, matching nn.GELU() default.
            # (tanh-approx GELU would run on the EUP and free VALU slots, at a
            #  small numerical deviation.)
            hdn = 0.5 * hdn * (1.0 + jax.lax.erf(hdn * 0.7071067811865476))
            x = x + jnp.dot(hdn, w2_ref[l], preferred_element_type=f32) + vec64(base + 4)

        # ---- per-image mean pool as a tiny (B, B*N) MXU matmul (XLU stays free) ----
        row = jax.lax.broadcasted_iota(jnp.int32, (batch, bn), 0)
        col = jax.lax.broadcasted_iota(jnp.int32, (batch, bn), 1)
        in_img = (col >= row * n_tokens) & (col < (row + 1) * n_tokens)
        pool = jnp.where(in_img, 1.0 / n_tokens, 0.0).astype(f32)  # (B, B*N)
        pooled = jnp.dot(pool, x, preferred_element_type=f32)      # (B, D)

        # ---- head LN + classifier (padded to full 128-lane store) ----
        mn = _layernorm(pooled, vec64(R_HEAD_G), vec64(R_HEAD_B))
        head_w = v128_ref[R128_HEADW:R128_HEADW + DIM, :]          # (D, 128)
        logits = jnp.dot(mn, head_w, preferred_element_type=f32) + vec128(R128_HEADB)
        o_ref[...] = logits.astype(o_ref.dtype)

    return kernel


# ---------------------------------------------------------------------------
# RandAPEv1 positional embedding (eval mode: deterministic, no random shifts)
# ---------------------------------------------------------------------------

def rand_ape_eval(h, w, dim):
    half = dim // 4
    rho = 10.0 ** jnp.linspace(0.0, 1.0, half, dtype=jnp.float32)
    wx = rho * jnp.cos(jnp.arange(half, dtype=jnp.float32))
    wy = rho * jnp.sin(jnp.arange(half, dtype=jnp.float32))
    h_range = jnp.arange(h, dtype=jnp.float32) * (2.0 * jnp.pi / h)
    w_range = jnp.arange(w, dtype=jnp.float32) * (2.0 * jnp.pi / w)
    y, x = jnp.meshgrid(h_range, w_range, indexing="ij")           # (h, w)
    y1, y2 = jnp.cos(y), jnp.sin(y)
    x1, x2 = jnp.cos(x), jnp.sin(x)
    phase1 = wx * y1[..., None] + wy * y2[..., None]
    phase2 = wx * x1[..., None] + wy * x2[..., None]
    pe = jnp.concatenate(
        [jnp.cos(phase1), jnp.sin(phase1), jnp.cos(phase2), jnp.sin(phase2)],
        axis=-1)
    return pe.reshape(h * w, dim).astype(jnp.float32)              # (N, D)


# ---------------------------------------------------------------------------
# Parameter packing (coalesced slabs + per-head weight layout)
# ---------------------------------------------------------------------------

def _pad_lanes(a, width):
    return jnp.pad(a, ((0, 0), (0, width - a.shape[-1])))


def pack_params(p):
    """Coalesce the many small tensors into 2 slabs + 4 stacked weight tensors."""
    w_patch = p["conv_w"].reshape(DIM, PATCH_DIM).T                # (P, D), (c,kh,kw)-major

    rows64 = [w_patch,
              p["conv_b"].reshape(1, DIM),
              p["patch_ln_g"], p["patch_ln_b"],
              p["head_ln_g"], p["head_ln_b"]]
    for l in range(DEPTH):
        rows64 += [p["attn_ln_g"][l], p["attn_ln_b"][l],
                   p["ffn_ln_g"][l], p["ffn_ln_b"][l], p["b2"][l]]
    v64 = jnp.concatenate(rows64, axis=0)
    assert v64.shape == (ROWS64, DIM)

    rows128 = [_pad_lanes(p["head_w"], C_PAD)]
    rows128 += [p["b1"][l] for l in range(DEPTH)]
    rows128 += [_pad_lanes(p["head_b"].reshape(1, NUM_CLASSES), C_PAD)]
    v128 = jnp.concatenate(rows128, axis=0)
    assert v128.shape == (ROWS128, C_PAD)

    def split_heads_in(w):     # (DEPTH, D, INNER) -> (DEPTH, HEADS, D, DIM_HEAD)
        return w.reshape(DEPTH, DIM, HEADS, DIM_HEAD).transpose(0, 2, 1, 3)

    # fold the softmax scale into the q projection (free; removes a VPU multiply)
    wqkv = jnp.stack([split_heads_in(p["wq"] * SCALE),
                      split_heads_in(p["wk"]),
                      split_heads_in(p["wv"])], axis=0)
    wqkv = wqkv.reshape(3 * DEPTH * HEADS, DIM, DIM_HEAD)

    wo = p["wo"].reshape(DEPTH, HEADS, DIM_HEAD, DIM).reshape(DEPTH * HEADS, DIM_HEAD, DIM)

    return v64, v128, wqkv, wo, p["w1"], p["w2"]


# ---------------------------------------------------------------------------
# Parameters & full forward
# ---------------------------------------------------------------------------

def init_params(key):
    ks = jax.random.split(key, 2 + DEPTH * 6 + 2)

    def lin(k, fan_in, shape):
        bound = 1.0 / np.sqrt(fan_in)
        return jax.random.uniform(k, shape, jnp.float32, -bound, bound)

    idx = 0
    conv_w = lin(ks[idx], 1 * 2 * 2, (DIM, 1, 2, 2)); idx += 1     # Conv2d(1, dim, 2)
    conv_b = lin(ks[idx], 1 * 2 * 2, (DIM,)); idx += 1
    wq, wk, wv, wo, w1, w2 = [], [], [], [], [], []
    for _ in range(DEPTH):
        wq.append(lin(ks[idx], DIM, (DIM, INNER))); idx += 1       # to_qkv, bias=False
        wk.append(lin(ks[idx], DIM, (DIM, INNER))); idx += 1
        wv.append(lin(ks[idx], DIM, (DIM, INNER))); idx += 1
        wo.append(lin(ks[idx], INNER, (INNER, DIM))); idx += 1     # to_out, bias=False
        w1.append(lin(ks[idx], DIM, (DIM, MLP_DIM))); idx += 1
        w2.append(lin(ks[idx], MLP_DIM, (MLP_DIM, DIM))); idx += 1
    head_w = lin(ks[idx], DIM, (DIM, NUM_CLASSES)); idx += 1
    head_b = lin(ks[idx], DIM, (NUM_CLASSES,)); idx += 1

    return {
        "conv_w": conv_w,
        "conv_b": conv_b,
        "patch_ln_g": jnp.ones((1, DIM), jnp.float32),
        "patch_ln_b": jnp.zeros((1, DIM), jnp.float32),
        "attn_ln_g": jnp.ones((DEPTH, 1, DIM), jnp.float32),
        "attn_ln_b": jnp.zeros((DEPTH, 1, DIM), jnp.float32),
        "wq": jnp.stack(wq), "wk": jnp.stack(wk), "wv": jnp.stack(wv),
        "wo": jnp.stack(wo),
        "ffn_ln_g": jnp.ones((DEPTH, 1, DIM), jnp.float32),
        "ffn_ln_b": jnp.zeros((DEPTH, 1, DIM), jnp.float32),
        "w1": jnp.stack(w1),
        "b1": jnp.zeros((DEPTH, 1, MLP_DIM), jnp.float32),
        "w2": jnp.stack(w2),
        "b2": jnp.zeros((DEPTH, 1, DIM), jnp.float32),
        "head_ln_g": jnp.ones((1, DIM), jnp.float32),
        "head_ln_b": jnp.zeros((1, DIM), jnp.float32),
        "head_w": head_w,
        "head_b": head_b,
    }


def simple_vit_forward(img, p):
    B, C, H, W = img.shape          # NCHW; to_patch_embedding uses Conv2d(1, dim, 2)
    assert C == 1 and H % PATCH == 0 and W % PATCH == 0
    hp, wp = H // PATCH, W // PATCH
    N = hp * wp
    BN = B * N

    # stride-2 conv as matmul: (c, kh, kw)-ordered 2x2 patches, batch folded into rows
    patches = img.reshape(B, C, hp, PATCH, wp, PATCH)
    patches = patches.transpose(0, 2, 4, 1, 3, 5).reshape(BN, C * PATCH * PATCH)

    pe = rand_ape_eval(hp, wp, DIM)                 # (N, D); posdrop = identity in eval
    pe = jnp.tile(pe, (B, 1))                       # (BN, D), matches batch-major rows

    v64, v128, wqkv, wo, w1, w2 = pack_params(p)

    # Whole problem (<1 MiB resident) fits VMEM: one grid-less pallas_call,
    # default whole-array VMEM blocks, 8 input DMAs, full 128-lane output store.
    out = pl.pallas_call(
        make_kernel(B, N),
        out_shape=jax.ShapeDtypeStruct((B, C_PAD), jnp.float32),
    )(patches, pe, v64, v128, wqkv, wo, w1, w2)

    return out[:, :NUM_CLASSES]


if __name__ == "__main__":
    key = jax.random.PRNGKey(0)
    k_img, k_params = jax.random.split(key)
    B, C, H, W = 2, 1, 16, 16
    img = jax.random.normal(k_img, (B, C, H, W), jnp.float32)
    params = init_params(k_params)

    fwd = jax.jit(simple_vit_forward)
    logits = jax.block_until_ready(fwd(img, params))
    assert logits.shape == (B, NUM_CLASSES)
    assert bool(jnp.all(jnp.isfinite(logits)))
    print("KERNEL_OK")
</pallas_src>

<mosaic_0001>
module attributes {stable_mosaic.version = 11 : i64} {
  func.func @kernel(%arg0: memref<128x4xf32, #tpu.memory_space<vmem>>, %arg1: memref<128x64xf32, #tpu.memory_space<vmem>>, %arg2: memref<19x64xf32, #tpu.memory_space<vmem>>, %arg3: memref<67x128xf32, #tpu.memory_space<vmem>>, %arg4: memref<24x64x16xf32, #tpu.memory_space<vmem>>, %arg5: memref<8x16x64xf32, #tpu.memory_space<vmem>>, %arg6: memref<2x64x128xf32, #tpu.memory_space<vmem>>, %arg7: memref<2x128x64xf32, #tpu.memory_space<vmem>>, %arg8: memref<2x128xf32, #tpu.memory_space<vmem>>) attributes {dimension_semantics = [], scalar_prefetch = 0 : i64, scratch_operands = 0 : i64, tpu.core_type = #tpu.core_type<tc>} {
    %c0 = arith.constant 0 : index
    %c0_0 = arith.constant 0 : index
    %0 = vector.load %arg2[%c0, %c0_0] : memref<19x64xf32, #tpu.memory_space<vmem>>, vector<4x64xf32>
    %c0_1 = arith.constant 0 : index
    %c0_2 = arith.constant 0 : index
    %1 = vector.load %arg0[%c0_1, %c0_2] : memref<128x4xf32, #tpu.memory_space<vmem>>, vector<128x4xf32>
    %cst = arith.constant dense<0.000000e+00> : vector<128x64xf32>
    %2 = tpu.matmul %1, %0, %cst {dimension_numbers = #tpu.dot_dimension_numbers<[1], [0], [0], [1], [0, 0, 1, 1], [], []>} : vector<128x4xf32>, vector<4x64xf32>, vector<128x64xf32> -> vector<128x64xf32>
    %c4 = arith.constant 4 : index
    %c0_3 = arith.constant 0 : index
    %3 = vector.load %arg2[%c4, %c0_3] : memref<19x64xf32, #tpu.memory_space<vmem>>, vector<1x64xf32>
    %4 = vector.broadcast %3 : vector<1x64xf32> to vector<128x64xf32>
    %5 = arith.addf %2, %4 : vector<128x64xf32>
    %c5 = arith.constant 5 : index
    %c0_4 = arith.constant 0 : index
    %6 = vector.load %arg2[%c5, %c0_4] : memref<19x64xf32, #tpu.memory_space<vmem>>, vector<1x64xf32>
    %c6 = arith.constant 6 : index
    %c0_5 = arith.constant 0 : index
    %7 = vector.load %arg2[%c6, %c0_5] : memref<19x64xf32, #tpu.memory_space<vmem>>, vector<1x64xf32>
    %cst_6 = arith.constant dense<0.000000e+00> : vector<128xf32>
    %8 = vector.multi_reduction <add>, %5, %cst_6 [1] : vector<128x64xf32> to vector<128xf32>
    %9 = vector.shape_cast %8 : vector<128xf32> to vector<128x1xf32>
    %cst_7 = arith.constant 6.400000e+01 : f32
    %10 = vector.broadcast %cst_7 : f32 to vector<128x1xf32>
    %11 = arith.divf %9, %10 : vector<128x1xf32>
    %12 = vector.broadcast %11 : vector<128x1xf32> to vector<128x64xf32>
    %13 = arith.subf %5, %12 : vector<128x64xf32>
    %14 = arith.mulf %13, %13 : vector<128x64xf32>
    %cst_8 = arith.constant dense<0.000000e+00> : vector<128xf32>
    %15 = vector.multi_reduction <add>, %14, %cst_8 [1] : vector<128x64xf32> to vector<128xf32>
    %16 = vector.shape_cast %15 : vector<128xf32> to vector<128x1xf32>
    %cst_9 = arith.constant 6.400000e+01 : f32
    %17 = vector.broadcast %cst_9 : f32 to vector<128x1xf32>
    %18 = arith.divf %16, %17 : vector<128x1xf32>
    %19 = vector.broadcast %11 : vector<128x1xf32> to vector<128x64xf32>
    %20 = arith.subf %5, %19 : vector<128x64xf32>
    %cst_10 = arith.constant 9.99999974E-6 : f32
    %21 = vector.broadcast %cst_10 : f32 to vector<128x1xf32>
    %22 = arith.addf %18, %21 : vector<128x1xf32>
    %23 = math.rsqrt %22 : vector<128x1xf32>
    %24 = vector.broadcast %23 : vector<128x1xf32> to vector<128x64xf32>
    %25 = arith.mulf %20, %24 : vector<128x64xf32>
    %26 = vector.broadcast %6 : vector<1x64xf32> to vector<128x64xf32>
    %27 = arith.mulf %25, %26 : vector<128x64xf32>
    %28 = vector.broadcast %7 : vector<1x64xf32> to vector<128x64xf32>
    %29 = arith.addf %27, %28 : vector<128x64xf32>
    %c0_11 = arith.constant 0 : index
    %c0_12 = arith.constant 0 : index
    %30 = vector.load %arg1[%c0_11, %c0_12] : memref<128x64xf32, #tpu.memory_space<vmem>>, vector<128x64xf32>
    %31 = arith.addf %29, %30 : vector<128x64xf32>
    %c9 = arith.constant 9 : index
    %c0_13 = arith.constant 0 : index
    %32 = vector.load %arg2[%c9, %c0_13] : memref<19x64xf32, #tpu.memory_space<vmem>>, vector<1x64xf32>
    %c10 = arith.constant 10 : index
    %c0_14 = arith.constant 0 : index
    %33 = vector.load %arg2[%c10, %c0_14] : memref<19x64xf32, #tpu.memory_space<vmem>>, vector<1x64xf32>
    %cst_15 = arith.constant dense<0.000000e+00> : vector<128xf32>
    %34 = vector.multi_reduction <add>, %31, %cst_15 [1] : vector<128x64xf32> to vector<128xf32>
    %35 = vector.shape_cast %34 : vector<128xf32> to vector<128x1xf32>
    %cst_16 = arith.constant 6.400000e+01 : f32
    %36 = vector.broadcast %cst_16 : f32 to vector<128x1xf32>
    %37 = arith.divf %35, %36 : vector<128x1xf32>
    %38 = vector.broadcast %37 : vector<128x1xf32> to vector<128x64xf32>
    %39 = arith.subf %31, %38 : vector<128x64xf32>
    %40 = arith.mulf %39, %39 : vector<128x64xf32>
    %cst_17 = arith.constant dense<0.000000e+00> : vector<128xf32>
    %41 = vector.multi_reduction <add>, %40, %cst_17 [1] : vector<128x64xf32> to vector<128xf32>
    %42 = vector.shape_cast %41 : vector<128xf32> to vector<128x1xf32>
    %cst_18 = arith.constant 6.400000e+01 : f32
    %43 = vector.broadcast %cst_18 : f32 to vector<128x1xf32>
    %44 = arith.divf %42, %43 : vector<128x1xf32>
    %45 = vector.broadcast %37 : vector<128x1xf32> to vector<128x64xf32>
    %46 = arith.subf %31, %45 : vector<128x64xf32>
    %cst_19 = arith.constant 9.99999974E-6 : f32
    %47 = vector.broadcast %cst_19 : f32 to vector<128x1xf32>
    %48 = arith.addf %44, %47 : vector<128x1xf32>
    %49 = math.rsqrt %48 : vector<128x1xf32>
    %50 = vector.broadcast %49 : vector<128x1xf32> to vector<128x64xf32>
    %51 = arith.mulf %46, %50 : vector<128x64xf32>
    %52 = vector.broadcast %32 : vector<1x64xf32> to vector<128x64xf32>
    %53 = arith.mulf %51, %52 : vector<128x64xf32>
    %54 = vector.broadcast %33 : vector<1x64xf32> to vector<128x64xf32>
    %55 = arith.addf %53, %54 : vector<128x64xf32>
    %c0_20 = arith.constant 0 : index
    %c0_21 = arith.constant 0 : index
    %c0_22 = arith.constant 0 : index
    %56 = vector.load %arg4[%c0_20, %c0_21, %c0_22] : memref<24x64x16xf32, #tpu.memory_space<vmem>>, vector<1x64x16xf32>
    %57 = vector.shape_cast %56 : vector<1x64x16xf32> to vector<64x16xf32>
    %cst_23 = arith.constant dense<0.000000e+00> : vector<128x16xf32>
    %58 = tpu.matmul %55, %57, %cst_23 {dimension_numbers = #tpu.dot_dimension_numbers<[1], [0], [0], [1], [0, 0, 1, 1], [], []>} : vector<128x64xf32>, vector<64x16xf32>, vector<128x16xf32> -> vector<128x16xf32>
    %c8 = arith.constant 8 : index
    %c0_24 = arith.constant 0 : index
    %c0_25 = arith.constant 0 : index
    %59 = vector.load %arg4[%c8, %c0_24, %c0_25] : memref<24x64x16xf32, #tpu.memory_space<vmem>>, vector<1x64x16xf32>
    %60 = vector.shape_cast %59 : vector<1x64x16xf32> to vector<64x16xf32>
    %cst_26 = arith.constant dense<0.000000e+00> : vector<128x16xf32>
    %61 = tpu.matmul %55, %60, %cst_26 {dimension_numbers = #tpu.dot_dimension_numbers<[1], [0], [0], [1], [0, 0, 1, 1], [], []>} : vector<128x64xf32>, vector<64x16xf32>, vector<128x16xf32> -> vector<128x16xf32>
    %c16 = arith.constant 16 : index
    %c0_27 = arith.constant 0 : index
    %c0_28 = arith.constant 0 : index
    %62 = vector.load %arg4[%c16, %c0_27, %c0_28] : memref<24x64x16xf32, #tpu.memory_space<vmem>>, vector<1x64x16xf32>
    %63 = vector.shape_cast %62 : vector<1x64x16xf32> to vector<64x16xf32>
    %cst_29 = arith.constant dense<0.000000e+00> : vector<128x16xf32>
    %64 = tpu.matmul %55, %63, %cst_29 {dimension_numbers = #tpu.dot_dimension_numbers<[1], [0], [0], [1], [0, 0, 1, 1], [], []>} : vector<128x64xf32>, vector<64x16xf32>, vector<128x16xf32> -> vector<128x16xf32>
    %65 = vector.extract_strided_slice %58 {offsets = [0, 0], sizes = [64, 16], strides = [1, 1]} : vector<128x16xf32> to vector<64x16xf32>
    %66 = vector.extract_strided_slice %61 {offsets = [0, 0], sizes = [64, 16], strides = [1, 1]} : vector<128x16xf32> to vector<64x16xf32>
    %67 = vector.extract_strided_slice %64 {offsets = [0, 0], sizes = [64, 16], strides = [1, 1]} : vector<128x16xf32> to vector<64x16xf32>
    %cst_30 = arith.constant dense<0.000000e+00> : vector<64x64xf32>
    %68 = tpu.matmul %65, %66, %cst_30 {dimension_numbers = #tpu.dot_dimension_numbers<[1], [1], [0], [0], [0, 0, 1, 0], [], []>} : vector<64x16xf32>, vector<64x16xf32>, vector<64x64xf32> -> vector<64x64xf32>
    %cst_31 = arith.constant dense<0xFF800000> : vector<64xf32>
    %69 = vector.multi_reduction <maximumf>, %68, %cst_31 [1] : vector<64x64xf32> to vector<64xf32>
    %70 = vector.shape_cast %69 : vector<64xf32> to vector<64x1xf32>
    %71 = vector.broadcast %70 : vector<64x1xf32> to vector<64x64xf32>
    %72 = arith.subf %68, %71 : vector<64x64xf32>
    %73 = math.exp %72 : vector<64x64xf32>
    %cst_32 = arith.constant dense<0.000000e+00> : vector<64xf32>
    %74 = vector.multi_reduction <add>, %73, %cst_32 [1] : vector<64x64xf32> to vector<64xf32>
    %75 = vector.shape_cast %74 : vector<64xf32> to vector<64x1xf32>
    %76 = vector.broadcast %75 : vector<64x1xf32> to vector<64x64xf32>
    %77 = arith.divf %73, %76 : vector<64x64xf32>
    %cst_33 = arith.constant dense<0.000000e+00> : vector<64x16xf32>
    %78 = tpu.matmul %77, %67, %cst_33 {dimension_numbers = #tpu.dot_dimension_numbers<[1], [0], [0], [1], [0, 0, 1, 1], [], []>} : vector<64x64xf32>, vector<64x16xf32>, vector<64x16xf32> -> vector<64x16xf32>
    %79 = vector.extract_strided_slice %58 {offsets = [64, 0], sizes = [64, 16], strides = [1, 1]} : vector<128x16xf32> to vector<64x16xf32>
    %80 = vector.extract_strided_slice %61 {offsets = [64, 0], sizes = [64, 16], strides = [1, 1]} : vector<128x16xf32> to vector<64x16xf32>
    %81 = vector.extract_strided_slice %64 {offsets = [64, 0], sizes = [64, 16], strides = [1, 1]} : vector<128x16xf32> to vector<64x16xf32>
    %cst_34 = arith.constant dense<0.000000e+00> : vector<64x64xf32>
    %82 = tpu.matmul %79, %80, %cst_34 {dimension_numbers = #tpu.dot_dimension_numbers<[1], [1], [0], [0], [0, 0, 1, 0], [], []>} : vector<64x16xf32>, vector<64x16xf32>, vector<64x64xf32> -> vector<64x64xf32>
    %cst_35 = arith.constant dense<0xFF800000> : vector<64xf32>
    %83 = vector.multi_reduction <maximumf>, %82, %cst_35 [1] : vector<64x64xf32> to vector<64xf32>
    %84 = vector.shape_cast %83 : vector<64xf32> to vector<64x1xf32>
    %85 = vector.broadcast %84 : vector<64x1xf32> to vector<64x64xf32>
    %86 = arith.subf %82, %85 : vector<64x64xf32>
    %87 = math.exp %86 : vector<64x64xf32>
    %cst_36 = arith.constant dense<0.000000e+00> : vector<64xf32>
    %88 = vector.multi_reduction <add>, %87, %cst_36 [1] : vector<64x64xf32> to vector<64xf32>
    %89 = vector.shape_cast %88 : vector<64xf32> to vector<64x1xf32>
    %90 = vector.broadcast %89 : vector<64x1xf32> to vector<64x64xf32>
    %91 = arith.divf %87, %90 : vector<64x64xf32>
    %cst_37 = arith.constant dense<0.000000e+00> : vector<64x16xf32>
    %92 = tpu.matmul %91, %81, %cst_37 {dimension_numbers = #tpu.dot_dimension_numbers<[1], [0], [0], [1], [0, 0, 1, 1], [], []>} : vector<64x64xf32>, vector<64x16xf32>, vector<64x16xf32> -> vector<64x16xf32>
    %93 = tpu.concatenate %78, %92 in 0 : vector<64x16xf32>, vector<64x16xf32> -> vector<128x16xf32>
    %c0_38 = arith.constant 0 : index
    %c0_39 = arith.constant 0 : index
    %c0_40 = arith.constant 0 : index
    %94 = vector.load %arg5[%c0_38, %c0_39, %c0_40] : memref<8x16x64xf32, #tpu.memory_space<vmem>>, vector<1x16x64xf32>
    %95 = vector.shape_cast %94 : vector<1x16x64xf32> to vector<16x64xf32>
    %cst_41 = arith.constant dense<0.000000e+00> : vector<128x64xf32>
    %96 = tpu.matmul %93, %95, %cst_41 {dimension_numbers = #tpu.dot_dimension_numbers<[1], [0], [0], [1], [0, 0, 1, 1], [], []>} : vector<128x16xf32>, vector<16x64xf32>, vector<128x64xf32> -> vector<128x64xf32>
    %c1 = arith.constant 1 : index
    %c0_42 = arith.constant 0 : index
    %c0_43 = arith.constant 0 : index
    %97 = vector.load %arg4[%c1, %c0_42, %c0_43] : memref<24x64x16xf32, #tpu.memory_space<vmem>>, vector<1x64x16xf32>
    %98 = vector.shape_cast %97 : vector<1x64x16xf32> to vector<64x16xf32>
    %cst_44 = arith.constant dense<0.000000e+00> : vector<128x16xf32>
    %99 = tpu.matmul %55, %98, %cst_44 {dimension_numbers = #tpu.dot_dimension_numbers<[1], [0], [0], [1], [0, 0, 1, 1], [], []>} : vector<128x64xf32>, vector<64x16xf32>, vector<128x16xf32> -> vector<128x16xf32>
    %c9_45 = arith.constant 9 : index
    %c0_46 = arith.constant 0 : index
    %c0_47 = arith.constant 0 : index
    %100 = vector.load %arg4[%c9_45, %c0_46, %c0_47] : memref<24x64x16xf32, #tpu.memory_space<vmem>>, vector<1x64x16xf32>
    %101 = vector.shape_cast %100 : vector<1x64x16xf32> to vector<64x16xf32>
    %cst_48 = arith.constant dense<0.000000e+00> : vector<128x16xf32>
    %102 = tpu.matmul %55, %101, %cst_48 {dimension_numbers = #tpu.dot_dimension_numbers<[1], [0], [0], [1], [0, 0, 1, 1], [], []>} : vector<128x64xf32>, vector<64x16xf32>, vector<128x16xf32> -> vector<128x16xf32>
    %c17 = arith.constant 17 : index
    %c0_49 = arith.constant 0 : index
    %c0_50 = arith.constant 0 : index
    %103 = vector.load %arg4[%c17, %c0_49, %c0_50] : memref<24x64x16xf32, #tpu.memory_space<vmem>>, vector<1x64x16xf32>
    %104 = vector.shape_cast %103 : vector<1x64x16xf32> to vector<64x16xf32>
    %cst_51 = arith.constant dense<0.000000e+00> : vector<128x16xf32>
    %105 = tpu.matmul %55, %104, %cst_51 {dimension_numbers = #tpu.dot_dimension_numbers<[1], [0], [0], [1], [0, 0, 1, 1], [], []>} : vector<128x64xf32>, vector<64x16xf32>, vector<128x16xf32> -> vector<128x16xf32>
    %106 = vector.extract_strided_slice %99 {offsets = [0, 0], sizes = [64, 16], strides = [1, 1]} : vector<128x16xf32> to vector<64x16xf32>
    %107 = vector.extract_strided_slice %102 {offsets = [0, 0], sizes = [64, 16], strides = [1, 1]} : vector<128x16xf32> to vector<64x16xf32>
    %108 = vector.extract_strided_slice %105 {offsets = [0, 0], sizes = [64, 16], strides = [1, 1]} : vector<128x16xf32> to vector<64x16xf32>
    %cst_52 = arith.constant dense<0.000000e+00> : vector<64x64xf32>
    %109 = tpu.matmul %106, %107, %cst_52 {dimension_numbers = #tpu.dot_dimension_numbers<[1], [1], [0], [0], [0, 0, 1, 0], [], []>} : vector<64x16xf32>, vector<64x16xf32>, vector<64x64xf32> -> vector<64x64xf32>
    %cst_53 = arith.constant dense<0xFF800000> : vector<64xf32>
    %110 = vector.multi_reduction <maximumf>, %109, %cst_53 [1] : vector<64x64xf32> to vector<64xf32>
    %111 = vector.shape_cast %110 : vector<64xf32> to vector<64x1xf32>
    %112 = vector.broadcast %111 : vector<64x1xf32> to vector<64x64xf32>
    %113 = arith.subf %109, %112 : vector<64x64xf32>
    %114 = math.exp %113 : vector<64x64xf32>
    %cst_54 = arith.constant dense<0.000000e+00> : vector<64xf32>
    %115 = vector.multi_reduction <add>, %114, %cst_54 [1] : vector<64x64xf32> to vector<64xf32>
    %116 = vector.shape_cast %115 : vector<64xf32> to vector<64x1xf32>
    %117 = vector.broadcast %116 : vector<64x1xf32> to vector<64x64xf32>
    %118 = arith.divf %114, %117 : vector<64x64xf32>
    %cst_55 = arith.constant dense<0.000000e+00> : vector<64x16xf32>
    %119 = tpu.matmul %118, %108, %cst_55 {dimension_numbers = #tpu.dot_dimension_numbers<[1], [0], [0], [1], [0, 0, 1, 1], [], []>} : vector<64x64xf32>, vector<64x16xf32>, vector<64x16xf32> -> vector<64x16xf32>
    %120 = vector.extract_strided_slice %99 {offsets = [64, 0], sizes = [64, 16], strides = [1, 1]} : vector<128x16xf32> to vector<64x16xf32>
    %121 = vector.extract_strided_slice %102 {offsets = [64, 0], sizes = [64, 16], strides = [1, 1]} : vector<128x16xf32> to vector<64x16xf32>
    %122 = vector.extract_strided_slice %105 {offsets = [64, 0], sizes = [64, 16], strides = [1, 1]} : vector<128x16xf32> to vector<64x16xf32>
    %cst_56 = arith.constant dense<0.000000e+00> : vector<64x64xf32>
    %123 = tpu.matmul %120, %121, %cst_56 {dimension_numbers = #tpu.dot_dimension_numbers<[1], [1], [0], [0], [0, 0, 1, 0], [], []>} : vector<64x16xf32>, vector<64x16xf32>, vector<64x64xf32> -> vector<64x64xf32>
    %cst_57 = arith.constant dense<0xFF800000> : vector<64xf32>
    %124 = vector.multi_reduction <maximumf>, %123, %cst_57 [1] : vector<64x64xf32> to vector<64xf32>
    %125 = vector.shape_cast %124 : vector<64xf32> to vector<64x1xf32>
    %126 = vector.broadcast %125 : vector<64x1xf32> to vector<64x64xf32>
    %127 = arith.subf %123, %126 : vector<64x64xf32>
    %128 = math.exp %127 : vector<64x64xf32>
    %cst_58 = arith.constant dense<0.000000e+00> : vector<64xf32>
    %129 = vector.multi_reduction <add>, %128, %cst_58 [1] : vector<64x64xf32> to vector<64xf32>
    %130 = vector.shape_cast %129 : vector<64xf32> to vector<64x1xf32>
    %131 = vector.broadcast %130 : vector<64x1xf32> to vector<64x64xf32>
    %132 = arith.divf %128, %131 : vector<64x64xf32>
    %cst_59 = arith.constant dense<0.000000e+00> : vector<64x16xf32>
    %133 = tpu.matmul %132, %122, %cst_59 {dimension_numbers = #tpu.dot_dimension_numbers<[1], [0], [0], [1], [0, 0, 1, 1], [], []>} : vector<64x64xf32>, vector<64x16xf32>, vector<64x16xf32> -> vector<64x16xf32>
    %134 = tpu.concatenate %119, %133 in 0 : vector<64x16xf32>, vector<64x16xf32> -> vector<128x16xf32>
    %c1_60 = arith.constant 1 : index
    %c0_61 = arith.constant 0 : index
    %c0_62 = arith.constant 0 : index
    %135 = vector.load %arg5[%c1_60, %c0_61, %c0_62] : memref<8x16x64xf32, #tpu.memory_space<vmem>>, vector<1x16x64xf32>
    %136 = vector.shape_cast %135 : vector<1x16x64xf32> to vector<16x64xf32>
    %cst_63 = arith.constant dense<0.000000e+00> : vector<128x64xf32>
    %137 = tpu.matmul %134, %136, %cst_63 {dimension_numbers = #tpu.dot_dimension_numbers<[1], [0], [0], [1], [0, 0, 1, 1], [], []>} : vector<128x16xf32>, vector<16x64xf32>, vector<128x64xf32> -> vector<128x64xf32>
    %138 = arith.addf %96, %137 : vector<128x64xf32>
    %c2 = arith.constant 2 : index
    %c0_64 = arith.constant 0 : index
    %c0_65 = arith.constant 0 : index
    %139 = vector.load %arg4[%c2, %c0_64, %c0_65] : memref<24x64x16xf32, #tpu.memory_space<vmem>>, vector<1x64x16xf32>
    %140 = vector.shape_cast %139 : vector<1x64x16xf32> to vector<64x16xf32>
    %cst_66 = arith.constant dense<0.000000e+00> : vector<128x16xf32>
    %141 = tpu.matmul %55, %140, %cst_66 {dimension_numbers = #tpu.dot_dimension_numbers<[1], [0], [0], [1], [0, 0, 1, 1], [], []>} : vector<128x64xf32>, vector<64x16xf32>, vector<128x16xf32> -> vector<128x16xf32>
    %c10_67 = arith.constant 10 : index
    %c0_68 = arith.constant 0 : index
    %c0_69 = arith.constant 0 : index
    %142 = vector.load %arg4[%c10_67, %c0_68, %c0_69] : memref<24x64x16xf32, #tpu.memory_space<vmem>>, vector<1x64x16xf32>
    %143 = vector.shape_cast %142 : vector<1x64x16xf32> to vector<64x16xf32>
    %cst_70 = arith.constant dense<0.000000e+00> : vector<128x16xf32>
    %144 = tpu.matmul %55, %143, %cst_70 {dimension_numbers = #tpu.dot_dimension_numbers<[1], [0], [0], [1], [0, 0, 1, 1], [], []>} : vector<128x64xf32>, vector<64x16xf32>, vector<128x16xf32> -> vector<128x16xf32>
    %c18 = arith.constant 18 : index
    %c0_71 = arith.constant 0 : index
    %c0_72 = arith.constant 0 : index
    %145 = vector.load %arg4[%c18, %c0_71, %c0_72] : memref<24x64x16xf32, #tpu.memory_space<vmem>>, vector<1x64x16xf32>
    %146 = vector.shape_cast %145 : vector<1x64x16xf32> to vector<64x16xf32>
    %cst_73 = arith.constant dense<0.000000e+00> : vector<128x16xf32>
    %147 = tpu.matmul %55, %146, %cst_73 {dimension_numbers = #tpu.dot_dimension_numbers<[1], [0], [0], [1], [0, 0, 1, 1], [], []>} : vector<128x64xf32>, vector<64x16xf32>, vector<128x16xf32> -> vector<128x16xf32>
    %148 = vector.extract_strided_slice %141 {offsets = [0, 0], sizes = [64, 16], strides = [1, 1]} : vector<128x16xf32> to vector<64x16xf32>
    %149 = vector.extract_strided_slice %144 {offsets = [0, 0], sizes = [64, 16], strides = [1, 1]} : vector<128x16xf32> to vector<64x16xf32>
    %150 = vector.extract_strided_slice %147 {offsets = [0, 0], sizes = [64, 16], strides = [1, 1]} : vector<128x16xf32> to vector<64x16xf32>
    %cst_74 = arith.constant dense<0.000000e+00> : vector<64x64xf32>
    %151 = tpu.matmul %148, %149, %cst_74 {dimension_numbers = #tpu.dot_dimension_numbers<[1], [1], [0], [0], [0, 0, 1, 0], [], []>} : vector<64x16xf32>, vector<64x16xf32>, vector<64x64xf32> -> vector<64x64xf32>
    %cst_75 = arith.constant dense<0xFF800000> : vector<64xf32>
    %152 = vector.multi_reduction <maximumf>, %151, %cst_75 [1] : vector<64x64xf32> to vector<64xf32>
    %153 = vector.shape_cast %152 : vector<64xf32> to vector<64x1xf32>
    %154 = vector.broadcast %153 : vector<64x1xf32> to vector<64x64xf32>
    %155 = arith.subf %151, %154 : vector<64x64xf32>
    %156 = math.exp %155 : vector<64x64xf32>
    %cst_76 = arith.constant dense<0.000000e+00> : vector<64xf32>
    %157 = vector.multi_reduction <add>, %156, %cst_76 [1] : vector<64x64xf32> to vector<64xf32>
    %158 = vector.shape_cast %157 : vector<64xf32> to vector<64x1xf32>
    %159 = vector.broadcast %158 : vector<64x1xf32> to vector<64x64xf32>
    %160 = arith.divf %156, %159 : vector<64x64xf32>
    %cst_77 = arith.constant dense<0.000000e+00> : vector<64x16xf32>
    %161 = tpu.matmul %160, %150, %cst_77 {dimension_numbers = #tpu.dot_dimension_numbers<[1], [0], [0], [1], [0, 0, 1, 1], [], []>} : vector<64x64xf32>, vector<64x16xf32>, vector<64x16xf32> -> vector<64x16xf32>
    %162 = vector.extract_strided_slice %141 {offsets = [64, 0], sizes = [64, 16], strides = [1, 1]} : vector<128x16xf32> to vector<64x16xf32>
    %163 = vector.extract_strided_slice %144 {offsets = [64, 0], sizes = [64, 16], strides = [1, 1]} : vector<128x16xf32> to vector<64x16xf32>
    %164 = vector.extract_strided_slice %147 {offsets = [64, 0], sizes = [64, 16], strides = [1, 1]} : vector<128x16xf32> to vector<64x16xf32>
    %cst_78 = arith.constant dense<0.000000e+00> : vector<64x64xf32>
    %165 = tpu.matmul %162, %163, %cst_78 {dimension_numbers = #tpu.dot_dimension_numbers<[1], [1], [0], [0], [0, 0, 1, 0], [], []>} : vector<64x16xf32>, vector<64x16xf32>, vector<64x64xf32> -> vector<64x64xf32>
    %cst_79 = arith.constant dense<0xFF800000> : vector<64xf32>
    %166 = vector.multi_reduction <maximumf>, %165, %cst_79 [1] : vector<64x64xf32> to vector<64xf32>
    %167 = vector.shape_cast %166 : vector<64xf32> to vector<64x1xf32>
    %168 = vector.broadcast %167 : vector<64x1xf32> to vector<64x64xf32>
    %169 = arith.subf %165, %168 : vector<64x64xf32>
    %170 = math.exp %169 : vector<64x64xf32>
    %cst_80 = arith.constant dense<0.000000e+00> : vector<64xf32>
    %171 = vector.multi_reduction <add>, %170, %cst_80 [1] : vector<64x64xf32> to vector<64xf32>
    %172 = vector.shape_cast %171 : vector<64xf32> to vector<64x1xf32>
    %173 = vector.broadcast %172 : vector<64x1xf32> to vector<64x64xf32>
    %174 = arith.divf %170, %173 : vector<64x64xf32>
    %cst_81 = arith.constant dense<0.000000e+00> : vector<64x16xf32>
    %175 = tpu.matmul %174, %164, %cst_81 {dimension_numbers = #tpu.dot_dimension_numbers<[1], [0], [0], [1], [0, 0, 1, 1], [], []>} : vector<64x64xf32>, vector<64x16xf32>, vector<64x16xf32> -> vector<64x16xf32>
    %176 = tpu.concatenate %161, %175 in 0 : vector<64x16xf32>, vector<64x16xf32> -> vector<128x16xf32>
    %c2_82 = arith.constant 2 : index
    %c0_83 = arith.constant 0 : index
    %c0_84 = arith.constant 0 : index
    %177 = vector.load %arg5[%c2_82, %c0_83, %c0_84] : memref<8x16x64xf32, #tpu.memory_space<vmem>>, vector<1x16x64xf32>
    %178 = vector.shape_cast %177 : vector<1x16x64xf32> to vector<16x64xf32>
    %cst_85 = arith.constant dense<0.000000e+00> : vector<128x64xf32>
    %179 = tpu.matmul %176, %178, %cst_85 {dimension_numbers = #tpu.dot_dimension_numbers<[1], [0], [0], [1], [0, 0, 1, 1], [], []>} : vector<128x16xf32>, vector<16x64xf32>, vector<128x64xf32> -> vector<128x64xf32>
    %180 = arith.addf %138, %179 : vector<128x64xf32>
    %c3 = arith.constant 3 : index
    %c0_86 = arith.constant 0 : index
    %c0_87 = arith.constant 0 : index
    %181 = vector.load %arg4[%c3, %c0_86, %c0_87] : memref<24x64x16xf32, #tpu.memory_space<vmem>>, vector<1x64x16xf32>
    %182 = vector.shape_cast %181 : vector<1x64x16xf32> to vector<64x16xf32>
    %cst_88 = arith.constant dense<0.000000e+00> : vector<128x16xf32>
    %183 = tpu.matmul %55, %182, %cst_88 {dimension_numbers = #tpu.dot_dimension_numbers<[1], [0], [0], [1], [0, 0, 1, 1], [], []>} : vector<128x64xf32>, vector<64x16xf32>, vector<128x16xf32> -> vector<128x16xf32>
    %c11 = arith.constant 11 : index
    %c0_89 = arith.constant 0 : index
    %c0_90 = arith.constant 0 : index
    %184 = vector.load %arg4[%c11, %c0_89, %c0_90] : memref<24x64x16xf32, #tpu.memory_space<vmem>>, vector<1x64x16xf32>
    %185 = vector.shape_cast %184 : vector<1x64x16xf32> to vector<64x16xf32>
    %cst_91 = arith.constant dense<0.000000e+00> : vector<128x16xf32>
    %186 = tpu.matmul %55, %185, %cst_91 {dimension_numbers = #tpu.dot_dimension_numbers<[1], [0], [0], [1], [0, 0, 1, 1], [], []>} : vector<128x64xf32>, vector<64x16xf32>, vector<128x16xf32> -> vector<128x16xf32>
    %c19 = arith.constant 19 : index
    %c0_92 = arith.constant 0 : index
    %c0_93 = arith.constant 0 : index
    %187 = vector.load %arg4[%c19, %c0_92, %c0_93] : memref<24x64x16xf32, #tpu.memory_space<vmem>>, vector<1x64x16xf32>
    %188 = vector.shape_cast %187 : vector<1x64x16xf32> to vector<64x16xf32>
    %cst_94 = arith.constant dense<0.000000e+00> : vector<128x16xf32>
    %189 = tpu.matmul %55, %188, %cst_94 {dimension_numbers = #tpu.dot_dimension_numbers<[1], [0], [0], [1], [0, 0, 1, 1], [], []>} : vector<128x64xf32>, vector<64x16xf32>, vector<128x16xf32> -> vector<128x16xf32>
    %190 = vector.extract_strided_slice %183 {offsets = [0, 0], sizes = [64, 16], strides = [1, 1]} : vector<128x16xf32> to vector<64x16xf32>
    %191 = vector.extract_strided_slice %186 {offsets = [0, 0], sizes = [64, 16], strides = [1, 1]} : vector<128x16xf32> to vector<64x16xf32>
    %192 = vector.extract_strided_slice %189 {offsets = [0, 0], sizes = [64, 16], strides = [1, 1]} : vector<128x16xf32> to vector<64x16xf32>
    %cst_95 = arith.constant dense<0.000000e+00> : vector<64x64xf32>
    %193 = tpu.matmul %190, %191, %cst_95 {dimension_numbers = #tpu.dot_dimension_numbers<[1], [1], [0], [0], [0, 0, 1, 0], [], []>} : vector<64x16xf32>, vector<64x16xf32>, vector<64x64xf32> -> vector<64x64xf32>
    %cst_96 = arith.constant dense<0xFF800000> : vector<64xf32>
    %194 = vector.multi_reduction <maximumf>, %193, %cst_96 [1] : vector<64x64xf32> to vector<64xf32>
    %195 = vector.shape_cast %194 : vector<64xf32> to vector<64x1xf32>
    %196 = vector.broadcast %195 : vector<64x1xf32> to vector<64x64xf32>
    %197 = arith.subf %193, %196 : vector<64x64xf32>
    %198 = math.exp %197 : vector<64x64xf32>
    %cst_97 = arith.constant dense<0.000000e+00> : vector<64xf32>
    %199 = vector.multi_reduction <add>, %198, %cst_97 [1] : vector<64x64xf32> to vector<64xf32>
    %200 = vector.shape_cast %199 : vector<64xf32> to vector<64x1xf32>
    %201 = vector.broadcast %200 : vector<64x1xf32> to vector<64x64xf32>
    %202 = arith.divf %198, %201 : vector<64x64xf32>
    %cst_98 = arith.constant dense<0.000000e+00> : vector<64x16xf32>
    %203 = tpu.matmul %202, %192, %cst_98 {dimension_numbers = #tpu.dot_dimension_numbers<[1], [0], [0], [1], [0, 0, 1, 1], [], []>} : vector<64x64xf32>, vector<64x16xf32>, vector<64x16xf32> -> vector<64x16xf32>
    %204 = vector.extract_strided_slice %183 {offsets = [64, 0], sizes = [64, 16], strides = [1, 1]} : vector<128x16xf32> to vector<64x16xf32>
    %205 = vector.extract_strided_slice %186 {offsets = [64, 0], sizes = [64, 16], strides = [1, 1]} : vector<128x16xf32> to vector<64x16xf32>
    %206 = vector.extract_strided_slice %189 {offsets = [64, 0], sizes = [64, 16], strides = [1, 1]} : vector<128x16xf32> to vector<64x16xf32>
    %cst_99 = arith.constant dense<0.000000e+00> : vector<64x64xf32>
    %207 = tpu.matmul %204, %205, %cst_99 {dimension_numbers = #tpu.dot_dimension_numbers<[1], [1], [0], [0], [0, 0, 1, 0], [], []>} : vector<64x16xf32>, vector<64x16xf32>, vector<64x64xf32> -> vector<64x64xf32>
    %cst_100 = arith.constant dense<0xFF800000> : vector<64xf32>
    %208 = vector.multi_reduction <maximumf>, %207, %cst_100 [1] : vector<64x64xf32> to vector<64xf32>
    %209 = vector.shape_cast %208 : vector<64xf32> to vector<64x1xf32>
    %210 = vector.broadcast %209 : vector<64x1xf32> to vector<64x64xf32>
    %211 = arith.subf %207, %210 : vector<64x64xf32>
    %212 = math.exp %211 : vector<64x64xf32>
    %cst_101 = arith.constant dense<0.000000e+00> : vector<64xf32>
    %213 = vector.multi_reduction <add>, %212, %cst_101 [1] : vector<64x64xf32> to vector<64xf32>
    %214 = vector.shape_cast %213 : vector<64xf32> to vector<64x1xf32>
    %215 = vector.broadcast %214 : vector<64x1xf32> to vector<64x64xf32>
    %216 = arith.divf %212, %215 : vector<64x64xf32>
    %cst_102 = arith.constant dense<0.000000e+00> : vector<64x16xf32>
    %217 = tpu.matmul %216, %206, %cst_102 {dimension_numbers = #tpu.dot_dimension_numbers<[1], [0], [0], [1], [0, 0, 1, 1], [], []>} : vector<64x64xf32>, vector<64x16xf32>, vector<64x16xf32> -> vector<64x16xf32>
    %218 = tpu.concatenate %203, %217 in 0 : vector<64x16xf32>, vector<64x16xf32> -> vector<128x16xf32>
    %c3_103 = arith.constant 3 : index
    %c0_104 = arith.constant 0 : index
    %c0_105 = arith.constant 0 : index
    %219 = vector.load %arg5[%c3_103, %c0_104, %c0_105] : memref<8x16x64xf32, #tpu.memory_space<vmem>>, vector<1x16x64xf32>
    %220 = vector.shape_cast %219 : vector<1x16x64xf32> to vector<16x64xf32>
    %cst_106 = arith.constant dense<0.000000e+00> : vector<128x64xf32>
    %221 = tpu.matmul %218, %220, %cst_106 {dimension_numbers = #tpu.dot_dimension_numbers<[1], [0], [0], [1], [0, 0, 1, 1], [], []>} : vector<128x16xf32>, vector<16x64xf32>, vector<128x64xf32> -> vector<128x64xf32>
    %222 = arith.addf %180, %221 : vector<128x64xf32>
    %223 = arith.addf %31, %222 : vector<128x64xf32>
    %c11_107 = arith.constant 11 : index
    %c0_108 = arith.constant 0 : index
    %224 = vector.load %arg2[%c11_107, %c0_108] : memref<19x64xf32, #tpu.memory_space<vmem>>, vector<1x64xf32>
    %c12 = arith.constant 12 : index
    %c0_109 = arith.constant 0 : index
    %225 = vector.load %arg2[%c12, %c0_109] : memref<19x64xf32, #tpu.memory_space<vmem>>, vector<1x64xf32>
    %cst_110 = arith.constant dense<0.000000e+00> : vector<128xf32>
    %226 = vector.multi_reduction <add>, %223, %cst_110 [1] : vector<128x64xf32> to vector<128xf32>
    %227 = vector.shape_cast %226 : vector<128xf32> to vector<128x1xf32>
    %cst_111 = arith.constant 6.400000e+01 : f32
    %228 = vector.broadcast %cst_111 : f32 to vector<128x1xf32>
    %229 = arith.divf %227, %228 : vector<128x1xf32>
    %230 = vector.broadcast %229 : vector<128x1xf32> to vector<128x64xf32>
    %231 = arith.subf %223, %230 : vector<128x64xf32>
    %232 = arith.mulf %231, %231 : vector<128x64xf32>
    %cst_112 = arith.constant dense<0.000000e+00> : vector<128xf32>
    %233 = vector.multi_reduction <add>, %232, %cst_112 [1] : vector<128x64xf32> to vector<128xf32>
    %234 = vector.shape_cast %233 : vector<128xf32> to vector<128x1xf32>
    %cst_113 = arith.constant 6.400000e+01 : f32
    %235 = vector.broadcast %cst_113 : f32 to vector<128x1xf32>
    %236 = arith.divf %234, %235 : vector<128x1xf32>
    %237 = vector.broadcast %229 : vector<128x1xf32> to vector<128x64xf32>
    %238 = arith.subf %223, %237 : vector<128x64xf32>
    %cst_114 = arith.constant 9.99999974E-6 : f32
    %239 = vector.broadcast %cst_114 : f32 to vector<128x1xf32>
    %240 = arith.addf %236, %239 : vector<128x1xf32>
    %241 = math.rsqrt %240 : vector<128x1xf32>
    %242 = vector.broadcast %241 : vector<128x1xf32> to vector<128x64xf32>
    %243 = arith.mulf %238, %242 : vector<128x64xf32>
    %244 = vector.broadcast %224 : vector<1x64xf32> to vector<128x64xf32>
    %245 = arith.mulf %243, %244 : vector<128x64xf32>
    %246 = vector.broadcast %225 : vector<1x64xf32> to vector<128x64xf32>
    %247 = arith.addf %245, %246 : vector<128x64xf32>
    %c0_115 = arith.constant 0 : index
    %c0_116 = arith.constant 0 : index
    %c0_117 = arith.constant 0 : index
    %248 = vector.load %arg6[%c0_115, %c0_116, %c0_117] : memref<2x64x128xf32, #tpu.memory_space<vmem>>, vector<1x64x128xf32>
    %249 = vector.shape_cast %248 : vector<1x64x128xf32> to vector<64x128xf32>
    %cst_118 = arith.constant dense<0.000000e+00> : vector<128x128xf32>
    %250 = tpu.matmul %247, %249, %cst_118 {dimension_numbers = #tpu.dot_dimension_numbers<[1], [0], [0], [1], [0, 0, 1, 1], [], []>} : vector<128x64xf32>, vector<64x128xf32>, vector<128x128xf32> -> vector<128x128xf32>
    %c64 = arith.constant 64 : index
    %c0_119 = arith.constant 0 : index
    %251 = vector.load %arg3[%c64, %c0_119] : memref<67x128xf32, #tpu.memory_space<vmem>>, vector<1x128xf32>
    %252 = vector.broadcast %251 : vector<1x128xf32> to vector<128x128xf32>
    %253 = arith.addf %250, %252 : vector<128x128xf32>
    %cst_120 = arith.constant 5.000000e-01 : f32
    %254 = vector.broadcast %cst_120 : f32 to vector<128x128xf32>
    %255 = arith.mulf %254, %253 : vector<128x128xf32>
    %cst_121 = arith.constant 0.707106769 : f32
    %256 = vector.broadcast %cst_121 : f32 to vector<128x128xf32>
    %257 = arith.mulf %253, %256 : vector<128x128xf32>
    %258 = math.erf %257 : vector<128x128xf32>
    %cst_122 = arith.constant 1.000000e+00 : f32
    %259 = vector.broadcast %cst_122 : f32 to vector<128x128xf32>
    %260 = arith.addf %259, %258 : vector<128x128xf32>
    %261 = arith.mulf %255, %260 : vector<128x128xf32>
    %c0_123 = arith.constant 0 : index
    %c0_124 = arith.constant 0 : index
    %c0_125 = arith.constant 0 : index
    %262 = vector.load %arg7[%c0_123, %c0_124, %c0_125] : memref<2x128x64xf32, #tpu.memory_space<vmem>>, vector<1x128x64xf32>
    %263 = vector.shape_cast %262 : vector<1x128x64xf32> to vector<128x64xf32>
    %cst_126 = arith.constant dense<0.000000e+00> : vector<128x64xf32>
    %264 = tpu.matmul %261, %263, %cst_126 {dimension_numbers = #tpu.dot_dimension_numbers<[1], [0], [0], [1], [0, 0, 1, 1], [], []>} : vector<128x128xf32>, vector<128x64xf32>, vector<128x64xf32> -> vector<128x64xf32>
    %265 = arith.addf %223, %264 : vector<128x64xf32>
    %c13 = arith.constant 13 : index
    %c0_127 = arith.constant 0 : index
    %266 = vector.load %arg2[%c13, %c0_127] : memref<19x64xf32, #tpu.memory_space<vmem>>, vector<1x64xf32>
    %267 = vector.broadcast %266 : vector<1x64xf32> to vector<128x64xf32>
    %268 = arith.addf %265, %267 : vector<128x64xf32>
    %c14 = arith.constant 14 : index
    %c0_128 = arith.constant 0 : index
    %269 = vector.load %arg2[%c14, %c0_128] : memref<19x64xf32, #tpu.memory_space<vmem>>, vector<1x64xf32>
    %c15 = arith.constant 15 : index
    %c0_129 = arith.constant 0 : index
    %270 = vector.load %arg2[%c15, %c0_129] : memref<19x64xf32, #tpu.memory_space<vmem>>, vector<1x64xf32>
    %cst_130 = arith.constant dense<0.000000e+00> : vector<128xf32>
    %271 = vector.multi_reduction <add>, %268, %cst_130 [1] : vector<128x64xf32> to vector<128xf32>
    %272 = vector.shape_cast %271 : vector<128xf32> to vector<128x1xf32>
    %cst_131 = arith.constant 6.400000e+01 : f32
    %273 = vector.broadcast %cst_131 : f32 to vector<128x1xf32>
    %274 = arith.divf %272, %273 : vector<128x1xf32>
    %275 = vector.broadcast %274 : vector<128x1xf32> to vector<128x64xf32>
    %276 = arith.subf %268, %275 : vector<128x64xf32>
    %277 = arith.mulf %276, %276 : vector<128x64xf32>
    %cst_132 = arith.constant dense<0.000000e+00> : vector<128xf32>
    %278 = vector.multi_reduction <add>, %277, %cst_132 [1] : vector<128x64xf32> to vector<128xf32>
    %279 = vector.shape_cast %278 : vector<128xf32> to vector<128x1xf32>
    %cst_133 = arith.constant 6.400000e+01 : f32
    %280 = vector.broadcast %cst_133 : f32 to vector<128x1xf32>
    %281 = arith.divf %279, %280 : vector<128x1xf32>
    %282 = vector.broadcast %274 : vector<128x1xf32> to vector<128x64xf32>
    %283 = arith.subf %268, %282 : vector<128x64xf32>
    %cst_134 = arith.constant 9.99999974E-6 : f32
    %284 = vector.broadcast %cst_134 : f32 to vector<128x1xf32>
    %285 = arith.addf %281, %284 : vector<128x1xf32>
    %286 = math.rsqrt %285 : vector<128x1xf32>
    %287 = vector.broadcast %286 : vector<128x1xf32> to vector<128x64xf32>
    %288 = arith.mulf %283, %287 : vector<128x64xf32>
    %289 = vector.broadcast %269 : vector<1x64xf32> to vector<128x64xf32>
    %290 = arith.mulf %288, %289 : vector<128x64xf32>
    %291 = vector.broadcast %270 : vector<1x64xf32> to vector<128x64xf32>
    %292 = arith.addf %290, %291 : vector<128x64xf32>
    %c4_135 = arith.constant 4 : index
    %c0_136 = arith.constant 0 : index
    %c0_137 = arith.constant 0 : index
    %293 = vector.load %arg4[%c4_135, %c0_136, %c0_137] : memref<24x64x16xf32, #tpu.memory_space<vmem>>, vector<1x64x16xf32>
    %294 = vector.shape_cast %293 : vector<1x64x16xf32> to vector<64x16xf32>
    %cst_138 = arith.constant dense<0.000000e+00> : vector<128x16xf32>
    %295 = tpu.matmul %292, %294, %cst_138 {dimension_numbers = #tpu.dot_dimension_numbers<[1], [0], [0], [1], [0, 0, 1, 1], [], []>} : vector<128x64xf32>, vector<64x16xf32>, vector<128x16xf32> -> vector<128x16xf32>
    %c12_139 = arith.constant 12 : index
    %c0_140 = arith.constant 0 : index
    %c0_141 = arith.constant 0 : index
    %296 = vector.load %arg4[%c12_139, %c0_140, %c0_141] : memref<24x64x16xf32, #tpu.memory_space<vmem>>, vector<1x64x16xf32>
    %297 = vector.shape_cast %296 : vector<1x64x16xf32> to vector<64x16xf32>
    %cst_142 = arith.constant dense<0.000000e+00> : vector<128x16xf32>
    %298 = tpu.matmul %292, %297, %cst_142 {dimension_numbers = #tpu.dot_dimension_numbers<[1], [0], [0], [1], [0, 0, 1, 1], [], []>} : vector<128x64xf32>, vector<64x16xf32>, vector<128x16xf32> -> vector<128x16xf32>
    %c20 = arith.constant 20 : index
    %c0_143 = arith.constant 0 : index
    %c0_144 = arith.constant 0 : index
    %299 = vector.load %arg4[%c20, %c0_143, %c0_144] : memref<24x64x16xf32, #tpu.memory_space<vmem>>, vector<1x64x16xf32>
    %300 = vector.shape_cast %299 : vector<1x64x16xf32> to vector<64x16xf32>
    %cst_145 = arith.constant dense<0.000000e+00> : vector<128x16xf32>
    %301 = tpu.matmul %292, %300, %cst_145 {dimension_numbers = #tpu.dot_dimension_numbers<[1], [0], [0], [1], [0, 0, 1, 1], [], []>} : vector<128x64xf32>, vector<64x16xf32>, vector<128x16xf32> -> vector<128x16xf32>
    %302 = vector.extract_strided_slice %295 {offsets = [0, 0], sizes = [64, 16], strides = [1, 1]} : vector<128x16xf32> to vector<64x16xf32>
    %303 = vector.extract_strided_slice %298 {offsets = [0, 0], sizes = [64, 16], strides = [1, 1]} : vector<128x16xf32> to vector<64x16xf32>
    %304 = vector.extract_strided_slice %301 {offsets = [0, 0], sizes = [64, 16], strides = [1, 1]} : vector<128x16xf32> to vector<64x16xf32>
    %cst_146 = arith.constant dense<0.000000e+00> : vector<64x64xf32>
    %305 = tpu.matmul %302, %303, %cst_146 {dimension_numbers = #tpu.dot_dimension_numbers<[1], [1], [0], [0], [0, 0, 1, 0], [], []>} : vector<64x16xf32>, vector<64x16xf32>, vector<64x64xf32> -> vector<64x64xf32>
    %cst_147 = arith.constant dense<0xFF800000> : vector<64xf32>
    %306 = vector.multi_reduction <maximumf>, %305, %cst_147 [1] : vector<64x64xf32> to vector<64xf32>
    %307 = vector.shape_cast %306 : vector<64xf32> to vector<64x1xf32>
    %308 = vector.broadcast %307 : vector<64x1xf32> to vector<64x64xf32>
    %309 = arith.subf %305, %308 : vector<64x64xf32>
    %310 = math.exp %309 : vector<64x64xf32>
    %cst_148 = arith.constant dense<0.000000e+00> : vector<64xf32>
    %311 = vector.multi_reduction <add>, %310, %cst_148 [1] : vector<64x64xf32> to vector<64xf32>
    %312 = vector.shape_cast %311 : vector<64xf32> to vector<64x1xf32>
    %313 = vector.broadcast %312 : vector<64x1xf32> to vector<64x64xf32>
    %314 = arith.divf %310, %313 : vector<64x64xf32>
    %cst_149 = arith.constant dense<0.000000e+00> : vector<64x16xf32>
    %315 = tpu.matmul %314, %304, %cst_149 {dimension_numbers = #tpu.dot_dimension_numbers<[1], [0], [0], [1], [0, 0, 1, 1], [], []>} : vector<64x64xf32>, vector<64x16xf32>, vector<64x16xf32> -> vector<64x16xf32>
    %316 = vector.extract_strided_slice %295 {offsets = [64, 0], sizes = [64, 16], strides = [1, 1]} : vector<128x16xf32> to vector<64x16xf32>
    %317 = vector.extract_strided_slice %298 {offsets = [64, 0], sizes = [64, 16], strides = [1, 1]} : vector<128x16xf32> to vector<64x16xf32>
    %318 = vector.extract_strided_slice %301 {offsets = [64, 0], sizes = [64, 16], strides = [1, 1]} : vector<128x16xf32> to vector<64x16xf32>
    %cst_150 = arith.constant dense<0.000000e+00> : vector<64x64xf32>
    %319 = tpu.matmul %316, %317, %cst_150 {dimension_numbers = #tpu.dot_dimension_numbers<[1], [1], [0], [0], [0, 0, 1, 0], [], []>} : vector<64x16xf32>, vector<64x16xf32>, vector<64x64xf32> -> vector<64x64xf32>
    %cst_151 = arith.constant dense<0xFF800000> : vector<64xf32>
    %320 = vector.multi_reduction <maximumf>, %319, %cst_151 [1] : vector<64x64xf32> to vector<64xf32>
    %321 = vector.shape_cast %320 : vector<64xf32> to vector<64x1xf32>
    %322 = vector.broadcast %321 : vector<64x1xf32> to vector<64x64xf32>
    %323 = arith.subf %319, %322 : vector<64x64xf32>
    %324 = math.exp %323 : vector<64x64xf32>
    %cst_152 = arith.constant dense<0.000000e+00> : vector<64xf32>
    %325 = vector.multi_reduction <add>, %324, %cst_152 [1] : vector<64x64xf32> to vector<64xf32>
    %326 = vector.shape_cast %325 : vector<64xf32> to vector<64x1xf32>
    %327 = vector.broadcast %326 : vector<64x1xf32> to vector<64x64xf32>
    %328 = arith.divf %324, %327 : vector<64x64xf32>
    %cst_153 = arith.constant dense<0.000000e+00> : vector<64x16xf32>
    %329 = tpu.matmul %328, %318, %cst_153 {dimension_numbers = #tpu.dot_dimension_numbers<[1], [0], [0], [1], [0, 0, 1, 1], [], []>} : vector<64x64xf32>, vector<64x16xf32>, vector<64x16xf32> -> vector<64x16xf32>
    %330 = tpu.concatenate %315, %329 in 0 : vector<64x16xf32>, vector<64x16xf32> -> vector<128x16xf32>
    %c4_154 = arith.constant 4 : index
    %c0_155 = arith.constant 0 : index
    %c0_156 = arith.constant 0 : index
    %331 = vector.load %arg5[%c4_154, %c0_155, %c0_156] : memref<8x16x64xf32, #tpu.memory_space<vmem>>, vector<1x16x64xf32>
    %332 = vector.shape_cast %331 : vector<1x16x64xf32> to vector<16x64xf32>
    %cst_157 = arith.constant dense<0.000000e+00> : vector<128x64xf32>
    %333 = tpu.matmul %330, %332, %cst_157 {dimension_numbers = #tpu.dot_dimension_numbers<[1], [0], [0], [1], [0, 0, 1, 1], [], []>} : vector<128x16xf32>, vector<16x64xf32>, vector<128x64xf32> -> vector<128x64xf32>
    %c5_158 = arith.constant 5 : index
    %c0_159 = arith.constant 0 : index
    %c0_160 = arith.constant 0 : index
    %334 = vector.load %arg4[%c5_158, %c0_159, %c0_160] : memref<24x64x16xf32, #tpu.memory_space<vmem>>, vector<1x64x16xf32>
    %335 = vector.shape_cast %334 : vector<1x64x16xf32> to vector<64x16xf32>
    %cst_161 = arith.constant dense<0.000000e+00> : vector<128x16xf32>
    %336 = tpu.matmul %292, %335, %cst_161 {dimension_numbers = #tpu.dot_dimension_numbers<[1], [0], [0], [1], [0, 0, 1, 1], [], []>} : vector<128x64xf32>, vector<64x16xf32>, vector<128x16xf32> -> vector<128x16xf32>
    %c13_162 = arith.constant 13 : index
    %c0_163 = arith.constant 0 : index
    %c0_164 = arith.constant 0 : index
    %337 = vector.load %arg4[%c13_162, %c0_163, %c0_164] : memref<24x64x16xf32, #tpu.memory_space<vmem>>, vector<1x64x16xf32>
    %338 = vector.shape_cast %337 : vector<1x64x16xf32> to vector<64x16xf32>
    %cst_165 = arith.constant dense<0.000000e+00> : vector<128x16xf32>
    %339 = tpu.matmul %292, %338, %cst_165 {dimension_numbers = #tpu.dot_dimension_numbers<[1], [0], [0], [1], [0, 0, 1, 1], [], []>} : vector<128x64xf32>, vector<64x16xf32>, vector<128x16xf32> -> vector<128x16xf32>
    %c21 = arith.constant 21 : index
    %c0_166 = arith.constant 0 : index
    %c0_167 = arith.constant 0 : index
    %340 = vector.load %arg4[%c21, %c0_166, %c0_167] : memref<24x64x16xf32, #tpu.memory_space<vmem>>, vector<1x64x16xf32>
    %341 = vector.shape_cast %340 : vector<1x64x16xf32> to vector<64x16xf32>
    %cst_168 = arith.constant dense<0.000000e+00> : vector<128x16xf32>
    %342 = tpu.matmul %292, %341, %cst_168 {dimension_numbers = #tpu.dot_dimension_numbers<[1], [0], [0], [1], [0, 0, 1, 1], [], []>} : vector<128x64xf32>, vector<64x16xf32>, vector<128x16xf32> -> vector<128x16xf32>
    %343 = vector.extract_strided_slice %336 {offsets = [0, 0], sizes = [64, 16], strides = [1, 1]} : vector<128x16xf32> to vector<64x16xf32>
    %344 = vector.extract_strided_slice %339 {offsets = [0, 0], sizes = [64, 16], strides = [1, 1]} : vector<128x16xf32> to vector<64x16xf32>
    %345 = vector.extract_strided_slice %342 {offsets = [0, 0], sizes = [64, 16], strides = [1, 1]} : vector<128x16xf32> to vector<64x16xf32>
    %cst_169 = arith.constant dense<0.000000e+00> : vector<64x64xf32>
    %346 = tpu.matmul %343, %344, %cst_169 {dimension_numbers = #tpu.dot_dimension_numbers<[1], [1], [0], [0], [0, 0, 1, 0], [], []>} : vector<64x16xf32>, vector<64x16xf32>, vector<64x64xf32> -> vector<64x64xf32>
    %cst_170 = arith.constant dense<0xFF800000> : vector<64xf32>
    %347 = vector.multi_reduction <maximumf>, %346, %cst_170 [1] : vector<64x64xf32> to vector<64xf32>
    %348 = vector.shape_cast %347 : vector<64xf32> to vector<64x1xf32>
    %349 = vector.broadcast %348 : vector<64x1xf32> to vector<64x64xf32>
    %350 = arith.subf %346, %349 : vector<64x64xf32>
    %351 = math.exp %350 : vector<64x64xf32>
    %cst_171 = arith.constant dense<0.000000e+00> : vector<64xf32>
    %352 = vector.multi_reduction <add>, %351, %cst_171 [1] : vector<64x64xf32> to vector<64xf32>
    %353 = vector.shape_cast %352 : vector<64xf32> to vector<64x1xf32>
    %354 = vector.broadcast %353 : vector<64x1xf32> to vector<64x64xf32>
    %355 = arith.divf %351, %354 : vector<64x64xf32>
    %cst_172 = arith.constant dense<0.000000e+00> : vector<64x16xf32>
    %356 = tpu.matmul %355, %345, %cst_172 {dimension_numbers = #tpu.dot_dimension_numbers<[1], [0], [0], [1], [0, 0, 1, 1], [], []>} : vector<64x64xf32>, vector<64x16xf32>, vector<64x16xf32> -> vector<64x16xf32>
    %357 = vector.extract_strided_slice %336 {offsets = [64, 0], sizes = [64, 16], strides = [1, 1]} : vector<128x16xf32> to vector<64x16xf32>
    %358 = vector.extract_strided_slice %339 {offsets = [64, 0], sizes = [64, 16], strides = [1, 1]} : vector<128x16xf32> to vector<64x16xf32>
    %359 = vector.extract_strided_slice %342 {offsets = [64, 0], sizes = [64, 16], strides = [1, 1]} : vector<128x16xf32> to vector<64x16xf32>
    %cst_173 = arith.constant dense<0.000000e+00> : vector<64x64xf32>
    %360 = tpu.matmul %357, %358, %cst_173 {dimension_numbers = #tpu.dot_dimension_numbers<[1], [1], [0], [0], [0, 0, 1, 0], [], []>} : vector<64x16xf32>, vector<64x16xf32>, vector<64x64xf32> -> vector<64x64xf32>
    %cst_174 = arith.constant dense<0xFF800000> : vector<64xf32>
    %361 = vector.multi_reduction <maximumf>, %360, %cst_174 [1] : vector<64x64xf32> to vector<64xf32>
    %362 = vector.shape_cast %361 : vector<64xf32> to vector<64x1xf32>
    %363 = vector.broadcast %362 : vector<64x1xf32> to vector<64x64xf32>
    %364 = arith.subf %360, %363 : vector<64x64xf32>
    %365 = math.exp %364 : vector<64x64xf32>
    %cst_175 = arith.constant dense<0.000000e+00> : vector<64xf32>
    %366 = vector.multi_reduction <add>, %365, %cst_175 [1] : vector<64x64xf32> to vector<64xf32>
    %367 = vector.shape_cast %366 : vector<64xf32> to vector<64x1xf32>
    %368 = vector.broadcast %367 : vector<64x1xf32> to vector<64x64xf32>
    %369 = arith.divf %365, %368 : vector<64x64xf32>
    %cst_176 = arith.constant dense<0.000000e+00> : vector<64x16xf32>
    %370 = tpu.matmul %369, %359, %cst_176 {dimension_numbers = #tpu.dot_dimension_numbers<[1], [0], [0], [1], [0, 0, 1, 1], [], []>} : vector<64x64xf32>, vector<64x16xf32>, vector<64x16xf32> -> vector<64x16xf32>
    %371 = tpu.concatenate %356, %370 in 0 : vector<64x16xf32>, vector<64x16xf32> -> vector<128x16xf32>
    %c5_177 = arith.constant 5 : index
    %c0_178 = arith.constant 0 : index
    %c0_179 = arith.constant 0 : index
    %372 = vector.load %arg5[%c5_177, %c0_178, %c0_179] : memref<8x16x64xf32, #tpu.memory_space<vmem>>, vector<1x16x64xf32>
    %373 = vector.shape_cast %372 : vector<1x16x64xf32> to vector<16x64xf32>
    %cst_180 = arith.constant dense<0.000000e+00> : vector<128x64xf32>
    %374 = tpu.matmul %371, %373, %cst_180 {dimension_numbers = #tpu.dot_dimension_numbers<[1], [0], [0], [1], [0, 0, 1, 1], [], []>} : vector<128x16xf32>, vector<16x64xf32>, vector<128x64xf32> -> vector<128x64xf32>
    %375 = arith.addf %333, %374 : vector<128x64xf32>
    %c6_181 = arith.constant 6 : index
    %c0_182 = arith.constant 0 : index
    %c0_183 = arith.constant 0 : index
    %376 = vector.load %arg4[%c6_181, %c0_182, %c0_183] : memref<24x64x16xf32, #tpu.memory_space<vmem>>, vector<1x64x16xf32>
    %377 = vector.shape_cast %376 : vector<1x64x16xf32> to vector<64x16xf32>
    %cst_184 = arith.constant dense<0.000000e+00> : vector<128x16xf32>
    %378 = tpu.matmul %292, %377, %cst_184 {dimension_numbers = #tpu.dot_dimension_numbers<[1], [0], [0], [1], [0, 0, 1, 1], [], []>} : vector<128x64xf32>, vector<64x16xf32>, vector<128x16xf32> -> vector<128x16xf32>
    %c14_185 = arith.constant 14 : index
    %c0_186 = arith.constant 0 : index
    %c0_187 = arith.constant 0 : index
    %379 = vector.load %arg4[%c14_185, %c0_186, %c0_187] : memref<24x64x16xf32, #tpu.memory_space<vmem>>, vector<1x64x16xf32>
    %380 = vector.shape_cast %379 : vector<1x64x16xf32> to vector<64x16xf32>
    %cst_188 = arith.constant dense<0.000000e+00> : vector<128x16xf32>
    %381 = tpu.matmul %292, %380, %cst_188 {dimension_numbers = #tpu.dot_dimension_numbers<[1], [0], [0], [1], [0, 0, 1, 1], [], []>} : vector<128x64xf32>, vector<64x16xf32>, vector<128x16xf32> -> vector<128x16xf32>
    %c22 = arith.constant 22 : index
    %c0_189 = arith.constant 0 : index
    %c0_190 = arith.constant 0 : index
    %382 = vector.load %arg4[%c22, %c0_189, %c0_190] : memref<24x64x16xf32, #tpu.memory_space<vmem>>, vector<1x64x16xf32>
    %383 = vector.shape_cast %382 : vector<1x64x16xf32> to vector<64x16xf32>
    %cst_191 = arith.constant dense<0.000000e+00> : vector<128x16xf32>
    %384 = tpu.matmul %292, %383, %cst_191 {dimension_numbers = #tpu.dot_dimension_numbers<[1], [0], [0], [1], [0, 0, 1, 1], [], []>} : vector<128x64xf32>, vector<64x16xf32>, vector<128x16xf32> -> vector<128x16xf32>
    %385 = vector.extract_strided_slice %378 {offsets = [0, 0], sizes = [64, 16], strides = [1, 1]} : vector<128x16xf32> to vector<64x16xf32>
    %386 = vector.extract_strided_slice %381 {offsets = [0, 0], sizes = [64, 16], strides = [1, 1]} : vector<128x16xf32> to vector<64x16xf32>
    %387 = vector.extract_strided_slice %384 {offsets = [0, 0], sizes = [64, 16], strides = [1, 1]} : vector<128x16xf32> to vector<64x16xf32>
    %cst_192 = arith.constant dense<0.000000e+00> : vector<64x64xf32>
    %388 = tpu.matmul %385, %386, %cst_192 {dimension_numbers = #tpu.dot_dimension_numbers<[1], [1], [0], [0], [0, 0, 1, 0], [], []>} : vector<64x16xf32>, vector<64x16xf32>, vector<64x64xf32> -> vector<64x64xf32>
    %cst_193 = arith.constant dense<0xFF800000> : vector<64xf32>
    %389 = vector.multi_reduction <maximumf>, %388, %cst_193 [1] : vector<64x64xf32> to vector<64xf32>
    %390 = vector.shape_cast %389 : vector<64xf32> to vector<64x1xf32>
    %391 = vector.broadcast %390 : vector<64x1xf32> to vector<64x64xf32>
    %392 = arith.subf %388, %391 : vector<64x64xf32>
    %393 = math.exp %392 : vector<64x64xf32>
    %cst_194 = arith.constant dense<0.000000e+00> : vector<64xf32>
    %394 = vector.multi_reduction <add>, %393, %cst_194 [1] : vector<64x64xf32> to vector<64xf32>
    %395 = vector.shape_cast %394 : vector<64xf32> to vector<64x1xf32>
    %396 = vector.broadcast %395 : vector<64x1xf32> to vector<64x64xf32>
    %397 = arith.divf %393, %396 : vector<64x64xf32>
    %cst_195 = arith.constant dense<0.000000e+00> : vector<64x16xf32>
    %398 = tpu.matmul %397, %387, %cst_195 {dimension_numbers = #tpu.dot_dimension_numbers<[1], [0], [0], [1], [0, 0, 1, 1], [], []>} : vector<64x64xf32>, vector<64x16xf32>, vector<64x16xf32> -> vector<64x16xf32>
    %399 = vector.extract_strided_slice %378 {offsets = [64, 0], sizes = [64, 16], strides = [1, 1]} : vector<128x16xf32> to vector<64x16xf32>
    %400 = vector.extract_strided_slice %381 {offsets = [64, 0], sizes = [64, 16], strides = [1, 1]} : vector<128x16xf32> to vector<64x16xf32>
    %401 = vector.extract_strided_slice %384 {offsets = [64, 0], sizes = [64, 16], strides = [1, 1]} : vector<128x16xf32> to vector<64x16xf32>
    %cst_196 = arith.constant dense<0.000000e+00> : vector<64x64xf32>
    %402 = tpu.matmul %399, %400, %cst_196 {dimension_numbers = #tpu.dot_dimension_numbers<[1], [1], [0], [0], [0, 0, 1, 0], [], []>} : vector<64x16xf32>, vector<64x16xf32>, vector<64x64xf32> -> vector<64x64xf32>
    %cst_197 = arith.constant dense<0xFF800000> : vector<64xf32>
    %403 = vector.multi_reduction <maximumf>, %402, %cst_197 [1] : vector<64x64xf32> to vector<64xf32>
    %404 = vector.shape_cast %403 : vector<64xf32> to vector<64x1xf32>
    %405 = vector.broadcast %404 : vector<64x1xf32> to vector<64x64xf32>
    %406 = arith.subf %402, %405 : vector<64x64xf32>
    %407 = math.exp %406 : vector<64x64xf32>
    %cst_198 = arith.constant dense<0.000000e+00> : vector<64xf32>
    %408 = vector.multi_reduction <add>, %407, %cst_198 [1] : vector<64x64xf32> to vector<64xf32>
    %409 = vector.shape_cast %408 : vector<64xf32> to vector<64x1xf32>
    %410 = vector.broadcast %409 : vector<64x1xf32> to vector<64x64xf32>
    %411 = arith.divf %407, %410 : vector<64x64xf32>
    %cst_199 = arith.constant dense<0.000000e+00> : vector<64x16xf32>
    %412 = tpu.matmul %411, %401, %cst_199 {dimension_numbers = #tpu.dot_dimension_numbers<[1], [0], [0], [1], [0, 0, 1, 1], [], []>} : vector<64x64xf32>, vector<64x16xf32>, vector<64x16xf32> -> vector<64x16xf32>
    %413 = tpu.concatenate %398, %412 in 0 : vector<64x16xf32>, vector<64x16xf32> -> vector<128x16xf32>
    %c6_200 = arith.constant 6 : index
    %c0_201 = arith.constant 0 : index
    %c0_202 = arith.constant 0 : index
    %414 = vector.load %arg5[%c6_200, %c0_201, %c0_202] : memref<8x16x64xf32, #tpu.memory_space<vmem>>, vector<1x16x64xf32>
    %415 = vector.shape_cast %414 : vector<1x16x64xf32> to vector<16x64xf32>
    %cst_203 = arith.constant dense<0.000000e+00> : vector<128x64xf32>
    %416 = tpu.matmul %413, %415, %cst_203 {dimension_numbers = #tpu.dot_dimension_numbers<[1], [0], [0], [1], [0, 0, 1, 1], [], []>} : vector<128x16xf32>, vector<16x64xf32>, vector<128x64xf32> -> vector<128x64xf32>
    %417 = arith.addf %375, %416 : vector<128x64xf32>
    %c7 = arith.constant 7 : index
    %c0_204 = arith.constant 0 : index
    %c0_205 = arith.constant 0 : index
    %418 = vector.load %arg4[%c7, %c0_204, %c0_205] : memref<24x64x16xf32, #tpu.memory_space<vmem>>, vector<1x64x16xf32>
    %419 = vector.shape_cast %418 : vector<1x64x16xf32> to vector<64x16xf32>
    %cst_206 = arith.constant dense<0.000000e+00> : vector<128x16xf32>
    %420 = tpu.matmul %292, %419, %cst_206 {dimension_numbers = #tpu.dot_dimension_numbers<[1], [0], [0], [1], [0, 0, 1, 1], [], []>} : vector<128x64xf32>, vector<64x16xf32>, vector<128x16xf32> -> vector<128x16xf32>
    %c15_207 = arith.constant 15 : index
    %c0_208 = arith.constant 0 : index
    %c0_209 = arith.constant 0 : index
    %421 = vector.load %arg4[%c15_207, %c0_208, %c0_209] : memref<24x64x16xf32, #tpu.memory_space<vmem>>, vector<1x64x16xf32>
    %422 = vector.shape_cast %421 : vector<1x64x16xf32> to vector<64x16xf32>
    %cst_210 = arith.constant dense<0.000000e+00> : vector<128x16xf32>
    %423 = tpu.matmul %292, %422, %cst_210 {dimension_numbers = #tpu.dot_dimension_numbers<[1], [0], [0], [1], [0, 0, 1, 1], [], []>} : vector<128x64xf32>, vector<64x16xf32>, vector<128x16xf32> -> vector<128x16xf32>
    %c23 = arith.constant 23 : index
    %c0_211 = arith.constant 0 : index
    %c0_212 = arith.constant 0 : index
    %424 = vector.load %arg4[%c23, %c0_211, %c0_212] : memref<24x64x16xf32, #tpu.memory_space<vmem>>, vector<1x64x16xf32>
    %425 = vector.shape_cast %424 : vector<1x64x16xf32> to vector<64x16xf32>
    %cst_213 = arith.constant dense<0.000000e+00> : vector<128x16xf32>
    %426 = tpu.matmul %292, %425, %cst_213 {dimension_numbers = #tpu.dot_dimension_numbers<[1], [0], [0], [1], [0, 0, 1, 1], [], []>} : vector<128x64xf32>, vector<64x16xf32>, vector<128x16xf32> -> vector<128x16xf32>
    %427 = vector.extract_strided_slice %420 {offsets = [0, 0], sizes = [64, 16], strides = [1, 1]} : vector<128x16xf32> to vector<64x16xf32>
    %428 = vector.extract_strided_slice %423 {offsets = [0, 0], sizes = [64, 16], strides = [1, 1]} : vector<128x16xf32> to vector<64x16xf32>
    %429 = vector.extract_strided_slice %426 {offsets = [0, 0], sizes = [64, 16], strides = [1, 1]} : vector<128x16xf32> to vector<64x16xf32>
    %cst_214 = arith.constant dense<0.000000e+00> : vector<64x64xf32>
    %430 = tpu.matmul %427, %428, %cst_214 {dimension_numbers = #tpu.dot_dimension_numbers<[1], [1], [0], [0], [0, 0, 1, 0], [], []>} : vector<64x16xf32>, vector<64x16xf32>, vector<64x64xf32> -> vector<64x64xf32>
    %cst_215 = arith.constant dense<0xFF800000> : vector<64xf32>
    %431 = vector.multi_reduction <maximumf>, %430, %cst_215 [1] : vector<64x64xf32> to vector<64xf32>
    %432 = vector.shape_cast %431 : vector<64xf32> to vector<64x1xf32>
    %433 = vector.broadcast %432 : vector<64x1xf32> to vector<64x64xf32>
    %434 = arith.subf %430, %433 : vector<64x64xf32>
    %435 = math.exp %434 : vector<64x64xf32>
    %cst_216 = arith.constant dense<0.000000e+00> : vector<64xf32>
    %436 = vector.multi_reduction <add>, %435, %cst_216 [1] : vector<64x64xf32> to vector<64xf32>
    %437 = vector.shape_cast %436 : vector<64xf32> to vector<64x1xf32>
    %438 = vector.broadcast %437 : vector<64x1xf32> to vector<64x64xf32>
    %439 = arith.divf %435, %438 : vector<64x64xf32>
    %cst_217 = arith.constant dense<0.000000e+00> : vector<64x16xf32>
    %440 = tpu.matmul %439, %429, %cst_217 {dimension_numbers = #tpu.dot_dimension_numbers<[1], [0], [0], [1], [0, 0, 1, 1], [], []>} : vector<64x64xf32>, vector<64x16xf32>, vector<64x16xf32> -> vector<64x16xf32>
    %441 = vector.extract_strided_slice %420 {offsets = [64, 0], sizes = [64, 16], strides = [1, 1]} : vector<128x16xf32> to vector<64x16xf32>
    %442 = vector.extract_strided_slice %423 {offsets = [64, 0], sizes = [64, 16], strides = [1, 1]} : vector<128x16xf32> to vector<64x16xf32>
    %443 = vector.extract_strided_slice %426 {offsets = [64, 0], sizes = [64, 16], strides = [1, 1]} : vector<128x16xf32> to vector<64x16xf32>
    %cst_218 = arith.constant dense<0.000000e+00> : vector<64x64xf32>
    %444 = tpu.matmul %441, %442, %cst_218 {dimension_numbers = #tpu.dot_dimension_numbers<[1], [1], [0], [0], [0, 0, 1, 0], [], []>} : vector<64x16xf32>, vector<64x16xf32>, vector<64x64xf32> -> vector<64x64xf32>
    %cst_219 = arith.constant dense<0xFF800000> : vector<64xf32>
    %445 = vector.multi_reduction <maximumf>, %444, %cst_219 [1] : vector<64x64xf32> to vector<64xf32>
    %446 = vector.shape_cast %445 : vector<64xf32> to vector<64x1xf32>
    %447 = vector.broadcast %446 : vector<64x1xf32> to vector<64x64xf32>
    %448 = arith.subf %444, %447 : vector<64x64xf32>
    %449 = math.exp %448 : vector<64x64xf32>
    %cst_220 = arith.constant dense<0.000000e+00> : vector<64xf32>
    %450 = vector.multi_reduction <add>, %449, %cst_220 [1] : vector<64x64xf32> to vector<64xf32>
    %451 = vector.shape_cast %450 : vector<64xf32> to vector<64x1xf32>
    %452 = vector.broadcast %451 : vector<64x1xf32> to vector<64x64xf32>
    %453 = arith.divf %449, %452 : vector<64x64xf32>
    %cst_221 = arith.constant dense<0.000000e+00> : vector<64x16xf32>
    %454 = tpu.matmul %453, %443, %cst_221 {dimension_numbers = #tpu.dot_dimension_numbers<[1], [0], [0], [1], [0, 0, 1, 1], [], []>} : vector<64x64xf32>, vector<64x16xf32>, vector<64x16xf32> -> vector<64x16xf32>
    %455 = tpu.concatenate %440, %454 in 0 : vector<64x16xf32>, vector<64x16xf32> -> vector<128x16xf32>
    %c7_222 = arith.constant 7 : index
    %c0_223 = arith.constant 0 : index
    %c0_224 = arith.constant 0 : index
    %456 = vector.load %arg5[%c7_222, %c0_223, %c0_224] : memref<8x16x64xf32, #tpu.memory_space<vmem>>, vector<1x16x64xf32>
    %457 = vector.shape_cast %456 : vector<1x16x64xf32> to vector<16x64xf32>
    %cst_225 = arith.constant dense<0.000000e+00> : vector<128x64xf32>
    %458 = tpu.matmul %455, %457, %cst_225 {dimension_numbers = #tpu.dot_dimension_numbers<[1], [0], [0], [1], [0, 0, 1, 1], [], []>} : vector<128x16xf32>, vector<16x64xf32>, vector<128x64xf32> -> vector<128x64xf32>
    %459 = arith.addf %417, %458 : vector<128x64xf32>
    %460 = arith.addf %268, %459 : vector<128x64xf32>
    %c16_226 = arith.constant 16 : index
    %c0_227 = arith.constant 0 : index
    %461 = vector.load %arg2[%c16_226, %c0_227] : memref<19x64xf32, #tpu.memory_space<vmem>>, vector<1x64xf32>
    %c17_228 = arith.constant 17 : index
    %c0_229 = arith.constant 0 : index
    %462 = vector.load %arg2[%c17_228, %c0_229] : memref<19x64xf32, #tpu.memory_space<vmem>>, vector<1x64xf32>
    %cst_230 = arith.constant dense<0.000000e+00> : vector<128xf32>
    %463 = vector.multi_reduction <add>, %460, %cst_230 [1] : vector<128x64xf32> to vector<128xf32>
    %464 = vector.shape_cast %463 : vector<128xf32> to vector<128x1xf32>
    %cst_231 = arith.constant 6.400000e+01 : f32
    %465 = vector.broadcast %cst_231 : f32 to vector<128x1xf32>
    %466 = arith.divf %464, %465 : vector<128x1xf32>
    %467 = vector.broadcast %466 : vector<128x1xf32> to vector<128x64xf32>
    %468 = arith.subf %460, %467 : vector<128x64xf32>
    %469 = arith.mulf %468, %468 : vector<128x64xf32>
    %cst_232 = arith.constant dense<0.000000e+00> : vector<128xf32>
    %470 = vector.multi_reduction <add>, %469, %cst_232 [1] : vector<128x64xf32> to vector<128xf32>
    %471 = vector.shape_cast %470 : vector<128xf32> to vector<128x1xf32>
    %cst_233 = arith.constant 6.400000e+01 : f32
    %472 = vector.broadcast %cst_233 : f32 to vector<128x1xf32>
    %473 = arith.divf %471, %472 : vector<128x1xf32>
    %474 = vector.broadcast %466 : vector<128x1xf32> to vector<128x64xf32>
    %475 = arith.subf %460, %474 : vector<128x64xf32>
    %cst_234 = arith.constant 9.99999974E-6 : f32
    %476 = vector.broadcast %cst_234 : f32 to vector<128x1xf32>
    %477 = arith.addf %473, %476 : vector<128x1xf32>
    %478 = math.rsqrt %477 : vector<128x1xf32>
    %479 = vector.broadcast %478 : vector<128x1xf32> to vector<128x64xf32>
    %480 = arith.mulf %475, %479 : vector<128x64xf32>
    %481 = vector.broadcast %461 : vector<1x64xf32> to vector<128x64xf32>
    %482 = arith.mulf %480, %481 : vector<128x64xf32>
    %483 = vector.broadcast %462 : vector<1x64xf32> to vector<128x64xf32>
    %484 = arith.addf %482, %483 : vector<128x64xf32>
    %c1_235 = arith.constant 1 : index
    %c0_236 = arith.constant 0 : index
    %c0_237 = arith.constant 0 : index
    %485 = vector.load %arg6[%c1_235, %c0_236, %c0_237] : memref<2x64x128xf32, #tpu.memory_space<vmem>>, vector<1x64x128xf32>
    %486 = vector.shape_cast %485 : vector<1x64x128xf32> to vector<64x128xf32>
    %cst_238 = arith.constant dense<0.000000e+00> : vector<128x128xf32>
    %487 = tpu.matmul %484, %486, %cst_238 {dimension_numbers = #tpu.dot_dimension_numbers<[1], [0], [0], [1], [0, 0, 1, 1], [], []>} : vector<128x64xf32>, vector<64x128xf32>, vector<128x128xf32> -> vector<128x128xf32>
    %c65 = arith.constant 65 : index
    %c0_239 = arith.constant 0 : index
    %488 = vector.load %arg3[%c65, %c0_239] : memref<67x128xf32, #tpu.memory_space<vmem>>, vector<1x128xf32>
    %489 = vector.broadcast %488 : vector<1x128xf32> to vector<128x128xf32>
    %490 = arith.addf %487, %489 : vector<128x128xf32>
    %cst_240 = arith.constant 5.000000e-01 : f32
    %491 = vector.broadcast %cst_240 : f32 to vector<128x128xf32>
    %492 = arith.mulf %491, %490 : vector<128x128xf32>
    %cst_241 = arith.constant 0.707106769 : f32
    %493 = vector.broadcast %cst_241 : f32 to vector<128x128xf32>
    %494 = arith.mulf %490, %493 : vector<128x128xf32>
    %495 = math.erf %494 : vector<128x128xf32>
    %cst_242 = arith.constant 1.000000e+00 : f32
    %496 = vector.broadcast %cst_242 : f32 to vector<128x128xf32>
    %497 = arith.addf %496, %495 : vector<128x128xf32>
    %498 = arith.mulf %492, %497 : vector<128x128xf32>
    %c1_243 = arith.constant 1 : index
    %c0_244 = arith.constant 0 : index
    %c0_245 = arith.constant 0 : index
    %499 = vector.load %arg7[%c1_243, %c0_244, %c0_245] : memref<2x128x64xf32, #tpu.memory_space<vmem>>, vector<1x128x64xf32>
    %500 = vector.shape_cast %499 : vector<1x128x64xf32> to vector<128x64xf32>
    %cst_246 = arith.constant dense<0.000000e+00> : vector<128x64xf32>
    %501 = tpu.matmul %498, %500, %cst_246 {dimension_numbers = #tpu.dot_dimension_numbers<[1], [0], [0], [1], [0, 0, 1, 1], [], []>} : vector<128x128xf32>, vector<128x64xf32>, vector<128x64xf32> -> vector<128x64xf32>
    %502 = arith.addf %460, %501 : vector<128x64xf32>
    %c18_247 = arith.constant 18 : index
    %c0_248 = arith.constant 0 : index
    %503 = vector.load %arg2[%c18_247, %c0_248] : memref<19x64xf32, #tpu.memory_space<vmem>>, vector<1x64xf32>
    %504 = vector.broadcast %503 : vector<1x64xf32> to vector<128x64xf32>
    %505 = arith.addf %502, %504 : vector<128x64xf32>
    %506 = tpu.iota {dimensions = array<i32: 0>} : vector<2x128xi32>
    %507 = tpu.iota {dimensions = array<i32: 1>} : vector<2x128xi32>
    %c64_i32 = arith.constant 64 : i32
    %508 = vector.broadcast %c64_i32 : i32 to vector<2x128xi32>
    %509 = arith.muli %506, %508 : vector<2x128xi32>
    %510 = arith.cmpi sge, %507, %509 : vector<2x128xi32>
    %c1_i32 = arith.constant 1 : i32
    %511 = vector.broadcast %c1_i32 : i32 to vector<2x128xi32>
    %512 = arith.addi %506, %511 : vector<2x128xi32>
    %c64_i32_249 = arith.constant 64 : i32
    %513 = vector.broadcast %c64_i32_249 : i32 to vector<2x128xi32>
    %514 = arith.muli %512, %513 : vector<2x128xi32>
    %515 = arith.cmpi slt, %507, %514 : vector<2x128xi32>
    %516 = arith.andi %510, %515 : vector<2x128xi1>
    %cst_250 = arith.constant 1.562500e-02 : f32
    %cst_251 = arith.constant 0.000000e+00 : f32
    %517 = vector.broadcast %cst_250 : f32 to vector<2x128xf32>
    %518 = vector.broadcast %cst_251 : f32 to vector<2x128xf32>
    %519 = arith.select %516, %517, %518 : vector<2x128xi1>, vector<2x128xf32>
    %cst_252 = arith.constant dense<0.000000e+00> : vector<2x64xf32>
    %520 = tpu.matmul %519, %505, %cst_252 {dimension_numbers = #tpu.dot_dimension_numbers<[1], [0], [0], [1], [0, 0, 1, 1], [], []>} : vector<2x128xf32>, vector<128x64xf32>, vector<2x64xf32> -> vector<2x64xf32>
    %c7_253 = arith.constant 7 : index
    %c0_254 = arith.constant 0 : index
    %521 = vector.load %arg2[%c7_253, %c0_254] : memref<19x64xf32, #tpu.memory_space<vmem>>, vector<1x64xf32>
    %c8_255 = arith.constant 8 : index
    %c0_256 = arith.constant 0 : index
    %522 = vector.load %arg2[%c8_255, %c0_256] : memref<19x64xf32, #tpu.memory_space<vmem>>, vector<1x64xf32>
    %cst_257 = arith.constant dense<0.000000e+00> : vector<2xf32>
    %523 = vector.multi_reduction <add>, %520, %cst_257 [1] : vector<2x64xf32> to vector<2xf32>
    %524 = vector.shape_cast %523 : vector<2xf32> to vector<2x1xf32>
    %cst_258 = arith.constant 6.400000e+01 : f32
    %525 = vector.broadcast %cst_258 : f32 to vector<2x1xf32>
    %526 = arith.divf %524, %525 : vector<2x1xf32>
    %527 = vector.broadcast %526 : vector<2x1xf32> to vector<2x64xf32>
    %528 = arith.subf %520, %527 : vector<2x64xf32>
    %529 = arith.mulf %528, %528 : vector<2x64xf32>
    %cst_259 = arith.constant dense<0.000000e+00> : vector<2xf32>
    %530 = vector.multi_reduction <add>, %529, %cst_259 [1] : vector<2x64xf32> to vector<2xf32>
    %531 = vector.shape_cast %530 : vector<2xf32> to vector<2x1xf32>
    %cst_260 = arith.constant 6.400000e+01 : f32
    %532 = vector.broadcast %cst_260 : f32 to vector<2x1xf32>
    %533 = arith.divf %531, %532 : vector<2x1xf32>
    %534 = vector.broadcast %526 : vector<2x1xf32> to vector<2x64xf32>
    %535 = arith.subf %520, %534 : vector<2x64xf32>
    %cst_261 = arith.constant 9.99999974E-6 : f32
    %536 = vector.broadcast %cst_261 : f32 to vector<2x1xf32>
    %537 = arith.addf %533, %536 : vector<2x1xf32>
    %538 = math.rsqrt %537 : vector<2x1xf32>
    %539 = vector.broadcast %538 : vector<2x1xf32> to vector<2x64xf32>
    %540 = arith.mulf %535, %539 : vector<2x64xf32>
    %541 = vector.broadcast %521 : vector<1x64xf32> to vector<2x64xf32>
    %542 = arith.mulf %540, %541 : vector<2x64xf32>
    %543 = vector.broadcast %522 : vector<1x64xf32> to vector<2x64xf32>
    %544 = arith.addf %542, %543 : vector<2x64xf32>
    %c0_262 = arith.constant 0 : index
    %c0_263 = arith.constant 0 : index
    %545 = vector.load %arg3[%c0_262, %c0_263] : memref<67x128xf32, #tpu.memory_space<vmem>>, vector<64x128xf32>
    %cst_264 = arith.constant dense<0.000000e+00> : vector<2x128xf32>
    %546 = tpu.matmul %544, %545, %cst_264 {dimension_numbers = #tpu.dot_dimension_numbers<[1], [0], [0], [1], [0, 0, 1, 1], [], []>} : vector<2x64xf32>, vector<64x128xf32>, vector<2x128xf32> -> vector<2x128xf32>
    %c66 = arith.constant 66 : index
    %c0_265 = arith.constant 0 : index
    %547 = vector.load %arg3[%c66, %c0_265] : memref<67x128xf32, #tpu.memory_space<vmem>>, vector<1x128xf32>
    %548 = vector.broadcast %547 : vector<1x128xf32> to vector<2x128xf32>
    %549 = arith.addf %546, %548 : vector<2x128xf32>
    %c0_266 = arith.constant 0 : index
    %c0_267 = arith.constant 0 : index
    %550 = vector.load %arg8[%c0_266, %c0_267] : memref<2x128xf32, #tpu.memory_space<vmem>>, vector<2x128xf32>
    tpu.vector_store %arg8[%c0_266, %c0_267], %549 {strides = array<i32>} : memref<2x128xf32, #tpu.memory_space<vmem>>, vector<2x128xf32>,
    return
  }
}

</mosaic_0001>

<bundles_post_ra>
// kernel: simple_vit_forward.1
= control target key start
LH: loop header
LB: loop body
LE: loop exit
PB: predicated region body
PF: predicated region fallthrough
CT: control target
= control target key end

     0   :  { %vm101_vm0 = vcmask 1043456   ;;  %vm52_vm1 = vcmask 31744   ;;  %s25417_s0 = inlined_call_operand.vmem [shape: f32[128,4], index: 0, kind: input, shape index: {}]   ;;  %s25418_s1 = inlined_call_operand.vmem [shape: f32[128,64], index: 1, kind: input, shape index: {}]   ;;  %s25419_s2 = inlined_call_operand.vmem [shape: f32[19,64], index: 2, kind: input, shape index: {}]   ;;  %s25420_s3 = inlined_call_operand.vmem [shape: f32[67,128], index: 3, kind: input, shape index: {}]   ;;  %s25421_s4 = inlined_call_operand.vmem [shape: f32[24,64,16], index: 4, kind: input, shape index: {}]   ;;  %s25422_s5 = inlined_call_operand.vmem [shape: f32[8,16,64], index: 5, kind: input, shape index: {}]   ;;  %s25423_s6 = inlined_call_operand.vmem [shape: f32[2,64,128], index: 6, kind: input, shape index: {}]   ;;  %s25424_s7 = inlined_call_operand.vmem [shape: f32[2,128,64], index: 7, kind: input, shape index: {}]   ;;  %s25425_s8 = inlined_call_operand.hbm [shape: f32[2,128], index: 8, kind: output, shape index: {}]  }
   0x1   :  { %v30_v0 = vld [vmem:[%s25419_s2] sm:$0xf]  ;;  %v32_v2 = vld [vmem:[%s25417_s0 + $0x8] sm:$0xff]  ;;  %v33_v3 = vld [vmem:[%s25417_s0 + $0x10] sm:$0xff] }
   0x2   :  { %v31_v1 = vld [vmem:[%s25417_s0] sm:$0xff]  ;;  %16661 = vmatprep.subr.msk.mxu0 %vm101_vm0, %v30_v0  ;;  %v34_v4 = vld [vmem:[%s25417_s0 + $0x18] sm:$0xff] }
   0x3   :  { %16663 = vmatprep.mubr.msk.f32.mxu0 %vm52_vm1, %v31_v1  ;;  %16662 = vmatpush3.msk.msra.mxu0 %vm101_vm0, %v30_v0  ;;  %v35_v5 = vld [vmem:[%s25417_s0 + $0x20] sm:$0xff] }
   0x4   :  { %16664 = vmatmul.mubr.msk.f32.vlgmr.msra.gmra.mxu0 %vm52_vm1, %v32_v2 }
   0x5   :  { %16666 = vmatprep.mubr.msk.f32.mxu0 %vm52_vm1, %v33_v3 }
   0x6   :  { %13 = vsyncpa [#allocation3], 0  ;;  %v36_v6 = vld [vmem:[%s25417_s0 + $0x28] sm:$0xff]  ;;  %v37_v7 = vld [vmem:[%s25417_s0 + $0x30] sm:$0xff]  ;;  %vm252_vm2 = vcmask 523264   ;;  %vm1293_vm3 = vcmask 130048  }
   0x7   :  { %v38_v8 = vld [vmem:[%s25417_s0 + $0x38] sm:$0xff]  ;;  %v39_v9 = vld [vmem:[%s25417_s0 + $0x40] sm:$0xff]  ;;  %v40_v10 = vld [vmem:[%s25417_s0 + $0x48] sm:$0xff]  ;;  %vm19778_vm4 = vmmov 0   ;;  %vm13962_vm8 = vcmask 517120  }
   0x8   :  { %16667 = vmatmul.mubr.msk.f32.gmra.mxu0 %vm52_vm1, %v34_v4  ;;  %v41_v11 = vld [vmem:[%s25417_s0 + $0x50] sm:$0xff]  ;;  %v42_v12 = vld [vmem:[%s25417_s0 + $0x58] sm:$0xff]  ;;  %v43_v13 = vld [vmem:[%s25417_s0 + $0x60] sm:$0xff] }
   0x9   :  { %16669 = vmatprep.mubr.msk.f32.mxu0 %vm52_vm1, %v35_v5  ;;  %v44_v14 = vld [vmem:[%s25417_s0 + $0x68] sm:$0xff]  ;;  %v45_v15 = vld [vmem:[%s25417_s0 + $0x70] sm:$0xff]  ;;  %v46_v16 = vld [vmem:[%s25417_s0 + $0x78] sm:$0xff] }
   0xa   :  { %v14087_v18 = vld [vmem:[%s25419_s2 + $0x4] ss:$0 sm:$0xff] }
   0xc   :  { %16670 = vmatmul.mubr.msk.f32.gmra.mxu0 %vm52_vm1, %v36_v6 }
   0xd   :  { %16672 = vmatprep.mubr.msk.f32.mxu0 %vm52_vm1, %v37_v7 }
  0x10   :  { %16673 = vmatmul.mubr.msk.f32.gmra.mxu0 %vm52_vm1, %v38_v8 }
  0x11   :  { %16675 = vmatprep.mubr.msk.f32.mxu0 %vm52_vm1, %v39_v9 }
  0x14   :  { %16676 = vmatmul.mubr.msk.f32.gmra.mxu0 %vm52_vm1, %v40_v10 }
  0x15   :  { %16678 = vmatprep.mubr.msk.f32.mxu0 %vm52_vm1, %v41_v11 }
  0x18   :  { %16679 = vmatmul.mubr.msk.f32.gmra.mxu0 %vm52_vm1, %v42_v12 }
  0x19   :  { %16681 = vmatprep.mubr.msk.f32.mxu0 %vm52_vm1, %v43_v13 }
  0x1c   :  { %16682 = vmatmul.mubr.msk.f32.gmra.mxu0 %vm52_vm1, %v44_v14 }
  0x1d   :  { %16684 = vmatprep.mubr.msk.f32.mxu0 %vm52_vm1, %v45_v15 }
  0x20   :  { %16685 = vmatmul.mubr.msk.f32.gmra.mxu0 %vm52_vm1, %v46_v16 }
  0xc4   :  { %v16665_v17 = vpop.f32.mrf.mxu0 }
  0xc5   :  { %v19898_v22 = vadd.f32 %v16665_v17, %v14087_v18 }
  0xc6   :  { %v171_v19 = vpop.f32.mrf.mxu0 }
  0xc7   :  { %v19896_v20 = vadd.f32 %v14087_v18, %v171_v19  ;;  %v256_v29 = vsel %vm252_vm2, %v19898_v22, 0.0 }
  0xc8   :  { %v16668_v21 = vpop.f32.mrf.mxu0 }
  0xc9   :  { %v253_v23 = vsel %vm252_vm2, %v19896_v20, 0.0  ;;  %v19904_v27 = vadd.f32 %v16668_v21, %v14087_v18 }
  0xca   :  { %v181_v24 = vpop.f32.mrf.mxu0  ;;  %254 = vadd.xlane.f32.xlu0 %v253_v23 }
  0xcb   :  { %v19902_v25 = vadd.f32 %v14087_v18, %v181_v24  ;;  %v262_v34 = vsel %vm252_vm2, %v19904_v27, 0.0 }
  0xcc   :  { %v16671_v26 = vpop.f32.mrf.mxu0 }
  0xcd   :  { %v259_v28 = vsel %vm252_vm2, %v19902_v25, 0.0  ;;  %v19912_v33 = vadd.f32 %v16671_v26, %v14087_v18 }
  0xce   :  { %v191_v30 = vpop.f32.mrf.mxu0  ;;  %260 = vadd.xlane.f32.xlu1 %v259_v28  ;;  %257 = vadd.xlane.f32.xlu0 %v256_v29 }
  0xcf   :  { %v19910_v31 = vadd.f32 %v14087_v18, %v191_v30  ;;  %v268_v40 = vsel %vm252_vm2, %v19912_v33, 0.0 }
  0xd0   :  { %v16674_v32 = vpop.f32.mrf.mxu0 }
  0xd1   :  { %v265_v35 = vsel %vm252_vm2, %v19910_v31, 0.0  ;;  %v19920_v39 = vadd.f32 %v16674_v32, %v14087_v18 }
  0xd2   :  { %v201_v36 = vpop.f32.mrf.mxu0  ;;  %263 = vadd.xlane.f32.xlu1 %v262_v34  ;;  %266 = vadd.xlane.f32.xlu0 %v265_v35 }
  0xd3   :  { %v19918_v37 = vadd.f32 %v14087_v18, %v201_v36  ;;  %v274_v46 = vsel %vm252_vm2, %v19920_v39, 0.0 }
  0xd4   :  { %v16677_v38 = vpop.f32.mrf.mxu0 }
  0xd5   :  { %v271_v41 = vsel %vm252_vm2, %v19918_v37, 0.0  ;;  %v19926_v43 = vadd.f32 %v16677_v38, %v14087_v18 }
  0xd6   :  { %v211_v42 = vpop.f32.mrf.mxu0  ;;  %269 = vadd.xlane.f32.xlu1 %v268_v40  ;;  %272 = vadd.xlane.f32.xlu0 %v271_v41 }
  0xd7   :  { %v19928_v44 = vadd.f32 %v14087_v18, %v211_v42  ;;  %v280_v51 = vsel %vm252_vm2, %v19926_v43, 0.0 }
  0xd8   :  { %v16680_v45 = vpop.f32.mrf.mxu0 }
  0xd9   :  { %v277_v47 = vsel %vm252_vm2, %v19928_v44, 0.0  ;;  %v19934_v49 = vadd.f32 %v16680_v45, %v14087_v18 }
  0xda   :  { %v221_v48 = vpop.f32.mrf.mxu0  ;;  %275 = vadd.xlane.f32.xlu1 %v274_v46  ;;  %278 = vadd.xlane.f32.xlu0 %v277_v47 }
  0xdb   :  { %v19936_v50 = vadd.f32 %v14087_v18, %v221_v48  ;;  %v286_v57 = vsel %vm252_vm2, %v19934_v49, 0.0 }
  0xdc   :  { %v16683_v52 = vpop.f32.mrf.mxu0 }
  0xdd   :  { %v283_v53 = vsel %vm252_vm2, %v19936_v50, 0.0  ;;  %v19942_v55 = vadd.f32 %v16683_v52, %v14087_v18 }
  0xde   :  { %v231_v54 = vpop.f32.mrf.mxu0  ;;  %281 = vadd.xlane.f32.xlu1 %v280_v51  ;;  %284 = vadd.xlane.f32.xlu0 %v283_v53 }
  0xdf   :  { %v19944_v56 = vadd.f32 %v14087_v18, %v231_v54  ;;  %v292_v63 = vsel %vm252_vm2, %v19942_v55, 0.0 }
  0xe0   :  { %v16686_v58 = vpop.f32.mrf.mxu0 }
  0xe1   :  { %v289_v59 = vsel %vm252_vm2, %v19944_v56, 0.0  ;;  %v19950_v61 = vadd.f32 %v16686_v58, %v14087_v18 }
  0xe2   :  { %v241_v60 = vpop.f32.mrf.mxu0  ;;  %287 = vadd.xlane.f32.xlu1 %v286_v57  ;;  %290 = vadd.xlane.f32.xlu0 %v289_v59 }
  0xe3   :  { %v19952_v62 = vadd.f32 %v14087_v18, %v241_v60  ;;  %v298_v1 = vsel %vm252_vm2, %v19950_v61, 0.0 }
  0xe5   :  { %v295_v0 = vsel %vm252_vm2, %v19952_v62, 0.0 }
  0xe6   :  { %293 = vadd.xlane.f32.xlu1 %v292_v63  ;;  %296 = vadd.xlane.f32.xlu0 %v295_v0 }
  0xea   :  { %299 = vadd.xlane.f32.xlu1 %v298_v1 }
 0x153   :  { %v255_v2 = vpop.xlane.xlu0 %254 }
 0x154   :  { %v302_v3 = vmul.f32 0.015625, %v255_v2 }
 0x156   :  { %v19961_v4 = vsub.f32 %v19896_v20, %v302_v3 }
 0x157   :  { %v261_v5 = vpop.xlane.xlu1 %260  ;;  %v258_v6 = vpop.xlane.xlu0 %257 }
 0x158   :  { %v304_v7 = vmul.f32 0.015625, %v261_v5  ;;  %v303_v8 = vmul.f32 0.015625, %v258_v6  ;;  %v334_v9 = vmul.f32 %v19961_v4, %v19961_v4 }
 0x15a   :  { %v19966_v10 = vsub.f32 %v19902_v25, %v304_v7  ;;  %v19969_v11 = vsub.f32 %v19898_v22, %v303_v8  ;;  %v350_v12 = vsel %vm252_vm2, %v334_v9, 0.0 }
 0x15b   :  { %v264_v13 = vpop.xlane.xlu1 %263  ;;  %351 = vadd.xlane.f32.xlu0 %v350_v12  ;;  %v267_v14 = vpop.xlane.xlu0 %266 }
 0x15c   :  { %v305_v15 = vmul.f32 0.015625, %v264_v13  ;;  %v306_v16 = vmul.f32 0.015625, %v267_v14  ;;  %v336_v17 = vmul.f32 %v19966_v10, %v19966_v10  ;;  %v335_v18 = vmul.f32 %v19969_v11, %v19969_v11 }
 0x15e   :  { %v19977_v19 = vsub.f32 %v19904_v27, %v305_v15  ;;  %v19980_v20 = vsub.f32 %v19910_v31, %v306_v16  ;;  %v356_v21 = vsel %vm252_vm2, %v336_v17, 0.0  ;;  %v353_v22 = vsel %vm252_vm2, %v335_v18, 0.0 }
 0x15f   :  { %v270_v23 = vpop.xlane.xlu1 %269  ;;  %357 = vadd.xlane.f32.xlu0 %v356_v21  ;;  %354 = vadd.xlane.f32.xlu1 %v353_v22  ;;  %v273_v24 = vpop.xlane.xlu0 %272 }
 0x160   :  { %v307_v25 = vmul.f32 0.015625, %v270_v23  ;;  %v308_v26 = vmul.f32 0.015625, %v273_v24  ;;  %v337_v28 = vmul.f32 %v19977_v19, %v19977_v19  ;;  %v338_v27 = vmul.f32 %v19980_v20, %v19980_v20 }
 0x162   :  { %v19989_v29 = vsub.f32 %v19912_v33, %v307_v25  ;;  %v19992_v30 = vsub.f32 %v19918_v37, %v308_v26  ;;  %v359_v31 = vsel %vm252_vm2, %v337_v28, 0.0  ;;  %v362_v32 = vsel %vm252_vm2, %v338_v27, 0.0 }
 0x163   :  { %v276_v34 = vpop.xlane.xlu1 %275  ;;  %360 = vadd.xlane.f32.xlu1 %v359_v31  ;;  %363 = vadd.xlane.f32.xlu0 %v362_v32  ;;  %v279_v35 = vpop.xlane.xlu0 %278 }
 0x164   :  { %v309_v36 = vmul.f32 0.015625, %v276_v34  ;;  %v310_v38 = vmul.f32 0.015625, %v279_v35  ;;  %v339_v40 = vmul.f32 %v19989_v29, %v19989_v29  ;;  %v340_v33 = vmul.f32 %v19992_v30, %v19992_v30 }
 0x166   :  { %v20001_v41 = vsub.f32 %v19920_v39, %v309_v36  ;;  %v20004_v37 = vsub.f32 %v19928_v44, %v310_v38  ;;  %v365_v42 = vsel %vm252_vm2, %v339_v40, 0.0  ;;  %v368_v45 = vsel %vm252_vm2, %v340_v33, 0.0 }
 0x167   :  { %v282_v46 = vpop.xlane.xlu1 %281  ;;  %366 = vadd.xlane.f32.xlu1 %v365_v42  ;;  %369 = vadd.xlane.f32.xlu0 %v368_v45  ;;  %v285_v47 = vpop.xlane.xlu0 %284 }
 0x168   :  { %v311_v48 = vmul.f32 0.015625, %v282_v46  ;;  %v312_v51 = vmul.f32 0.015625, %v285_v47  ;;  %v341_v52 = vmul.f32 %v20001_v41, %v20001_v41  ;;  %v342_v39 = vmul.f32 %v20004_v37, %v20004_v37 }
 0x16a   :  { %v20013_v53 = vsub.f32 %v19926_v43, %v311_v48  ;;  %v20016_v44 = vsub.f32 %v19936_v50, %v312_v51  ;;  %v371_v54 = vsel %vm252_vm2, %v341_v52, 0.0  ;;  %v374_v57 = vsel %vm252_vm2, %v342_v39, 0.0 }
 0x16b   :  { %v288_v58 = vpop.xlane.xlu1 %287  ;;  %372 = vadd.xlane.f32.xlu1 %v371_v54  ;;  %375 = vadd.xlane.f32.xlu0 %v374_v57  ;;  %v291_v59 = vpop.xlane.xlu0 %290 }
 0x16c   :  { %v313_v60 = vmul.f32 0.015625, %v288_v58  ;;  %v314_v63 = vmul.f32 0.015625, %v291_v59  ;;  %v343_v0 = vmul.f32 %v20013_v53, %v20013_v53  ;;  %v344_v43 = vmul.f32 %v20016_v44, %v20016_v44 }
 0x16e   :  { %v20025_v1 = vsub.f32 %v19934_v49, %v313_v60  ;;  %v20028_v50 = vsub.f32 %v19944_v56, %v314_v63  ;;  %v377_v2 = vsel %vm252_vm2, %v343_v0, 0.0  ;;  %v380_v3 = vsel %vm252_vm2, %v344_v43, 0.0  ;;  %v20059_v60 = vld [vmem:[%s25419_s2 + $0x5] ss:$0 sm:$0xff] }
 0x16f   :  { %v294_v5 = vpop.xlane.xlu1 %293  ;;  %378 = vadd.xlane.f32.xlu1 %v377_v2  ;;  %381 = vadd.xlane.f32.xlu0 %v380_v3  ;;  %v297_v6 = vpop.xlane.xlu0 %296 }
 0x170   :  { %v315_v7 = vmul.f32 0.015625, %v294_v5  ;;  %v316_v8 = vmul.f32 0.015625, %v297_v6  ;;  %v345_v9 = vmul.f32 %v20025_v1, %v20025_v1  ;;  %v346_v49 = vmul.f32 %v20028_v50, %v20028_v50  ;;  %v20065_v5 = vld [vmem:[%s25419_s2 + $0x6] ss:$0 sm:$0xff] }
 0x172   :  { %v20037_v12 = vsub.f32 %v19942_v55, %v315_v7  ;;  %v20040_v56 = vsub.f32 %v19952_v62, %v316_v8  ;;  %v383_v13 = vsel %vm252_vm2, %v345_v9, 0.0  ;;  %v386_v14 = vsel %vm252_vm2, %v346_v49, 0.0  ;;  %v502_v49 = vld [vmem:[%s25418_s1] sm:$0xff] }
 0x173   :  { %v300_v15 = vpop.xlane.xlu1 %299  ;;  %384 = vadd.xlane.f32.xlu1 %v383_v13  ;;  %387 = vadd.xlane.f32.xlu0 %v386_v14 }
 0x174   :  { %v317_v16 = vmul.f32 0.015625, %v300_v15  ;;  %v347_v17 = vmul.f32 %v20037_v12, %v20037_v12  ;;  %v348_v18 = vmul.f32 %v20040_v56, %v20040_v56 }
 0x176   :  { %v20049_v55 = vsub.f32 %v19950_v61, %v317_v16  ;;  %v389_v62 = vsel %vm252_vm2, %v347_v17, 0.0  ;;  %v392_v21 = vsel %vm252_vm2, %v348_v18, 0.0 }
 0x177   :  { %390 = vadd.xlane.f32.xlu1 %v389_v62  ;;  %393 = vadd.xlane.f32.xlu0 %v392_v21 }
 0x178   :  { %v349_v22 = vmul.f32 %v20049_v55, %v20049_v55 }
 0x17a   :  { %v395_v23 = vsel %vm252_vm2, %v349_v22, 0.0 }
 0x17b   :  { %396 = vadd.xlane.f32.xlu1 %v395_v23 }
 0x1e4   :  { %v352_v24 = vpop.xlane.xlu0 %351 }
 0x1e5   :  { %v398_v25 = vmul.f32 0.015625, %v352_v24 }
 0x1e7   :  { %v414_v26 = vadd.f32 1e-05, %v398_v25 }
 0x1e8   :  { %v355_v28 = vpop.xlane.xlu1 %354  ;;  %v358_v27 = vpop.xlane.xlu0 %357 }
 0x1e9   :  { %19017 = vrsqrt.f32 %v414_v26  ;;  %v399_v61 = vmul.f32 0.015625, %v355_v28  ;;  %v400_v31 = vmul.f32 0.015625, %v358_v27  ;;  %v503_v26 = vld [vmem:[%s25418_s1 + $0x8] sm:$0xff] }
 0x1eb   :  { %v415_v32 = vadd.f32 1e-05, %v399_v61  ;;  %v416_v34 = vadd.f32 1e-05, %v400_v31  ;;  %v504_v31 = vld [vmem:[%s25418_s1 + $0x10] sm:$0xff] }
 0x1ec   :  { %v361_v35 = vpop.xlane.xlu1 %360  ;;  %v364_v36 = vpop.xlane.xlu0 %363 }
 0x1ed   :  { %19019 = vrsqrt.f32 %v415_v32  ;;  %v401_v38 = vmul.f32 0.015625, %v361_v35  ;;  %v402_v40 = vmul.f32 0.015625, %v364_v36 }
 0x1ee   :  { %19021 = vrsqrt.f32 %v416_v34 }
 0x1ef   :  { %v417_v33 = vadd.f32 1e-05, %v401_v38  ;;  %v418_v42 = vadd.f32 1e-05, %v402_v40 }
 0x1f0   :  { %v367_v45 = vpop.xlane.xlu1 %366  ;;  %v370_v46 = vpop.xlane.xlu0 %369 }
 0x1f1   :  { %19023 = vrsqrt.f32 %v417_v33  ;;  %v403_v47 = vmul.f32 0.015625, %v367_v45  ;;  %v404_v48 = vmul.f32 0.015625, %v370_v46 }
 0x1f2   :  { %19025 = vrsqrt.f32 %v418_v42 }
 0x1f3   :  { %v419_v51 = vadd.f32 1e-05, %v403_v47  ;;  %v420_v52 = vadd.f32 1e-05, %v404_v48 }
 0x1f4   :  { %v373_v39 = vpop.xlane.xlu1 %372  ;;  %v376_v54 = vpop.xlane.xlu0 %375 }
 0x1f5   :  { %19027 = vrsqrt.f32 %v419_v51  ;;  %v405_v57 = vmul.f32 0.015625, %v373_v39  ;;  %v406_v58 = vmul.f32 0.015625, %v376_v54 }
 0x1f6   :  { %v19018_v59 = vpop.eup %19017  ;;  %19029 = vrsqrt.f32 %v420_v52 }
 0x1f7   :  { %v421_v63 = vadd.f32 1e-05, %v405_v57  ;;  %v422_v0 = vadd.f32 1e-05, %v406_v58  ;;  %v446_v43 = vmul.f32 %v19018_v59, %v19961_v4  ;;  %v506_v57 = vld [vmem:[%s25418_s1 + $0x20] sm:$0xff] }
 0x1f8   :  { %v379_v2 = vpop.xlane.xlu1 %378  ;;  %v382_v3 = vpop.xlane.xlu0 %381 }
 0x1f9   :  { %19031 = vrsqrt.f32 %v421_v63  ;;  %v407_v6 = vmul.f32 0.015625, %v379_v2  ;;  %v408_v7 = vmul.f32 0.015625, %v382_v3  ;;  %v466_v8 = vmul.f32 %v20059_v60, %v446_v43 }
 0x1fa   :  { %v19020_v9 = vpop.eup %19019  ;;  %19033 = vrsqrt.f32 %v422_v0 }
 0x1fb   :  { %v19022_v13 = vpop.eup %19021  ;;  %v423_v4 = vadd.f32 1e-05, %v407_v6  ;;  %v424_v14 = vadd.f32 1e-05, %v408_v7  ;;  %v486_v15 = vadd.f32 %v20065_v5, %v466_v8  ;;  %v447_v16 = vmul.f32 %v19020_v9, %v19969_v11  ;;  %v507_v9 = vld [vmem:[%s25418_s1 + $0x28] sm:$0xff] }
 0x1fc   :  { %v385_v17 = vpop.xlane.xlu1 %384  ;;  %v388_v18 = vpop.xlane.xlu0 %387  ;;  %v448_v62 = vmul.f32 %v19022_v13, %v19966_v10 }
 0x1fd   :  { %19035 = vrsqrt.f32 %v423_v4  ;;  %v409_v21 = vmul.f32 0.015625, %v385_v17  ;;  %v410_v22 = vmul.f32 0.015625, %v388_v18  ;;  %v20074_v23 = vadd.f32 %v502_v49, %v486_v15  ;;  %v508_v15 = vld [vmem:[%s25418_s1 + $0x30] sm:$0xff] }
 0x1fe   :  { %v19024_v24 = vpop.eup %19023  ;;  %19037 = vrsqrt.f32 %v424_v14  ;;  %v467_v25 = vmul.f32 %v20059_v60, %v447_v16  ;;  %v468_v28 = vmul.f32 %v20059_v60, %v448_v62 }
 0x1ff   :  { %25494 = vst [vmem:[#allocation5_spill] sm:$0xff] %v20074_v23  ;;  %v19026_v11 = vpop.eup %19025  ;;  %v425_v27 = vadd.f32 1e-05, %v409_v21  ;;  %v426_v61 = vadd.f32 1e-05, %v410_v22  ;;  %v536_v10 = vsel %vm252_vm2, %v20074_v23, 0.0  ;;  %v449_v32 = vmul.f32 %v19024_v24, %v19977_v19 }
 0x200   :  { %v391_v34 = vpop.xlane.xlu1 %390  ;;  %537 = vadd.xlane.f32.xlu0 %v536_v10  ;;  %v394_v35 = vpop.xlane.xlu0 %393  ;;  %v487_v36 = vadd.f32 %v20065_v5, %v467_v25  ;;  %v488_v38 = vadd.f32 %v20065_v5, %v468_v28  ;;  %v450_v40 = vmul.f32 %v19026_v11, %v19980_v20  ;;  %v505_v19 = vld [vmem:[%s25418_s1 + $0x18] sm:$0xff] }
 0x201   :  { %19039 = vrsqrt.f32 %v425_v27  ;;  %v411_v33 = vmul.f32 0.015625, %v391_v34  ;;  %v412_v42 = vmul.f32 0.015625, %v394_v35  ;;  %v469_v45 = vmul.f32 %v20059_v60, %v449_v32  ;;  %v510_v27 = vld [vmem:[%s25418_s1 + $0x40] sm:$0xff] }
 0x202   :  { %v19028_v46 = vpop.eup %19027  ;;  %19041 = vrsqrt.f32 %v426_v61  ;;  %v20091_v47 = vadd.f32 %v503_v26, %v487_v36  ;;  %v20093_v48 = vadd.f32 %v504_v31, %v488_v38  ;;  %v470_v51 = vmul.f32 %v20059_v60, %v450_v40 }
 0x203   :  { %v19030_v52 = vpop.eup %19029  ;;  %v427_v39 = vadd.f32 1e-05, %v411_v33  ;;  %v428_v20 = vadd.f32 1e-05, %v412_v42  ;;  %v489_v54 = vadd.f32 %v20065_v5, %v469_v45  ;;  %v451_v58 = vmul.f32 %v19028_v46, %v19989_v29  ;;  %v512_v45 = vld [vmem:[%s25418_s1 + $0x50] sm:$0xff] }
 0x204   :  { %25495 = vst [vmem:[#allocation6_spill] sm:$0xff] %v20091_v47  ;;  %25496 = vst [vmem:[#allocation7_spill] sm:$0xff] %v20093_v48  ;;  %v539_v59 = vsel %vm252_vm2, %v20091_v47, 0.0  ;;  %v397_v63 = vpop.xlane.xlu1 %396  ;;  %v542_v0 = vsel %vm252_vm2, %v20093_v48, 0.0  ;;  %v490_v43 = vadd.f32 %v20065_v5, %v470_v51  ;;  %v452_v2 = vmul.f32 %v19030_v52, %v19992_v30 }
 0x205   :  { %19043 = vrsqrt.f32 %v427_v39  ;;  %540 = vadd.xlane.f32.xlu1 %v539_v59  ;;  %v413_v3 = vmul.f32 0.015625, %v397_v63  ;;  %543 = vadd.xlane.f32.xlu0 %v542_v0  ;;  %v20110_v6 = vadd.f32 %v505_v19, %v489_v54  ;;  %v471_v7 = vmul.f32 %v20059_v60, %v451_v58  ;;  %v514_v0 = vld [vmem:[%s25418_s1 + $0x60] sm:$0xff] }
 0x206   :  { %v19032_v29 = vpop.eup %19031  ;;  %19045 = vrsqrt.f32 %v428_v20  ;;  %v20113_v8 = vadd.f32 %v506_v57, %v490_v43  ;;  %v472_v49 = vmul.f32 %v20059_v60, %v452_v2 }
 0x207   :  { %25497 = vst [vmem:[#allocation8_spill] sm:$0xff] %v20110_v6  ;;  %v19034_v13 = vpop.eup %19033  ;;  %v429_v30 = vadd.f32 1e-05, %v413_v3  ;;  %v545_v4 = vsel %vm252_vm2, %v20110_v6, 0.0  ;;  %v491_v14 = vadd.f32 %v20065_v5, %v471_v7  ;;  %v453_v16 = vmul.f32 %v19032_v29, %v20001_v41  ;;  %v509_v41 = vld [vmem:[%s25418_s1 + $0x38] sm:$0xff] }
 0x208   :  { %25498 = vst [vmem:[#allocation9_spill] sm:$0xff] %v20113_v8  ;;  %v548_v17 = vsel %vm252_vm2, %v20113_v8, 0.0  ;;  %v492_v18 = vadd.f32 %v20065_v5, %v472_v49  ;;  %v454_v62 = vmul.f32 %v19034_v13, %v20004_v37 }
 0x209   :  { %19047 = vrsqrt.f32 %v429_v30  ;;  %546 = vadd.xlane.f32.xlu1 %v545_v4  ;;  %549 = vadd.xlane.f32.xlu0 %v548_v17  ;;  %v20130_v21 = vadd.f32 %v507_v9, %v491_v14  ;;  %v473_v22 = vmul.f32 %v20059_v60, %v453_v16  ;;  %v516_v14 = vld [vmem:[%s25418_s1 + $0x70] sm:$0xff] }
 0x20a   :  { %v19036_v24 = vpop.eup %19035  ;;  %v20133_v25 = vadd.f32 %v508_v15, %v492_v18  ;;  %v474_v26 = vmul.f32 %v20059_v60, %v454_v62 }
 0x20b   :  { %25499 = vst [vmem:[#allocation10_spill] sm:$0xff] %v20130_v21  ;;  %v19038_v28 = vpop.eup %19037  ;;  %v551_v37 = vsel %vm252_vm2, %v20130_v21, 0.0  ;;  %v493_v11 = vadd.f32 %v20065_v5, %v473_v22  ;;  %v455_v61 = vmul.f32 %v19036_v24, %v20013_v53  ;;  %v511_v53 = vld [vmem:[%s25418_s1 + $0x48] sm:$0xff]  ;;  %v517_v24 = vld [vmem:[%s25418_s1 + $0x78] sm:$0xff] }
 0x20c   :  { %25500 = vst [vmem:[#allocation11_spill] sm:$0xff] %v20133_v25  ;;  %v554_v10 = vsel %vm252_vm2, %v20133_v25, 0.0  ;;  %v494_v31 = vadd.f32 %v20065_v5, %v474_v26  ;;  %v456_v32 = vmul.f32 %v19038_v28, %v20016_v44 }
 0x20d   :  { %552 = vadd.xlane.f32.xlu1 %v551_v37  ;;  %555 = vadd.xlane.f32.xlu0 %v554_v10  ;;  %v20150_v34 = vadd.f32 %v509_v41, %v493_v11  ;;  %v475_v35 = vmul.f32 %v20059_v60, %v455_v61  ;;  %v14132_v37 = vld [vmem:[%s25421_s4 + $0x238] sm:$0xff] }
 0x20e   :  { %v19040_v36 = vpop.eup %19039  ;;  %v20153_v38 = vadd.f32 %v510_v27, %v494_v31  ;;  %v476_v40 = vmul.f32 %v20059_v60, %v456_v32  ;;  %16727 = vmatprep.subr.mxu0 %v14132_v37 }
 0x20f   :  { %25501 = vst [vmem:[#allocation12_spill] sm:$0xff] %v20150_v34  ;;  %v19042_v33 = vpop.eup %19041  ;;  %v557_v42 = vsel %vm252_vm2, %v20150_v34, 0.0  ;;  %v495_v44 = vadd.f32 %v20065_v5, %v475_v35  ;;  %v457_v46 = vmul.f32 %v19040_v36, %v20025_v1  ;;  %v513_v1 = vld [vmem:[%s25418_s1 + $0x58] sm:$0xff]  ;;  %16728 = vmatpush3.msra.mxu0 %v14132_v37 }
 0x210   :  { %25502 = vst [vmem:[#allocation13_spill] sm:$0xff] %v20153_v38  ;;  %v560_v19 = vsel %vm252_vm2, %v20153_v38, 0.0  ;;  %v496_v51 = vadd.f32 %v20065_v5, %v476_v40  ;;  %v458_v52 = vmul.f32 %v19042_v33, %v20028_v50 }
 0x211   :  { %558 = vadd.xlane.f32.xlu1 %v557_v42  ;;  %561 = vadd.xlane.f32.xlu0 %v560_v19  ;;  %v20170_v39 = vadd.f32 %v511_v53, %v495_v44  ;;  %v477_v20 = vmul.f32 %v20059_v60, %v457_v46 }
 0x212   :  { %v19044_v54 = vpop.eup %19043  ;;  %v20173_v57 = vadd.f32 %v512_v45, %v496_v51  ;;  %v478_v58 = vmul.f32 %v20059_v60, %v458_v52 }
 0x213   :  { %25503 = vst [vmem:[#allocation14_spill] sm:$0xff] %v20170_v39  ;;  %v19046_v59 = vpop.eup %19045  ;;  %v563_v63 = vsel %vm252_vm2, %v20170_v39, 0.0  ;;  %v497_v50 = vadd.f32 %v20065_v5, %v477_v20  ;;  %v459_v43 = vmul.f32 %v19044_v54, %v20037_v12  ;;  %v515_v12 = vld [vmem:[%s25418_s1 + $0x68] sm:$0xff] }
 0x214   :  { %25504 = vst [vmem:[#allocation15_spill] sm:$0xff] %v20173_v57  ;;  %v566_v2 = vsel %vm252_vm2, %v20173_v57, 0.0  ;;  %v498_v3 = vadd.f32 %v20065_v5, %v478_v58  ;;  %v460_v7 = vmul.f32 %v19046_v59, %v20040_v56 }
 0x215   :  { %564 = vadd.xlane.f32.xlu1 %v563_v63  ;;  %567 = vadd.xlane.f32.xlu0 %v566_v2  ;;  %v20190_v29 = vadd.f32 %v513_v1, %v497_v50  ;;  %v479_v9 = vmul.f32 %v20059_v60, %v459_v43 }
 0x216   :  { %v19048_v49 = vpop.eup %19047  ;;  %v20193_v13 = vadd.f32 %v514_v0, %v498_v3  ;;  %v480_v30 = vmul.f32 %v20059_v60, %v460_v7 }
 0x217   :  { %25505 = vst [vmem:[#allocation16_spill] sm:$0xff] %v20190_v29  ;;  %v569_v4 = vsel %vm252_vm2, %v20190_v29, 0.0  ;;  %v499_v56 = vadd.f32 %v20065_v5, %v479_v9  ;;  %v461_v15 = vmul.f32 %v19048_v49, %v20049_v55 }
 0x218   :  { %25506 = vst [vmem:[#allocation17_spill] sm:$0xff] %v20193_v13  ;;  %v572_v16 = vsel %vm252_vm2, %v20193_v13, 0.0  ;;  %v500_v17 = vadd.f32 %v20065_v5, %v480_v30 }
 0x219   :  { %570 = vadd.xlane.f32.xlu1 %v569_v4  ;;  %573 = vadd.xlane.f32.xlu0 %v572_v16  ;;  %v20209_v18 = vadd.f32 %v515_v12, %v499_v56  ;;  %v481_v62 = vmul.f32 %v20059_v60, %v461_v15 }
 0x21a   :  { %v20212_v22 = vadd.f32 %v516_v14, %v500_v17 }
 0x21b   :  { %25507 = vst [vmem:[#allocation18_spill] sm:$0xff] %v20209_v18  ;;  %v575_v55 = vsel %vm252_vm2, %v20209_v18, 0.0  ;;  %v501_v41 = vadd.f32 %v20065_v5, %v481_v62 }
 0x21c   :  { %25508 = vst [vmem:[#allocation19_spill] sm:$0xff] %v20212_v22  ;;  %v578_v26 = vsel %vm252_vm2, %v20212_v22, 0.0 }
 0x21d   :  { %576 = vadd.xlane.f32.xlu1 %v575_v55  ;;  %579 = vadd.xlane.f32.xlu0 %v578_v26  ;;  %v20222_v28 = vadd.f32 %v517_v24, %v501_v41 }
 0x21f   :  { %25509 = vst [vmem:[#allocation20_spill] sm:$0xff] %v20222_v28  ;;  %v581_v60 = vsel %vm252_vm2, %v20222_v28, 0.0 }
 0x221   :  { %582 = vadd.xlane.f32.xlu1 %v581_v60 }
 0x289   :  { %v538_v11 = vpop.xlane.xlu0 %537 }
 0x28a   :  { %v584_v27 = vmul.f32 0.015625, %v538_v11 }
 0x28c   :  { %v20230_v5 = vsub.f32 %v20074_v23, %v584_v27 }
 0x28e   :  { %v541_v61 = vpop.xlane.xlu1 %540  ;;  %v544_v10 = vpop.xlane.xlu0 %543  ;;  %v616_v31 = vmul.f32 %v20230_v5, %v20230_v5 }
 0x28f   :  { %v585_v32 = vmul.f32 0.015625, %v541_v61  ;;  %v586_v35 = vmul.f32 0.015625, %v544_v10 }
 0x290   :  { %v632_v36 = vsel %vm252_vm2, %v616_v31, 0.0 }
 0x291   :  { %v20236_v53 = vsub.f32 %v20091_v47, %v585_v32  ;;  %v20239_v40 = vsub.f32 %v20093_v48, %v586_v35  ;;  %633 = vadd.xlane.f32.xlu0 %v632_v36 }
 0x292   :  { %v547_v33 = vpop.xlane.xlu1 %546  ;;  %v550_v42 = vpop.xlane.xlu0 %549 }
 0x293   :  { %v587_v44 = vmul.f32 0.015625, %v547_v33  ;;  %v588_v45 = vmul.f32 0.015625, %v550_v42  ;;  %v617_v46 = vmul.f32 %v20236_v53, %v20236_v53  ;;  %v618_v19 = vmul.f32 %v20239_v40, %v20239_v40 }
 0x295   :  { %v20246_v51 = vsub.f32 %v20110_v6, %v587_v44  ;;  %v20249_v52 = vsub.f32 %v20113_v8, %v588_v45  ;;  %v635_v20 = vsel %vm252_vm2, %v617_v46, 0.0  ;;  %v638_v54 = vsel %vm252_vm2, %v618_v19, 0.0 }
 0x296   :  { %636 = vadd.xlane.f32.xlu1 %v635_v20  ;;  %v553_v1 = vpop.xlane.xlu1 %552  ;;  %639 = vadd.xlane.f32.xlu0 %v638_v54  ;;  %v556_v58 = vpop.xlane.xlu0 %555 }
 0x297   :  { %v589_v59 = vmul.f32 0.015625, %v553_v1  ;;  %v590_v63 = vmul.f32 0.015625, %v556_v58  ;;  %v619_v50 = vmul.f32 %v20246_v51, %v20246_v51  ;;  %v620_v0 = vmul.f32 %v20249_v52, %v20249_v52 }
 0x299   :  { %v20258_v43 = vsub.f32 %v20130_v21, %v589_v59  ;;  %v20261_v2 = vsub.f32 %v20133_v25, %v590_v63  ;;  %v641_v3 = vsel %vm252_vm2, %v619_v50, 0.0  ;;  %v644_v7 = vsel %vm252_vm2, %v620_v0, 0.0  ;;  %v791_v63 = vld [vmem:[%s25421_s4 + $0x38] sm:$0xff] }
 0x29a   :  { %642 = vadd.xlane.f32.xlu1 %v641_v3  ;;  %v559_v9 = vpop.xlane.xlu1 %558  ;;  %645 = vadd.xlane.f32.xlu0 %v644_v7  ;;  %v562_v49 = vpop.xlane.xlu0 %561 }
 0x29b   :  { %v591_v12 = vmul.f32 0.015625, %v559_v9  ;;  %v592_v30 = vmul.f32 0.015625, %v562_v49  ;;  %v621_v4 = vmul.f32 %v20258_v43, %v20258_v43  ;;  %v622_v56 = vmul.f32 %v20261_v2, %v20261_v2  ;;  %v14131_v9 = vld [vmem:[%s25421_s4 + $0x230] sm:$0xff]  ;;  %16687 = vmatprep.subr.mxu1 %v791_v63 }
 0x29c   :  { %16729 = vmatprep.subr.mxu0 %v14131_v9  ;;  %16688 = vmatpush3.msra.mxu1 %v791_v63 }
 0x29d   :  { %v20270_v14 = vsub.f32 %v20150_v34, %v591_v12  ;;  %v20273_v15 = vsub.f32 %v20153_v38, %v592_v30  ;;  %v647_v16 = vsel %vm252_vm2, %v621_v4, 0.0  ;;  %v650_v17 = vsel %vm252_vm2, %v622_v56, 0.0  ;;  %v790_v12 = vld [vmem:[%s25421_s4 + $0x30] sm:$0xff]  ;;  %16730 = vmatpush3.msra.mxu0 %v14131_v9 }
 0x29e   :  { %648 = vadd.xlane.f32.xlu1 %v647_v16  ;;  %v565_v62 = vpop.xlane.xlu1 %564  ;;  %651 = vadd.xlane.f32.xlu0 %v650_v17  ;;  %v568_v24 = vpop.xlane.xlu0 %567  ;;  %v14130_v16 = vld [vmem:[%s25421_s4 + $0x228] sm:$0xff] }
 0x29f   :  { %v593_v55 = vmul.f32 0.015625, %v565_v62  ;;  %v594_v41 = vmul.f32 0.015625, %v568_v24  ;;  %v623_v26 = vmul.f32 %v20270_v14, %v20270_v14  ;;  %v624_v60 = vmul.f32 %v20273_v15, %v20273_v15  ;;  %16689 = vmatprep.subr.mxu1 %v790_v12  ;;  %v789_v17 = vld [vmem:[%s25421_s4 + $0x28] sm:$0xff]  ;;  %16731 = vmatprep.subr.mxu0 %v14130_v16 }
 0x2a0   :  { %16690 = vmatpush3.msra.mxu1 %v790_v12  ;;  %16732 = vmatpush3.msra.mxu0 %v14130_v16 }
 0x2a1   :  { %v20282_v37 = vsub.f32 %v20170_v39, %v593_v55  ;;  %v20285_v11 = vsub.f32 %v20173_v57, %v594_v41  ;;  %v653_v27 = vsel %vm252_vm2, %v623_v26, 0.0  ;;  %v656_v61 = vsel %vm252_vm2, %v624_v60, 0.0  ;;  %v14129_v41 = vld [vmem:[%s25421_s4 + $0x220] sm:$0xff]  ;;  %16691 = vmatprep.subr.mxu1 %v789_v17 }
 0x2a2   :  { %654 = vadd.xlane.f32.xlu1 %v653_v27  ;;  %v571_v10 = vpop.xlane.xlu1 %570  ;;  %657 = vadd.xlane.f32.xlu0 %v656_v61  ;;  %v574_v31 = vpop.xlane.xlu0 %573  ;;  %v788_v26 = vld [vmem:[%s25421_s4 + $0x20] sm:$0xff]  ;;  %v14128_v27 = vld [vmem:[%s25421_s4 + $0x218] sm:$0xff] }
 0x2a3   :  { %v595_v32 = vmul.f32 0.015625, %v571_v10  ;;  %v596_v35 = vmul.f32 0.015625, %v574_v31  ;;  %v625_v36 = vmul.f32 %v20282_v37, %v20282_v37  ;;  %v626_v33 = vmul.f32 %v20285_v11, %v20285_v11  ;;  %16733 = vmatprep.subr.mxu0 %v14129_v41  ;;  %16692 = vmatpush3.msra.mxu1 %v789_v17  ;;  %v787_v10 = vld [vmem:[%s25421_s4 + $0x18] sm:$0xff]  ;;  %v14127_v31 = vld [vmem:[%s25421_s4 + $0x210] sm:$0xff] }
 0x2a4   :  { %16734 = vmatpush3.msra.mxu0 %v14129_v41  ;;  %16693 = vmatprep.subr.mxu1 %v788_v26 }
 0x2a5   :  { %v20294_v42 = vsub.f32 %v20190_v29, %v595_v32  ;;  %v20297_v44 = vsub.f32 %v20193_v13, %v596_v35  ;;  %v659_v45 = vsel %vm252_vm2, %v625_v36, 0.0  ;;  %v662_v46 = vsel %vm252_vm2, %v626_v33, 0.0  ;;  %16735 = vmatprep.subr.mxu0 %v14128_v27  ;;  %16694 = vmatpush3.msra.mxu1 %v788_v26  ;;  %v786_v32 = vld [vmem:[%s25421_s4 + $0x10] sm:$0xff]  ;;  %v14126_v35 = vld [vmem:[%s25421_s4 + $0x208] sm:$0xff]  ;;  %v14125_v33 = vld [vmem:[%s25421_s4 + $0x200] sm:$0xff] }
 0x2a6   :  { %660 = vadd.xlane.f32.xlu1 %v659_v45  ;;  %v577_v19 = vpop.xlane.xlu1 %576  ;;  %663 = vadd.xlane.f32.xlu0 %v662_v46  ;;  %v580_v20 = vpop.xlane.xlu0 %579  ;;  %v785_v36 = vld [vmem:[%s25421_s4 + $0x8] sm:$0xff]  ;;  %v784_v45 = vld [vmem:[%s25421_s4] sm:$0xff]  ;;  %v20373_v46 = vld [vmem:[%s25421_s4 + $0x438] sm:$0xff] }
 0x2a7   :  { %v597_v54 = vmul.f32 0.015625, %v577_v19  ;;  %v598_v1 = vmul.f32 0.015625, %v580_v20  ;;  %v627_v58 = vmul.f32 %v20294_v42, %v20294_v42  ;;  %v628_v59 = vmul.f32 %v20297_v44, %v20297_v44  ;;  %16736 = vmatpush3.msra.mxu0 %v14128_v27  ;;  %16695 = vmatprep.subr.mxu1 %v787_v10 }
 0x2a8   :  { %16737 = vmatprep.subr.mxu0 %v14127_v31  ;;  %16696 = vmatpush3.msra.mxu1 %v787_v10  ;;  %v20379_v10 = vld [vmem:[%s25419_s2 + $0x9] ss:$0 sm:$0xff] }
 0x2a9   :  { %v20309_v50 = vsub.f32 %v20209_v18, %v597_v54  ;;  %v20312_v0 = vsub.f32 %v20212_v22, %v598_v1  ;;  %v665_v3 = vsel %vm252_vm2, %v627_v58, 0.0  ;;  %v668_v7 = vsel %vm252_vm2, %v628_v59, 0.0  ;;  %16738 = vmatpush3.msra.mxu0 %v14127_v31  ;;  %16697 = vmatprep.subr.mxu1 %v786_v32 }
 0x2aa   :  { %666 = vadd.xlane.f32.xlu1 %v665_v3  ;;  %v583_v49 = vpop.xlane.xlu1 %582  ;;  %669 = vadd.xlane.f32.xlu0 %v668_v7 }
 0x2ab   :  { %v599_v30 = vmul.f32 0.015625, %v583_v49  ;;  %v629_v4 = vmul.f32 %v20309_v50, %v20309_v50  ;;  %v630_v56 = vmul.f32 %v20312_v0, %v20312_v0  ;;  %16739 = vmatprep.subr.mxu0 %v14126_v35  ;;  %16698 = vmatpush3.msra.mxu1 %v786_v32 }
 0x2ac   :  { %16740 = vmatpush3.msra.mxu0 %v14126_v35  ;;  %16699 = vmatprep.subr.mxu1 %v785_v36 }
 0x2ad   :  { %v20333_v62 = vsub.f32 %v20222_v28, %v599_v30  ;;  %v671_v24 = vsel %vm252_vm2, %v629_v4, 0.0  ;;  %v674_v55 = vsel %vm252_vm2, %v630_v56, 0.0  ;;  %16741 = vmatprep.subr.mxu0 %v14125_v33  ;;  %16700 = vmatpush3.msra.mxu1 %v785_v36  ;;  %v20385_v36 = vld [vmem:[%s25419_s2 + $0xa] ss:$0 sm:$0xff] }
 0x2ae   :  { %672 = vadd.xlane.f32.xlu1 %v671_v24  ;;  %675 = vadd.xlane.f32.xlu0 %v674_v55 }
 0x2af   :  { %v631_v60 = vmul.f32 %v20333_v62, %v20333_v62  ;;  %16742 = vmatpush3.msra.mxu0 %v14125_v33  ;;  %16701 = vmatprep.subr.mxu1 %v784_v45 }
 0x2b0   :  { %16702 = vmatpush3.msra.mxu1 %v784_v45 }
 0x2b1   :  { %v677_v61 = vsel %vm252_vm2, %v631_v60, 0.0  ;;  %16767 = vmatprep.subr.mxu1 %v20373_v46 }
 0x2b2   :  { %678 = vadd.xlane.f32.xlu1 %v677_v61 }
 0x31a   :  { %v634_v19 = vpop.xlane.xlu0 %633 }
 0x31b   :  { %v680_v20 = vmul.f32 0.015625, %v634_v19 }
 0x31d   :  { %v696_v54 = vadd.f32 1e-05, %v680_v20 }
 0x31f   :  { %19049 = vrsqrt.f32 %v696_v54  ;;  %v637_v1 = vpop.xlane.xlu1 %636  ;;  %v640_v58 = vpop.xlane.xlu0 %639 }
 0x320   :  { %v681_v59 = vmul.f32 0.015625, %v637_v1  ;;  %v682_v63 = vmul.f32 0.015625, %v640_v58 }
 0x322   :  { %v697_v3 = vadd.f32 1e-05, %v681_v59  ;;  %v698_v7 = vadd.f32 1e-05, %v682_v63 }
 0x323   :  { %v643_v9 = vpop.xlane.xlu1 %642  ;;  %v646_v49 = vpop.xlane.xlu0 %645 }
 0x324   :  { %19051 = vrsqrt.f32 %v697_v3  ;;  %v683_v12 = vmul.f32 0.015625, %v643_v9  ;;  %v684_v30 = vmul.f32 0.015625, %v646_v49 }
 0x325   :  { %19053 = vrsqrt.f32 %v698_v7 }
 0x326   :  { %v699_v4 = vadd.f32 1e-05, %v683_v12  ;;  %v700_v56 = vadd.f32 1e-05, %v684_v30 }
 0x327   :  { %v649_v16 = vpop.xlane.xlu1 %648  ;;  %v652_v17 = vpop.xlane.xlu0 %651 }
 0x328   :  { %19055 = vrsqrt.f32 %v699_v4  ;;  %v685_v24 = vmul.f32 0.015625, %v649_v16  ;;  %v686_v55 = vmul.f32 0.015625, %v652_v17 }
 0x329   :  { %19057 = vrsqrt.f32 %v700_v56 }
 0x32a   :  { %v701_v41 = vadd.f32 1e-05, %v685_v24  ;;  %v702_v26 = vadd.f32 1e-05, %v686_v55 }
 0x32b   :  { %v655_v60 = vpop.xlane.xlu1 %654  ;;  %v658_v27 = vpop.xlane.xlu0 %657 }
 0x32c   :  { %v19050_v61 = vpop.eup %19049  ;;  %19059 = vrsqrt.f32 %v701_v41  ;;  %v687_v31 = vmul.f32 0.015625, %v655_v60  ;;  %v688_v32 = vmul.f32 0.015625, %v658_v27 }
 0x32d   :  { %v728_v35 = vmul.f32 %v19050_v61, %v20230_v5  ;;  %19061 = vrsqrt.f32 %v702_v26 }
 0x32e   :  { %v703_v33 = vadd.f32 1e-05, %v687_v31  ;;  %v704_v45 = vadd.f32 1e-05, %v688_v32 }
 0x32f   :  { %v748_v19 = vmul.f32 %v20379_v10, %v728_v35  ;;  %v661_v20 = vpop.xlane.xlu1 %660  ;;  %v664_v54 = vpop.xlane.xlu0 %663 }
 0x330   :  { %19063 = vrsqrt.f32 %v703_v33  ;;  %v689_v1 = vmul.f32 0.015625, %v661_v20  ;;  %v690_v58 = vmul.f32 0.015625, %v664_v54 }
 0x331   :  { %v19052_v59 = vpop.eup %19051  ;;  %v20389_v63 = vadd.f32 %v20385_v36, %v748_v19  ;;  %19065 = vrsqrt.f32 %v704_v45 }
 0x332   :  { %v19054_v5 = vpop.eup %19053  ;;  %v729_v3 = vmul.f32 %v19052_v59, %v20236_v53  ;;  %v705_v7 = vadd.f32 1e-05, %v689_v1  ;;  %v706_v9 = vadd.f32 1e-05, %v690_v58 }
 0x333   :  { %v730_v49 = vmul.f32 %v19054_v5, %v20239_v40  ;;  %v667_v12 = vpop.xlane.xlu1 %666  ;;  %v670_v30 = vpop.xlane.xlu0 %669  ;;  %16703 = vmatprep.mubr.msk.f32.mxu1 %vm252_vm2, %v20389_v63  ;;  %16743 = vmatprep.mubr.msk.f32.mxu0 %vm252_vm2, %v20389_v63 }
 0x334   :  { %v749_v4 = vmul.f32 %v20379_v10, %v729_v3  ;;  %19067 = vrsqrt.f32 %v705_v7  ;;  %v691_v56 = vmul.f32 0.015625, %v667_v12  ;;  %v692_v16 = vmul.f32 0.015625, %v670_v30 }
 0x335   :  { %v19056_v17 = vpop.eup %19055  ;;  %v750_v53 = vmul.f32 %v20379_v10, %v730_v49  ;;  %19069 = vrsqrt.f32 %v706_v9 }
 0x336   :  { %v19058_v24 = vpop.eup %19057  ;;  %v20400_v40 = vadd.f32 %v20385_v36, %v749_v4  ;;  %v731_v55 = vmul.f32 %v19056_v17, %v20246_v51  ;;  %v707_v41 = vadd.f32 1e-05, %v691_v56  ;;  %v708_v26 = vadd.f32 1e-05, %v692_v16  ;;  %v14155_v51 = vld [vmem:[%s25421_s4 + $0x430] sm:$0xff] }
 0x337   :  { %v20404_v60 = vadd.f32 %v20385_v36, %v750_v53  ;;  %v732_v27 = vmul.f32 %v19058_v24, %v20249_v52  ;;  %v673_v61 = vpop.xlane.xlu1 %672  ;;  %v676_v31 = vpop.xlane.xlu0 %675 }
 0x338   :  { %v751_v32 = vmul.f32 %v20379_v10, %v731_v55  ;;  %19071 = vrsqrt.f32 %v707_v41  ;;  %v693_v35 = vmul.f32 0.015625, %v673_v61  ;;  %v694_v33 = vmul.f32 0.015625, %v676_v31  ;;  %16704 = vmatmul.mubr.msk.f32.vlgmr.msra.gmra.mxu1 %vm252_vm2, %v20400_v40  ;;  %16744 = vmatmul.mubr.msk.f32.vlgmr.msra.gmra.mxu0 %vm252_vm2, %v20400_v40  ;;  %v14152_v31 = vld [vmem:[%s25421_s4 + $0x418] sm:$0xff] }
 0x339   :  { %v19060_v45 = vpop.eup %19059  ;;  %v752_v52 = vmul.f32 %v20379_v10, %v732_v27  ;;  %19073 = vrsqrt.f32 %v708_v26  ;;  %16706 = vmatprep.mubr.msk.f32.mxu1 %vm252_vm2, %v20404_v60  ;;  %16746 = vmatprep.mubr.msk.f32.mxu0 %vm252_vm2, %v20404_v60 }
 0x33a   :  { %v19062_v19 = vpop.eup %19061  ;;  %v20421_v20 = vadd.f32 %v20385_v36, %v751_v32  ;;  %v733_v54 = vmul.f32 %v19060_v45, %v20258_v43  ;;  %v709_v1 = vadd.f32 1e-05, %v693_v35  ;;  %v710_v58 = vadd.f32 1e-05, %v694_v33  ;;  %16768 = vmatpush3.msra.mxu1 %v20373_v46  ;;  %v14154_v43 = vld [vmem:[%s25421_s4 + $0x428] sm:$0xff] }
 0x33b   :  { %v20426_v59 = vadd.f32 %v20385_v36, %v752_v52  ;;  %v734_v5 = vmul.f32 %v19062_v19, %v20261_v2  ;;  %v679_v3 = vpop.xlane.xlu1 %678  ;;  %16769 = vmatprep.subr.mxu1 %v14155_v51  ;;  %v14151_v19 = vld [vmem:[%s25421_s4 + $0x410] sm:$0xff] }
 0x33c   :  { %v753_v7 = vmul.f32 %v20379_v10, %v733_v54  ;;  %19075 = vrsqrt.f32 %v709_v1  ;;  %v695_v9 = vmul.f32 0.015625, %v679_v3  ;;  %16707 = vmatmul.mubr.msk.f32.gmra.mxu1 %vm252_vm2, %v20421_v20  ;;  %16747 = vmatmul.mubr.msk.f32.gmra.mxu0 %vm252_vm2, %v20421_v20 }
 0x33d   :  { %v19064_v46 = vpop.eup %19063  ;;  %v754_v49 = vmul.f32 %v20379_v10, %v734_v5  ;;  %19077 = vrsqrt.f32 %v710_v58  ;;  %16709 = vmatprep.mubr.msk.f32.mxu1 %vm252_vm2, %v20426_v59  ;;  %16749 = vmatprep.mubr.msk.f32.mxu0 %vm252_vm2, %v20426_v59 }
 0x33e   :  { %v19066_v2 = vpop.eup %19065  ;;  %v20443_v12 = vadd.f32 %v20385_v36, %v753_v7  ;;  %v735_v30 = vmul.f32 %v19064_v46, %v20270_v14  ;;  %v711_v4 = vadd.f32 1e-05, %v695_v9  ;;  %16770 = vmatpush3.msra.mxu1 %v14155_v51  ;;  %v14153_v14 = vld [vmem:[%s25421_s4 + $0x420] sm:$0xff]  ;;  %v14150_v9 = vld [vmem:[%s25421_s4 + $0x408] sm:$0xff] }
 0x33f   :  { %v20447_v56 = vadd.f32 %v20385_v36, %v754_v49  ;;  %v736_v16 = vmul.f32 %v19066_v2, %v20273_v15  ;;  %16771 = vmatprep.subr.mxu1 %v14154_v43 }
 0x340   :  { %v755_v17 = vmul.f32 %v20379_v10, %v735_v30  ;;  %19079 = vrsqrt.f32 %v711_v4  ;;  %16710 = vmatmul.mubr.msk.f32.gmra.mxu1 %vm252_vm2, %v20443_v12  ;;  %16750 = vmatmul.mubr.msk.f32.gmra.mxu0 %vm252_vm2, %v20443_v12  ;;  %v14149_v30 = vld [vmem:[%s25421_s4 + $0x400] sm:$0xff] }
 0x341   :  { %v19068_v53 = vpop.eup %19067  ;;  %v756_v24 = vmul.f32 %v20379_v10, %v736_v16  ;;  %16712 = vmatprep.mubr.msk.f32.mxu1 %vm252_vm2, %v20447_v56  ;;  %16752 = vmatprep.mubr.msk.f32.mxu0 %vm252_vm2, %v20447_v56 }
 0x342   :  { %v19070_v15 = vpop.eup %19069  ;;  %v20464_v55 = vadd.f32 %v20385_v36, %v755_v17  ;;  %v737_v41 = vmul.f32 %v19068_v53, %v20282_v37  ;;  %16772 = vmatpush3.msra.mxu1 %v14154_v43 }
 0x343   :  { %v20468_v26 = vadd.f32 %v20385_v36, %v756_v24  ;;  %v738_v27 = vmul.f32 %v19070_v15, %v20285_v11  ;;  %16773 = vmatprep.subr.mxu1 %v14153_v14 }
 0x344   :  { %25510 = vst [vmem:[#allocation21_spill] sm:$0xff] %v20464_v55  ;;  %v757_v61 = vmul.f32 %v20379_v10, %v737_v41  ;;  %16713 = vmatmul.mubr.msk.f32.gmra.mxu1 %vm252_vm2, %v20464_v55  ;;  %16753 = vmatmul.mubr.msk.f32.gmra.mxu0 %vm252_vm2, %v20464_v55 }
 0x345   :  { %25511 = vst [vmem:[#allocation22_spill] sm:$0xff] %v20468_v26  ;;  %v19072_v37 = vpop.eup %19071  ;;  %v758_v32 = vmul.f32 %v20379_v10, %v738_v27  ;;  %16715 = vmatprep.mubr.msk.f32.mxu1 %vm252_vm2, %v20468_v26  ;;  %16755 = vmatprep.mubr.msk.f32.mxu0 %vm252_vm2, %v20468_v26 }
 0x346   :  { %v19074_v11 = vpop.eup %19073  ;;  %v20485_v35 = vadd.f32 %v20385_v36, %v757_v61  ;;  %v739_v33 = vmul.f32 %v19072_v37, %v20294_v42  ;;  %16774 = vmatpush3.msra.mxu1 %v14153_v14 }
 0x347   :  { %v20489_v51 = vadd.f32 %v20385_v36, %v758_v32  ;;  %v740_v45 = vmul.f32 %v19074_v11, %v20297_v44  ;;  %16775 = vmatprep.subr.mxu1 %v14152_v31 }
 0x348   :  { %25512 = vst [vmem:[#allocation23_spill] sm:$0xff] %v20485_v35  ;;  %v759_v52 = vmul.f32 %v20379_v10, %v739_v33  ;;  %16716 = vmatmul.mubr.msk.f32.gmra.mxu1 %vm252_vm2, %v20485_v35  ;;  %16756 = vmatmul.mubr.msk.f32.gmra.mxu0 %vm252_vm2, %v20485_v35 }
 0x349   :  { %25513 = vst [vmem:[#allocation24_spill] sm:$0xff] %v20489_v51  ;;  %v19076_v42 = vpop.eup %19075  ;;  %v760_v54 = vmul.f32 %v20379_v10, %v740_v45  ;;  %16718 = vmatprep.mubr.msk.f32.mxu1 %vm252_vm2, %v20489_v51  ;;  %16758 = vmatprep.mubr.msk.f32.mxu0 %vm252_vm2, %v20489_v51 }
 0x34a   :  { %v19078_v44 = vpop.eup %19077  ;;  %v20506_v1 = vadd.f32 %v20385_v36, %v759_v52  ;;  %v741_v58 = vmul.f32 %v19076_v42, %v20309_v50  ;;  %16776 = vmatpush3.msra.mxu1 %v14152_v31 }
 0x34b   :  { %v20510_v5 = vadd.f32 %v20385_v36, %v760_v54  ;;  %v742_v3 = vmul.f32 %v19078_v44, %v20312_v0  ;;  %16777 = vmatprep.subr.mxu1 %v14151_v19 }
 0x34c   :  { %25514 = vst [vmem:[#allocation25_spill] sm:$0xff] %v20506_v1  ;;  %v761_v7 = vmul.f32 %v20379_v10, %v741_v58  ;;  %16719 = vmatmul.mubr.msk.f32.gmra.mxu1 %vm252_vm2, %v20506_v1  ;;  %16759 = vmatmul.mubr.msk.f32.gmra.mxu0 %vm252_vm2, %v20506_v1 }
 0x34d   :  { %25515 = vst [vmem:[#allocation26_spill] sm:$0xff] %v20510_v5  ;;  %v19080_v50 = vpop.eup %19079  ;;  %v762_v43 = vmul.f32 %v20379_v10, %v742_v3  ;;  %16721 = vmatprep.mubr.msk.f32.mxu1 %vm252_vm2, %v20510_v5  ;;  %16761 = vmatprep.mubr.msk.f32.mxu0 %vm252_vm2, %v20510_v5 }
 0x34e   :  { %v20527_v0 = vadd.f32 %v20385_v36, %v761_v7  ;;  %v743_v46 = vmul.f32 %v19080_v50, %v20333_v62  ;;  %16778 = vmatpush3.msra.mxu1 %v14151_v19 }
 0x34f   :  { %v20531_v49 = vadd.f32 %v20385_v36, %v762_v43  ;;  %16779 = vmatprep.subr.mxu1 %v14150_v9 }
 0x350   :  { %25516 = vst [vmem:[#allocation27_spill] sm:$0xff] %v20527_v0  ;;  %v763_v2 = vmul.f32 %v20379_v10, %v743_v46  ;;  %16722 = vmatmul.mubr.msk.f32.gmra.mxu1 %vm252_vm2, %v20527_v0  ;;  %16762 = vmatmul.mubr.msk.f32.gmra.mxu0 %vm252_vm2, %v20527_v0 }
 0x351   :  { %25517 = vst [vmem:[#allocation28_spill] sm:$0xff] %v20531_v49  ;;  %16724 = vmatprep.mubr.msk.f32.mxu1 %vm252_vm2, %v20531_v49  ;;  %16764 = vmatprep.mubr.msk.f32.mxu0 %vm252_vm2, %v20531_v49 }
 0x352   :  { %v20546_v62 = vadd.f32 %v20385_v36, %v763_v2  ;;  %16780 = vmatpush3.msra.mxu1 %v14150_v9 }
 0x353   :  { %16781 = vmatprep.subr.mxu1 %v14149_v30 }
 0x354   :  { %25518 = vst [vmem:[#allocation29_spill] sm:$0xff] %v20546_v62  ;;  %16725 = vmatmul.mubr.msk.f32.gmra.mxu1 %vm252_vm2, %v20546_v62  ;;  %16765 = vmatmul.mubr.msk.f32.gmra.mxu0 %vm252_vm2, %v20546_v62 }
 0x355   :  { %16783 = vmatprep.mubr.msk.f32.mxu1 %vm252_vm2, %v20389_v63  ;;  %16782 = vmatpush3.msra.mxu1 %v14149_v30 }
 0x358   :  { %16784 = vmatmul.mubr.msk.f32.vlgmr.msra.gmra.mxu1 %vm252_vm2, %v20400_v40 }
 0x359   :  { %16786 = vmatprep.mubr.msk.f32.mxu1 %vm252_vm2, %v20404_v60 }
 0x35c   :  { %16787 = vmatmul.mubr.msk.f32.gmra.mxu1 %vm252_vm2, %v20421_v20 }
 0x35d   :  { %16789 = vmatprep.mubr.msk.f32.mxu1 %vm252_vm2, %v20426_v59 }
 0x360   :  { %16790 = vmatmul.mubr.msk.f32.gmra.mxu1 %vm252_vm2, %v20443_v12 }
 0x361   :  { %16792 = vmatprep.mubr.msk.f32.mxu1 %vm252_vm2, %v20447_v56 }
 0x364   :  { %16793 = vmatmul.mubr.msk.f32.gmra.mxu1 %vm252_vm2, %v20464_v55 }
 0x365   :  { %16795 = vmatprep.mubr.msk.f32.mxu1 %vm252_vm2, %v20468_v26 }
 0x368   :  { %16796 = vmatmul.mubr.msk.f32.gmra.mxu1 %vm252_vm2, %v20485_v35 }
 0x369   :  { %16798 = vmatprep.mubr.msk.f32.mxu1 %vm252_vm2, %v20489_v51 }
 0x36c   :  { %16799 = vmatmul.mubr.msk.f32.gmra.mxu1 %vm252_vm2, %v20506_v1 }
 0x36d   :  { %16801 = vmatprep.mubr.msk.f32.mxu1 %vm252_vm2, %v20510_v5 }
 0x370   :  { %16802 = vmatmul.mubr.msk.f32.gmra.mxu1 %vm252_vm2, %v20527_v0 }
 0x371   :  { %16804 = vmatprep.mubr.msk.f32.mxu1 %vm252_vm2, %v20531_v49 }
 0x374   :  { %16805 = vmatmul.mubr.msk.f32.gmra.mxu1 %vm252_vm2, %v20546_v62 }
 0x3f8   :  { %v16705_v10 = vpop.f32.mrf.mxu1  ;;  %v16745_v36 = vpop.f32.mrf.mxu0 }
 0x3fa   :  { %v906_v4 = vpop.f32.mrf.mxu1  ;;  %v1060_v16 = vpop.f32.mrf.mxu0 }
 0x3fb   :  { %16823 = vmatprep.mubr.msk.f32.mxu0 %vm1293_vm3, %v906_v4 }
 0x3fc   :  { %v16708_v17 = vpop.f32.mrf.mxu1  ;;  %v16748_v14 = vpop.f32.mrf.mxu0 }
 0x3fe   :  { %v916_v53 = vpop.f32.mrf.mxu1  ;;  %v1070_v24 = vpop.f32.mrf.mxu0 }
 0x400   :  { %v20585_v15 = vpop.f32.mrf.mxu1  ;;  %v16751_v41 = vpop.f32.mrf.mxu0 }
 0x402   :  { %v926_v27 = vpop.f32.mrf.mxu1  ;;  %v1080_v61 = vpop.f32.mrf.mxu0 }
 0x404   :  { %v20587_v31 = vpop.f32.mrf.mxu1  ;;  %v16754_v37 = vpop.f32.mrf.mxu0 }
 0x405   :  { %16807 = vmatprep.subr.msk.mxu0 %vm1293_vm3, %v16754_v37 }
 0x406   :  { %v20590_v32 = vpop.f32.mrf.mxu1  ;;  %v1090_v11 = vpop.f32.mrf.mxu0  ;;  %16808 = vmatpush3.xpose.msk.msra.mxu0 %vm1293_vm3, %v16754_v37 }
 0x407   :  { %16809 = vmatprep.subr.msk.mxu0 %vm1293_vm3, %v1090_v11 }
 0x408   :  { %v20594_v33 = vpop.f32.mrf.mxu1  ;;  %v20596_v45 = vpop.f32.mrf.mxu0 }
 0x40a   :  { %v20598_v52 = vpop.f32.mrf.mxu1  ;;  %16810 = vmatpush3.xpose.msk.msra.mxu0 %vm1293_vm3, %v1090_v11  ;;  %v20604_v42 = vpop.f32.mrf.mxu0 }
 0x40b   :  { %16811 = vmatprep.subr.msk.mxu0 %vm1293_vm3, %v16751_v41 }
 0x40c   :  { %v20602_v19 = vpop.f32.mrf.mxu1  ;;  %v20612_v58 = vpop.f32.mrf.mxu0 }
 0x40e   :  { %v20606_v54 = vpop.f32.mrf.mxu1  ;;  %16812 = vmatpush3.xpose.msk.msra.mxu0 %vm1293_vm3, %v16751_v41  ;;  %v20620_v9 = vpop.f32.mrf.mxu0 }
 0x40f   :  { %16813 = vmatprep.subr.msk.mxu0 %vm1293_vm3, %v1080_v61 }
 0x410   :  { %v20610_v44 = vpop.f32.mrf.mxu1  ;;  %v16763_v46 = vpop.f32.mrf.mxu0 }
 0x412   :  { %v20614_v3 = vpop.f32.mrf.mxu1  ;;  %16814 = vmatpush3.xpose.msk.msra.mxu0 %vm1293_vm3, %v1080_v61  ;;  %v1120_v4 = vpop.f32.mrf.mxu0 }
 0x413   :  { %16815 = vmatprep.subr.msk.mxu0 %vm1293_vm3, %v16748_v14 }
 0x414   :  { %v20618_v7 = vpop.f32.mrf.mxu1  ;;  %v16766_v37 = vpop.f32.mrf.mxu0 }
 0x416   :  { %v20622_v50 = vpop.f32.mrf.mxu1  ;;  %16816 = vmatpush3.xpose.msk.msra.mxu0 %vm1293_vm3, %v16748_v14  ;;  %v1130_v22 = vpop.f32.mrf.mxu0 }
 0x417   :  { %16817 = vmatprep.subr.msk.mxu0 %vm1293_vm3, %v1070_v24 }
 0x418   :  { %v16785_v43 = vpop.f32.mrf.mxu1 }
 0x41a   :  { %v1214_v2 = vpop.f32.mrf.mxu1  ;;  %16818 = vmatpush3.xpose.msk.msra.mxu0 %vm1293_vm3, %v1070_v24 }
 0x41b   :  { %16819 = vmatprep.subr.msk.mxu0 %vm1293_vm3, %v16745_v36 }
 0x41c   :  { %v16788_v30 = vpop.f32.mrf.mxu1 }
 0x41e   :  { %v1224_v41 = vpop.f32.mrf.mxu1  ;;  %16820 = vmatpush3.xpose.msk.msra.mxu0 %vm1293_vm3, %v16745_v36 }
 0x41f   :  { %16821 = vmatprep.subr.msk.mxu0 %vm1293_vm3, %v1060_v16 }
 0x420   :  { %v16791_v61 = vpop.f32.mrf.mxu1 }
 0x422   :  { %v1234_v11 = vpop.f32.mrf.mxu1  ;;  %16822 = vmatpush3.xpose.msk.msra.mxu0 %vm1293_vm3, %v1060_v16 }
 0x423   :  { %16863 = vmatprep.subr.msk.mxu0 %vm1293_vm3, %v16766_v37 }
 0x424   :  { %v16794_v14 = vpop.f32.mrf.mxu1 }
 0x425   :  { %16824 = vmatmul.mubr.msk.f32.vlgmr.msra.gmra.mxu0 %vm1293_vm3, %v16705_v10  ;;  %16835 = vmatprep.subr.mxu1 %v16794_v14 }
 0x426   :  { %v1244_v24 = vpop.f32.mrf.mxu1  ;;  %16826 = vmatprep.mubr.msk.f32.mxu0 %vm1293_vm3, %v916_v53  ;;  %16836 = vmatpush3.msra.mxu1 %v16794_v14 }
 0x427   :  { %16864 = vmatpush3.xpose.msk.msra.mxu0 %vm1293_vm3, %v16766_v37  ;;  %16837 = vmatprep.subr.mxu1 %v1244_v24 }
 0x428   :  { %16865 = vmatprep.subr.msk.mxu0 %vm1293_vm3, %v1130_v22  ;;  %v20636_v36 = vpop.f32.mrf.mxu1  ;;  %16838 = vmatpush3.msra.mxu1 %v1244_v24 }
 0x429   :  { %16827 = vmatmul.mubr.msk.f32.gmra.mxu0 %vm1293_vm3, %v16708_v17  ;;  %16839 = vmatprep.subr.mxu1 %v16791_v61 }
 0x42a   :  { %v20639_v16 = vpop.f32.mrf.mxu1  ;;  %16829 = vmatprep.mubr.msk.f32.mxu0 %vm1293_vm3, %v926_v27  ;;  %16840 = vmatpush3.msra.mxu1 %v16791_v61  ;;  %v14252_v27 = vld [vmem:[%s25421_s4 + $0x278] sm:$0xff] }
 0x42b   :  { %16866 = vmatpush3.xpose.msk.msra.mxu0 %vm1293_vm3, %v1130_v22  ;;  %16841 = vmatprep.subr.mxu1 %v1234_v11 }
 0x42c   :  { %16867 = vmatprep.subr.msk.mxu0 %vm1293_vm3, %v16763_v46  ;;  %v20644_v10 = vpop.f32.mrf.mxu1  ;;  %16842 = vmatpush3.msra.mxu1 %v1234_v11 }
 0x42d   :  { %16830 = vmatmul.mubr.msk.f32.gmra.mxu0 %vm1293_vm3, %v20585_v15  ;;  %16843 = vmatprep.subr.mxu1 %v16788_v30 }
 0x42e   :  { %v20648_v53 = vpop.f32.mrf.mxu1  ;;  %16832 = vmatprep.mubr.msk.f32.mxu0 %vm1293_vm3, %v20590_v32  ;;  %16844 = vmatpush3.msra.mxu1 %v16788_v30  ;;  %v14250_v32 = vld [vmem:[%s25421_s4 + $0x268] sm:$0xff] }
 0x42f   :  { %16868 = vmatpush3.xpose.msk.msra.mxu0 %vm1293_vm3, %v16763_v46  ;;  %16845 = vmatprep.subr.mxu1 %v1224_v41 }
 0x430   :  { %16869 = vmatprep.subr.msk.mxu0 %vm1293_vm3, %v1120_v4  ;;  %v20654_v22 = vpop.f32.mrf.mxu1  ;;  %16846 = vmatpush3.msra.mxu1 %v1224_v41 }
 0x431   :  { %16833 = vmatmul.mubr.msk.f32.gmra.mxu0 %vm1293_vm3, %v20587_v31  ;;  %16847 = vmatprep.subr.mxu1 %v16785_v43  ;;  %v14251_v31 = vld [vmem:[%s25421_s4 + $0x270] sm:$0xff] }
 0x432   :  { %v20658_v17 = vpop.f32.mrf.mxu1  ;;  %16848 = vmatpush3.msra.mxu1 %v16785_v43  ;;  %16879 = vmatprep.mubr.msk.f32.mxu0 %vm1293_vm3, %v20598_v52  ;;  %v14247_v52 = vld [vmem:[%s25421_s4 + $0x250] sm:$0xff] }
 0x433   :  { %16870 = vmatpush3.xpose.msk.msra.mxu0 %vm1293_vm3, %v1120_v4  ;;  %16849 = vmatprep.subr.mxu1 %v1214_v2 }
 0x434   :  { %16871 = vmatprep.subr.msk.mxu0 %vm1293_vm3, %v20612_v58  ;;  %v20665_v15 = vpop.f32.mrf.mxu1  ;;  %16850 = vmatpush3.msra.mxu1 %v1214_v2 }
 0x435   :  { %16891 = vmatprep.subr.mxu1 %v20665_v15 }
 0x437   :  { %16872 = vmatpush3.xpose.msk.msra.mxu0 %vm1293_vm3, %v20612_v58 }
 0x438   :  { %16873 = vmatprep.subr.msk.mxu0 %vm1293_vm3, %v20620_v9 }
 0x43b   :  { %16874 = vmatpush3.xpose.msk.msra.mxu0 %vm1293_vm3, %v20620_v9 }
 0x43c   :  { %16875 = vmatprep.subr.msk.mxu0 %vm1293_vm3, %v20596_v45 }
 0x43f   :  { %16876 = vmatpush3.xpose.msk.msra.mxu0 %vm1293_vm3, %v20596_v45  ;;  %v14249_v45 = vld [vmem:[%s25421_s4 + $0x260] sm:$0xff] }
 0x440   :  { %16877 = vmatprep.subr.msk.mxu0 %vm1293_vm3, %v20604_v42 }
 0x443   :  { %16878 = vmatpush3.xpose.msk.msra.mxu0 %vm1293_vm3, %v20604_v42  ;;  %v14245_v42 = vld [vmem:[%s25421_s4 + $0x240] sm:$0xff] }
 0x444   :  { %16959 = vmatprep.subr.mxu0 %v14252_v27 }
 0x446   :  { %16880 = vmatmul.mubr.msk.f32.vlgmr.msra.gmra.mxu0 %vm1293_vm3, %v20594_v33  ;;  %v14248_v33 = vld [vmem:[%s25421_s4 + $0x258] sm:$0xff] }
 0x447   :  { %16882 = vmatprep.mubr.msk.f32.mxu0 %vm1293_vm3, %v20606_v54  ;;  %16960 = vmatpush3.msra.mxu0 %v14252_v27 }
 0x448   :  { %16961 = vmatprep.subr.mxu0 %v14251_v31 }
 0x449   :  { %16962 = vmatpush3.msra.mxu0 %v14251_v31 }
 0x44a   :  { %16883 = vmatmul.mubr.msk.f32.gmra.mxu0 %vm1293_vm3, %v20602_v19  ;;  %16963 = vmatprep.subr.mxu0 %v14250_v32  ;;  %v14246_v19 = vld [vmem:[%s25421_s4 + $0x248] sm:$0xff] }
 0x44b   :  { %16885 = vmatprep.mubr.msk.f32.mxu0 %vm1293_vm3, %v20614_v3  ;;  %16964 = vmatpush3.msra.mxu0 %v14250_v32 }
 0x44c   :  { %16965 = vmatprep.subr.mxu0 %v14249_v45 }
 0x44d   :  { %16966 = vmatpush3.msra.mxu0 %v14249_v45 }
 0x44e   :  { %16886 = vmatmul.mubr.msk.f32.gmra.mxu0 %vm1293_vm3, %v20610_v44  ;;  %16967 = vmatprep.subr.mxu0 %v14248_v33 }
 0x44f   :  { %16888 = vmatprep.mubr.msk.f32.mxu0 %vm1293_vm3, %v20622_v50  ;;  %16968 = vmatpush3.msra.mxu0 %v14248_v33 }
 0x450   :  { %16969 = vmatprep.subr.mxu0 %v14247_v52 }
 0x451   :  { %16970 = vmatpush3.msra.mxu0 %v14247_v52 }
 0x452   :  { %16889 = vmatmul.mubr.msk.f32.gmra.mxu0 %vm1293_vm3, %v20618_v7  ;;  %16971 = vmatprep.subr.mxu0 %v14246_v19 }
 0x453   :  { %16972 = vmatpush3.msra.mxu0 %v14246_v19  ;;  %16975 = vmatprep.mubr.msk.f32.mxu0 %vm252_vm2, %v20389_v63 }
 0x454   :  { %16973 = vmatprep.subr.mxu0 %v14245_v42 }
 0x455   :  { %16974 = vmatpush3.msra.mxu0 %v14245_v42 }
 0x456   :  { %16976 = vmatmul.mubr.msk.f32.vlgmr.msra.gmra.mxu0 %vm252_vm2, %v20400_v40 }
 0x457   :  { %16978 = vmatprep.mubr.msk.f32.mxu0 %vm252_vm2, %v20404_v60 }
 0x45a   :  { %16979 = vmatmul.mubr.msk.f32.gmra.mxu0 %vm252_vm2, %v20421_v20 }
 0x45b   :  { %16981 = vmatprep.mubr.msk.f32.mxu0 %vm252_vm2, %v20426_v59 }
 0x45e   :  { %16982 = vmatmul.mubr.msk.f32.gmra.mxu0 %vm252_vm2, %v20443_v12 }
 0x45f   :  { %16984 = vmatprep.mubr.msk.f32.mxu0 %vm252_vm2, %v20447_v56 }
 0x462   :  { %16985 = vmatmul.mubr.msk.f32.gmra.mxu0 %vm252_vm2, %v20464_v55 }
 0x463   :  { %16987 = vmatprep.mubr.msk.f32.mxu0 %vm252_vm2, %v20468_v26 }
 0x466   :  { %16988 = vmatmul.mubr.msk.f32.gmra.mxu0 %vm252_vm2, %v20485_v35 }
 0x467   :  { %16990 = vmatprep.mubr.msk.f32.mxu0 %vm252_vm2, %v20489_v51 }
 0x46a   :  { %16991 = vmatmul.mubr.msk.f32.gmra.mxu0 %vm252_vm2, %v20506_v1 }
 0x46b   :  { %16993 = vmatprep.mubr.msk.f32.mxu0 %vm252_vm2, %v20510_v5 }
 0x46e   :  { %16994 = vmatmul.mubr.msk.f32.gmra.mxu0 %vm252_vm2, %v20527_v0 }
 0x46f   :  { %16996 = vmatprep.mubr.msk.f32.mxu0 %vm252_vm2, %v20531_v49 }
 0x472   :  { %16997 = vmatmul.mubr.msk.f32.gmra.mxu0 %vm252_vm2, %v20546_v62 }
 0x4e5   :  { %v20752_v54 = vpop.f32.mrf.mxu0 }
 0x4e6   :  { %v1450_v44 = vsel %vm252_vm2, %v20752_v54, -inf }
 0x4e7   :  { %1451 = vmax.xlane.f32.xlu1 %v1450_v44  ;;  %v20756_v58 = vpop.f32.mrf.mxu0 }
 0x4e8   :  { %v1447_v3 = vsel %vm252_vm2, %v20756_v58, -inf }
 0x4e9   :  { %1448 = vmax.xlane.f32.xlu0 %v1447_v3  ;;  %v20760_v7 = vpop.f32.mrf.mxu0 }
 0x4ea   :  { %v1456_v9 = vsel %vm252_vm2, %v20760_v7, -inf }
 0x4eb   :  { %1457 = vmax.xlane.f32.xlu1 %v1456_v9  ;;  %v20764_v50 = vpop.f32.mrf.mxu0 }
 0x4ec   :  { %v1453_v43 = vsel %vm252_vm2, %v20764_v50, -inf }
 0x4ed   :  { %1454 = vmax.xlane.f32.xlu0 %v1453_v43  ;;  %v20768_v46 = vpop.f32.mrf.mxu0 }
 0x4ee   :  { %v1462_v2 = vsel %vm252_vm2, %v20768_v46, -inf }
 0x4ef   :  { %1463 = vmax.xlane.f32.xlu1 %v1462_v2  ;;  %v20772_v30 = vpop.f32.mrf.mxu0 }
 0x4f0   :  { %v1459_v4 = vsel %vm252_vm2, %v20772_v30, -inf }
 0x4f1   :  { %1460 = vmax.xlane.f32.xlu0 %v1459_v4  ;;  %v20776_v41 = vpop.f32.mrf.mxu0 }
 0x4f2   :  { %v1468_v61 = vsel %vm252_vm2, %v20776_v41, -inf }
 0x4f3   :  { %1469 = vmax.xlane.f32.xlu1 %v1468_v61  ;;  %v20780_v37 = vpop.f32.mrf.mxu0 }
 0x4f4   :  { %v1465_v11 = vsel %vm252_vm2, %v20780_v37, -inf }
 0x4f5   :  { %1466 = vmax.xlane.f32.xlu0 %v1465_v11 }
 0x506   :  { %v20784_v14 = vpop.f32.mrf.mxu0 }
 0x507   :  { %v1820_v24 = vsel %vm252_vm2, %v20784_v14, -inf }
 0x508   :  { %1821 = vmax.xlane.f32.xlu1 %v1820_v24  ;;  %v20788_v27 = vpop.f32.mrf.mxu0 }
 0x509   :  { %v1817_v31 = vsel %vm252_vm2, %v20788_v27, -inf }
 0x50a   :  { %v20792_v32 = vpop.f32.mrf.mxu0  ;;  %1818 = vmax.xlane.f32.xlu0 %v1817_v31 }
 0x50b   :  { %v1826_v45 = vsel %vm252_vm2, %v20792_v32, -inf }
 0x50c   :  { %1827 = vmax.xlane.f32.xlu1 %v1826_v45  ;;  %v20796_v33 = vpop.f32.mrf.mxu0 }
 0x50d   :  { %v1823_v52 = vsel %vm252_vm2, %v20796_v33, -inf }
 0x50e   :  { %v20800_v19 = vpop.f32.mrf.mxu0  ;;  %1824 = vmax.xlane.f32.xlu0 %v1823_v52 }
 0x50f   :  { %v1832_v42 = vsel %vm252_vm2, %v20800_v19, -inf }
 0x510   :  { %1833 = vmax.xlane.f32.xlu1 %v1832_v42  ;;  %v20804_v44 = vpop.f32.mrf.mxu0 }
 0x511   :  { %v1829_v3 = vsel %vm252_vm2, %v20804_v44, -inf }
 0x512   :  { %1830 = vmax.xlane.f32.xlu0 %v1829_v3  ;;  %v20808_v9 = vpop.f32.mrf.mxu0 }
 0x513   :  { %v1838_v43 = vsel %vm252_vm2, %v20808_v9, -inf }
 0x514   :  { %1839 = vmax.xlane.f32.xlu1 %v1838_v43  ;;  %v20812_v2 = vpop.f32.mrf.mxu0 }
 0x515   :  { %v1835_v4 = vsel %vm252_vm2, %v20812_v2, -inf }
 0x516   :  { %v16977_v61 = vpop.f32.mrf.mxu0  ;;  %1836 = vmax.xlane.f32.xlu0 %v1835_v4 }
 0x518   :  { %v2265_v11 = vpop.f32.mrf.mxu0 }
 0x51a   :  { %v16980_v24 = vpop.f32.mrf.mxu0 }
 0x51c   :  { %v2275_v31 = vpop.f32.mrf.mxu0 }
 0x51e   :  { %v16983_v45 = vpop.f32.mrf.mxu0 }
 0x520   :  { %v2285_v52 = vpop.f32.mrf.mxu0 }
 0x522   :  { %v16986_v42 = vpop.f32.mrf.mxu0 }
 0x523   :  { %17039 = vmatprep.subr.msk.mxu0 %vm1293_vm3, %v16986_v42 }
 0x524   :  { %v2295_v3 = vpop.f32.mrf.mxu0  ;;  %17040 = vmatpush3.xpose.msk.msra.mxu0 %vm1293_vm3, %v16986_v42 }
 0x525   :  { %17041 = vmatprep.subr.msk.mxu0 %vm1293_vm3, %v2295_v3 }
 0x528   :  { %17042 = vmatpush3.xpose.msk.msra.mxu0 %vm1293_vm3, %v2295_v3 }
 0x529   :  { %17043 = vmatprep.subr.msk.mxu0 %vm1293_vm3, %v16983_v45 }
 0x52c   :  { %17044 = vmatpush3.xpose.msk.msra.mxu0 %vm1293_vm3, %v16983_v45 }
 0x52d   :  { %17045 = vmatprep.subr.msk.mxu0 %vm1293_vm3, %v2285_v52 }
 0x530   :  { %17046 = vmatpush3.xpose.msk.msra.mxu0 %vm1293_vm3, %v2285_v52 }
 0x531   :  { %17047 = vmatprep.subr.msk.mxu0 %vm1293_vm3, %v16980_v24 }
 0x534   :  { %17048 = vmatpush3.xpose.msk.msra.mxu0 %vm1293_vm3, %v16980_v24 }
 0x535   :  { %17049 = vmatprep.subr.msk.mxu0 %vm1293_vm3, %v2275_v31 }
 0x538   :  { %17050 = vmatpush3.xpose.msk.msra.mxu0 %vm1293_vm3, %v2275_v31 }
 0x539   :  { %17051 = vmatprep.subr.msk.mxu0 %vm1293_vm3, %v16977_v61 }
 0x53c   :  { %17052 = vmatpush3.xpose.msk.msra.mxu0 %vm1293_vm3, %v16977_v61 }
 0x53d   :  { %17053 = vmatprep.subr.msk.mxu0 %vm1293_vm3, %v2265_v11 }
 0x540   :  { %17054 = vmatpush3.xpose.msk.msra.mxu0 %vm1293_vm3, %v2265_v11 }
 0x570   :  { %v1452_v43 = vpop.xlane.xlu1 %1451 }
 0x571   :  { %v1472_v4 = vsub.f32 %v20752_v54, %v1452_v43 }
 0x572   :  { %v1449_v45 = vpop.xlane.xlu0 %1448 }
 0x573   :  { %v1481_v52 = vmul.f32 1.442695, %v1472_v4  ;;  %v1471_v42 = vsub.f32 %v20756_v58, %v1449_v45 }
 0x574   :  { %v1458_v24 = vpop.xlane.xlu1 %1457 }
 0x575   :  { %19081 = vpow2.f32 %v1481_v52  ;;  %v1479_v3 = vmul.f32 1.442695, %v1471_v42  ;;  %v1474_v31 = vsub.f32 %v20760_v7, %v1458_v24 }
 0x576   :  { %v1455_v28 = vpop.xlane.xlu0 %1454 }
 0x577   :  { %19083 = vpow2.f32 %v1479_v3  ;;  %v1485_v13 = vmul.f32 1.442695, %v1474_v31  ;;  %v1473_v61 = vsub.f32 %v20764_v50, %v1455_v28 }
 0x578   :  { %v1464_v18 = vpop.xlane.xlu1 %1463 }
 0x579   :  { %19085 = vpow2.f32 %v1485_v13  ;;  %v1483_v11 = vmul.f32 1.442695, %v1473_v61  ;;  %v1476_v57 = vsub.f32 %v20768_v46, %v1464_v18 }
 0x57a   :  { %v1461_v54 = vpop.xlane.xlu0 %1460 }
 0x57b   :  { %19087 = vpow2.f32 %v1483_v11  ;;  %v1489_v43 = vmul.f32 1.442695, %v1476_v57  ;;  %v1475_v58 = vsub.f32 %v20772_v30, %v1461_v54 }
 0x57c   :  { %v1470_v4 = vpop.xlane.xlu1 %1469 }
 0x57d   :  { %19089 = vpow2.f32 %v1489_v43  ;;  %v1487_v45 = vmul.f32 1.442695, %v1475_v58  ;;  %v1478_v7 = vsub.f32 %v20776_v41, %v1470_v4 }
 0x57e   :  { %v1467_v52 = vpop.xlane.xlu0 %1466 }
 0x57f   :  { %19091 = vpow2.f32 %v1487_v45  ;;  %v1493_v42 = vmul.f32 1.442695, %v1478_v7  ;;  %v1477_v28 = vsub.f32 %v20780_v37, %v1467_v52 }
 0x581   :  { %19093 = vpow2.f32 %v1493_v42  ;;  %v1491_v13 = vmul.f32 1.442695, %v1477_v28 }
 0x582   :  { %v20840_v50 = vpop.eup %19081 }
 0x583   :  { %19095 = vpow2.f32 %v1491_v13  ;;  %v1498_v57 = vsel %vm252_vm2, %v20840_v50, 0.0 }
 0x584   :  { %v20844_v18 = vpop.eup %19083  ;;  %1499 = vadd.xlane.f32.xlu1 %v1498_v57 }
 0x585   :  { %v1495_v46 = vsel %vm252_vm2, %v20844_v18, 0.0 }
 0x586   :  { %v20848_v30 = vpop.eup %19085  ;;  %1496 = vadd.xlane.f32.xlu0 %v1495_v46 }
 0x587   :  { %v1504_v41 = vsel %vm252_vm2, %v20848_v30, 0.0 }
 0x588   :  { %v20852_v37 = vpop.eup %19087  ;;  %1505 = vadd.xlane.f32.xlu1 %v1504_v41 }
 0x589   :  { %v1501_v24 = vsel %vm252_vm2, %v20852_v37, 0.0 }
 0x58a   :  { %v20856_v3 = vpop.eup %19089  ;;  %1502 = vadd.xlane.f32.xlu0 %v1501_v24 }
 0x58b   :  { %v1510_v31 = vsel %vm252_vm2, %v20856_v3, 0.0 }
 0x58c   :  { %v20860_v61 = vpop.eup %19091  ;;  %1511 = vadd.xlane.f32.xlu1 %v1510_v31 }
 0x58d   :  { %v1507_v11 = vsel %vm252_vm2, %v20860_v61, 0.0 }
 0x58e   :  { %v20864_v54 = vpop.eup %19093  ;;  %1508 = vadd.xlane.f32.xlu0 %v1507_v11 }
 0x58f   :  { %v1516_v43 = vsel %vm252_vm2, %v20864_v54, 0.0 }
 0x590   :  { %v20868_v58 = vpop.eup %19095  ;;  %1517 = vadd.xlane.f32.xlu1 %v1516_v43 }
 0x591   :  { %v1822_v4 = vpop.xlane.xlu1 %1821  ;;  %v1513_v45 = vsel %vm252_vm2, %v20868_v58, 0.0 }
 0x592   :  { %v1842_v7 = vsub.f32 %v20784_v14, %v1822_v4  ;;  %1514 = vadd.xlane.f32.xlu0 %v1513_v45 }
 0x593   :  { %v1819_v52 = vpop.xlane.xlu0 %1818 }
 0x594   :  { %v1851_v42 = vmul.f32 1.442695, %v1842_v7  ;;  %v1841_v28 = vsub.f32 %v20788_v27, %v1819_v52 }
 0x595   :  { %v1828_v13 = vpop.xlane.xlu1 %1827 }
 0x596   :  { %19097 = vpow2.f32 %v1851_v42  ;;  %v1849_v57 = vmul.f32 1.442695, %v1841_v28  ;;  %v1844_v46 = vsub.f32 %v20792_v32, %v1828_v13 }
 0x597   :  { %v1825_v41 = vpop.xlane.xlu0 %1824 }
 0x598   :  { %19099 = vpow2.f32 %v1849_v57  ;;  %v1855_v24 = vmul.f32 1.442695, %v1844_v46  ;;  %v1843_v31 = vsub.f32 %v20796_v33, %v1825_v41 }
 0x599   :  { %v1834_v11 = vpop.xlane.xlu1 %1833 }
 0x59a   :  { %19101 = vpow2.f32 %v1855_v24  ;;  %v1853_v43 = vmul.f32 1.442695, %v1843_v31  ;;  %v1846_v14 = vsub.f32 %v20800_v19, %v1834_v11 }
 0x59b   :  { %v1831_v4 = vpop.xlane.xlu0 %1830 }
 0x59c   :  { %19103 = vpow2.f32 %v1853_v43  ;;  %v1859_v45 = vmul.f32 1.442695, %v1846_v14  ;;  %v1845_v27 = vsub.f32 %v20804_v44, %v1831_v4 }
 0x59d   :  { %v1840_v7 = vpop.xlane.xlu1 %1839 }
 0x59e   :  { %19105 = vpow2.f32 %v1859_v45  ;;  %v1857_v52 = vmul.f32 1.442695, %v1845_v27  ;;  %v1848_v32 = vsub.f32 %v20808_v9, %v1840_v7 }
 0x59f   :  { %v1837_v42 = vpop.xlane.xlu0 %1836 }
 0x5a0   :  { %19107 = vpow2.f32 %v1857_v52  ;;  %v1863_v28 = vmul.f32 1.442695, %v1848_v32  ;;  %v1847_v33 = vsub.f32 %v20812_v2, %v1837_v42 }
 0x5a2   :  { %19109 = vpow2.f32 %v1863_v28  ;;  %v1861_v13 = vmul.f32 1.442695, %v1847_v33 }
 0x5a3   :  { %v20880_v57 = vpop.eup %19097 }
 0x5a4   :  { %19111 = vpow2.f32 %v1861_v13  ;;  %v1868_v19 = vsel %vm252_vm2, %v20880_v57, 0.0 }
 0x5a5   :  { %v20884_v46 = vpop.eup %19099  ;;  %1869 = vadd.xlane.f32.xlu1 %v1868_v19 }
 0x5a6   :  { %v1865_v44 = vsel %vm252_vm2, %v20884_v46, 0.0 }
 0x5a7   :  { %v20888_v9 = vpop.eup %19101  ;;  %1866 = vadd.xlane.f32.xlu0 %v1865_v44 }
 0x5a8   :  { %v1874_v2 = vsel %vm252_vm2, %v20888_v9, 0.0 }
 0x5a9   :  { %v20892_v41 = vpop.eup %19103  ;;  %1875 = vadd.xlane.f32.xlu1 %v1874_v2 }
 0x5aa   :  { %v1871_v24 = vsel %vm252_vm2, %v20892_v41, 0.0 }
 0x5ab   :  { %v20896_v31 = vpop.eup %19105  ;;  %1872 = vadd.xlane.f32.xlu0 %v1871_v24 }
 0x5ac   :  { %v1880_v11 = vsel %vm252_vm2, %v20896_v31, 0.0 }
 0x5ad   :  { %v20900_v43 = vpop.eup %19107  ;;  %1881 = vadd.xlane.f32.xlu1 %v1880_v11 }
 0x5ae   :  { %v1877_v14 = vsel %vm252_vm2, %v20900_v43, 0.0 }
 0x5af   :  { %v20904_v4 = vpop.eup %19109  ;;  %1878 = vadd.xlane.f32.xlu0 %v1877_v14 }
 0x5b0   :  { %v1886_v45 = vsel %vm252_vm2, %v20904_v4, 0.0 }
 0x5b1   :  { %v20908_v27 = vpop.eup %19111  ;;  %1887 = vadd.xlane.f32.xlu1 %v1886_v45 }
 0x5b2   :  { %v1883_v7 = vsel %vm252_vm2, %v20908_v27, 0.0 }
 0x5b3   :  { %1884 = vadd.xlane.f32.xlu0 %v1883_v7 }
 0x60d   :  { %v1500_v52 = vpop.xlane.xlu1 %1499 }
 0x60e   :  { %19113 = vrcp.f32 %v1500_v52  ;;  %v1284_v52 = vpop.f32.mrf.mxu1 }
 0x60f   :  { %v1497_v32 = vpop.xlane.xlu0 %1496 }
 0x610   :  { %19115 = vrcp.f32 %v1497_v32 }
 0x611   :  { %v1506_v42 = vpop.xlane.xlu1 %1505 }
 0x612   :  { %19117 = vrcp.f32 %v1506_v42 }
 0x613   :  { %v1503_v28 = vpop.xlane.xlu0 %1502 }
 0x614   :  { %19119 = vrcp.f32 %v1503_v28 }
 0x615   :  { %v1512_v33 = vpop.xlane.xlu1 %1511 }
 0x616   :  { %19121 = vrcp.f32 %v1512_v33 }
 0x617   :  { %v1509_v13 = vpop.xlane.xlu0 %1508 }
 0x618   :  { %19123 = vrcp.f32 %v1509_v13 }
 0x619   :  { %v1518_v19 = vpop.xlane.xlu1 %1517 }
 0x61a   :  { %19125 = vrcp.f32 %v1518_v19 }
 0x61b   :  { %v1515_v44 = vpop.xlane.xlu0 %1514  ;;  %v19114_v2 = vpop.eup %19113 }
 0x61c   :  { %19127 = vrcp.f32 %v1515_v44  ;;  %v1522_v14 = vmul.f32 %v19114_v2, %v20840_v50 }
 0x61d   :  { %v19116_v24 = vpop.eup %19115 }
 0x61e   :  { %v1520_v11 = vmul.f32 %v19116_v24, %v20844_v18 }
 0x61f   :  { %v19118_v45 = vpop.eup %19117 }
 0x620   :  { %16851 = vmatprep.mubr.msk.f32.mxu1 %vm252_vm2, %v1520_v11  ;;  %v1526_v42 = vmul.f32 %v19118_v45, %v20848_v30  ;;  %v14227_v11 = vld [vmem:[%s25421_s4 + $0x70] sm:$0xff] }
 0x621   :  { %v19120_v7 = vpop.eup %19119  ;;  %16852 = vmatmul.mubr.msk.f32.vlgmr.msra.gmra.mxu1 %vm252_vm2, %v1522_v14 }
 0x622   :  { %16892 = vmatpush3.msra.mxu1 %v20665_v15  ;;  %v1524_v32 = vmul.f32 %v19120_v7, %v20852_v37  ;;  %v14226_v7 = vld [vmem:[%s25421_s4 + $0x68] sm:$0xff] }
 0x623   :  { %16893 = vmatprep.subr.mxu1 %v1284_v52  ;;  %v19122_v28 = vpop.eup %19121 }
 0x624   :  { %16894 = vmatpush3.msra.mxu1 %v1284_v52  ;;  %16854 = vmatprep.mubr.msk.f32.mxu1 %vm252_vm2, %v1524_v32  ;;  %v1530_v15 = vmul.f32 %v19122_v28, %v20856_v3  ;;  %v14225_v52 = vld [vmem:[%s25421_s4 + $0x60] sm:$0xff] }
 0x625   :  { %v19124_v18 = vpop.eup %19123  ;;  %16895 = vmatprep.subr.mxu1 %v20654_v22  ;;  %16855 = vmatmul.mubr.msk.f32.gmra.mxu1 %vm252_vm2, %v1526_v42  ;;  %v14224_v42 = vld [vmem:[%s25421_s4 + $0x58] sm:$0xff] }
 0x626   :  { %16896 = vmatpush3.msra.mxu1 %v20654_v22  ;;  %v1528_v50 = vmul.f32 %v19124_v18, %v20860_v61  ;;  %v20966_v18 = vpop.f32.mrf.mxu0 }
 0x627   :  { %16897 = vmatprep.subr.mxu1 %v20658_v17  ;;  %v19126_v37 = vpop.eup %19125 }
 0x628   :  { %16898 = vmatpush3.msra.mxu1 %v20658_v17  ;;  %16857 = vmatprep.mubr.msk.f32.mxu1 %vm252_vm2, %v1528_v50  ;;  %v1534_v61 = vmul.f32 %v19126_v37, %v20864_v54  ;;  %v14223_v50 = vld [vmem:[%s25421_s4 + $0x50] sm:$0xff] }
 0x629   :  { %v19128_v30 = vpop.eup %19127  ;;  %16899 = vmatprep.subr.mxu1 %v20644_v10  ;;  %16858 = vmatmul.mubr.msk.f32.gmra.mxu1 %vm252_vm2, %v1530_v15 }
 0x62a   :  { %16900 = vmatpush3.msra.mxu1 %v20644_v10  ;;  %v1532_v22 = vmul.f32 %v19128_v30, %v20868_v58  ;;  %v14228_v10 = vld [vmem:[%s25421_s4 + $0x78] sm:$0xff]  ;;  %v20978_v30 = vpop.f32.mrf.mxu0 }
 0x62b   :  { %16901 = vmatprep.subr.mxu1 %v20648_v53 }
 0x62c   :  { %16902 = vmatpush3.msra.mxu1 %v20648_v53  ;;  %16860 = vmatprep.mubr.msk.f32.mxu1 %vm252_vm2, %v1532_v22  ;;  %v14221_v22 = vld [vmem:[%s25421_s4 + $0x40] sm:$0xff] }
 0x62d   :  { %16903 = vmatprep.subr.mxu1 %v20636_v36  ;;  %16861 = vmatmul.mubr.msk.f32.gmra.mxu1 %vm252_vm2, %v1534_v61  ;;  %v14275_v61 = vld [vmem:[%s25421_s4 + $0x470] sm:$0xff] }
 0x62e   :  { %v1870_v17 = vpop.xlane.xlu1 %1869  ;;  %16904 = vmatpush3.msra.mxu1 %v20636_v36 }
 0x62f   :  { %16905 = vmatprep.subr.mxu1 %v20639_v16  ;;  %19129 = vrcp.f32 %v1870_v17  ;;  %v14274_v17 = vld [vmem:[%s25421_s4 + $0x468] sm:$0xff] }
 0x630   :  { %v1867_v3 = vpop.xlane.xlu0 %1866  ;;  %16906 = vmatpush3.msra.mxu1 %v20639_v16 }
 0x631   :  { %19131 = vrcp.f32 %v1867_v3  ;;  %16919 = vmatprep.subr.mxu1 %v14228_v10  ;;  %v14273_v3 = vld [vmem:[%s25421_s4 + $0x460] sm:$0xff] }
 0x632   :  { %v1876_v53 = vpop.xlane.xlu1 %1875 }
 0x633   :  { %19133 = vrcp.f32 %v1876_v53  ;;  %v14272_v53 = vld [vmem:[%s25421_s4 + $0x458] sm:$0xff] }
 0x634   :  { %v1873_v54 = vpop.xlane.xlu0 %1872 }
 0x635   :  { %19135 = vrcp.f32 %v1873_v54 }
 0x636   :  { %v1882_v58 = vpop.xlane.xlu1 %1881 }
 0x637   :  { %19137 = vrcp.f32 %v1882_v58  ;;  %v14271_v58 = vld [vmem:[%s25421_s4 + $0x450] sm:$0xff] }
 0x638   :  { %v1879_v33 = vpop.xlane.xlu0 %1878 }
 0x639   :  { %19139 = vrcp.f32 %v1879_v33  ;;  %v14270_v33 = vld [vmem:[%s25421_s4 + $0x448] sm:$0xff] }
 0x63a   :  { %v1888_v36 = vpop.xlane.xlu1 %1887 }
 0x63b   :  { %19141 = vrcp.f32 %v1888_v36 }
 0x63c   :  { %v1885_v13 = vpop.xlane.xlu0 %1884  ;;  %v19130_v19 = vpop.eup %19129 }
 0x63d   :  { %19143 = vrcp.f32 %v1885_v13  ;;  %v1892_v16 = vmul.f32 %v19130_v19, %v20880_v57  ;;  %v14269_v13 = vld [vmem:[%s25421_s4 + $0x440] sm:$0xff] }
 0x63e   :  { %v19132_v44 = vpop.eup %19131 }
 0x63f   :  { %v1890_v2 = vmul.f32 %v19132_v44, %v20884_v46 }
 0x640   :  { %v19134_v24 = vpop.eup %19133 }
 0x641   :  { %16907 = vmatprep.mubr.msk.f32.mxu1 %vm252_vm2, %v1890_v2  ;;  %v1896_v57 = vmul.f32 %v19134_v24, %v20888_v9 }
 0x642   :  { %v19136_v14 = vpop.eup %19135  ;;  %16908 = vmatmul.mubr.msk.f32.vlgmr.msra.gmra.mxu1 %vm252_vm2, %v1892_v16 }
 0x643   :  { %16920 = vmatpush3.msra.mxu1 %v14228_v10  ;;  %v1894_v45 = vmul.f32 %v19136_v14, %v20892_v41 }
 0x644   :  { %16921 = vmatprep.subr.mxu1 %v14227_v11  ;;  %v19138_v46 = vpop.eup %19137 }
 0x645   :  { %16922 = vmatpush3.msra.mxu1 %v14227_v11  ;;  %16910 = vmatprep.mubr.msk.f32.mxu1 %vm252_vm2, %v1894_v45  ;;  %v1900_v9 = vmul.f32 %v19138_v46, %v20896_v31  ;;  %v14222_v31 = vld [vmem:[%s25421_s4 + $0x48] sm:$0xff] }
 0x646   :  { %v19140_v32 = vpop.eup %19139  ;;  %16923 = vmatprep.subr.mxu1 %v14226_v7  ;;  %16911 = vmatmul.mubr.msk.f32.gmra.mxu1 %vm252_vm2, %v1896_v57 }
 0x647   :  { %16924 = vmatpush3.msra.mxu1 %v14226_v7  ;;  %v1898_v41 = vmul.f32 %v19140_v32, %v20900_v43 }
 0x648   :  { %16925 = vmatprep.subr.mxu1 %v14225_v52  ;;  %v19142_v28 = vpop.eup %19141 }
 0x649   :  { %16926 = vmatpush3.msra.mxu1 %v14225_v52  ;;  %16913 = vmatprep.mubr.msk.f32.mxu1 %vm252_vm2, %v1898_v41  ;;  %v1904_v37 = vmul.f32 %v19142_v28, %v20904_v4  ;;  %v14276_v4 = vld [vmem:[%s25421_s4 + $0x478] sm:$0xff] }
 0x64a   :  { %v19144_v15 = vpop.eup %19143  ;;  %16927 = vmatprep.subr.mxu1 %v14224_v42  ;;  %16914 = vmatmul.mubr.msk.f32.gmra.mxu1 %vm252_vm2, %v1900_v9 }
 0x64b   :  { %16928 = vmatpush3.msra.mxu1 %v14224_v42  ;;  %v1902_v43 = vmul.f32 %v19144_v15, %v20908_v27  ;;  %v20990_v27 = vpop.f32.mrf.mxu0 }
 0x64c   :  { %16929 = vmatprep.subr.mxu1 %v14223_v50 }
 0x64d   :  { %16930 = vmatpush3.msra.mxu1 %v14223_v50  ;;  %16916 = vmatprep.mubr.msk.f32.mxu1 %vm252_vm2, %v1902_v43  ;;  %v2315_v10 = vpop.f32.mrf.mxu0 }
 0x64e   :  { %16931 = vmatprep.subr.mxu1 %v14222_v31  ;;  %16917 = vmatmul.mubr.msk.f32.gmra.mxu1 %vm252_vm2, %v1904_v37 }
 0x64f   :  { %16932 = vmatpush3.msra.mxu1 %v14222_v31  ;;  %16935 = vmatprep.mubr.msk.f32.mxu1 %vm252_vm2, %v20389_v63  ;;  %v16995_v54 = vpop.f32.mrf.mxu0 }
 0x650   :  { %16933 = vmatprep.subr.mxu1 %v14221_v22 }
 0x651   :  { %16934 = vmatpush3.msra.mxu1 %v14221_v22  ;;  %v2325_v36 = vpop.f32.mrf.mxu0 }
 0x652   :  { %16999 = vmatprep.subr.mxu1 %v14276_v4  ;;  %16936 = vmatmul.mubr.msk.f32.vlgmr.msra.gmra.mxu1 %vm252_vm2, %v20400_v40 }
 0x653   :  { %17000 = vmatpush3.msra.mxu1 %v14276_v4  ;;  %16938 = vmatprep.mubr.msk.f32.mxu1 %vm252_vm2, %v20404_v60  ;;  %v16998_v19 = vpop.f32.mrf.mxu0 }
 0x654   :  { %17001 = vmatprep.subr.mxu1 %v14275_v61 }
 0x655   :  { %17002 = vmatpush3.msra.mxu1 %v14275_v61  ;;  %v2335_v44 = vpop.f32.mrf.mxu0 }
 0x656   :  { %17003 = vmatprep.subr.mxu1 %v14274_v17  ;;  %16939 = vmatmul.mubr.msk.f32.gmra.mxu1 %vm252_vm2, %v20421_v20 }
 0x657   :  { %17004 = vmatpush3.msra.mxu1 %v14274_v17  ;;  %16941 = vmatprep.mubr.msk.f32.mxu1 %vm252_vm2, %v20426_v59 }
 0x658   :  { %17005 = vmatprep.subr.mxu1 %v14273_v3 }
 0x659   :  { %17006 = vmatpush3.msra.mxu1 %v14273_v3 }
 0x65a   :  { %17007 = vmatprep.subr.mxu1 %v14272_v53  ;;  %16942 = vmatmul.mubr.msk.f32.gmra.mxu1 %vm252_vm2, %v20443_v12 }
 0x65b   :  { %17008 = vmatpush3.msra.mxu1 %v14272_v53  ;;  %16944 = vmatprep.mubr.msk.f32.mxu1 %vm252_vm2, %v20447_v56 }
 0x65c   :  { %17009 = vmatprep.subr.mxu1 %v14271_v58 }
 0x65d   :  { %17010 = vmatpush3.msra.mxu1 %v14271_v58 }
 0x65e   :  { %17011 = vmatprep.subr.mxu1 %v14270_v33  ;;  %16945 = vmatmul.mubr.msk.f32.gmra.mxu1 %vm252_vm2, %v20464_v55 }
 0x65f   :  { %17012 = vmatpush3.msra.mxu1 %v14270_v33  ;;  %16947 = vmatprep.mubr.msk.f32.mxu1 %vm252_vm2, %v20468_v26 }
 0x660   :  { %17013 = vmatprep.subr.mxu1 %v14269_v13 }
 0x661   :  { %17014 = vmatpush3.msra.mxu1 %v14269_v13 }
 0x662   :  { %17095 = vmatprep.subr.msk.mxu1 %vm1293_vm3, %v16998_v19  ;;  %16948 = vmatmul.mubr.msk.f32.gmra.mxu1 %vm252_vm2, %v20485_v35 }
 0x663   :  { %16950 = vmatprep.mubr.msk.f32.mxu1 %vm252_vm2, %v20489_v51 }
 0x666   :  { %16951 = vmatmul.mubr.msk.f32.gmra.mxu1 %vm252_vm2, %v20506_v1 }
 0x667   :  { %16953 = vmatprep.mubr.msk.f32.mxu1 %vm252_vm2, %v20510_v5 }
 0x66a   :  { %16954 = vmatmul.mubr.msk.f32.gmra.mxu1 %vm252_vm2, %v20527_v0 }
 0x66b   :  { %16956 = vmatprep.mubr.msk.f32.mxu1 %vm252_vm2, %v20531_v49 }
 0x66e   :  { %16957 = vmatmul.mubr.msk.f32.gmra.mxu1 %vm252_vm2, %v20546_v62 }
 0x66f   :  { %17015 = vmatprep.mubr.msk.f32.mxu1 %vm252_vm2, %v20389_v63 }
 0x672   :  { %17016 = vmatmul.mubr.msk.f32.vlgmr.msra.gmra.mxu1 %vm252_vm2, %v20400_v40 }
 0x673   :  { %17096 = vmatpush3.xpose.msk.msra.mxu1 %vm1293_vm3, %v16998_v19  ;;  %17018 = vmatprep.mubr.msk.f32.mxu1 %vm252_vm2, %v20404_v60 }
 0x674   :  { %17097 = vmatprep.subr.msk.mxu1 %vm1293_vm3, %v2335_v44 }
 0x676   :  { %17019 = vmatmul.mubr.msk.f32.gmra.mxu1 %vm252_vm2, %v20421_v20 }
 0x677   :  { %17098 = vmatpush3.xpose.msk.msra.mxu1 %vm1293_vm3, %v2335_v44  ;;  %17021 = vmatprep.mubr.msk.f32.mxu1 %vm252_vm2, %v20426_v59 }
 0x678   :  { %17099 = vmatprep.subr.msk.mxu1 %vm1293_vm3, %v16995_v54 }
 0x67a   :  { %17022 = vmatmul.mubr.msk.f32.gmra.mxu1 %vm252_vm2, %v20443_v12 }
 0x67b   :  { %17100 = vmatpush3.xpose.msk.msra.mxu1 %vm1293_vm3, %v16995_v54  ;;  %17024 = vmatprep.mubr.msk.f32.mxu1 %vm252_vm2, %v20447_v56 }
 0x67c   :  { %17101 = vmatprep.subr.msk.mxu1 %vm1293_vm3, %v2325_v36 }
 0x67e   :  { %17025 = vmatmul.mubr.msk.f32.gmra.mxu1 %vm252_vm2, %v20464_v55 }
 0x67f   :  { %17102 = vmatpush3.xpose.msk.msra.mxu1 %vm1293_vm3, %v2325_v36  ;;  %17027 = vmatprep.mubr.msk.f32.mxu1 %vm252_vm2, %v20468_v26 }
 0x680   :  { %17103 = vmatprep.subr.msk.mxu1 %vm1293_vm3, %v20990_v27 }
 0x682   :  { %17028 = vmatmul.mubr.msk.f32.gmra.mxu1 %vm252_vm2, %v20485_v35 }
 0x683   :  { %17104 = vmatpush3.xpose.msk.msra.mxu1 %vm1293_vm3, %v20990_v27  ;;  %17030 = vmatprep.mubr.msk.f32.mxu1 %vm252_vm2, %v20489_v51 }
 0x684   :  { %17105 = vmatprep.subr.msk.mxu1 %vm1293_vm3, %v2315_v10 }
 0x686   :  { %17031 = vmatmul.mubr.msk.f32.gmra.mxu1 %vm252_vm2, %v20506_v1 }
 0x687   :  { %17106 = vmatpush3.xpose.msk.msra.mxu1 %vm1293_vm3, %v2315_v10  ;;  %17033 = vmatprep.mubr.msk.f32.mxu1 %vm252_vm2, %v20510_v5 }
 0x688   :  { %17107 = vmatprep.subr.msk.mxu1 %vm1293_vm3, %v20966_v18 }
 0x68a   :  { %17034 = vmatmul.mubr.msk.f32.gmra.mxu1 %vm252_vm2, %v20527_v0 }
 0x68b   :  { %17108 = vmatpush3.xpose.msk.msra.mxu1 %vm1293_vm3, %v20966_v18  ;;  %17036 = vmatprep.mubr.msk.f32.mxu1 %vm252_vm2, %v20531_v49 }
 0x68c   :  { %17109 = vmatprep.subr.msk.mxu1 %vm1293_vm3, %v20978_v30 }
 0x68e   :  { %17037 = vmatmul.mubr.msk.f32.gmra.mxu1 %vm252_vm2, %v20546_v62 }
 0x68f   :  { %17110 = vmatpush3.xpose.msk.msra.mxu1 %vm1293_vm3, %v20978_v30 }
 0x6e1   :  { %v21097_v2 = vpop.f32.mrf.mxu1 }
 0x6e3   :  { %v21099_v16 = vpop.f32.mrf.mxu1 }
 0x6e5   :  { %v21101_v24 = vpop.f32.mrf.mxu1 }
 0x6e7   :  { %v21103_v11 = vpop.f32.mrf.mxu1 }
 0x6e9   :  { %v21105_v14 = vpop.f32.mrf.mxu1 }
 0x6eb   :  { %v21107_v45 = vpop.f32.mrf.mxu1 }
 0x6ed   :  { %v21109_v7 = vpop.f32.mrf.mxu1 }
 0x6ef   :  { %v21111_v57 = vpop.f32.mrf.mxu1 }
 0x702   :  { %v21113_v46 = vpop.f32.mrf.mxu1 }
 0x704   :  { %v21115_v52 = vpop.f32.mrf.mxu1 }
 0x706   :  { %v21117_v32 = vpop.f32.mrf.mxu1 }
 0x708   :  { %v21119_v41 = vpop.f32.mrf.mxu1 }
 0x70a   :  { %v21121_v42 = vpop.f32.mrf.mxu1 }
 0x70c   :  { %v21123_v9 = vpop.f32.mrf.mxu1 }
 0x70e   :  { %v21125_v28 = vpop.f32.mrf.mxu1 }
 0x710   :  { %v21127_v18 = vpop.f32.mrf.mxu1 }
 0x712   :  { %v16937_v50 = vpop.f32.mrf.mxu1 }
 0x714   :  { %v2111_v15 = vpop.f32.mrf.mxu1 }
 0x715   :  { %17055 = vmatprep.mubr.msk.f32.mxu0 %vm1293_vm3, %v2111_v15 }
 0x716   :  { %v16940_v43 = vpop.f32.mrf.mxu1  ;;  %17056 = vmatmul.mubr.msk.f32.vlgmr.msra.gmra.mxu0 %vm1293_vm3, %v16937_v50 }
 0x718   :  { %v2121_v31 = vpop.f32.mrf.mxu1 }
 0x719   :  { %17058 = vmatprep.mubr.msk.f32.mxu0 %vm1293_vm3, %v2121_v31 }
 0x71a   :  { %v16943_v37 = vpop.f32.mrf.mxu1  ;;  %17059 = vmatmul.mubr.msk.f32.gmra.mxu0 %vm1293_vm3, %v16940_v43 }
 0x71c   :  { %v2131_v30 = vpop.f32.mrf.mxu1 }
 0x71d   :  { %17061 = vmatprep.mubr.msk.f32.mxu0 %vm1293_vm3, %v2131_v30 }
 0x71e   :  { %v16946_v22 = vpop.f32.mrf.mxu1  ;;  %17062 = vmatmul.mubr.msk.f32.gmra.mxu0 %vm1293_vm3, %v16943_v37 }
 0x720   :  { %v2141_v4 = vpop.f32.mrf.mxu1 }
 0x721   :  { %17064 = vmatprep.mubr.msk.f32.mxu0 %vm1293_vm3, %v2141_v4 }
 0x722   :  { %v16949_v27 = vpop.f32.mrf.mxu1  ;;  %17065 = vmatmul.mubr.msk.f32.gmra.mxu0 %vm1293_vm3, %v16946_v22 }
 0x724   :  { %v2151_v61 = vpop.f32.mrf.mxu1 }
 0x725   :  { %17111 = vmatprep.mubr.msk.f32.mxu1 %vm1293_vm3, %v2151_v61 }
 0x726   :  { %v16952_v17 = vpop.f32.mrf.mxu1  ;;  %17112 = vmatmul.mubr.msk.f32.vlgmr.msra.gmra.mxu1 %vm1293_vm3, %v16949_v27 }
 0x728   :  { %v2161_v10 = vpop.f32.mrf.mxu1 }
 0x729   :  { %17114 = vmatprep.mubr.msk.f32.mxu1 %vm1293_vm3, %v2161_v10 }
 0x72a   :  { %v16955_v3 = vpop.f32.mrf.mxu1  ;;  %17115 = vmatmul.mubr.msk.f32.gmra.mxu1 %vm1293_vm3, %v16952_v17 }
 0x72c   :  { %v2171_v53 = vpop.f32.mrf.mxu1 }
 0x72d   :  { %17117 = vmatprep.mubr.msk.f32.mxu1 %vm1293_vm3, %v2171_v53 }
 0x72e   :  { %v16958_v54 = vpop.f32.mrf.mxu1  ;;  %17118 = vmatmul.mubr.msk.f32.gmra.mxu1 %vm1293_vm3, %v16955_v3 }
 0x730   :  { %v2181_v58 = vpop.f32.mrf.mxu1 }
 0x731   :  { %17120 = vmatprep.mubr.msk.f32.mxu1 %vm1293_vm3, %v2181_v58 }
 0x732   :  { %v17017_v33 = vpop.f32.mrf.mxu1  ;;  %17121 = vmatmul.mubr.msk.f32.gmra.mxu1 %vm1293_vm3, %v16958_v54 }
 0x734   :  { %v2419_v36 = vpop.f32.mrf.mxu1 }
 0x736   :  { %v17020_v13 = vpop.f32.mrf.mxu1 }
 0x738   :  { %v2429_v19 = vpop.f32.mrf.mxu1 }
 0x73a   :  { %v17023_v44 = vpop.f32.mrf.mxu1 }
 0x73c   :  { %v2439_v50 = vpop.f32.mrf.mxu1 }
 0x73e   :  { %v17026_v15 = vpop.f32.mrf.mxu1 }
 0x73f   :  { %17067 = vmatprep.subr.mxu0 %v17026_v15 }
 0x740   :  { %v2449_v43 = vpop.f32.mrf.mxu1  ;;  %17068 = vmatpush3.msra.mxu0 %v17026_v15 }
 0x741   :  { %17069 = vmatprep.subr.mxu0 %v2449_v43 }
 0x742   :  { %v21145_v31 = vpop.f32.mrf.mxu1  ;;  %17070 = vmatpush3.msra.mxu0 %v2449_v43 }
 0x743   :  { %17071 = vmatprep.subr.mxu0 %v17023_v44 }
 0x744   :  { %v21147_v37 = vpop.f32.mrf.mxu1  ;;  %17072 = vmatpush3.msra.mxu0 %v17023_v44 }
 0x745   :  { %17073 = vmatprep.subr.mxu0 %v2439_v50 }
 0x746   :  { %v21149_v30 = vpop.f32.mrf.mxu1  ;;  %17074 = vmatpush3.msra.mxu0 %v2439_v50 }
 0x747   :  { %17075 = vmatprep.subr.mxu0 %v17020_v13 }
 0x748   :  { %v21151_v22 = vpop.f32.mrf.mxu1  ;;  %17076 = vmatpush3.msra.mxu0 %v17020_v13 }
 0x749   :  { %17077 = vmatprep.subr.mxu0 %v2429_v19 }
 0x74a   :  { %v21153_v4 = vpop.f32.mrf.mxu1  ;;  %17078 = vmatpush3.msra.mxu0 %v2429_v19 }
 0x74b   :  { %17079 = vmatprep.subr.mxu0 %v17017_v33 }
 0x74c   :  { %v21155_v27 = vpop.f32.mrf.mxu1  ;;  %17080 = vmatpush3.msra.mxu0 %v17017_v33 }
 0x74d   :  { %17081 = vmatprep.subr.mxu0 %v2419_v36 }
 0x74e   :  { %v21157_v61 = vpop.f32.mrf.mxu1  ;;  %17082 = vmatpush3.msra.mxu0 %v2419_v36 }
 0x74f   :  { %17123 = vmatprep.subr.mxu0 %v21157_v61 }
 0x7d6   :  { %v17057_v17 = vpop.f32.mrf.mxu0 }
 0x7d7   :  { %v2654_v10 = vsel %vm252_vm2, %v17057_v17, -inf }
 0x7d8   :  { %2655 = vmax.xlane.f32.xlu1 %v2654_v10  ;;  %v2612_v3 = vpop.f32.mrf.mxu0  ;;  %v21167_v10 = vpop.f32.mrf.mxu1 }
 0x7d9   :  { %v2651_v53 = vsel %vm252_vm2, %v2612_v3, -inf }
 0x7da   :  { %2652 = vmax.xlane.f32.xlu0 %v2651_v53  ;;  %v17060_v54 = vpop.f32.mrf.mxu0 }
 0x7db   :  { %v2660_v58 = vsel %vm252_vm2, %v17060_v54, -inf }
 0x7dc   :  { %2661 = vmax.xlane.f32.xlu1 %v2660_v58  ;;  %v2622_v13 = vpop.f32.mrf.mxu0 }
 0x7dd   :  { %v2657_v33 = vsel %vm252_vm2, %v2622_v13, -inf }
 0x7de   :  { %2658 = vmax.xlane.f32.xlu0 %v2657_v33  ;;  %v17063_v19 = vpop.f32.mrf.mxu0 }
 0x7df   :  { %v2666_v36 = vsel %vm252_vm2, %v17063_v19, -inf }
 0x7e0   :  { %2667 = vmax.xlane.f32.xlu1 %v2666_v36  ;;  %v2632_v44 = vpop.f32.mrf.mxu0 }
 0x7e1   :  { %v2663_v50 = vsel %vm252_vm2, %v2632_v44, -inf }
 0x7e2   :  { %2664 = vmax.xlane.f32.xlu0 %v2663_v50  ;;  %v17066_v15 = vpop.f32.mrf.mxu0 }
 0x7e3   :  { %v2672_v43 = vsel %vm252_vm2, %v17066_v15, -inf }
 0x7e4   :  { %2673 = vmax.xlane.f32.xlu1 %v2672_v43  ;;  %v2642_v53 = vpop.f32.mrf.mxu0 }
 0x7e5   :  { %v2669_v58 = vsel %vm252_vm2, %v2642_v53, -inf }
 0x7e6   :  { %2670 = vmax.xlane.f32.xlu0 %v2669_v58  ;;  %v17113_v29 = vpop.f32.mrf.mxu1 }
 0x7e7   :  { %v3024_v33 = vsel %vm252_vm2, %v17113_v29, -inf }
 0x7e8   :  { %3025 = vmax.xlane.f32.xlu1 %v3024_v33  ;;  %v21171_v38 = vpop.f32.mrf.mxu1 }
 0x7e9   :  { %v3021_v36 = vsel %vm252_vm2, %v21171_v38, -inf }
 0x7ea   :  { %3022 = vmax.xlane.f32.xlu0 %v3021_v36  ;;  %v21175_v50 = vpop.f32.mrf.mxu1 }
 0x7eb   :  { %v3030_v39 = vsel %vm252_vm2, %v21175_v50, -inf }
 0x7ec   :  { %3031 = vmax.xlane.f32.xlu1 %v3030_v39  ;;  %v21179_v43 = vpop.f32.mrf.mxu1 }
 0x7ed   :  { %v3027_v58 = vsel %vm252_vm2, %v21179_v43, -inf }
 0x7ee   :  { %3028 = vmax.xlane.f32.xlu0 %v3027_v58  ;;  %v21183_v25 = vpop.f32.mrf.mxu1 }
 0x7ef   :  { %v3036_v33 = vsel %vm252_vm2, %v21183_v25, -inf }
 0x7f0   :  { %3037 = vmax.xlane.f32.xlu1 %v3036_v33  ;;  %v21187_v34 = vpop.f32.mrf.mxu1 }
 0x7f1   :  { %v3033_v36 = vsel %vm252_vm2, %v21187_v34, -inf }
 0x7f2   :  { %3034 = vmax.xlane.f32.xlu0 %v3033_v36  ;;  %v21191_v8 = vpop.f32.mrf.mxu1 }
 0x7f3   :  { %v3042_v39 = vsel %vm252_vm2, %v21191_v8, -inf }
 0x7f4   :  { %3043 = vmax.xlane.f32.xlu1 %v3042_v39  ;;  %v21195_v21 = vpop.f32.mrf.mxu1 }
 0x7f5   :  { %v3039_v58 = vsel %vm252_vm2, %v21195_v21, -inf }
 0x7f6   :  { %3040 = vmax.xlane.f32.xlu0 %v3039_v58 }
 0x861   :  { %v2656_v48 = vpop.xlane.xlu1 %2655 }
 0x862   :  { %v2676_v33 = vsub.f32 %v17057_v17, %v2656_v48 }
 0x863   :  { %v2653_v6 = vpop.xlane.xlu0 %2652 }
 0x864   :  { %v2685_v23 = vmul.f32 1.442695, %v2676_v33  ;;  %v2675_v47 = vsub.f32 %v2612_v3, %v2653_v6 }
 0x865   :  { %v2662_v62 = vpop.xlane.xlu1 %2661 }
 0x866   :  { %19145 = vpow2.f32 %v2685_v23  ;;  %v2683_v36 = vmul.f32 1.442695, %v2675_v47  ;;  %v2678_v49 = vsub.f32 %v17060_v54, %v2662_v62 }
 0x867   :  { %v2659_v0 = vpop.xlane.xlu0 %2658 }
 0x868   :  { %19147 = vpow2.f32 %v2683_v36  ;;  %v2689_v5 = vmul.f32 1.442695, %v2678_v49  ;;  %v2677_v1 = vsub.f32 %v2622_v13, %v2659_v0 }
 0x869   :  { %v2668_v39 = vpop.xlane.xlu1 %2667 }
 0x86a   :  { %19149 = vpow2.f32 %v2689_v5  ;;  %v2687_v51 = vmul.f32 1.442695, %v2677_v1  ;;  %v2680_v35 = vsub.f32 %v17063_v19, %v2668_v39 }
 0x86b   :  { %v2665_v26 = vpop.xlane.xlu0 %2664 }
 0x86c   :  { %19151 = vpow2.f32 %v2687_v51  ;;  %v2693_v58 = vmul.f32 1.442695, %v2680_v35  ;;  %v2679_v55 = vsub.f32 %v2632_v44, %v2665_v26 }
 0x86d   :  { %v2674_v48 = vpop.xlane.xlu1 %2673 }
 0x86e   :  { %19153 = vpow2.f32 %v2693_v58  ;;  %v2691_v17 = vmul.f32 1.442695, %v2679_v55  ;;  %v2682_v6 = vsub.f32 %v17066_v15, %v2674_v48 }
 0x86f   :  { %v2671_v3 = vpop.xlane.xlu0 %2670 }
 0x870   :  { %19155 = vpow2.f32 %v2691_v17  ;;  %v2697_v23 = vmul.f32 1.442695, %v2682_v6  ;;  %v2681_v47 = vsub.f32 %v2642_v53, %v2671_v3 }
 0x871   :  { %v3026_v62 = vpop.xlane.xlu1 %3025 }
 0x872   :  { %19157 = vpow2.f32 %v2697_v23  ;;  %v2695_v49 = vmul.f32 1.442695, %v2681_v47  ;;  %v3046_v0 = vsub.f32 %v17113_v29, %v3026_v62 }
 0x873   :  { %v21199_v54 = vpop.eup %19145  ;;  %v3023_v1 = vpop.xlane.xlu0 %3022 }
 0x874   :  { %19159 = vpow2.f32 %v2695_v49  ;;  %v3055_v5 = vmul.f32 1.442695, %v3046_v0  ;;  %v3045_v35 = vsub.f32 %v21171_v38, %v3023_v1  ;;  %v2702_v26 = vsel %vm252_vm2, %v21199_v54, 0.0 }
 0x875   :  { %v21204_v55 = vpop.eup %19147  ;;  %v3032_v51 = vpop.xlane.xlu1 %3031  ;;  %2703 = vadd.xlane.f32.xlu1 %v2702_v26 }
 0x876   :  { %19161 = vpow2.f32 %v3055_v5  ;;  %v3053_v13 = vmul.f32 1.442695, %v3045_v35  ;;  %v3048_v19 = vsub.f32 %v21175_v50, %v3032_v51  ;;  %v2699_v29 = vsel %vm252_vm2, %v21204_v55, 0.0 }
 0x877   :  { %v21209_v44 = vpop.eup %19149  ;;  %v3029_v15 = vpop.xlane.xlu0 %3028  ;;  %2700 = vadd.xlane.f32.xlu0 %v2699_v29 }
 0x878   :  { %19163 = vpow2.f32 %v3053_v13  ;;  %v3059_v38 = vmul.f32 1.442695, %v3048_v19  ;;  %v3047_v53 = vsub.f32 %v21179_v43, %v3029_v15  ;;  %v2708_v33 = vsel %vm252_vm2, %v21209_v44, 0.0 }
 0x879   :  { %v21214_v36 = vpop.eup %19151  ;;  %v3038_v39 = vpop.xlane.xlu1 %3037  ;;  %2709 = vadd.xlane.f32.xlu1 %v2708_v33 }
 0x87a   :  { %19165 = vpow2.f32 %v3059_v38  ;;  %v3057_v50 = vmul.f32 1.442695, %v3047_v53  ;;  %v3050_v58 = vsub.f32 %v21183_v25, %v3038_v39  ;;  %v2705_v48 = vsel %vm252_vm2, %v21214_v36, 0.0 }
 0x87b   :  { %v21219_v17 = vpop.eup %19153  ;;  %v3035_v6 = vpop.xlane.xlu0 %3034  ;;  %2706 = vadd.xlane.f32.xlu0 %v2705_v48 }
 0x87c   :  { %19167 = vpow2.f32 %v3057_v50  ;;  %v3063_v43 = vmul.f32 1.442695, %v3050_v58  ;;  %v3049_v3 = vsub.f32 %v21187_v34, %v3035_v6  ;;  %v2714_v23 = vsel %vm252_vm2, %v21219_v17, 0.0 }
 0x87d   :  { %v21224_v47 = vpop.eup %19155  ;;  %2715 = vadd.xlane.f32.xlu1 %v2714_v23  ;;  %v3044_v62 = vpop.xlane.xlu1 %3043 }
 0x87e   :  { %19169 = vpow2.f32 %v3063_v43  ;;  %v3061_v25 = vmul.f32 1.442695, %v3049_v3  ;;  %v3052_v49 = vsub.f32 %v21191_v8, %v3044_v62  ;;  %v2711_v0 = vsel %vm252_vm2, %v21224_v47, 0.0 }
 0x87f   :  { %v21229_v1 = vpop.eup %19157  ;;  %2712 = vadd.xlane.f32.xlu0 %v2711_v0  ;;  %v3041_v5 = vpop.xlane.xlu0 %3040 }
 0x880   :  { %19171 = vpow2.f32 %v3061_v25  ;;  %v3067_v34 = vmul.f32 1.442695, %v3052_v49  ;;  %v3051_v35 = vsub.f32 %v21195_v21, %v3041_v5  ;;  %v2720_v26 = vsel %vm252_vm2, %v21229_v1, 0.0  ;;  %v14342_v25 = vld [vmem:[%s25422_s5 + $0x18] sm:$0xff]  ;;  %v14341_v49 = vld [vmem:[%s25422_s5 + $0x10] sm:$0xff] }
 0x881   :  { %v21234_v51 = vpop.eup %19159  ;;  %2721 = vadd.xlane.f32.xlu1 %v2720_v26  ;;  %17151 = vmatprep.subr.mxu1 %v14342_v25 }
 0x882   :  { %19173 = vpow2.f32 %v3067_v34  ;;  %v3065_v13 = vmul.f32 1.442695, %v3051_v35  ;;  %v2717_v8 = vsel %vm252_vm2, %v21234_v51, 0.0  ;;  %17152 = vmatpush3.msra.mxu1 %v14342_v25 }
 0x883   :  { %v21238_v19 = vpop.eup %19161  ;;  %2718 = vadd.xlane.f32.xlu0 %v2717_v8  ;;  %17153 = vmatprep.subr.mxu1 %v14341_v49 }
 0x884   :  { %19175 = vpow2.f32 %v3065_v13  ;;  %v3072_v29 = vsel %vm252_vm2, %v21238_v19, 0.0  ;;  %17154 = vmatpush3.msra.mxu1 %v14341_v49 }
 0x885   :  { %v21242_v15 = vpop.eup %19163  ;;  %3073 = vadd.xlane.f32.xlu1 %v3072_v29 }
 0x886   :  { %v3069_v21 = vsel %vm252_vm2, %v21242_v15, 0.0 }
 0x887   :  { %v21246_v38 = vpop.eup %19165  ;;  %3070 = vadd.xlane.f32.xlu0 %v3069_v21 }
 0x888   :  { %v3078_v53 = vsel %vm252_vm2, %v21246_v38, 0.0 }
 0x889   :  { %v21250_v33 = vpop.eup %19167  ;;  %3079 = vadd.xlane.f32.xlu1 %v3078_v53 }
 0x88a   :  { %v3075_v39 = vsel %vm252_vm2, %v21250_v33, 0.0 }
 0x88b   :  { %v21254_v50 = vpop.eup %19169  ;;  %3076 = vadd.xlane.f32.xlu0 %v3075_v39 }
 0x88c   :  { %v3084_v58 = vsel %vm252_vm2, %v21254_v50, 0.0 }
 0x88d   :  { %v21258_v48 = vpop.eup %19171  ;;  %3085 = vadd.xlane.f32.xlu1 %v3084_v58 }
 0x88e   :  { %v3081_v6 = vsel %vm252_vm2, %v21258_v48, 0.0 }
 0x88f   :  { %v21262_v43 = vpop.eup %19173  ;;  %3082 = vadd.xlane.f32.xlu0 %v3081_v6 }
 0x890   :  { %v3090_v3 = vsel %vm252_vm2, %v21262_v43, 0.0 }
 0x891   :  { %v21266_v23 = vpop.eup %19175  ;;  %3091 = vadd.xlane.f32.xlu1 %v3090_v3 }
 0x892   :  { %v3087_v62 = vsel %vm252_vm2, %v21266_v23, 0.0 }
 0x893   :  { %3088 = vadd.xlane.f32.xlu0 %v3087_v62 }
 0x8fe   :  { %v2704_v0 = vpop.xlane.xlu1 %2703 }
 0x8ff   :  { %19177 = vrcp.f32 %v2704_v0 }
 0x900   :  { %v2701_v5 = vpop.xlane.xlu0 %2700 }
 0x901   :  { %19179 = vrcp.f32 %v2701_v5 }
 0x902   :  { %v2710_v34 = vpop.xlane.xlu1 %2709 }
 0x903   :  { %19181 = vrcp.f32 %v2710_v34 }
 0x904   :  { %v2707_v35 = vpop.xlane.xlu0 %2706 }
 0x905   :  { %19183 = vrcp.f32 %v2707_v35 }
 0x906   :  { %v2716_v26 = vpop.xlane.xlu1 %2715 }
 0x907   :  { %19185 = vrcp.f32 %v2716_v26 }
 0x908   :  { %v2713_v13 = vpop.xlane.xlu0 %2712 }
 0x909   :  { %19187 = vrcp.f32 %v2713_v13 }
 0x90a   :  { %v2722_v8 = vpop.xlane.xlu1 %2721 }
 0x90b   :  { %19189 = vrcp.f32 %v2722_v8 }
 0x90c   :  { %v2719_v29 = vpop.xlane.xlu0 %2718  ;;  %v19178_v21 = vpop.eup %19177 }
 0x90d   :  { %19191 = vrcp.f32 %v2719_v29  ;;  %v2726_v6 = vmul.f32 %v19178_v21, %v21199_v54  ;;  %v2034_v29 = vld [vmem:[%s25422_s5] sm:$0xff] }
 0x90e   :  { %v19180_v53 = vpop.eup %19179  ;;  %v3074_v39 = vpop.xlane.xlu1 %3073 }
 0x90f   :  { %v2724_v58 = vmul.f32 %v19180_v53, %v21204_v55  ;;  %19193 = vrcp.f32 %v3074_v39 }
 0x910   :  { %v3071_v3 = vpop.xlane.xlu0 %3070  ;;  %v19182_v62 = vpop.eup %19181 }
 0x911   :  { %19195 = vrcp.f32 %v3071_v3  ;;  %17083 = vmatprep.mubr.msk.f32.mxu0 %vm252_vm2, %v2724_v58  ;;  %v2730_v54 = vmul.f32 %v19182_v62, %v21209_v44 }
 0x912   :  { %v19184_v25 = vpop.eup %19183  ;;  %v3080_v49 = vpop.xlane.xlu1 %3079  ;;  %17084 = vmatmul.mubr.msk.f32.vlgmr.msra.gmra.mxu0 %vm252_vm2, %v2726_v6 }
 0x913   :  { %17124 = vmatpush3.msra.mxu0 %v21157_v61  ;;  %v2728_v0 = vmul.f32 %v19184_v25, %v21214_v36  ;;  %19197 = vrcp.f32 %v3080_v49  ;;  %v14380_v25 = vld [vmem:[%s25421_s4 + $0xa8] sm:$0xff] }
 0x914   :  { %17125 = vmatprep.subr.mxu0 %v21167_v10  ;;  %v3077_v55 = vpop.xlane.xlu0 %3076  ;;  %v19186_v5 = vpop.eup %19185 }
 0x915   :  { %17126 = vmatpush3.msra.mxu0 %v21167_v10  ;;  %19199 = vrcp.f32 %v3077_v55  ;;  %17086 = vmatprep.mubr.msk.f32.mxu0 %vm252_vm2, %v2728_v0  ;;  %v2734_v36 = vmul.f32 %v19186_v5, %v21219_v17  ;;  %v14379_v0 = vld [vmem:[%s25421_s4 + $0xa0] sm:$0xff] }
 0x916   :  { %v19188_v34 = vpop.eup %19187  ;;  %17127 = vmatprep.subr.mxu0 %v21153_v4  ;;  %v3086_v35 = vpop.xlane.xlu1 %3085  ;;  %17087 = vmatmul.mubr.msk.f32.gmra.mxu0 %vm252_vm2, %v2730_v54  ;;  %v14378_v54 = vld [vmem:[%s25421_s4 + $0x98] sm:$0xff] }
 0x917   :  { %17128 = vmatpush3.msra.mxu0 %v21153_v4  ;;  %v2732_v61 = vmul.f32 %v19188_v34, %v21224_v47  ;;  %19201 = vrcp.f32 %v3086_v35  ;;  %v14377_v34 = vld [vmem:[%s25421_s4 + $0x90] sm:$0xff] }
 0x918   :  { %17129 = vmatprep.subr.mxu0 %v21155_v27  ;;  %v3083_v44 = vpop.xlane.xlu0 %3082  ;;  %v19190_v10 = vpop.eup %19189 }
 0x919   :  { %17130 = vmatpush3.msra.mxu0 %v21155_v27  ;;  %19203 = vrcp.f32 %v3083_v44  ;;  %17089 = vmatprep.mubr.msk.f32.mxu0 %vm252_vm2, %v2732_v61  ;;  %v2738_v47 = vmul.f32 %v19190_v10, %v21229_v1  ;;  %v14376_v61 = vld [vmem:[%s25421_s4 + $0x88] sm:$0xff] }
 0x91a   :  { %v19192_v26 = vpop.eup %19191  ;;  %17131 = vmatprep.subr.mxu0 %v21149_v30  ;;  %v3092_v13 = vpop.xlane.xlu1 %3091  ;;  %17090 = vmatmul.mubr.msk.f32.gmra.mxu0 %vm252_vm2, %v2734_v36  ;;  %v14375_v36 = vld [vmem:[%s25421_s4 + $0x80] sm:$0xff] }
 0x91b   :  { %17132 = vmatpush3.msra.mxu0 %v21149_v30  ;;  %v2736_v4 = vmul.f32 %v19192_v26, %v21234_v51  ;;  %19205 = vrcp.f32 %v3092_v13  ;;  %v2035_v51 = vld [vmem:[%s25422_s5 + $0x8] sm:$0xff]  ;;  %v14430_v26 = vld [vmem:[%s25421_s4 + $0x4b8] sm:$0xff] }
 0x91c   :  { %17133 = vmatprep.subr.mxu0 %v21151_v22  ;;  %v3089_v17 = vpop.xlane.xlu0 %3088  ;;  %v19194_v27 = vpop.eup %19193 }
 0x91d   :  { %17134 = vmatpush3.msra.mxu0 %v21151_v22  ;;  %19207 = vrcp.f32 %v3089_v17  ;;  %17092 = vmatprep.mubr.msk.f32.mxu0 %vm252_vm2, %v2736_v4  ;;  %v3096_v1 = vmul.f32 %v19194_v27, %v21238_v19  ;;  %v14406_v19 = vld [vmem:[%s25421_s4 + $0x2b8] sm:$0xff] }
 0x91e   :  { %v19196_v8 = vpop.eup %19195  ;;  %17135 = vmatprep.subr.mxu0 %v21145_v31  ;;  %17093 = vmatmul.mubr.msk.f32.gmra.mxu0 %vm252_vm2, %v2738_v47 }
 0x91f   :  { %17136 = vmatpush3.msra.mxu0 %v21145_v31  ;;  %v3094_v30 = vmul.f32 %v19196_v8, %v21242_v15 }
 0x920   :  { %17137 = vmatprep.subr.mxu0 %v21147_v37  ;;  %v19198_v22 = vpop.eup %19197 }
 0x921   :  { %17138 = vmatpush3.msra.mxu0 %v21147_v37  ;;  %17139 = vmatprep.mubr.msk.f32.mxu0 %vm252_vm2, %v3094_v30  ;;  %v3100_v21 = vmul.f32 %v19198_v22, %v21246_v38  ;;  %v14429_v22 = vld [vmem:[%s25421_s4 + $0x4b0] sm:$0xff] }
 0x922   :  { %v19200_v31 = vpop.eup %19199  ;;  %17140 = vmatmul.mubr.msk.f32.vlgmr.msra.gmra.mxu0 %vm252_vm2, %v3096_v1  ;;  %17179 = vmatprep.subr.mxu0 %v2035_v51 }
 0x923   :  { %v3098_v15 = vmul.f32 %v19200_v31, %v21250_v33  ;;  %17180 = vmatpush3.msra.mxu0 %v2035_v51  ;;  %v14428_v31 = vld [vmem:[%s25421_s4 + $0x4a8] sm:$0xff] }
 0x924   :  { %17181 = vmatprep.subr.mxu0 %v2034_v29  ;;  %v19202_v37 = vpop.eup %19201 }
 0x925   :  { %17142 = vmatprep.mubr.msk.f32.mxu0 %vm252_vm2, %v3098_v15  ;;  %17182 = vmatpush3.msra.mxu0 %v2034_v29  ;;  %v3104_v33 = vmul.f32 %v19202_v37, %v21254_v50  ;;  %v14405_v50 = vld [vmem:[%s25421_s4 + $0x2b0] sm:$0xff]  ;;  %v14426_v37 = vld [vmem:[%s25421_s4 + $0x498] sm:$0xff] }
 0x926   :  { %v19204_v53 = vpop.eup %19203  ;;  %17143 = vmatmul.mubr.msk.f32.gmra.mxu0 %vm252_vm2, %v3100_v21  ;;  %17247 = vmatprep.subr.mxu0 %v14406_v19 }
 0x927   :  { %v3102_v39 = vmul.f32 %v19204_v53, %v21258_v48  ;;  %v14404_v48 = vld [vmem:[%s25421_s4 + $0x2a8] sm:$0xff] }
 0x928   :  { %v19206_v58 = vpop.eup %19205 }
 0x929   :  { %17145 = vmatprep.mubr.msk.f32.mxu0 %vm252_vm2, %v3102_v39  ;;  %v3108_v3 = vmul.f32 %v19206_v58, %v21262_v43  ;;  %v14425_v39 = vld [vmem:[%s25421_s4 + $0x490] sm:$0xff]  ;;  %v14424_v58 = vld [vmem:[%s25421_s4 + $0x488] sm:$0xff] }
 0x92a   :  { %v19208_v6 = vpop.eup %19207  ;;  %17146 = vmatmul.mubr.msk.f32.gmra.mxu0 %vm252_vm2, %v3104_v33 }
 0x92b   :  { %v3106_v38 = vmul.f32 %v19208_v6, %v21266_v23  ;;  %v14381_v23 = vld [vmem:[%s25421_s4 + $0xb0] sm:$0xff] }
 0x92d   :  { %17148 = vmatprep.mubr.msk.f32.mxu0 %vm252_vm2, %v3106_v38  ;;  %v14423_v38 = vld [vmem:[%s25421_s4 + $0x480] sm:$0xff] }
 0x92e   :  { %17149 = vmatmul.mubr.msk.f32.gmra.mxu0 %vm252_vm2, %v3108_v3 }
 0x92f   :  { %17183 = vmatprep.mubr.msk.f32.mxu0 %vm1293_vm3, %v21099_v16  ;;  %v14403_v16 = vld [vmem:[%s25421_s4 + $0x2a0] sm:$0xff] }
 0x932   :  { %17184 = vmatmul.mubr.msk.f32.vlgmr.msra.gmra.mxu0 %vm1293_vm3, %v21097_v2  ;;  %v14402_v2 = vld [vmem:[%s25421_s4 + $0x298] sm:$0xff] }
 0x933   :  { %17186 = vmatprep.mubr.msk.f32.mxu0 %vm1293_vm3, %v21103_v11  ;;  %17248 = vmatpush3.msra.mxu0 %v14406_v19  ;;  %v14401_v11 = vld [vmem:[%s25421_s4 + $0x290] sm:$0xff]  ;;  %v14427_v19 = vld [vmem:[%s25421_s4 + $0x4a0] sm:$0xff] }
 0x934   :  { %17249 = vmatprep.subr.mxu0 %v14405_v50 }
 0x935   :  { %17250 = vmatpush3.msra.mxu0 %v14405_v50 }
 0x936   :  { %17187 = vmatmul.mubr.msk.f32.gmra.mxu0 %vm1293_vm3, %v21101_v24  ;;  %17251 = vmatprep.subr.mxu0 %v14404_v48  ;;  %v14400_v24 = vld [vmem:[%s25421_s4 + $0x288] sm:$0xff] }
 0x937   :  { %17189 = vmatprep.mubr.msk.f32.mxu0 %vm1293_vm3, %v21107_v45  ;;  %17252 = vmatpush3.msra.mxu0 %v14404_v48  ;;  %v14399_v45 = vld [vmem:[%s25421_s4 + $0x280] sm:$0xff] }
 0x938   :  { %17253 = vmatprep.subr.mxu0 %v14403_v16 }
 0x939   :  { %17254 = vmatpush3.msra.mxu0 %v14403_v16 }
 0x93a   :  { %17190 = vmatmul.mubr.msk.f32.gmra.mxu0 %vm1293_vm3, %v21105_v14  ;;  %17255 = vmatprep.subr.mxu0 %v14402_v2  ;;  %v14382_v14 = vld [vmem:[%s25421_s4 + $0xb8] sm:$0xff] }
 0x93b   :  { %17192 = vmatprep.mubr.msk.f32.mxu0 %vm1293_vm3, %v21111_v57  ;;  %17256 = vmatpush3.msra.mxu0 %v14402_v2  ;;  %v25520_v57 = vld [vmem:[#allocation22_spill] sm:$0xff] }
 0x93c   :  { %17257 = vmatprep.subr.mxu0 %v14401_v11  ;;  %17207 = vmatprep.subr.mxu1 %v14382_v14 }
 0x93d   :  { %17258 = vmatpush3.msra.mxu0 %v14401_v11 }
 0x93e   :  { %17193 = vmatmul.mubr.msk.f32.gmra.mxu0 %vm1293_vm3, %v21109_v7  ;;  %17259 = vmatprep.subr.mxu0 %v14400_v24  ;;  %v25519_v7 = vld [vmem:[#allocation21_spill] sm:$0xff] }
 0x93f   :  { %17195 = vmatprep.mubr.msk.f32.mxu0 %vm1293_vm3, %v21115_v52  ;;  %17260 = vmatpush3.msra.mxu0 %v14400_v24  ;;  %v25522_v52 = vld [vmem:[#allocation24_spill] sm:$0xff] }
 0x940   :  { %17261 = vmatprep.subr.mxu0 %v14399_v45 }
 0x941   :  { %17262 = vmatpush3.msra.mxu0 %v14399_v45 }
 0x942   :  { %17196 = vmatmul.mubr.msk.f32.gmra.mxu0 %vm1293_vm3, %v21113_v46  ;;  %v25521_v46 = vld [vmem:[#allocation23_spill] sm:$0xff] }
 0x943   :  { %17198 = vmatprep.mubr.msk.f32.mxu0 %vm1293_vm3, %v21119_v41  ;;  %v25524_v41 = vld [vmem:[#allocation26_spill] sm:$0xff] }
 0x946   :  { %17199 = vmatmul.mubr.msk.f32.gmra.mxu0 %vm1293_vm3, %v21117_v32  ;;  %v25523_v32 = vld [vmem:[#allocation25_spill] sm:$0xff] }
 0x947   :  { %17201 = vmatprep.mubr.msk.f32.mxu0 %vm1293_vm3, %v21123_v9  ;;  %v25526_v9 = vld [vmem:[#allocation28_spill] sm:$0xff] }
 0x94a   :  { %17202 = vmatmul.mubr.msk.f32.gmra.mxu0 %vm1293_vm3, %v21121_v42  ;;  %v25525_v42 = vld [vmem:[#allocation27_spill] sm:$0xff] }
 0x94b   :  { %17204 = vmatprep.mubr.msk.f32.mxu0 %vm1293_vm3, %v21127_v18 }
 0x94e   :  { %17205 = vmatmul.mubr.msk.f32.gmra.mxu0 %vm1293_vm3, %v21125_v28  ;;  %v25527_v28 = vld [vmem:[#allocation29_spill] sm:$0xff] }
 0x94f   :  { %17263 = vmatprep.mubr.msk.f32.mxu0 %vm252_vm2, %v20389_v63 }
 0x952   :  { %17264 = vmatmul.mubr.msk.f32.vlgmr.msra.gmra.mxu0 %vm252_vm2, %v20400_v40 }
 0x953   :  { %17266 = vmatprep.mubr.msk.f32.mxu0 %vm252_vm2, %v20404_v60 }
 0x956   :  { %17267 = vmatmul.mubr.msk.f32.gmra.mxu0 %vm252_vm2, %v20421_v20 }
 0x957   :  { %17269 = vmatprep.mubr.msk.f32.mxu0 %vm252_vm2, %v20426_v59 }
 0x95a   :  { %17270 = vmatmul.mubr.msk.f32.gmra.mxu0 %vm252_vm2, %v20443_v12 }
 0x95b   :  { %17272 = vmatprep.mubr.msk.f32.mxu0 %vm252_vm2, %v20447_v56 }
 0x95e   :  { %17273 = vmatmul.mubr.msk.f32.gmra.mxu0 %vm252_vm2, %v25519_v7 }
 0x95f   :  { %17275 = vmatprep.mubr.msk.f32.mxu0 %vm252_vm2, %v25520_v57 }
 0x962   :  { %17276 = vmatmul.mubr.msk.f32.gmra.mxu0 %vm252_vm2, %v25521_v46 }
 0x963   :  { %17278 = vmatprep.mubr.msk.f32.mxu0 %vm252_vm2, %v25522_v52 }
 0x966   :  { %17279 = vmatmul.mubr.msk.f32.gmra.mxu0 %vm252_vm2, %v25523_v32 }
 0x967   :  { %17281 = vmatprep.mubr.msk.f32.mxu0 %vm252_vm2, %v25524_v41 }
 0x96a   :  { %17282 = vmatmul.mubr.msk.f32.gmra.mxu0 %vm252_vm2, %v25525_v42 }
 0x96b   :  { %17284 = vmatprep.mubr.msk.f32.mxu0 %vm252_vm2, %v25526_v9 }
 0x96e   :  { %17285 = vmatmul.mubr.msk.f32.gmra.mxu0 %vm252_vm2, %v25527_v28 }
 0x9d2   :  { %v17085_v18 = vpop.f32.mrf.mxu0 }
 0x9d4   :  { %v2829_v43 = vpop.f32.mrf.mxu0 }
 0x9d5   :  { %17155 = vmatprep.mubr.msk.f32.mxu1 %vm1293_vm3, %v2829_v43 }
 0x9d6   :  { %v17088_v62 = vpop.f32.mrf.mxu0  ;;  %17156 = vmatmul.mubr.msk.f32.vlgmr.msra.gmra.mxu1 %vm1293_vm3, %v17085_v18 }
 0x9d7   :  { %17208 = vmatpush3.msra.mxu1 %v14382_v14 }
 0x9d8   :  { %v2839_v49 = vpop.f32.mrf.mxu0  ;;  %17209 = vmatprep.subr.mxu1 %v14381_v23 }
 0x9d9   :  { %17158 = vmatprep.mubr.msk.f32.mxu1 %vm1293_vm3, %v2839_v49  ;;  %17210 = vmatpush3.msra.mxu1 %v14381_v23 }
 0x9da   :  { %v17091_v55 = vpop.f32.mrf.mxu0  ;;  %17159 = vmatmul.mubr.msk.f32.gmra.mxu1 %vm1293_vm3, %v17088_v62  ;;  %17211 = vmatprep.subr.mxu1 %v14380_v25 }
 0x9db   :  { %17212 = vmatpush3.msra.mxu1 %v14380_v25 }
 0x9dc   :  { %v2849_v5 = vpop.f32.mrf.mxu0  ;;  %17213 = vmatprep.subr.mxu1 %v14379_v0 }
 0x9dd   :  { %17161 = vmatprep.mubr.msk.f32.mxu1 %vm1293_vm3, %v2849_v5  ;;  %17214 = vmatpush3.msra.mxu1 %v14379_v0 }
 0x9de   :  { %v17094_v35 = vpop.f32.mrf.mxu0  ;;  %17162 = vmatmul.mubr.msk.f32.gmra.mxu1 %vm1293_vm3, %v17091_v55  ;;  %17215 = vmatprep.subr.mxu1 %v14378_v54 }
 0x9df   :  { %17216 = vmatpush3.msra.mxu1 %v14378_v54 }
 0x9e0   :  { %v2859_v44 = vpop.f32.mrf.mxu0  ;;  %17217 = vmatprep.subr.mxu1 %v14377_v34 }
 0x9e1   :  { %17164 = vmatprep.mubr.msk.f32.mxu1 %vm1293_vm3, %v2859_v44  ;;  %17218 = vmatpush3.msra.mxu1 %v14377_v34 }
 0x9e2   :  { %v17141_v10 = vpop.f32.mrf.mxu0  ;;  %17165 = vmatmul.mubr.msk.f32.gmra.mxu1 %vm1293_vm3, %v17094_v35  ;;  %17219 = vmatprep.subr.mxu1 %v14376_v61 }
 0x9e3   :  { %17220 = vmatpush3.msra.mxu1 %v14376_v61 }
 0x9e4   :  { %v3199_v13 = vpop.f32.mrf.mxu0  ;;  %17221 = vmatprep.subr.mxu1 %v14375_v36 }
 0x9e5   :  { %17167 = vmatprep.mubr.msk.f32.mxu1 %vm1293_vm3, %v3199_v13  ;;  %17222 = vmatpush3.msra.mxu1 %v14375_v36 }
 0x9e6   :  { %v17144_v4 = vpop.f32.mrf.mxu0  ;;  %17168 = vmatmul.mubr.msk.f32.gmra.mxu1 %vm1293_vm3, %v17141_v10  ;;  %17287 = vmatprep.subr.mxu1 %v14430_v26 }
 0x9e8   :  { %v3209_v17 = vpop.f32.mrf.mxu0 }
 0x9e9   :  { %17170 = vmatprep.mubr.msk.f32.mxu1 %vm1293_vm3, %v3209_v17 }
 0x9ea   :  { %v17147_v47 = vpop.f32.mrf.mxu0  ;;  %17171 = vmatmul.mubr.msk.f32.gmra.mxu1 %vm1293_vm3, %v17144_v4 }
 0x9ec   :  { %v3219_v27 = vpop.f32.mrf.mxu0 }
 0x9ed   :  { %17173 = vmatprep.mubr.msk.f32.mxu1 %vm1293_vm3, %v3219_v27 }
 0x9ee   :  { %v17150_v8 = vpop.f32.mrf.mxu0  ;;  %17174 = vmatmul.mubr.msk.f32.gmra.mxu1 %vm1293_vm3, %v17147_v47 }
 0x9f0   :  { %v3229_v30 = vpop.f32.mrf.mxu0 }
 0x9f1   :  { %17176 = vmatprep.mubr.msk.f32.mxu1 %vm1293_vm3, %v3229_v30 }
 0x9f2   :  { %17177 = vmatmul.mubr.msk.f32.gmra.mxu1 %vm1293_vm3, %v17150_v8  ;;  %v21460_v51 = vpop.f32.mrf.mxu0 }
 0x9f3   :  { %17223 = vmatprep.mubr.msk.f32.mxu1 %vm252_vm2, %v20389_v63 }
 0x9f4   :  { %v21464_v1 = vpop.f32.mrf.mxu0 }
 0x9f5   :  { %25528 = vst [vmem:[#allocation21_spill] sm:$0xff] %v21464_v1 }
 0x9f6   :  { %v21469_v29 = vpop.f32.mrf.mxu0  ;;  %17224 = vmatmul.mubr.msk.f32.vlgmr.msra.gmra.mxu1 %vm252_vm2, %v20400_v40 }
 0x9f7   :  { %17226 = vmatprep.mubr.msk.f32.mxu1 %vm252_vm2, %v20404_v60  ;;  %17288 = vmatpush3.msra.mxu1 %v14430_v26 }
 0x9f8   :  { %v21478_v15 = vpop.f32.mrf.mxu0  ;;  %17289 = vmatprep.subr.mxu1 %v14429_v22 }
 0x9f9   :  { %25529 = vst [vmem:[#allocation22_spill] sm:$0xff] %v21478_v15  ;;  %17290 = vmatpush3.msra.mxu1 %v14429_v22 }
 0x9fa   :  { %v21483_v21 = vpop.f32.mrf.mxu0  ;;  %17227 = vmatmul.mubr.msk.f32.gmra.mxu1 %vm252_vm2, %v20421_v20  ;;  %17291 = vmatprep.subr.mxu1 %v14428_v31 }
 0x9fb   :  { %17229 = vmatprep.mubr.msk.f32.mxu1 %vm252_vm2, %v20426_v59  ;;  %17292 = vmatpush3.msra.mxu1 %v14428_v31 }
 0x9fc   :  { %v21492_v53 = vpop.f32.mrf.mxu0  ;;  %17293 = vmatprep.subr.mxu1 %v14427_v19 }
 0x9fd   :  { %25530 = vst [vmem:[#allocation23_spill] sm:$0xff] %v21492_v53  ;;  %17294 = vmatpush3.msra.mxu1 %v14427_v19 }
 0x9fe   :  { %v21497_v33 = vpop.f32.mrf.mxu0  ;;  %17230 = vmatmul.mubr.msk.f32.gmra.mxu1 %vm252_vm2, %v20443_v12  ;;  %17295 = vmatprep.subr.mxu1 %v14426_v37 }
 0x9ff   :  { %25531 = vst [vmem:[#allocation24_spill] sm:$0xff] %v21497_v33  ;;  %17232 = vmatprep.mubr.msk.f32.mxu1 %vm252_vm2, %v20447_v56  ;;  %17296 = vmatpush3.msra.mxu1 %v14426_v37 }
 0xa00   :  { %v21506_v6 = vpop.f32.mrf.mxu0  ;;  %17297 = vmatprep.subr.mxu1 %v14425_v39 }
 0xa01   :  { %25532 = vst [vmem:[#allocation25_spill] sm:$0xff] %v21506_v6  ;;  %17298 = vmatpush3.msra.mxu1 %v14425_v39 }
 0xa02   :  { %v21511_v3 = vpop.f32.mrf.mxu0  ;;  %17233 = vmatmul.mubr.msk.f32.gmra.mxu1 %vm252_vm2, %v25519_v7  ;;  %17299 = vmatprep.subr.mxu1 %v14424_v58 }
 0xa03   :  { %25533 = vst [vmem:[#allocation26_spill] sm:$0xff] %v21511_v3  ;;  %17235 = vmatprep.mubr.msk.f32.mxu1 %vm252_vm2, %v25520_v57  ;;  %17300 = vmatpush3.msra.mxu1 %v14424_v58 }
 0xa04   :  { %v21517_v50 = vpop.f32.mrf.mxu0  ;;  %17301 = vmatprep.subr.mxu1 %v14423_v38 }
 0xa05   :  { %25534 = vst [vmem:[#allocation27_spill] sm:$0xff] %v21517_v50  ;;  %17302 = vmatpush3.msra.mxu1 %v14423_v38 }
 0xa06   :  { %v21519_v48 = vpop.f32.mrf.mxu0  ;;  %17236 = vmatmul.mubr.msk.f32.gmra.mxu1 %vm252_vm2, %v25521_v46 }
 0xa07   :  { %25535 = vst [vmem:[#allocation28_spill] sm:$0xff] %v21519_v48  ;;  %17238 = vmatprep.mubr.msk.f32.mxu1 %vm252_vm2, %v25522_v52 }
 0xa08   :  { %v21525_v16 = vpop.f32.mrf.mxu0 }
 0xa09   :  { %25536 = vst [vmem:[#allocation29_spill] sm:$0xff] %v21525_v16 }
 0xa0a   :  { %v21527_v2 = vpop.f32.mrf.mxu0  ;;  %17239 = vmatmul.mubr.msk.f32.gmra.mxu1 %vm252_vm2, %v25523_v32 }
 0xa0b   :  { %25537 = vst [vmem:[#allocation30_spill] sm:$0xff] %v21527_v2  ;;  %17241 = vmatprep.mubr.msk.f32.mxu1 %vm252_vm2, %v25524_v41 }
 0xa0c   :  { %v21533_v11 = vpop.f32.mrf.mxu0 }
 0xa0d   :  { %25538 = vst [vmem:[#allocation31_spill] sm:$0xff] %v21533_v11 }
 0xa0e   :  { %v21535_v24 = vpop.f32.mrf.mxu0  ;;  %17242 = vmatmul.mubr.msk.f32.gmra.mxu1 %vm252_vm2, %v25525_v42 }
 0xa0f   :  { %25539 = vst [vmem:[#allocation32_spill] sm:$0xff] %v21535_v24  ;;  %17244 = vmatprep.mubr.msk.f32.mxu1 %vm252_vm2, %v25526_v9 }
 0xa10   :  { %v21541_v45 = vpop.f32.mrf.mxu0 }
 0xa11   :  { %25540 = vst [vmem:[#allocation33_spill] sm:$0xff] %v21541_v45 }
 0xa12   :  { %17245 = vmatmul.mubr.msk.f32.gmra.mxu1 %vm252_vm2, %v25527_v28  ;;  %v17265_v14 = vpop.f32.mrf.mxu0 }
 0xa13   :  { %17303 = vmatprep.mubr.msk.f32.mxu1 %vm252_vm2, %v20389_v63 }
 0xa14   :  { %v3856_v18 = vpop.f32.mrf.mxu0 }
 0xa16   :  { %v17268_v43 = vpop.f32.mrf.mxu0  ;;  %17304 = vmatmul.mubr.msk.f32.vlgmr.msra.gmra.mxu1 %vm252_vm2, %v20400_v40 }
 0xa17   :  { %17306 = vmatprep.mubr.msk.f32.mxu1 %vm252_vm2, %v20404_v60 }
 0xa18   :  { %v3866_v23 = vpop.f32.mrf.mxu0 }
 0xa1a   :  { %v17271_v62 = vpop.f32.mrf.mxu0  ;;  %17307 = vmatmul.mubr.msk.f32.gmra.mxu1 %vm252_vm2, %v20421_v20 }
 0xa1b   :  { %17309 = vmatprep.mubr.msk.f32.mxu1 %vm252_vm2, %v20426_v59 }
 0xa1c   :  { %v3876_v25 = vpop.f32.mrf.mxu0 }
 0xa1e   :  { %v17274_v49 = vpop.f32.mrf.mxu0  ;;  %17310 = vmatmul.mubr.msk.f32.gmra.mxu1 %vm252_vm2, %v20443_v12 }
 0xa1f   :  { %17312 = vmatprep.mubr.msk.f32.mxu1 %vm252_vm2, %v20447_v56  ;;  %17327 = vmatprep.subr.msk.mxu0 %vm1293_vm3, %v17274_v49 }
 0xa20   :  { %v3886_v0 = vpop.f32.mrf.mxu0  ;;  %17328 = vmatpush3.xpose.msk.msra.mxu0 %vm1293_vm3, %v17274_v49 }
 0xa21   :  { %17329 = vmatprep.subr.msk.mxu0 %vm1293_vm3, %v3886_v0 }
 0xa22   :  { %v17277_v55 = vpop.f32.mrf.mxu0  ;;  %17313 = vmatmul.mubr.msk.f32.gmra.mxu1 %vm252_vm2, %v25519_v7 }
 0xa23   :  { %17315 = vmatprep.mubr.msk.f32.mxu1 %vm252_vm2, %v25520_v57 }
 0xa24   :  { %v3896_v54 = vpop.f32.mrf.mxu0  ;;  %17330 = vmatpush3.xpose.msk.msra.mxu0 %vm1293_vm3, %v3886_v0 }
 0xa25   :  { %17331 = vmatprep.subr.msk.mxu0 %vm1293_vm3, %v17271_v62 }
 0xa26   :  { %v17280_v5 = vpop.f32.mrf.mxu0  ;;  %17316 = vmatmul.mubr.msk.f32.gmra.mxu1 %vm252_vm2, %v25521_v46 }
 0xa27   :  { %17318 = vmatprep.mubr.msk.f32.mxu1 %vm252_vm2, %v25522_v52 }
 0xa28   :  { %v3906_v34 = vpop.f32.mrf.mxu0  ;;  %17332 = vmatpush3.xpose.msk.msra.mxu0 %vm1293_vm3, %v17271_v62 }
 0xa29   :  { %17333 = vmatprep.subr.msk.mxu0 %vm1293_vm3, %v3876_v25 }
 0xa2a   :  { %v17283_v35 = vpop.f32.mrf.mxu0  ;;  %17319 = vmatmul.mubr.msk.f32.gmra.mxu1 %vm252_vm2, %v25523_v32 }
 0xa2b   :  { %17321 = vmatprep.mubr.msk.f32.mxu1 %vm252_vm2, %v25524_v41 }
 0xa2c   :  { %v3916_v61 = vpop.f32.mrf.mxu0  ;;  %17334 = vmatpush3.xpose.msk.msra.mxu0 %vm1293_vm3, %v3876_v25 }
 0xa2d   :  { %17335 = vmatprep.subr.msk.mxu0 %vm1293_vm3, %v17268_v43 }
 0xa2e   :  { %v17286_v44 = vpop.f32.mrf.mxu0  ;;  %17322 = vmatmul.mubr.msk.f32.gmra.mxu1 %vm252_vm2, %v25525_v42 }
 0xa2f   :  { %17324 = vmatprep.mubr.msk.f32.mxu1 %vm252_vm2, %v25526_v9  ;;  %17383 = vmatprep.subr.msk.mxu1 %vm1293_vm3, %v17286_v44 }
 0xa30   :  { %v3926_v36 = vpop.f32.mrf.mxu0  ;;  %17336 = vmatpush3.xpose.msk.msra.mxu0 %vm1293_vm3, %v17268_v43  ;;  %17384 = vmatpush3.xpose.msk.msra.mxu1 %vm1293_vm3, %v17286_v44 }
 0xa31   :  { %17337 = vmatprep.subr.msk.mxu0 %vm1293_vm3, %v3866_v23  ;;  %17385 = vmatprep.subr.msk.mxu1 %vm1293_vm3, %v3926_v36 }
 0xa32   :  { %17325 = vmatmul.mubr.msk.f32.gmra.mxu1 %vm252_vm2, %v25527_v28 }
 0xa34   :  { %17338 = vmatpush3.xpose.msk.msra.mxu0 %vm1293_vm3, %v3866_v23  ;;  %17386 = vmatpush3.xpose.msk.msra.mxu1 %vm1293_vm3, %v3926_v36 }
 0xa35   :  { %17339 = vmatprep.subr.msk.mxu0 %vm1293_vm3, %v17265_v14  ;;  %17387 = vmatprep.subr.msk.mxu1 %vm1293_vm3, %v17283_v35 }
 0xa38   :  { %17340 = vmatpush3.xpose.msk.msra.mxu0 %vm1293_vm3, %v17265_v14  ;;  %17388 = vmatpush3.xpose.msk.msra.mxu1 %vm1293_vm3, %v17283_v35 }
 0xa39   :  { %17341 = vmatprep.subr.msk.mxu0 %vm1293_vm3, %v3856_v18  ;;  %17389 = vmatprep.subr.msk.mxu1 %vm1293_vm3, %v3916_v61 }
 0xa3c   :  { %17342 = vmatpush3.xpose.msk.msra.mxu0 %vm1293_vm3, %v3856_v18  ;;  %17390 = vmatpush3.xpose.msk.msra.mxu1 %vm1293_vm3, %v3916_v61 }
 0xa3d   :  { %17391 = vmatprep.subr.msk.mxu1 %vm1293_vm3, %v17280_v5 }
 0xa40   :  { %17392 = vmatpush3.xpose.msk.msra.mxu1 %vm1293_vm3, %v17280_v5 }
 0xa41   :  { %17393 = vmatprep.subr.msk.mxu1 %vm1293_vm3, %v3906_v34 }
 0xa44   :  { %17394 = vmatpush3.xpose.msk.msra.mxu1 %vm1293_vm3, %v3906_v34 }
 0xa45   :  { %17395 = vmatprep.subr.msk.mxu1 %vm1293_vm3, %v17277_v55 }
 0xa48   :  { %17396 = vmatpush3.xpose.msk.msra.mxu1 %vm1293_vm3, %v17277_v55 }
 0xa49   :  { %17397 = vmatprep.subr.msk.mxu1 %vm1293_vm3, %v3896_v54 }
 0xa4c   :  { %17398 = vmatpush3.xpose.msk.msra.mxu1 %vm1293_vm3, %v3896_v54 }
 0xa96   :  { %v21609_v10 = vpop.f32.mrf.mxu1 }
 0xa98   :  { %v21611_v26 = vpop.f32.mrf.mxu1 }
 0xa99   :  { %25541 = vst [vmem:[#allocation34_spill] sm:$0xff] %v21611_v26 }
 0xa9a   :  { %v21613_v13 = vpop.f32.mrf.mxu1 }
 0xa9c   :  { %v21615_v4 = vpop.f32.mrf.mxu1 }
 0xa9d   :  { %25542 = vst [vmem:[#allocation35_spill] sm:$0xff] %v21615_v4 }
 0xa9e   :  { %v21617_v17 = vpop.f32.mrf.mxu1 }
 0xaa0   :  { %v21619_v47 = vpop.f32.mrf.mxu1 }
 0xaa1   :  { %25543 = vst [vmem:[#allocation36_spill] sm:$0xff] %v21619_v47 }
 0xaa2   :  { %v21621_v27 = vpop.f32.mrf.mxu1 }
 0xaa4   :  { %v21623_v8 = vpop.f32.mrf.mxu1 }
 0xaa5   :  { %25544 = vst [vmem:[#allocation37_spill] sm:$0xff] %v21623_v8 }
 0xaa6   :  { %v21625_v30 = vpop.f32.mrf.mxu1 }
 0xaa7   :  { %25545 = vst [vmem:[#allocation38_spill] sm:$0xff] %v21625_v30 }
 0xaa8   :  { %v21627_v22 = vpop.f32.mrf.mxu1 }
 0xaa9   :  { %25546 = vst [vmem:[#allocation39_spill] sm:$0xff] %v21627_v22 }
 0xaaa   :  { %v21629_v31 = vpop.f32.mrf.mxu1 }
 0xaab   :  { %25547 = vst [vmem:[#allocation40_spill] sm:$0xff] %v21629_v31 }
 0xaac   :  { %v21631_v19 = vpop.f32.mrf.mxu1 }
 0xaad   :  { %25548 = vst [vmem:[#allocation41_spill] sm:$0xff] %v21631_v19 }
 0xaae   :  { %v21633_v37 = vpop.f32.mrf.mxu1 }
 0xaaf   :  { %25549 = vst [vmem:[#allocation42_spill] sm:$0xff] %v21633_v37 }
 0xab0   :  { %v21635_v39 = vpop.f32.mrf.mxu1 }
 0xab1   :  { %25550 = vst [vmem:[#allocation43_spill] sm:$0xff] %v21635_v39 }
 0xab2   :  { %v21637_v58 = vpop.f32.mrf.mxu1 }
 0xab3   :  { %25551 = vst [vmem:[#allocation44_spill] sm:$0xff] %v21637_v58 }
 0xab4   :  { %v21639_v38 = vpop.f32.mrf.mxu1 }
 0xab5   :  { %25552 = vst [vmem:[#allocation45_spill] sm:$0xff] %v21639_v38 }
 0xab6   :  { %v17225_v14 = vpop.f32.mrf.mxu1 }
 0xab8   :  { %v3702_v18 = vpop.f32.mrf.mxu1 }
 0xab9   :  { %17343 = vmatprep.mubr.msk.f32.mxu0 %vm1293_vm3, %v3702_v18 }
 0xaba   :  { %v17228_v43 = vpop.f32.mrf.mxu1  ;;  %17344 = vmatmul.mubr.msk.f32.vlgmr.msra.gmra.mxu0 %vm1293_vm3, %v17225_v14 }
 0xabc   :  { %v3712_v23 = vpop.f32.mrf.mxu1 }
 0xabd   :  { %17346 = vmatprep.mubr.msk.f32.mxu0 %vm1293_vm3, %v3712_v23 }
 0xabe   :  { %v17231_v62 = vpop.f32.mrf.mxu1  ;;  %17347 = vmatmul.mubr.msk.f32.gmra.mxu0 %vm1293_vm3, %v17228_v43 }
 0xac0   :  { %v3722_v25 = vpop.f32.mrf.mxu1 }
 0xac1   :  { %17349 = vmatprep.mubr.msk.f32.mxu0 %vm1293_vm3, %v3722_v25 }
 0xac2   :  { %v17234_v49 = vpop.f32.mrf.mxu1  ;;  %17350 = vmatmul.mubr.msk.f32.gmra.mxu0 %vm1293_vm3, %v17231_v62 }
 0xac4   :  { %v3732_v0 = vpop.f32.mrf.mxu1 }
 0xac5   :  { %17352 = vmatprep.mubr.msk.f32.mxu0 %vm1293_vm3, %v3732_v0 }
 0xac6   :  { %v17237_v55 = vpop.f32.mrf.mxu1  ;;  %17353 = vmatmul.mubr.msk.f32.gmra.mxu0 %vm1293_vm3, %v17234_v49 }
 0xac8   :  { %v3742_v54 = vpop.f32.mrf.mxu1 }
 0xac9   :  { %17399 = vmatprep.mubr.msk.f32.mxu1 %vm1293_vm3, %v3742_v54 }
 0xaca   :  { %v17240_v5 = vpop.f32.mrf.mxu1  ;;  %17400 = vmatmul.mubr.msk.f32.vlgmr.msra.gmra.mxu1 %vm1293_vm3, %v17237_v55 }
 0xacc   :  { %v3752_v34 = vpop.f32.mrf.mxu1 }
 0xacd   :  { %17402 = vmatprep.mubr.msk.f32.mxu1 %vm1293_vm3, %v3752_v34 }
 0xace   :  { %v17243_v35 = vpop.f32.mrf.mxu1  ;;  %17403 = vmatmul.mubr.msk.f32.gmra.mxu1 %vm1293_vm3, %v17240_v5 }
 0xad0   :  { %v3762_v61 = vpop.f32.mrf.mxu1 }
 0xad1   :  { %17405 = vmatprep.mubr.msk.f32.mxu1 %vm1293_vm3, %v3762_v61 }
 0xad2   :  { %v17246_v44 = vpop.f32.mrf.mxu1  ;;  %17406 = vmatmul.mubr.msk.f32.gmra.mxu1 %vm1293_vm3, %v17243_v35 }
 0xad4   :  { %v3772_v36 = vpop.f32.mrf.mxu1 }
 0xad5   :  { %17408 = vmatprep.mubr.msk.f32.mxu1 %vm1293_vm3, %v3772_v36 }
 0xad6   :  { %v17305_v14 = vpop.f32.mrf.mxu1  ;;  %17409 = vmatmul.mubr.msk.f32.gmra.mxu1 %vm1293_vm3, %v17246_v44 }
 0xad8   :  { %v4010_v18 = vpop.f32.mrf.mxu1 }
 0xada   :  { %v17308_v43 = vpop.f32.mrf.mxu1 }
 0xadc   :  { %v4020_v23 = vpop.f32.mrf.mxu1 }
 0xade   :  { %v17311_v62 = vpop.f32.mrf.mxu1 }
 0xae0   :  { %v4030_v25 = vpop.f32.mrf.mxu1 }
 0xae2   :  { %v17314_v49 = vpop.f32.mrf.mxu1 }
 0xae3   :  { %17355 = vmatprep.subr.mxu0 %v17314_v49 }
 0xae4   :  { %v4040_v0 = vpop.f32.mrf.mxu1  ;;  %17356 = vmatpush3.msra.mxu0 %v17314_v49 }
 0xae5   :  { %17357 = vmatprep.subr.mxu0 %v4040_v0 }
 0xae6   :  { %v21657_v55 = vpop.f32.mrf.mxu1  ;;  %17358 = vmatpush3.msra.mxu0 %v4040_v0 }
 0xae7   :  { %17359 = vmatprep.subr.mxu0 %v17311_v62 }
 0xae8   :  { %v21659_v54 = vpop.f32.mrf.mxu1  ;;  %17360 = vmatpush3.msra.mxu0 %v17311_v62 }
 0xae9   :  { %17361 = vmatprep.subr.mxu0 %v4030_v25 }
 0xaea   :  { %v21661_v5 = vpop.f32.mrf.mxu1  ;;  %17362 = vmatpush3.msra.mxu0 %v4030_v25 }
 0xaeb   :  { %17363 = vmatprep.subr.mxu0 %v17308_v43 }
 0xaec   :  { %v21663_v34 = vpop.f32.mrf.mxu1  ;;  %17364 = vmatpush3.msra.mxu0 %v17308_v43 }
 0xaed   :  { %17365 = vmatprep.subr.mxu0 %v4020_v23 }
 0xaee   :  { %v21665_v35 = vpop.f32.mrf.mxu1  ;;  %17366 = vmatpush3.msra.mxu0 %v4020_v23 }
 0xaef   :  { %17367 = vmatprep.subr.mxu0 %v17305_v14 }
 0xaf0   :  { %v21667_v61 = vpop.f32.mrf.mxu1  ;;  %17368 = vmatpush3.msra.mxu0 %v17305_v14 }
 0xaf1   :  { %17369 = vmatprep.subr.mxu0 %v4010_v18 }
 0xaf2   :  { %v21669_v44 = vpop.f32.mrf.mxu1  ;;  %17370 = vmatpush3.msra.mxu0 %v4010_v18 }
 0xaf3   :  { %17411 = vmatprep.subr.mxu0 %v21669_v44 }
 0xb7a   :  { %v17345_v36 = vpop.f32.mrf.mxu0 }
 0xb7b   :  { %v4245_v62 = vsel %vm252_vm2, %v17345_v36, -inf }
 0xb7c   :  { %4246 = vmax.xlane.f32.xlu1 %v4245_v62  ;;  %v4203_v25 = vpop.f32.mrf.mxu0 }
 0xb7d   :  { %v4242_v43 = vsel %vm252_vm2, %v4203_v25, -inf }
 0xb7e   :  { %4243 = vmax.xlane.f32.xlu0 %v4242_v43  ;;  %v17348_v49 = vpop.f32.mrf.mxu0  ;;  %v21679_v43 = vpop.f32.mrf.mxu1 }
 0xb7f   :  { %v4251_v23 = vsel %vm252_vm2, %v17348_v49, -inf }
 0xb80   :  { %4252 = vmax.xlane.f32.xlu1 %v4251_v23  ;;  %v4213_v0 = vpop.f32.mrf.mxu0 }
 0xb81   :  { %v4248_v14 = vsel %vm252_vm2, %v4213_v0, -inf }
 0xb82   :  { %4249 = vmax.xlane.f32.xlu0 %v4248_v14  ;;  %v17351_v45 = vpop.f32.mrf.mxu0 }
 0xb83   :  { %v4257_v18 = vsel %vm252_vm2, %v17351_v45, -inf }
 0xb84   :  { %4258 = vmax.xlane.f32.xlu1 %v4257_v18  ;;  %v4223_v38 = vpop.f32.mrf.mxu0 }
 0xb85   :  { %v4254_v11 = vsel %vm252_vm2, %v4223_v38, -inf }
 0xb86   :  { %4255 = vmax.xlane.f32.xlu0 %v4254_v11  ;;  %v17354_v62 = vpop.f32.mrf.mxu0 }
 0xb87   :  { %v4263_v39 = vsel %vm252_vm2, %v17354_v62, -inf }
 0xb88   :  { %4264 = vmax.xlane.f32.xlu1 %v4263_v39  ;;  %v4233_v16 = vpop.f32.mrf.mxu0 }
 0xb89   :  { %v4260_v23 = vsel %vm252_vm2, %v4233_v16, -inf }
 0xb8a   :  { %4261 = vmax.xlane.f32.xlu0 %v4260_v23  ;;  %v17401_v19 = vpop.f32.mrf.mxu1 }
 0xb8b   :  { %v4615_v14 = vsel %vm252_vm2, %v17401_v19, -inf }
 0xb8c   :  { %4616 = vmax.xlane.f32.xlu1 %v4615_v14  ;;  %v21683_v50 = vpop.f32.mrf.mxu1 }
 0xb8d   :  { %v4612_v18 = vsel %vm252_vm2, %v21683_v50, -inf }
 0xb8e   :  { %4613 = vmax.xlane.f32.xlu0 %v4612_v18  ;;  %v21687_v11 = vpop.f32.mrf.mxu1 }
 0xb8f   :  { %v4621_v22 = vsel %vm252_vm2, %v21687_v11, -inf }
 0xb90   :  { %4622 = vmax.xlane.f32.xlu1 %v4621_v22  ;;  %v21691_v39 = vpop.f32.mrf.mxu1 }
 0xb91   :  { %v4618_v23 = vsel %vm252_vm2, %v21691_v39, -inf }
 0xb92   :  { %4619 = vmax.xlane.f32.xlu0 %v4618_v23  ;;  %v21695_v6 = vpop.f32.mrf.mxu1 }
 0xb93   :  { %v4627_v14 = vsel %vm252_vm2, %v21695_v6, -inf }
 0xb94   :  { %4628 = vmax.xlane.f32.xlu1 %v4627_v14  ;;  %v21699_v8 = vpop.f32.mrf.mxu1 }
 0xb95   :  { %v4624_v18 = vsel %vm252_vm2, %v21699_v8, -inf }
 0xb96   :  { %4625 = vmax.xlane.f32.xlu0 %v4624_v18  ;;  %v21703_v53 = vpop.f32.mrf.mxu1 }
 0xb97   :  { %v4633_v22 = vsel %vm252_vm2, %v21703_v53, -inf }
 0xb98   :  { %4634 = vmax.xlane.f32.xlu1 %v4633_v22  ;;  %v21707_v47 = vpop.f32.mrf.mxu1 }
 0xb99   :  { %v4630_v23 = vsel %vm252_vm2, %v21707_v47, -inf }
 0xb9a   :  { %4631 = vmax.xlane.f32.xlu0 %v4630_v23 }
 0xc05   :  { %v4247_v15 = vpop.xlane.xlu1 %4246 }
 0xc06   :  { %v4267_v14 = vsub.f32 %v17345_v36, %v4247_v15 }
 0xc07   :  { %v4244_v4 = vpop.xlane.xlu0 %4243 }
 0xc08   :  { %v4276_v1 = vmul.f32 1.442695, %v4267_v14  ;;  %v4266_v26 = vsub.f32 %v4203_v25, %v4244_v4 }
 0xc09   :  { %v4253_v24 = vpop.xlane.xlu1 %4252 }
 0xc0a   :  { %19209 = vpow2.f32 %v4276_v1  ;;  %v4274_v18 = vmul.f32 1.442695, %v4266_v26  ;;  %v4269_v58 = vsub.f32 %v17348_v49, %v4253_v24 }
 0xc0b   :  { %v4250_v2 = vpop.xlane.xlu0 %4249 }
 0xc0c   :  { %19211 = vpow2.f32 %v4274_v18  ;;  %v4280_v37 = vmul.f32 1.442695, %v4269_v58  ;;  %v4268_v48 = vsub.f32 %v4213_v0, %v4250_v2 }
 0xc0d   :  { %v4259_v22 = vpop.xlane.xlu1 %4258 }
 0xc0e   :  { %19213 = vpow2.f32 %v4280_v37  ;;  %v4278_v31 = vmul.f32 1.442695, %v4268_v48  ;;  %v4271_v3 = vsub.f32 %v17351_v45, %v4259_v22 }
 0xc0f   :  { %v4256_v30 = vpop.xlane.xlu0 %4255 }
 0xc10   :  { %19215 = vpow2.f32 %v4278_v31  ;;  %v4284_v23 = vmul.f32 1.442695, %v4271_v3  ;;  %v4270_v33 = vsub.f32 %v4223_v38, %v4256_v30 }
 0xc11   :  { %v4265_v15 = vpop.xlane.xlu1 %4264 }
 0xc12   :  { %19217 = vpow2.f32 %v4284_v23  ;;  %v4282_v36 = vmul.f32 1.442695, %v4270_v33  ;;  %v4273_v4 = vsub.f32 %v17354_v62, %v4265_v15 }
 0xc13   :  { %v4262_v25 = vpop.xlane.xlu0 %4261 }
 0xc14   :  { %19219 = vpow2.f32 %v4282_v36  ;;  %v4288_v1 = vmul.f32 1.442695, %v4273_v4  ;;  %v4272_v24 = vsub.f32 %v4233_v16, %v4262_v25 }
 0xc15   :  { %v4617_v26 = vpop.xlane.xlu1 %4616 }
 0xc16   :  { %19221 = vpow2.f32 %v4288_v1  ;;  %v4286_v58 = vmul.f32 1.442695, %v4272_v24  ;;  %v4637_v2 = vsub.f32 %v17401_v19, %v4617_v26 }
 0xc17   :  { %v21711_v49 = vpop.eup %19209  ;;  %v4614_v48 = vpop.xlane.xlu0 %4613 }
 0xc18   :  { %19223 = vpow2.f32 %v4286_v58  ;;  %v4646_v45 = vmul.f32 1.442695, %v4637_v2  ;;  %v4636_v3 = vsub.f32 %v21683_v50, %v4614_v48  ;;  %v4293_v30 = vsel %vm252_vm2, %v21711_v49, 0.0 }
 0xc19   :  { %v21716_v33 = vpop.eup %19211  ;;  %v4623_v31 = vpop.xlane.xlu1 %4622  ;;  %4294 = vadd.xlane.f32.xlu1 %v4293_v30 }
 0xc1a   :  { %19225 = vpow2.f32 %v4646_v45  ;;  %v4644_v16 = vmul.f32 1.442695, %v4636_v3  ;;  %v4639_v37 = vsub.f32 %v21687_v11, %v4623_v31  ;;  %v4290_v19 = vsel %vm252_vm2, %v21716_v33, 0.0 }
 0xc1b   :  { %v21721_v38 = vpop.eup %19213  ;;  %v4620_v0 = vpop.xlane.xlu0 %4619  ;;  %4291 = vadd.xlane.f32.xlu0 %v4290_v19 }
 0xc1c   :  { %19227 = vpow2.f32 %v4644_v16  ;;  %v4650_v50 = vmul.f32 1.442695, %v4639_v37  ;;  %v4638_v62 = vsub.f32 %v21691_v39, %v4620_v0  ;;  %v4299_v14 = vsel %vm252_vm2, %v21721_v38, 0.0 }
 0xc1d   :  { %v21726_v18 = vpop.eup %19215  ;;  %v4629_v22 = vpop.xlane.xlu1 %4628  ;;  %4300 = vadd.xlane.f32.xlu1 %v4299_v14 }
 0xc1e   :  { %19229 = vpow2.f32 %v4650_v50  ;;  %v4648_v11 = vmul.f32 1.442695, %v4638_v62  ;;  %v4641_v23 = vsub.f32 %v21695_v6, %v4629_v22  ;;  %v4296_v15 = vsel %vm252_vm2, %v21726_v18, 0.0 }
 0xc1f   :  { %v21731_v36 = vpop.eup %19217  ;;  %v4626_v4 = vpop.xlane.xlu0 %4625  ;;  %4297 = vadd.xlane.f32.xlu0 %v4296_v15 }
 0xc20   :  { %19231 = vpow2.f32 %v4648_v11  ;;  %v4654_v39 = vmul.f32 1.442695, %v4641_v23  ;;  %v4640_v25 = vsub.f32 %v21699_v8, %v4626_v4  ;;  %v4305_v1 = vsel %vm252_vm2, %v21731_v36, 0.0 }
 0xc21   :  { %v21736_v24 = vpop.eup %19219  ;;  %4306 = vadd.xlane.f32.xlu1 %v4305_v1  ;;  %v4635_v26 = vpop.xlane.xlu1 %4634 }
 0xc22   :  { %19233 = vpow2.f32 %v4654_v39  ;;  %v4652_v6 = vmul.f32 1.442695, %v4640_v25  ;;  %v4643_v58 = vsub.f32 %v21703_v53, %v4635_v26  ;;  %v4302_v2 = vsel %vm252_vm2, %v21736_v24, 0.0 }
 0xc23   :  { %v21741_v48 = vpop.eup %19221  ;;  %4303 = vadd.xlane.f32.xlu0 %v4302_v2  ;;  %v4632_v45 = vpop.xlane.xlu0 %4631 }
 0xc24   :  { %19235 = vpow2.f32 %v4652_v6  ;;  %v4658_v8 = vmul.f32 1.442695, %v4643_v58  ;;  %v4642_v3 = vsub.f32 %v21707_v47, %v4632_v45  ;;  %v4311_v30 = vsel %vm252_vm2, %v21741_v48, 0.0  ;;  %v14496_v6 = vld [vmem:[%s25422_s5 + $0x28] sm:$0xff]  ;;  %v14495_v58 = vld [vmem:[%s25422_s5 + $0x20] sm:$0xff] }
 0xc25   :  { %v21746_v31 = vpop.eup %19223  ;;  %4312 = vadd.xlane.f32.xlu1 %v4311_v30  ;;  %17439 = vmatprep.subr.mxu1 %v14496_v6 }
 0xc26   :  { %19237 = vpow2.f32 %v4658_v8  ;;  %v4656_v16 = vmul.f32 1.442695, %v4642_v3  ;;  %v4308_v53 = vsel %vm252_vm2, %v21746_v31, 0.0  ;;  %17440 = vmatpush3.msra.mxu1 %v14496_v6 }
 0xc27   :  { %v21750_v37 = vpop.eup %19225  ;;  %4309 = vadd.xlane.f32.xlu0 %v4308_v53  ;;  %17441 = vmatprep.subr.mxu1 %v14495_v58 }
 0xc28   :  { %19239 = vpow2.f32 %v4656_v16  ;;  %v4663_v19 = vsel %vm252_vm2, %v21750_v37, 0.0  ;;  %17442 = vmatpush3.msra.mxu1 %v14495_v58 }
 0xc29   :  { %v21754_v0 = vpop.eup %19227  ;;  %4664 = vadd.xlane.f32.xlu1 %v4663_v19 }
 0xc2a   :  { %v4660_v47 = vsel %vm252_vm2, %v21754_v0, 0.0 }
 0xc2b   :  { %v21758_v50 = vpop.eup %19229  ;;  %4661 = vadd.xlane.f32.xlu0 %v4660_v47 }
 0xc2c   :  { %v4669_v62 = vsel %vm252_vm2, %v21758_v50, 0.0 }
 0xc2d   :  { %v21762_v14 = vpop.eup %19231  ;;  %4670 = vadd.xlane.f32.xlu1 %v4669_v62 }
 0xc2e   :  { %v4666_v22 = vsel %vm252_vm2, %v21762_v14, 0.0 }
 0xc2f   :  { %v21766_v11 = vpop.eup %19233  ;;  %4667 = vadd.xlane.f32.xlu0 %v4666_v22 }
 0xc30   :  { %v4675_v23 = vsel %vm252_vm2, %v21766_v11, 0.0 }
 0xc31   :  { %v21770_v15 = vpop.eup %19235  ;;  %4676 = vadd.xlane.f32.xlu1 %v4675_v23 }
 0xc32   :  { %v4672_v4 = vsel %vm252_vm2, %v21770_v15, 0.0 }
 0xc33   :  { %v21774_v39 = vpop.eup %19237  ;;  %4673 = vadd.xlane.f32.xlu0 %v4672_v4 }
 0xc34   :  { %v4681_v25 = vsel %vm252_vm2, %v21774_v39, 0.0 }
 0xc35   :  { %v21778_v1 = vpop.eup %19239  ;;  %4682 = vadd.xlane.f32.xlu1 %v4681_v25 }
 0xc36   :  { %v4678_v26 = vsel %vm252_vm2, %v21778_v1, 0.0 }
 0xc37   :  { %4679 = vadd.xlane.f32.xlu0 %v4678_v26 }
 0xca2   :  { %v4295_v2 = vpop.xlane.xlu1 %4294 }
 0xca3   :  { %19241 = vrcp.f32 %v4295_v2 }
 0xca4   :  { %v4292_v45 = vpop.xlane.xlu0 %4291 }
 0xca5   :  { %19243 = vrcp.f32 %v4292_v45 }
 0xca6   :  { %v4301_v8 = vpop.xlane.xlu1 %4300 }
 0xca7   :  { %19245 = vrcp.f32 %v4301_v8 }
 0xca8   :  { %v4298_v3 = vpop.xlane.xlu0 %4297 }
 0xca9   :  { %19247 = vrcp.f32 %v4298_v3 }
 0xcaa   :  { %v4307_v30 = vpop.xlane.xlu1 %4306 }
 0xcab   :  { %19249 = vrcp.f32 %v4307_v30 }
 0xcac   :  { %v4304_v16 = vpop.xlane.xlu0 %4303 }
 0xcad   :  { %19251 = vrcp.f32 %v4304_v16 }
 0xcae   :  { %v4313_v53 = vpop.xlane.xlu1 %4312 }
 0xcaf   :  { %19253 = vrcp.f32 %v4313_v53 }
 0xcb0   :  { %v4310_v19 = vpop.xlane.xlu0 %4309  ;;  %v19242_v47 = vpop.eup %19241 }
 0xcb1   :  { %19255 = vrcp.f32 %v4310_v19  ;;  %v4317_v4 = vmul.f32 %v19242_v47, %v21711_v49  ;;  %v14519_v19 = vld [vmem:[%s25421_s4 + $0xf0] sm:$0xff] }
 0xcb2   :  { %v19244_v62 = vpop.eup %19243  ;;  %v4665_v22 = vpop.xlane.xlu1 %4664 }
 0xcb3   :  { %v4315_v23 = vmul.f32 %v19244_v62, %v21716_v33  ;;  %19257 = vrcp.f32 %v4665_v22  ;;  %v14517_v62 = vld [vmem:[%s25421_s4 + $0xe0] sm:$0xff] }
 0xcb4   :  { %v4662_v25 = vpop.xlane.xlu0 %4661  ;;  %v19246_v26 = vpop.eup %19245 }
 0xcb5   :  { %19259 = vrcp.f32 %v4662_v25  ;;  %17371 = vmatprep.mubr.msk.f32.mxu0 %vm252_vm2, %v4315_v23  ;;  %v4321_v49 = vmul.f32 %v19246_v26, %v21721_v38  ;;  %v14516_v23 = vld [vmem:[%s25421_s4 + $0xd8] sm:$0xff]  ;;  %v14515_v25 = vld [vmem:[%s25421_s4 + $0xd0] sm:$0xff] }
 0xcb6   :  { %v19248_v6 = vpop.eup %19247  ;;  %v4671_v58 = vpop.xlane.xlu1 %4670  ;;  %17372 = vmatmul.mubr.msk.f32.vlgmr.msra.gmra.mxu0 %vm252_vm2, %v4317_v4 }
 0xcb7   :  { %17412 = vmatpush3.msra.mxu0 %v21669_v44  ;;  %v4319_v2 = vmul.f32 %v19248_v6, %v21726_v18  ;;  %19261 = vrcp.f32 %v4671_v58  ;;  %v14514_v6 = vld [vmem:[%s25421_s4 + $0xc8] sm:$0xff]  ;;  %v14513_v58 = vld [vmem:[%s25421_s4 + $0xc0] sm:$0xff] }
 0xcb8   :  { %17413 = vmatprep.subr.mxu0 %v21679_v43  ;;  %v4668_v33 = vpop.xlane.xlu0 %4667  ;;  %v19250_v45 = vpop.eup %19249 }
 0xcb9   :  { %17414 = vmatpush3.msra.mxu0 %v21679_v43  ;;  %19263 = vrcp.f32 %v4668_v33  ;;  %17374 = vmatprep.mubr.msk.f32.mxu0 %vm252_vm2, %v4319_v2  ;;  %v4325_v18 = vmul.f32 %v19250_v45, %v21731_v36  ;;  %v14566_v2 = vld [vmem:[%s25421_s4 + $0x4e8] sm:$0xff]  ;;  %v14565_v33 = vld [vmem:[%s25421_s4 + $0x4e0] sm:$0xff]  ;;  %v14563_v45 = vld [vmem:[%s25421_s4 + $0x4d0] sm:$0xff] }
 0xcba   :  { %v19252_v8 = vpop.eup %19251  ;;  %17415 = vmatprep.subr.mxu0 %v21665_v35  ;;  %v4677_v3 = vpop.xlane.xlu1 %4676  ;;  %17375 = vmatmul.mubr.msk.f32.gmra.mxu0 %vm252_vm2, %v4321_v49  ;;  %v14564_v49 = vld [vmem:[%s25421_s4 + $0x4d8] sm:$0xff] }
 0xcbb   :  { %17416 = vmatpush3.msra.mxu0 %v21665_v35  ;;  %v4323_v44 = vmul.f32 %v19252_v8, %v21736_v24  ;;  %19265 = vrcp.f32 %v4677_v3  ;;  %v14562_v8 = vld [vmem:[%s25421_s4 + $0x4c8] sm:$0xff]  ;;  %v14561_v3 = vld [vmem:[%s25421_s4 + $0x4c0] sm:$0xff] }
 0xcbc   :  { %17417 = vmatprep.subr.mxu0 %v21667_v61  ;;  %v4674_v38 = vpop.xlane.xlu0 %4673  ;;  %v19254_v43 = vpop.eup %19253 }
 0xcbd   :  { %17418 = vmatpush3.msra.mxu0 %v21667_v61  ;;  %19267 = vrcp.f32 %v4674_v38  ;;  %17377 = vmatprep.mubr.msk.f32.mxu0 %vm252_vm2, %v4323_v44  ;;  %v4329_v24 = vmul.f32 %v19254_v43, %v21741_v48  ;;  %v14544_v44 = vld [vmem:[%s25421_s4 + $0x2f8] sm:$0xff]  ;;  %v14543_v43 = vld [vmem:[%s25421_s4 + $0x2f0] sm:$0xff] }
 0xcbe   :  { %v19256_v30 = vpop.eup %19255  ;;  %17419 = vmatprep.subr.mxu0 %v21661_v5  ;;  %v4683_v16 = vpop.xlane.xlu1 %4682  ;;  %17378 = vmatmul.mubr.msk.f32.gmra.mxu0 %vm252_vm2, %v4325_v18 }
 0xcbf   :  { %17420 = vmatpush3.msra.mxu0 %v21661_v5  ;;  %v4327_v35 = vmul.f32 %v19256_v30, %v21746_v31  ;;  %19269 = vrcp.f32 %v4683_v16  ;;  %v14520_v31 = vld [vmem:[%s25421_s4 + $0xf8] sm:$0xff]  ;;  %17507 = vmatprep.subr.mxu1 %v14544_v44  ;;  %v14542_v16 = vld [vmem:[%s25421_s4 + $0x2e8] sm:$0xff] }
 0xcc0   :  { %17421 = vmatprep.subr.mxu0 %v21663_v34  ;;  %v4680_v36 = vpop.xlane.xlu0 %4679  ;;  %v19258_v61 = vpop.eup %19257 }
 0xcc1   :  { %17422 = vmatpush3.msra.mxu0 %v21663_v34  ;;  %19271 = vrcp.f32 %v4680_v36  ;;  %17380 = vmatprep.mubr.msk.f32.mxu0 %vm252_vm2, %v4327_v35  ;;  %v4687_v48 = vmul.f32 %v19258_v61, %v21750_v37  ;;  %v14518_v37 = vld [vmem:[%s25421_s4 + $0xe8] sm:$0xff]  ;;  %v14541_v36 = vld [vmem:[%s25421_s4 + $0x2e0] sm:$0xff]  ;;  %v14540_v61 = vld [vmem:[%s25421_s4 + $0x2d8] sm:$0xff] }
 0xcc2   :  { %v19260_v53 = vpop.eup %19259  ;;  %17423 = vmatprep.subr.mxu0 %v21657_v55  ;;  %17381 = vmatmul.mubr.msk.f32.gmra.mxu0 %vm252_vm2, %v4329_v24 }
 0xcc3   :  { %17424 = vmatpush3.msra.mxu0 %v21657_v55  ;;  %v4685_v5 = vmul.f32 %v19260_v53, %v21754_v0 }
 0xcc4   :  { %17425 = vmatprep.subr.mxu0 %v21659_v54  ;;  %v19262_v34 = vpop.eup %19261 }
 0xcc5   :  { %17426 = vmatpush3.msra.mxu0 %v21659_v54  ;;  %17427 = vmatprep.mubr.msk.f32.mxu0 %vm252_vm2, %v4685_v5  ;;  %v4691_v54 = vmul.f32 %v19262_v34, %v21758_v50  ;;  %v14539_v5 = vld [vmem:[%s25421_s4 + $0x2d0] sm:$0xff] }
 0xcc6   :  { %v19264_v55 = vpop.eup %19263  ;;  %17428 = vmatmul.mubr.msk.f32.vlgmr.msra.gmra.mxu0 %vm252_vm2, %v4687_v48  ;;  %17467 = vmatprep.subr.mxu0 %v14520_v31  ;;  %v14538_v48 = vld [vmem:[%s25421_s4 + $0x2c8] sm:$0xff] }
 0xcc7   :  { %17468 = vmatpush3.msra.mxu0 %v14520_v31  ;;  %v4689_v0 = vmul.f32 %v19264_v55, %v21762_v14 }
 0xcc8   :  { %17469 = vmatprep.subr.mxu0 %v14519_v19  ;;  %v19266_v47 = vpop.eup %19265 }
 0xcc9   :  { %17430 = vmatprep.mubr.msk.f32.mxu0 %vm252_vm2, %v4689_v0  ;;  %17470 = vmatpush3.msra.mxu0 %v14519_v19  ;;  %v4695_v50 = vmul.f32 %v19266_v47, %v21766_v11  ;;  %v14537_v19 = vld [vmem:[%s25421_s4 + $0x2c0] sm:$0xff] }
 0xcca   :  { %v19268_v22 = vpop.eup %19267  ;;  %17431 = vmatmul.mubr.msk.f32.gmra.mxu0 %vm252_vm2, %v4691_v54  ;;  %17471 = vmatprep.subr.mxu0 %v14518_v37 }
 0xccb   :  { %17472 = vmatpush3.msra.mxu0 %v14518_v37  ;;  %v4693_v14 = vmul.f32 %v19268_v22, %v21770_v15 }
 0xccc   :  { %17473 = vmatprep.subr.mxu0 %v14517_v62  ;;  %v19270_v4 = vpop.eup %19269 }
 0xccd   :  { %17433 = vmatprep.mubr.msk.f32.mxu0 %vm252_vm2, %v4693_v14  ;;  %17474 = vmatpush3.msra.mxu0 %v14517_v62  ;;  %v4699_v11 = vmul.f32 %v19270_v4, %v21774_v39  ;;  %v14567_v39 = vld [vmem:[%s25421_s4 + $0x4f0] sm:$0xff] }
 0xcce   :  { %v19272_v26 = vpop.eup %19271  ;;  %17434 = vmatmul.mubr.msk.f32.gmra.mxu0 %vm252_vm2, %v4695_v50  ;;  %17475 = vmatprep.subr.mxu0 %v14516_v23 }
 0xccf   :  { %17476 = vmatpush3.msra.mxu0 %v14516_v23  ;;  %v4697_v15 = vmul.f32 %v19272_v26, %v21778_v1  ;;  %v14568_v1 = vld [vmem:[%s25421_s4 + $0x4f8] sm:$0xff] }
 0xcd0   :  { %17477 = vmatprep.subr.mxu0 %v14515_v25 }
 0xcd1   :  { %17436 = vmatprep.mubr.msk.f32.mxu0 %vm252_vm2, %v4697_v15  ;;  %17478 = vmatpush3.msra.mxu0 %v14515_v25 }
 0xcd2   :  { %17437 = vmatmul.mubr.msk.f32.gmra.mxu0 %vm252_vm2, %v4699_v11  ;;  %17479 = vmatprep.subr.mxu0 %v14514_v6 }
 0xcd3   :  { %17480 = vmatpush3.msra.mxu0 %v14514_v6  ;;  %17483 = vmatprep.mubr.msk.f32.mxu0 %vm252_vm2, %v20389_v63 }
 0xcd4   :  { %17481 = vmatprep.subr.mxu0 %v14513_v58 }
 0xcd5   :  { %17482 = vmatpush3.msra.mxu0 %v14513_v58 }
 0xcd6   :  { %17484 = vmatmul.mubr.msk.f32.vlgmr.msra.gmra.mxu0 %vm252_vm2, %v20400_v40  ;;  %17547 = vmatprep.subr.mxu0 %v14568_v1 }
 0xcd7   :  { %17486 = vmatprep.mubr.msk.f32.mxu0 %vm252_vm2, %v20404_v60  ;;  %17548 = vmatpush3.msra.mxu0 %v14568_v1 }
 0xcd8   :  { %17549 = vmatprep.subr.mxu0 %v14567_v39 }
 0xcd9   :  { %17550 = vmatpush3.msra.mxu0 %v14567_v39 }
 0xcda   :  { %17487 = vmatmul.mubr.msk.f32.gmra.mxu0 %vm252_vm2, %v20421_v20  ;;  %17551 = vmatprep.subr.mxu0 %v14566_v2 }
 0xcdb   :  { %17489 = vmatprep.mubr.msk.f32.mxu0 %vm252_vm2, %v20426_v59  ;;  %17552 = vmatpush3.msra.mxu0 %v14566_v2 }
 0xcdc   :  { %17553 = vmatprep.subr.mxu0 %v14565_v33 }
 0xcdd   :  { %17554 = vmatpush3.msra.mxu0 %v14565_v33 }
 0xcde   :  { %17490 = vmatmul.mubr.msk.f32.gmra.mxu0 %vm252_vm2, %v20443_v12  ;;  %17555 = vmatprep.subr.mxu0 %v14564_v49 }
 0xcdf   :  { %17492 = vmatprep.mubr.msk.f32.mxu0 %vm252_vm2, %v20447_v56  ;;  %17556 = vmatpush3.msra.mxu0 %v14564_v49 }
 0xce0   :  { %17557 = vmatprep.subr.mxu0 %v14563_v45 }
 0xce1   :  { %17558 = vmatpush3.msra.mxu0 %v14563_v45 }
 0xce2   :  { %17493 = vmatmul.mubr.msk.f32.gmra.mxu0 %vm252_vm2, %v25519_v7  ;;  %17559 = vmatprep.subr.mxu0 %v14562_v8 }
 0xce3   :  { %17495 = vmatprep.mubr.msk.f32.mxu0 %vm252_vm2, %v25520_v57  ;;  %17560 = vmatpush3.msra.mxu0 %v14562_v8  ;;  %v3554_v8 = vadd.f32 %v21460_v51, %v21609_v10  ;;  %v25553_v10 = vld [vmem:[#allocation24_spill] sm:$0xff] }
 0xce4   :  { %17561 = vmatprep.subr.mxu0 %v14561_v3 }
 0xce5   :  { %17562 = vmatpush3.msra.mxu0 %v14561_v3 }
 0xce6   :  { %17496 = vmatmul.mubr.msk.f32.gmra.mxu0 %vm252_vm2, %v25521_v46 }
 0xce7   :  { %17498 = vmatprep.mubr.msk.f32.mxu0 %vm252_vm2, %v25522_v52 }
 0xcea   :  { %17499 = vmatmul.mubr.msk.f32.gmra.mxu0 %vm252_vm2, %v25523_v32 }
 0xceb   :  { %17501 = vmatprep.mubr.msk.f32.mxu0 %vm252_vm2, %v25524_v41 }
 0xcee   :  { %17502 = vmatmul.mubr.msk.f32.gmra.mxu0 %vm252_vm2, %v25525_v42 }
 0xcef   :  { %17504 = vmatprep.mubr.msk.f32.mxu0 %vm252_vm2, %v25526_v9 }
 0xcf2   :  { %17505 = vmatmul.mubr.msk.f32.gmra.mxu0 %vm252_vm2, %v25527_v28 }
 0xcf3   :  { %17563 = vmatprep.mubr.msk.f32.mxu0 %vm252_vm2, %v20389_v63 }
 0xcf6   :  { %17564 = vmatmul.mubr.msk.f32.vlgmr.msra.gmra.mxu0 %vm252_vm2, %v20400_v40 }
 0xcf7   :  { %17566 = vmatprep.mubr.msk.f32.mxu0 %vm252_vm2, %v20404_v60 }
 0xcfa   :  { %17567 = vmatmul.mubr.msk.f32.gmra.mxu0 %vm252_vm2, %v20421_v20 }
 0xcfb   :  { %17569 = vmatprep.mubr.msk.f32.mxu0 %vm252_vm2, %v20426_v59 }
 0xcfe   :  { %17570 = vmatmul.mubr.msk.f32.gmra.mxu0 %vm252_vm2, %v20443_v12 }
 0xcff   :  { %17572 = vmatprep.mubr.msk.f32.mxu0 %vm252_vm2, %v20447_v56 }
 0xd02   :  { %17573 = vmatmul.mubr.msk.f32.gmra.mxu0 %vm252_vm2, %v25519_v7 }
 0xd03   :  { %17575 = vmatprep.mubr.msk.f32.mxu0 %vm252_vm2, %v25520_v57 }
 0xd06   :  { %17576 = vmatmul.mubr.msk.f32.gmra.mxu0 %vm252_vm2, %v25521_v46 }
 0xd07   :  { %17578 = vmatprep.mubr.msk.f32.mxu0 %vm252_vm2, %v25522_v52 }
 0xd0a   :  { %17579 = vmatmul.mubr.msk.f32.gmra.mxu0 %vm252_vm2, %v25523_v32 }
 0xd0b   :  { %17581 = vmatprep.mubr.msk.f32.mxu0 %vm252_vm2, %v25524_v41 }
 0xd0e   :  { %17582 = vmatmul.mubr.msk.f32.gmra.mxu0 %vm252_vm2, %v25525_v42 }
 0xd0f   :  { %17584 = vmatprep.mubr.msk.f32.mxu0 %vm252_vm2, %v25526_v9 }
 0xd12   :  { %17585 = vmatmul.mubr.msk.f32.gmra.mxu0 %vm252_vm2, %v25527_v28 }
 0xd76   :  { %v17373_v38 = vpop.f32.mrf.mxu0 }
 0xd78   :  { %v4420_v18 = vpop.f32.mrf.mxu0 }
 0xd79   :  { %17443 = vmatprep.mubr.msk.f32.mxu1 %vm1293_vm3, %v4420_v18  ;;  %v3564_v18 = vadd.f32 %v21469_v29, %v21613_v13  ;;  %v25554_v13 = vld [vmem:[#allocation38_spill] sm:$0xff] }
 0xd7a   :  { %v17376_v30 = vpop.f32.mrf.mxu0  ;;  %17444 = vmatmul.mubr.msk.f32.vlgmr.msra.gmra.mxu1 %vm1293_vm3, %v17373_v38 }
 0xd7b   :  { %17508 = vmatpush3.msra.mxu1 %v14544_v44 }
 0xd7c   :  { %v4430_v35 = vpop.f32.mrf.mxu0  ;;  %17509 = vmatprep.subr.mxu1 %v14543_v43 }
 0xd7d   :  { %17446 = vmatprep.mubr.msk.f32.mxu1 %vm1293_vm3, %v4430_v35  ;;  %17510 = vmatpush3.msra.mxu1 %v14543_v43  ;;  %v3574_v35 = vadd.f32 %v21483_v21, %v21617_v17  ;;  %v25556_v17 = vld [vmem:[#allocation40_spill] sm:$0xff] }
 0xd7e   :  { %v17379_v24 = vpop.f32.mrf.mxu0  ;;  %17447 = vmatmul.mubr.msk.f32.gmra.mxu1 %vm1293_vm3, %v17376_v30  ;;  %17511 = vmatprep.subr.mxu1 %v14542_v16 }
 0xd7f   :  { %17512 = vmatpush3.msra.mxu1 %v14542_v16 }
 0xd80   :  { %v4440_v53 = vpop.f32.mrf.mxu0  ;;  %17513 = vmatprep.subr.mxu1 %v14541_v36 }
 0xd81   :  { %17449 = vmatprep.mubr.msk.f32.mxu1 %vm1293_vm3, %v4440_v53  ;;  %17514 = vmatpush3.msra.mxu1 %v14541_v36 }
 0xd82   :  { %v17382_v31 = vpop.f32.mrf.mxu0  ;;  %17450 = vmatmul.mubr.msk.f32.gmra.mxu1 %vm1293_vm3, %v17379_v24  ;;  %17515 = vmatprep.subr.mxu1 %v14540_v61 }
 0xd83   :  { %17516 = vmatpush3.msra.mxu1 %v14540_v61  ;;  %v3584_v61 = vadd.f32 %v25553_v10, %v21621_v27 }
 0xd84   :  { %v4450_v34 = vpop.f32.mrf.mxu0  ;;  %17517 = vmatprep.subr.mxu1 %v14539_v5 }
 0xd85   :  { %17452 = vmatprep.mubr.msk.f32.mxu1 %vm1293_vm3, %v4450_v34  ;;  %17518 = vmatpush3.msra.mxu1 %v14539_v5 }
 0xd86   :  { %v17429_v55 = vpop.f32.mrf.mxu0  ;;  %17453 = vmatmul.mubr.msk.f32.gmra.mxu1 %vm1293_vm3, %v17382_v31  ;;  %17519 = vmatprep.subr.mxu1 %v14538_v48  ;;  %v25555_v31 = vld [vmem:[#allocation26_spill] sm:$0xff] }
 0xd87   :  { %17520 = vmatpush3.msra.mxu1 %v14538_v48  ;;  %v3594_v48 = vadd.f32 %v25555_v31, %v25554_v13 }
 0xd88   :  { %v4790_v0 = vpop.f32.mrf.mxu0  ;;  %17521 = vmatprep.subr.mxu1 %v14537_v19 }
 0xd89   :  { %17455 = vmatprep.mubr.msk.f32.mxu1 %vm1293_vm3, %v4790_v0  ;;  %17522 = vmatpush3.msra.mxu1 %v14537_v19 }
 0xd8a   :  { %v17432_v37 = vpop.f32.mrf.mxu0  ;;  %17456 = vmatmul.mubr.msk.f32.gmra.mxu1 %vm1293_vm3, %v17429_v55  ;;  %v25557_v55 = vld [vmem:[#allocation28_spill] sm:$0xff] }
 0xd8b   :  { %v3604_v0 = vadd.f32 %v25557_v55, %v25556_v17 }
 0xd8c   :  { %v4800_v54 = vpop.f32.mrf.mxu0 }
 0xd8d   :  { %17458 = vmatprep.mubr.msk.f32.mxu1 %vm1293_vm3, %v4800_v54 }
 0xd8e   :  { %v17435_v47 = vpop.f32.mrf.mxu0  ;;  %17459 = vmatmul.mubr.msk.f32.gmra.mxu1 %vm1293_vm3, %v17432_v37 }
 0xd90   :  { %v4810_v62 = vpop.f32.mrf.mxu0 }
 0xd91   :  { %17461 = vmatprep.mubr.msk.f32.mxu1 %vm1293_vm3, %v4810_v62  ;;  %v25559_v62 = vld [vmem:[#allocation30_spill] sm:$0xff] }
 0xd92   :  { %v17438_v22 = vpop.f32.mrf.mxu0  ;;  %17462 = vmatmul.mubr.msk.f32.gmra.mxu1 %vm1293_vm3, %v17435_v47  ;;  %v25558_v47 = vld [vmem:[#allocation42_spill] sm:$0xff] }
 0xd94   :  { %v4820_v14 = vpop.f32.mrf.mxu0 }
 0xd95   :  { %17464 = vmatprep.mubr.msk.f32.mxu1 %vm1293_vm3, %v4820_v14 }
 0xd96   :  { %17465 = vmatmul.mubr.msk.f32.gmra.mxu1 %vm1293_vm3, %v17438_v22  ;;  %v21987_v23 = vpop.f32.mrf.mxu0  ;;  %v3614_v22 = vadd.f32 %v25559_v62, %v25558_v47 }
 0xd97   :  { %17523 = vmatprep.mubr.msk.f32.mxu1 %vm252_vm2, %v20389_v63 }
 0xd98   :  { %v5116_v50 = vpop.f32.mrf.mxu0 }
 0xd9a   :  { %v21991_v4 = vpop.f32.mrf.mxu0  ;;  %17524 = vmatmul.mubr.msk.f32.vlgmr.msra.gmra.mxu1 %vm252_vm2, %v20400_v40 }
 0xd9b   :  { %17526 = vmatprep.mubr.msk.f32.mxu1 %vm252_vm2, %v20404_v60 }
 0xd9c   :  { %v21997_v25 = vpop.f32.mrf.mxu0 }
 0xd9e   :  { %v21999_v26 = vpop.f32.mrf.mxu0  ;;  %17527 = vmatmul.mubr.msk.f32.gmra.mxu1 %vm252_vm2, %v20421_v20 }
 0xd9f   :  { %17529 = vmatprep.mubr.msk.f32.mxu1 %vm252_vm2, %v20426_v59 }
 0xda0   :  { %v22005_v63 = vpop.f32.mrf.mxu0 }
 0xda2   :  { %v22007_v15 = vpop.f32.mrf.mxu0  ;;  %17530 = vmatmul.mubr.msk.f32.gmra.mxu1 %vm252_vm2, %v20443_v12 }
 0xda3   :  { %17532 = vmatprep.mubr.msk.f32.mxu1 %vm252_vm2, %v20447_v56 }
 0xda4   :  { %v22013_v40 = vpop.f32.mrf.mxu0 }
 0xda6   :  { %v22015_v60 = vpop.f32.mrf.mxu0  ;;  %17533 = vmatmul.mubr.msk.f32.gmra.mxu1 %vm252_vm2, %v25519_v7 }
 0xda7   :  { %17535 = vmatprep.mubr.msk.f32.mxu1 %vm252_vm2, %v25520_v57 }
 0xda8   :  { %v22021_v20 = vpop.f32.mrf.mxu0 }
 0xdaa   :  { %v22023_v59 = vpop.f32.mrf.mxu0  ;;  %17536 = vmatmul.mubr.msk.f32.gmra.mxu1 %vm252_vm2, %v25521_v46 }
 0xdab   :  { %17538 = vmatprep.mubr.msk.f32.mxu1 %vm252_vm2, %v25522_v52 }
 0xdac   :  { %v22029_v12 = vpop.f32.mrf.mxu0 }
 0xdae   :  { %v22031_v56 = vpop.f32.mrf.mxu0  ;;  %17539 = vmatmul.mubr.msk.f32.gmra.mxu1 %vm252_vm2, %v25523_v32 }
 0xdaf   :  { %17541 = vmatprep.mubr.msk.f32.mxu1 %vm252_vm2, %v25524_v41 }
 0xdb0   :  { %v22037_v7 = vpop.f32.mrf.mxu0 }
 0xdb2   :  { %v22039_v57 = vpop.f32.mrf.mxu0  ;;  %17542 = vmatmul.mubr.msk.f32.gmra.mxu1 %vm252_vm2, %v25525_v42 }
 0xdb3   :  { %17544 = vmatprep.mubr.msk.f32.mxu1 %vm252_vm2, %v25526_v9 }
 0xdb4   :  { %v22045_v46 = vpop.f32.mrf.mxu0 }
 0xdb6   :  { %17545 = vmatmul.mubr.msk.f32.gmra.mxu1 %vm252_vm2, %v25527_v28  ;;  %v17565_v52 = vpop.f32.mrf.mxu0 }
 0xdb7   :  { %17603 = vmatprep.mubr.msk.f32.mxu1 %vm1293_vm3, %v5116_v50 }
 0xdb8   :  { %v5424_v32 = vpop.f32.mrf.mxu0 }
 0xdba   :  { %v17568_v41 = vpop.f32.mrf.mxu0 }
 0xdbc   :  { %v5434_v6 = vpop.f32.mrf.mxu0 }
 0xdbe   :  { %v17571_v11 = vpop.f32.mrf.mxu0 }
 0xdc0   :  { %v5444_v58 = vpop.f32.mrf.mxu0 }
 0xdc2   :  { %v17574_v1 = vpop.f32.mrf.mxu0 }
 0xdc3   :  { %17615 = vmatprep.subr.mxu0 %v17574_v1 }
 0xdc4   :  { %v5454_v39 = vpop.f32.mrf.mxu0  ;;  %17616 = vmatpush3.msra.mxu0 %v17574_v1 }
 0xdc5   :  { %17617 = vmatprep.subr.mxu0 %v5454_v39 }
 0xdc6   :  { %v22050_v42 = vpop.f32.mrf.mxu0  ;;  %17618 = vmatpush3.msra.mxu0 %v5454_v39 }
 0xdc7   :  { %17619 = vmatprep.subr.mxu0 %v17571_v11 }
 0xdc8   :  { %v22052_v9 = vpop.f32.mrf.mxu0  ;;  %17620 = vmatpush3.msra.mxu0 %v17571_v11 }
 0xdc9   :  { %17621 = vmatprep.subr.mxu0 %v5444_v58 }
 0xdca   :  { %v22054_v28 = vpop.f32.mrf.mxu0  ;;  %17622 = vmatpush3.msra.mxu0 %v5444_v58 }
 0xdcb   :  { %17623 = vmatprep.subr.mxu0 %v17568_v41 }
 0xdcc   :  { %v22056_v2 = vpop.f32.mrf.mxu0  ;;  %17624 = vmatpush3.msra.mxu0 %v17568_v41  ;;  %v25561_v41 = vld [vmem:[#allocation32_spill] sm:$0xff] }
 0xdcd   :  { %17625 = vmatprep.subr.mxu0 %v5434_v6 }
 0xdce   :  { %v22058_v33 = vpop.f32.mrf.mxu0  ;;  %17626 = vmatpush3.msra.mxu0 %v5434_v6 }
 0xdcf   :  { %17627 = vmatprep.subr.mxu0 %v17565_v52 }
 0xdd0   :  { %v22060_v49 = vpop.f32.mrf.mxu0  ;;  %17628 = vmatpush3.msra.mxu0 %v17565_v52 }
 0xdd1   :  { %17629 = vmatprep.subr.mxu0 %v5424_v32 }
 0xdd2   :  { %v22062_v45 = vpop.f32.mrf.mxu0  ;;  %17630 = vmatpush3.msra.mxu0 %v5424_v32  ;;  %v25560_v32 = vld [vmem:[#allocation44_spill] sm:$0xff] }
 0xdd3   :  { %17671 = vmatprep.subr.mxu0 %v22062_v45  ;;  %v3624_v6 = vadd.f32 %v25561_v41, %v25560_v32 }
 0xe3a   :  { %v17445_v3 = vpop.f32.mrf.mxu1 }
 0xe3b   :  { %v22067_v44 = vadd.f32 %v17445_v3, %v3554_v8 }
 0xe3c   :  { %v22069_v38 = vpop.f32.mrf.mxu1 }
 0xe3e   :  { %v17448_v43 = vpop.f32.mrf.mxu1 }
 0xe3f   :  { %v22073_v30 = vadd.f32 %v17448_v43, %v3564_v18 }
 0xe40   :  { %v22075_v16 = vpop.f32.mrf.mxu1 }
 0xe42   :  { %v17451_v36 = vpop.f32.mrf.mxu1 }
 0xe43   :  { %v22079_v24 = vadd.f32 %v17451_v36, %v3574_v35 }
 0xe44   :  { %v22081_v51 = vpop.f32.mrf.mxu1 }
 0xe46   :  { %v17454_v53 = vpop.f32.mrf.mxu1 }
 0xe47   :  { %v22085_v5 = vadd.f32 %v17454_v53, %v3584_v61 }
 0xe48   :  { %v22087_v29 = vpop.f32.mrf.mxu1 }
 0xe4a   :  { %v17457_v34 = vpop.f32.mrf.mxu1 }
 0xe4b   :  { %v22091_v19 = vadd.f32 %v17457_v34, %v3594_v48 }
 0xe4c   :  { %v22093_v21 = vpop.f32.mrf.mxu1 }
 0xe4e   :  { %v17460_v37 = vpop.f32.mrf.mxu1 }
 0xe4f   :  { %v22097_v54 = vadd.f32 %v17460_v37, %v3604_v0 }
 0xe50   :  { %v22099_v27 = vpop.f32.mrf.mxu1 }
 0xe52   :  { %v17463_v14 = vpop.f32.mrf.mxu1 }
 0xe53   :  { %v22103_v50 = vadd.f32 %v17463_v14, %v3614_v22 }
 0xe54   :  { %v22105_v52 = vpop.f32.mrf.mxu1 }
 0xe56   :  { %v17466_v11 = vpop.f32.mrf.mxu1 }
 0xe57   :  { %v22109_v58 = vadd.f32 %v17466_v11, %v3624_v6 }
 0xe58   :  { %v22111_v1 = vpop.f32.mrf.mxu1 }
 0xe5a   :  { %v17525_v39 = vpop.f32.mrf.mxu1 }
 0xe5c   :  { %v5270_v8 = vpop.f32.mrf.mxu1 }
 0xe5e   :  { %v17528_v3 = vpop.f32.mrf.mxu1 }
 0xe60   :  { %v5280_v18 = vpop.f32.mrf.mxu1 }
 0xe62   :  { %v17531_v43 = vpop.f32.mrf.mxu1 }
 0xe64   :  { %v5290_v35 = vpop.f32.mrf.mxu1 }
 0xe66   :  { %v17534_v36 = vpop.f32.mrf.mxu1 }
 0xe67   :  { %17587 = vmatprep.subr.msk.mxu1 %vm1293_vm3, %v17534_v36 }
 0xe68   :  { %v5300_v10 = vpop.f32.mrf.mxu1  ;;  %17588 = vmatpush3.xpose.msk.msra.mxu1 %vm1293_vm3, %v17534_v36 }
 0xe69   :  { %17589 = vmatprep.subr.msk.mxu1 %vm1293_vm3, %v5300_v10 }
 0xe6a   :  { %v17537_v61 = vpop.f32.mrf.mxu1 }
 0xe6c   :  { %17590 = vmatpush3.xpose.msk.msra.mxu1 %vm1293_vm3, %v5300_v10  ;;  %v5310_v53 = vpop.f32.mrf.mxu1 }
 0xe6d   :  { %17591 = vmatprep.subr.msk.mxu1 %vm1293_vm3, %v17531_v43 }
 0xe6e   :  { %v17540_v13 = vpop.f32.mrf.mxu1 }
 0xe70   :  { %17592 = vmatpush3.xpose.msk.msra.mxu1 %vm1293_vm3, %v17531_v43  ;;  %v5320_v31 = vpop.f32.mrf.mxu1 }
 0xe71   :  { %17593 = vmatprep.subr.msk.mxu1 %vm1293_vm3, %v5290_v35 }
 0xe72   :  { %v17543_v48 = vpop.f32.mrf.mxu1 }
 0xe74   :  { %17594 = vmatpush3.xpose.msk.msra.mxu1 %vm1293_vm3, %v5290_v35  ;;  %v5330_v34 = vpop.f32.mrf.mxu1 }
 0xe75   :  { %17595 = vmatprep.subr.msk.mxu1 %vm1293_vm3, %v17528_v3 }
 0xe76   :  { %v17546_v17 = vpop.f32.mrf.mxu1 }
 0xe78   :  { %17596 = vmatpush3.xpose.msk.msra.mxu1 %vm1293_vm3, %v17528_v3  ;;  %v5340_v55 = vpop.f32.mrf.mxu1 }
 0xe79   :  { %17597 = vmatprep.subr.msk.mxu1 %vm1293_vm3, %v5280_v18 }
 0xe7c   :  { %17598 = vmatpush3.xpose.msk.msra.mxu1 %vm1293_vm3, %v5280_v18 }
 0xe7d   :  { %17599 = vmatprep.subr.msk.mxu1 %vm1293_vm3, %v17525_v39 }
 0xe80   :  { %17600 = vmatpush3.xpose.msk.msra.mxu1 %vm1293_vm3, %v17525_v39 }
 0xe81   :  { %17601 = vmatprep.subr.msk.mxu1 %vm1293_vm3, %v5270_v8 }
 0xe84   :  { %17602 = vmatpush3.xpose.msk.msra.mxu1 %vm1293_vm3, %v5270_v8 }
 0xe85   :  { %17643 = vmatprep.subr.msk.mxu1 %vm1293_vm3, %v17546_v17 }
 0xe87   :  { %17604 = vmatmul.mubr.msk.f32.vlgmr.msra.gmra.mxu1 %vm1293_vm3, %v21987_v23 }
 0xe88   :  { %17606 = vmatprep.mubr.msk.f32.mxu1 %vm1293_vm3, %v21997_v25  ;;  %17644 = vmatpush3.xpose.msk.msra.mxu1 %vm1293_vm3, %v17546_v17 }
 0xe89   :  { %17645 = vmatprep.subr.msk.mxu1 %vm1293_vm3, %v5340_v55 }
 0xe8b   :  { %17607 = vmatmul.mubr.msk.f32.gmra.mxu1 %vm1293_vm3, %v21991_v4 }
 0xe8c   :  { %17609 = vmatprep.mubr.msk.f32.mxu1 %vm1293_vm3, %v22005_v63  ;;  %17646 = vmatpush3.xpose.msk.msra.mxu1 %vm1293_vm3, %v5340_v55 }
 0xe8d   :  { %17647 = vmatprep.subr.msk.mxu1 %vm1293_vm3, %v17543_v48 }
 0xe8f   :  { %17610 = vmatmul.mubr.msk.f32.gmra.mxu1 %vm1293_vm3, %v21999_v26 }
 0xe90   :  { %17612 = vmatprep.mubr.msk.f32.mxu1 %vm1293_vm3, %v22013_v40  ;;  %17648 = vmatpush3.xpose.msk.msra.mxu1 %vm1293_vm3, %v17543_v48 }
 0xe91   :  { %17649 = vmatprep.subr.msk.mxu1 %vm1293_vm3, %v5330_v34 }
 0xe93   :  { %17613 = vmatmul.mubr.msk.f32.gmra.mxu1 %vm1293_vm3, %v22007_v15 }
 0xe94   :  { %17650 = vmatpush3.xpose.msk.msra.mxu1 %vm1293_vm3, %v5330_v34  ;;  %17659 = vmatprep.mubr.msk.f32.mxu1 %vm1293_vm3, %v22021_v20 }
 0xe95   :  { %17651 = vmatprep.subr.msk.mxu1 %vm1293_vm3, %v17540_v13 }
 0xe98   :  { %17652 = vmatpush3.xpose.msk.msra.mxu1 %vm1293_vm3, %v17540_v13 }
 0xe99   :  { %17653 = vmatprep.subr.msk.mxu1 %vm1293_vm3, %v5320_v31 }
 0xe9c   :  { %17654 = vmatpush3.xpose.msk.msra.mxu1 %vm1293_vm3, %v5320_v31 }
 0xe9d   :  { %17655 = vmatprep.subr.msk.mxu1 %vm1293_vm3, %v17537_v61 }
 0xea0   :  { %17656 = vmatpush3.xpose.msk.msra.mxu1 %vm1293_vm3, %v17537_v61 }
 0xea1   :  { %17657 = vmatprep.subr.msk.mxu1 %vm1293_vm3, %v5310_v53 }
 0xea4   :  { %17658 = vmatpush3.xpose.msk.msra.mxu1 %vm1293_vm3, %v5310_v53 }
 0xea7   :  { %17660 = vmatmul.mubr.msk.f32.vlgmr.msra.gmra.mxu1 %vm1293_vm3, %v22015_v60 }
 0xea8   :  { %17662 = vmatprep.mubr.msk.f32.mxu1 %vm1293_vm3, %v22029_v12 }
 0xeab   :  { %17663 = vmatmul.mubr.msk.f32.gmra.mxu1 %vm1293_vm3, %v22023_v59 }
 0xeac   :  { %17665 = vmatprep.mubr.msk.f32.mxu1 %vm1293_vm3, %v22037_v7 }
 0xeaf   :  { %17666 = vmatmul.mubr.msk.f32.gmra.mxu1 %vm1293_vm3, %v22031_v56 }
 0xeb0   :  { %17668 = vmatprep.mubr.msk.f32.mxu1 %vm1293_vm3, %v22045_v46 }
 0xeb3   :  { %17669 = vmatmul.mubr.msk.f32.gmra.mxu1 %vm1293_vm3, %v22039_v57 }
 0xf47   :  { %v17605_v23 = vpop.f32.mrf.mxu1 }
 0xf48   :  { %v5659_v4 = vsel %vm252_vm2, %v17605_v23, -inf }
 0xf49   :  { %5660 = vmax.xlane.f32.xlu1 %v5659_v4  ;;  %v5617_v25 = vpop.f32.mrf.mxu1 }
 0xf4a   :  { %v5656_v26 = vsel %vm252_vm2, %v5617_v25, -inf }
 0xf4b   :  { %5657 = vmax.xlane.f32.xlu0 %v5656_v26  ;;  %v17608_v63 = vpop.f32.mrf.mxu1 }
 0xf4c   :  { %v5665_v15 = vsel %vm252_vm2, %v17608_v63, -inf }
 0xf4d   :  { %5666 = vmax.xlane.f32.xlu1 %v5665_v15  ;;  %v5627_v40 = vpop.f32.mrf.mxu1 }
 0xf4e   :  { %v5662_v60 = vsel %vm252_vm2, %v5627_v40, -inf }
 0xf4f   :  { %5663 = vmax.xlane.f32.xlu0 %v5662_v60  ;;  %v17611_v20 = vpop.f32.mrf.mxu1 }
 0xf50   :  { %v5671_v59 = vsel %vm252_vm2, %v17611_v20, -inf }
 0xf51   :  { %5672 = vmax.xlane.f32.xlu1 %v5671_v59  ;;  %v5637_v12 = vpop.f32.mrf.mxu1 }
 0xf52   :  { %v5668_v56 = vsel %vm252_vm2, %v5637_v12, -inf }
 0xf53   :  { %5669 = vmax.xlane.f32.xlu0 %v5668_v56  ;;  %v17614_v7 = vpop.f32.mrf.mxu1 }
 0xf54   :  { %v5677_v57 = vsel %vm252_vm2, %v17614_v7, -inf }
 0xf55   :  { %5678 = vmax.xlane.f32.xlu1 %v5677_v57  ;;  %v5647_v46 = vpop.f32.mrf.mxu1 }
 0xf56   :  { %v5674_v0 = vsel %vm252_vm2, %v5647_v46, -inf }
 0xf57   :  { %5675 = vmax.xlane.f32.xlu0 %v5674_v0 }
 0xf67   :  { %v22183_v37 = vpop.f32.mrf.mxu1 }
 0xf68   :  { %v6029_v47 = vsel %vm252_vm2, %v22183_v37, -inf }
 0xf69   :  { %6030 = vmax.xlane.f32.xlu1 %v6029_v47  ;;  %v22187_v62 = vpop.f32.mrf.mxu1 }
 0xf6a   :  { %v6026_v22 = vsel %vm252_vm2, %v22187_v62, -inf }
 0xf6b   :  { %v22191_v14 = vpop.f32.mrf.mxu1  ;;  %6027 = vmax.xlane.f32.xlu0 %v6026_v22 }
 0xf6c   :  { %v6035_v32 = vsel %vm252_vm2, %v22191_v14, -inf }
 0xf6d   :  { %6036 = vmax.xlane.f32.xlu1 %v6035_v32  ;;  %v22195_v41 = vpop.f32.mrf.mxu1 }
 0xf6e   :  { %v6032_v6 = vsel %vm252_vm2, %v22195_v41, -inf }
 0xf6f   :  { %v22199_v11 = vpop.f32.mrf.mxu1  ;;  %6033 = vmax.xlane.f32.xlu0 %v6032_v6 }
 0xf70   :  { %v6041_v39 = vsel %vm252_vm2, %v22199_v11, -inf }
 0xf71   :  { %6042 = vmax.xlane.f32.xlu1 %v6041_v39  ;;  %v22203_v8 = vpop.f32.mrf.mxu1 }
 0xf72   :  { %v6038_v3 = vsel %vm252_vm2, %v22203_v8, -inf }
 0xf73   :  { %v22207_v18 = vpop.f32.mrf.mxu1  ;;  %6039 = vmax.xlane.f32.xlu0 %v6038_v3 }
 0xf74   :  { %v6047_v43 = vsel %vm252_vm2, %v22207_v18, -inf }
 0xf75   :  { %6048 = vmax.xlane.f32.xlu1 %v6047_v43  ;;  %v22211_v35 = vpop.f32.mrf.mxu1 }
 0xf76   :  { %v6044_v36 = vsel %vm252_vm2, %v22211_v35, -inf }
 0xf77   :  { %6045 = vmax.xlane.f32.xlu0 %v6044_v36 }
 0xfd2   :  { %v5661_v10 = vpop.xlane.xlu1 %5660 }
 0xfd3   :  { %v5681_v61 = vsub.f32 %v17605_v23, %v5661_v10 }
 0xfd4   :  { %v5658_v53 = vpop.xlane.xlu0 %5657 }
 0xfd5   :  { %v5690_v13 = vmul.f32 1.442695, %v5681_v61  ;;  %v5680_v31 = vsub.f32 %v5617_v25, %v5658_v53 }
 0xfd6   :  { %v5667_v48 = vpop.xlane.xlu1 %5666 }
 0xfd7   :  { %19273 = vpow2.f32 %v5690_v13  ;;  %v5688_v34 = vmul.f32 1.442695, %v5680_v31  ;;  %v5683_v17 = vsub.f32 %v17608_v63, %v5667_v48 }
 0xfd8   :  { %v5664_v55 = vpop.xlane.xlu0 %5663 }
 0xfd9   :  { %19275 = vpow2.f32 %v5688_v34  ;;  %v5694_v4 = vmul.f32 1.442695, %v5683_v17  ;;  %v5682_v26 = vsub.f32 %v5627_v40, %v5664_v55 }
 0xfda   :  { %v5673_v15 = vpop.xlane.xlu1 %5672 }
 0xfdb   :  { %19277 = vpow2.f32 %v5694_v4  ;;  %v5692_v60 = vmul.f32 1.442695, %v5682_v26  ;;  %v5685_v59 = vsub.f32 %v17611_v20, %v5673_v15 }
 0xfdc   :  { %v5670_v56 = vpop.xlane.xlu0 %5669 }
 0xfdd   :  { %19279 = vpow2.f32 %v5692_v60  ;;  %v5698_v57 = vmul.f32 1.442695, %v5685_v59  ;;  %v5684_v0 = vsub.f32 %v5637_v12, %v5670_v56 }
 0xfde   :  { %v5679_v23 = vpop.xlane.xlu1 %5678 }
 0xfdf   :  { %19281 = vpow2.f32 %v5698_v57  ;;  %v5696_v47 = vmul.f32 1.442695, %v5684_v0  ;;  %v5687_v25 = vsub.f32 %v17614_v7, %v5679_v23 }
 0xfe0   :  { %v5676_v22 = vpop.xlane.xlu0 %5675 }
 0xfe1   :  { %19283 = vpow2.f32 %v5696_v47  ;;  %v5702_v32 = vmul.f32 1.442695, %v5687_v25  ;;  %v5686_v63 = vsub.f32 %v5647_v46, %v5676_v22 }
 0xfe3   :  { %19285 = vpow2.f32 %v5702_v32  ;;  %v5700_v6 = vmul.f32 1.442695, %v5686_v63 }
 0xfe4   :  { %v22215_v39 = vpop.eup %19273 }
 0xfe5   :  { %19287 = vpow2.f32 %v5700_v6  ;;  %v5707_v40 = vsel %vm252_vm2, %v22215_v39, 0.0 }
 0xfe6   :  { %v22219_v20 = vpop.eup %19275  ;;  %5708 = vadd.xlane.f32.xlu1 %v5707_v40 }
 0xfe7   :  { %v5704_v12 = vsel %vm252_vm2, %v22219_v20, 0.0 }
 0xfe8   :  { %v22223_v3 = vpop.eup %19277  ;;  %5705 = vadd.xlane.f32.xlu0 %v5704_v12 }
 0xfe9   :  { %v5713_v7 = vsel %vm252_vm2, %v22223_v3, 0.0 }
 0xfea   :  { %v22227_v46 = vpop.eup %19279  ;;  %5714 = vadd.xlane.f32.xlu1 %v5713_v7 }
 0xfeb   :  { %v5710_v43 = vsel %vm252_vm2, %v22227_v46, 0.0 }
 0xfec   :  { %v22231_v36 = vpop.eup %19281  ;;  %5711 = vadd.xlane.f32.xlu0 %v5710_v43 }
 0xfed   :  { %v5719_v10 = vsel %vm252_vm2, %v22231_v36, 0.0 }
 0xfee   :  { %v22235_v61 = vpop.eup %19283  ;;  %5720 = vadd.xlane.f32.xlu1 %v5719_v10 }
 0xfef   :  { %v5716_v53 = vsel %vm252_vm2, %v22235_v61, 0.0 }
 0xff0   :  { %v22239_v13 = vpop.eup %19285  ;;  %5717 = vadd.xlane.f32.xlu0 %v5716_v53 }
 0xff1   :  { %v5725_v31 = vsel %vm252_vm2, %v22239_v13, 0.0 }
 0xff2   :  { %v22243_v48 = vpop.eup %19287  ;;  %v6031_v34 = vpop.xlane.xlu1 %6030  ;;  %5726 = vadd.xlane.f32.xlu1 %v5725_v31 }
 0xff3   :  { %v6051_v17 = vsub.f32 %v22183_v37, %v6031_v34  ;;  %v5722_v55 = vsel %vm252_vm2, %v22243_v48, 0.0 }
 0xff4   :  { %5723 = vadd.xlane.f32.xlu0 %v5722_v55  ;;  %v6028_v4 = vpop.xlane.xlu0 %6027 }
 0xff5   :  { %v6060_v26 = vmul.f32 1.442695, %v6051_v17  ;;  %v6050_v15 = vsub.f32 %v22187_v62, %v6028_v4 }
 0xff6   :  { %v6037_v60 = vpop.xlane.xlu1 %6036 }
 0xff7   :  { %19289 = vpow2.f32 %v6060_v26  ;;  %v6058_v59 = vmul.f32 1.442695, %v6050_v15  ;;  %v6053_v56 = vsub.f32 %v22191_v14, %v6037_v60 }
 0xff8   :  { %v6034_v57 = vpop.xlane.xlu0 %6033 }
 0xff9   :  { %19291 = vpow2.f32 %v6058_v59  ;;  %v6064_v0 = vmul.f32 1.442695, %v6053_v56  ;;  %v6052_v23 = vsub.f32 %v22195_v41, %v6034_v57 }
 0xffa   :  { %v6043_v47 = vpop.xlane.xlu1 %6042 }
 0xffb   :  { %19293 = vpow2.f32 %v6064_v0  ;;  %v6062_v37 = vmul.f32 1.442695, %v6052_v23  ;;  %v6055_v25 = vsub.f32 %v22199_v11, %v6043_v47 }
 0xffc   :  { %v6040_v22 = vpop.xlane.xlu0 %6039 }
 0xffd   :  { %19295 = vpow2.f32 %v6062_v37  ;;  %v6068_v32 = vmul.f32 1.442695, %v6055_v25  ;;  %v6054_v62 = vsub.f32 %v22203_v8, %v6040_v22 }
 0xffe   :  { %v6049_v63 = vpop.xlane.xlu1 %6048 }
 0xfff   :  { %19297 = vpow2.f32 %v6068_v32  ;;  %v6066_v6 = vmul.f32 1.442695, %v6054_v62  ;;  %v6057_v14 = vsub.f32 %v22207_v18, %v6049_v63 }
0x1000   :  { %v6046_v40 = vpop.xlane.xlu0 %6045 }
0x1001   :  { %19299 = vpow2.f32 %v6066_v6  ;;  %v6072_v12 = vmul.f32 1.442695, %v6057_v14  ;;  %v6056_v41 = vsub.f32 %v22211_v35, %v6046_v40 }
0x1003   :  { %19301 = vpow2.f32 %v6072_v12  ;;  %v6070_v7 = vmul.f32 1.442695, %v6056_v41  ;;  %v5494_v12 = vpop.f32.mrf.mxu0 }
0x1004   :  { %v22255_v43 = vpop.eup %19289 }
0x1005   :  { %19303 = vpow2.f32 %v6070_v7  ;;  %v6077_v11 = vsel %vm252_vm2, %v22255_v43, 0.0 }
0x1006   :  { %v22259_v10 = vpop.eup %19291  ;;  %6078 = vadd.xlane.f32.xlu1 %v6077_v11 }
0x1007   :  { %v6074_v8 = vsel %vm252_vm2, %v22259_v10, 0.0 }
0x1008   :  { %v22263_v18 = vpop.eup %19293  ;;  %6075 = vadd.xlane.f32.xlu0 %v6074_v8 }
0x1009   :  { %v6083_v35 = vsel %vm252_vm2, %v22263_v18, 0.0 }
0x100a   :  { %v22267_v53 = vpop.eup %19295  ;;  %6084 = vadd.xlane.f32.xlu1 %v6083_v35 }
0x100b   :  { %v6080_v31 = vsel %vm252_vm2, %v22267_v53, 0.0 }
0x100c   :  { %v22271_v34 = vpop.eup %19297  ;;  %6081 = vadd.xlane.f32.xlu0 %v6080_v31 }
0x100d   :  { %v6089_v17 = vsel %vm252_vm2, %v22271_v34, 0.0 }
0x100e   :  { %v22275_v55 = vpop.eup %19299  ;;  %6090 = vadd.xlane.f32.xlu1 %v6089_v17 }
0x100f   :  { %v6086_v4 = vsel %vm252_vm2, %v22275_v55, 0.0 }
0x1010   :  { %v22279_v26 = vpop.eup %19301  ;;  %6087 = vadd.xlane.f32.xlu0 %v6086_v4 }
0x1011   :  { %v6095_v15 = vsel %vm252_vm2, %v22279_v26, 0.0 }
0x1012   :  { %v22283_v60 = vpop.eup %19303  ;;  %6096 = vadd.xlane.f32.xlu1 %v6095_v15 }
0x1013   :  { %v6092_v59 = vsel %vm252_vm2, %v22283_v60, 0.0 }
0x1014   :  { %6093 = vadd.xlane.f32.xlu0 %v6092_v59  ;;  %v14633_v59 = vld [vmem:[%s25422_s5 + $0x30] sm:$0xff] }
0x106f   :  { %v5709_v56 = vpop.xlane.xlu1 %5708 }
0x1070   :  { %19305 = vrcp.f32 %v5709_v56 }
0x1071   :  { %v5706_v57 = vpop.xlane.xlu0 %5705 }
0x1072   :  { %19307 = vrcp.f32 %v5706_v57 }
0x1073   :  { %v5715_v0 = vpop.xlane.xlu1 %5714 }
0x1074   :  { %19309 = vrcp.f32 %v5715_v0 }
0x1075   :  { %v5712_v23 = vpop.xlane.xlu0 %5711 }
0x1076   :  { %19311 = vrcp.f32 %v5712_v23 }
0x1077   :  { %v5721_v47 = vpop.xlane.xlu1 %5720 }
0x1078   :  { %19313 = vrcp.f32 %v5721_v47 }
0x1079   :  { %v5718_v37 = vpop.xlane.xlu0 %5717 }
0x107a   :  { %19315 = vrcp.f32 %v5718_v37 }
0x107b   :  { %v5727_v25 = vpop.xlane.xlu1 %5726 }
0x107c   :  { %19317 = vrcp.f32 %v5727_v25 }
0x107d   :  { %v5724_v22 = vpop.xlane.xlu0 %5723  ;;  %v19306_v32 = vpop.eup %19305 }
0x107e   :  { %19319 = vrcp.f32 %v5724_v22  ;;  %v5731_v6 = vmul.f32 %v19306_v32, %v22215_v39 }
0x107f   :  { %v19308_v62 = vpop.eup %19307 }
0x1080   :  { %v5729_v63 = vmul.f32 %v19308_v62, %v22219_v20 }
0x1081   :  { %v19310_v14 = vpop.eup %19309 }
0x1082   :  { %17631 = vmatprep.mubr.msk.f32.mxu0 %vm252_vm2, %v5729_v63  ;;  %v5735_v7 = vmul.f32 %v19310_v14, %v22223_v3 }
0x1083   :  { %v19312_v40 = vpop.eup %19311  ;;  %17632 = vmatmul.mubr.msk.f32.vlgmr.msra.gmra.mxu0 %vm252_vm2, %v5731_v6 }
0x1084   :  { %17672 = vmatpush3.msra.mxu0 %v22062_v45  ;;  %v5733_v41 = vmul.f32 %v19312_v40, %v22227_v46 }
0x1085   :  { %17673 = vmatprep.subr.mxu0 %v5494_v12  ;;  %v19314_v11 = vpop.eup %19313 }
0x1086   :  { %17674 = vmatpush3.msra.mxu0 %v5494_v12  ;;  %17634 = vmatprep.mubr.msk.f32.mxu0 %vm252_vm2, %v5733_v41  ;;  %v5739_v45 = vmul.f32 %v19314_v11, %v22231_v36 }
0x1087   :  { %v19316_v20 = vpop.eup %19315  ;;  %17675 = vmatprep.subr.mxu0 %v22058_v33  ;;  %17635 = vmatmul.mubr.msk.f32.gmra.mxu0 %vm252_vm2, %v5735_v7 }
0x1088   :  { %17676 = vmatpush3.msra.mxu0 %v22058_v33  ;;  %v5737_v39 = vmul.f32 %v19316_v20, %v22235_v61 }
0x1089   :  { %17677 = vmatprep.subr.mxu0 %v22060_v49  ;;  %v19318_v46 = vpop.eup %19317 }
0x108a   :  { %17678 = vmatpush3.msra.mxu0 %v22060_v49  ;;  %17637 = vmatprep.mubr.msk.f32.mxu0 %vm252_vm2, %v5737_v39  ;;  %v5743_v61 = vmul.f32 %v19318_v46, %v22239_v13  ;;  %v25562_v39 = vld [vmem:[#allocation34_spill] sm:$0xff] }
0x108b   :  { %v19320_v3 = vpop.eup %19319  ;;  %17679 = vmatprep.subr.mxu0 %v22054_v28  ;;  %17638 = vmatmul.mubr.msk.f32.gmra.mxu0 %vm252_vm2, %v5739_v45  ;;  %v25563_v45 = vld [vmem:[#allocation21_spill] sm:$0xff] }
0x108c   :  { %17680 = vmatpush3.msra.mxu0 %v22054_v28  ;;  %v5741_v33 = vmul.f32 %v19320_v3, %v22243_v48  ;;  %v14634_v28 = vld [vmem:[%s25422_s5 + $0x38] sm:$0xff]  ;;  %v3549_v46 = vadd.f32 %v25563_v45, %v25562_v39 }
0x108d   :  { %17681 = vmatprep.subr.mxu0 %v22056_v2  ;;  %v25578_v39 = vld [vmem:[#allocation39_spill] sm:$0xff] }
0x108e   :  { %17682 = vmatpush3.msra.mxu0 %v22056_v2  ;;  %17640 = vmatprep.mubr.msk.f32.mxu0 %vm252_vm2, %v5741_v33  ;;  %v5025_v33 = vadd.f32 %v22069_v38, %v3549_v46  ;;  %v25579_v45 = vld [vmem:[#allocation27_spill] sm:$0xff] }
0x108f   :  { %17683 = vmatprep.subr.mxu0 %v22050_v42  ;;  %v6079_v49 = vpop.xlane.xlu1 %6078  ;;  %17641 = vmatmul.mubr.msk.f32.gmra.mxu0 %vm252_vm2, %v5743_v61  ;;  %v3589_v46 = vadd.f32 %v25579_v45, %v25578_v39 }
0x1090   :  { %17684 = vmatpush3.msra.mxu0 %v22050_v42  ;;  %19321 = vrcp.f32 %v6079_v49 }
0x1091   :  { %17685 = vmatprep.subr.mxu0 %v22052_v9  ;;  %v6076_v36 = vpop.xlane.xlu0 %6075 }
0x1092   :  { %17686 = vmatpush3.msra.mxu0 %v22052_v9  ;;  %19323 = vrcp.f32 %v6076_v36  ;;  %v25565_v36 = vld [vmem:[#allocation22_spill] sm:$0xff] }
0x1093   :  { %v6085_v2 = vpop.xlane.xlu1 %6084  ;;  %17699 = vmatprep.subr.mxu0 %v14634_v28 }
0x1094   :  { %19325 = vrcp.f32 %v6085_v2 }
0x1095   :  { %v6082_v13 = vpop.xlane.xlu0 %6081 }
0x1096   :  { %19327 = vrcp.f32 %v6082_v13  ;;  %v25566_v13 = vld [vmem:[#allocation6_spill] sm:$0xff] }
0x1097   :  { %v6091_v48 = vpop.xlane.xlu1 %6090 }
0x1098   :  { %19329 = vrcp.f32 %v6091_v48 }
0x1099   :  { %v6088_v8 = vpop.xlane.xlu0 %6087 }
0x109a   :  { %19331 = vrcp.f32 %v6088_v8 }
0x109b   :  { %v6097_v42 = vpop.xlane.xlu1 %6096 }
0x109c   :  { %19333 = vrcp.f32 %v6097_v42 }
0x109d   :  { %v6094_v35 = vpop.xlane.xlu0 %6093  ;;  %v19322_v31 = vpop.eup %19321 }
0x109e   :  { %19335 = vrcp.f32 %v6094_v35  ;;  %v6101_v9 = vmul.f32 %v19322_v31, %v22255_v43  ;;  %v25567_v31 = vld [vmem:[#allocation5_spill] sm:$0xff] }
0x109f   :  { %v19324_v17 = vpop.eup %19323 }
0x10a0   :  { %v6099_v4 = vmul.f32 %v19324_v17, %v22259_v10 }
0x10a1   :  { %v19326_v15 = vpop.eup %19325 }
0x10a2   :  { %17687 = vmatprep.mubr.msk.f32.mxu0 %vm252_vm2, %v6099_v4  ;;  %v6105_v0 = vmul.f32 %v19326_v15, %v22263_v18  ;;  %v25569_v15 = vld [vmem:[#allocation23_spill] sm:$0xff] }
0x10a3   :  { %v19328_v56 = vpop.eup %19327  ;;  %17688 = vmatmul.mubr.msk.f32.vlgmr.msra.gmra.mxu0 %vm252_vm2, %v6101_v9  ;;  %v25568_v9 = vld [vmem:[#allocation36_spill] sm:$0xff] }
0x10a4   :  { %v6103_v57 = vmul.f32 %v19328_v56, %v22267_v53  ;;  %17700 = vmatpush3.msra.mxu0 %v14634_v28  ;;  %v25564_v28 = vld [vmem:[#allocation35_spill] sm:$0xff]  ;;  %v25570_v56 = vld [vmem:[#allocation8_spill] sm:$0xff] }
0x10a5   :  { %17701 = vmatprep.subr.mxu0 %v14633_v59  ;;  %v19330_v23 = vpop.eup %19329  ;;  %v3559_v2 = vadd.f32 %v25565_v36, %v25564_v28  ;;  %v25580_v28 = vld [vmem:[#allocation41_spill] sm:$0xff] }
0x10a6   :  { %17690 = vmatprep.mubr.msk.f32.mxu0 %vm252_vm2, %v6103_v57  ;;  %17702 = vmatpush3.msra.mxu0 %v14633_v59  ;;  %v6109_v47 = vmul.f32 %v19330_v23, %v22271_v34  ;;  %v3569_v59 = vadd.f32 %v25569_v15, %v25568_v9  ;;  %v25581_v36 = vld [vmem:[#allocation29_spill] sm:$0xff]  ;;  %v25584_v9 = vld [vmem:[#allocation43_spill] sm:$0xff] }
0x10a7   :  { %v19332_v43 = vpop.eup %19331  ;;  %17691 = vmatmul.mubr.msk.f32.gmra.mxu0 %vm252_vm2, %v6105_v0  ;;  %v5027_v35 = vadd.f32 %v22075_v16, %v3559_v2  ;;  %v3599_v2 = vadd.f32 %v25581_v36, %v25580_v28  ;;  %v25585_v15 = vld [vmem:[#allocation31_spill] sm:$0xff] }
0x10a8   :  { %v6107_v10 = vmul.f32 %v19332_v43, %v22275_v55  ;;  %v5029_v43 = vadd.f32 %v22081_v51, %v3569_v59  ;;  %v3609_v59 = vadd.f32 %v25585_v15, %v25584_v9 }
0x10a9   :  { %v19334_v37 = vpop.eup %19333 }
0x10aa   :  { %17693 = vmatprep.mubr.msk.f32.mxu0 %vm252_vm2, %v6107_v10  ;;  %v6113_v53 = vmul.f32 %v19334_v37, %v22279_v26 }
0x10ab   :  { %v19336_v25 = vpop.eup %19335  ;;  %17694 = vmatmul.mubr.msk.f32.gmra.mxu0 %vm252_vm2, %v6109_v47 }
0x10ac   :  { %v6111_v18 = vmul.f32 %v19336_v25, %v22283_v60 }
0x10ae   :  { %17696 = vmatprep.mubr.msk.f32.mxu0 %vm252_vm2, %v6111_v18  ;;  %v25572_v18 = vld [vmem:[#allocation37_spill] sm:$0xff] }
0x10af   :  { %17697 = vmatmul.mubr.msk.f32.gmra.mxu0 %vm252_vm2, %v6113_v53  ;;  %v25573_v53 = vld [vmem:[#allocation25_spill] sm:$0xff] }
0x1143   :  { %v17633_v22 = vpop.f32.mrf.mxu0 }
0x1145   :  { %v5834_v32 = vpop.f32.mrf.mxu0 }
0x1146   :  { %17703 = vmatprep.mubr.msk.f32.mxu0 %vm1293_vm3, %v5834_v32  ;;  %v25574_v32 = vld [vmem:[#allocation10_spill] sm:$0xff] }
0x1147   :  { %v17636_v55 = vpop.f32.mrf.mxu0  ;;  %17704 = vmatmul.mubr.msk.f32.vlgmr.msra.gmra.mxu0 %vm1293_vm3, %v17633_v22  ;;  %v3579_v22 = vadd.f32 %v25573_v53, %v25572_v18  ;;  %v25588_v18 = vld [vmem:[#allocation45_spill] sm:$0xff] }
0x1148   :  { %v25589_v53 = vld [vmem:[#allocation33_spill] sm:$0xff] }
0x1149   :  { %v5844_v34 = vpop.f32.mrf.mxu0 }
0x114a   :  { %17706 = vmatprep.mubr.msk.f32.mxu0 %vm1293_vm3, %v5844_v34 }
0x114b   :  { %v17639_v62 = vpop.f32.mrf.mxu0  ;;  %17707 = vmatmul.mubr.msk.f32.gmra.mxu0 %vm1293_vm3, %v17636_v55 }
0x114d   :  { %v5854_v60 = vpop.f32.mrf.mxu0 }
0x114e   :  { %17709 = vmatprep.mubr.msk.f32.mxu0 %vm1293_vm3, %v5854_v60  ;;  %v5031_v60 = vadd.f32 %v22087_v29, %v3579_v22  ;;  %v3619_v22 = vadd.f32 %v25589_v53, %v25588_v18 }
0x114f   :  { %v17642_v26 = vpop.f32.mrf.mxu0  ;;  %17710 = vmatmul.mubr.msk.f32.gmra.mxu0 %vm1293_vm3, %v17639_v62 }
0x1151   :  { %v5864_v63 = vpop.f32.mrf.mxu0 }
0x1152   :  { %17712 = vmatprep.mubr.msk.f32.mxu0 %vm1293_vm3, %v5864_v63 }
0x1153   :  { %17713 = vmatmul.mubr.msk.f32.gmra.mxu0 %vm1293_vm3, %v17642_v26 }
0x1163   :  { %v17689_v6 = vpop.f32.mrf.mxu0 }
0x1165   :  { %v6204_v14 = vpop.f32.mrf.mxu0 }
0x1166   :  { %17715 = vmatprep.mubr.msk.f32.mxu0 %vm1293_vm3, %v6204_v14 }
0x1167   :  { %v17692_v40 = vpop.f32.mrf.mxu0  ;;  %17716 = vmatmul.mubr.msk.f32.gmra.mxu0 %vm1293_vm3, %v17689_v6 }
0x1169   :  { %v6214_v12 = vpop.f32.mrf.mxu0 }
0x116a   :  { %17718 = vmatprep.mubr.msk.f32.mxu0 %vm1293_vm3, %v6214_v12 }
0x116b   :  { %v17695_v41 = vpop.f32.mrf.mxu0  ;;  %17719 = vmatmul.mubr.msk.f32.gmra.mxu0 %vm1293_vm3, %v17692_v40  ;;  %v25576_v40 = vld [vmem:[#allocation12_spill] sm:$0xff] }
0x116d   :  { %v6224_v7 = vpop.f32.mrf.mxu0 }
0x116e   :  { %17721 = vmatprep.mubr.msk.f32.mxu0 %vm1293_vm3, %v6224_v7 }
0x116f   :  { %v17698_v11 = vpop.f32.mrf.mxu0  ;;  %17722 = vmatmul.mubr.msk.f32.gmra.mxu0 %vm1293_vm3, %v17695_v41 }
0x1171   :  { %v6234_v20 = vpop.f32.mrf.mxu0 }
0x1172   :  { %17724 = vmatprep.mubr.msk.f32.mxu0 %vm1293_vm3, %v6234_v20 }
0x1173   :  { %17725 = vmatmul.mubr.msk.f32.gmra.mxu0 %vm1293_vm3, %v17698_v11  ;;  %v25577_v11 = vld [vmem:[#allocation11_spill] sm:$0xff] }
0x1207   :  { %v17705_v3 = vpop.f32.mrf.mxu0 }
0x1208   :  { %v6440_v61 = vadd.f32 %v17705_v3, %v22067_v44 }
0x1209   :  { %v6360_v49 = vpop.f32.mrf.mxu0 }
0x120a   :  { %v22361_v48 = vadd.f32 %v6440_v61, %v25566_v13  ;;  %v6439_v8 = vadd.f32 %v6360_v49, %v5025_v33  ;;  %v5033_v33 = vadd.f32 %v22093_v21, %v3589_v46  ;;  %v25582_v13 = vld [vmem:[#allocation14_spill] sm:$0xff] }
0x120b   :  { %v17708_v42 = vpop.f32.mrf.mxu0 }
0x120c   :  { %v22365_v17 = vadd.f32 %v6439_v8, %v25567_v31  ;;  %v6442_v4 = vadd.f32 %v17708_v42, %v22073_v30  ;;  %v6476_v38 = vsel %vm252_vm2, %v22361_v48, 0.0  ;;  %v25571_v30 = vld [vmem:[#allocation7_spill] sm:$0xff]  ;;  %v5035_v31 = vadd.f32 %v22099_v27, %v3599_v2 }
0x120d   :  { %6477 = vadd.xlane.f32.xlu1 %v6476_v38  ;;  %v6370_v44 = vpop.f32.mrf.mxu0 }
0x120e   :  { %v22373_v57 = vadd.f32 %v6442_v4, %v25570_v56  ;;  %v6441_v0 = vadd.f32 %v6370_v44, %v5027_v35  ;;  %v6473_v16 = vsel %vm252_vm2, %v22365_v17, 0.0  ;;  %v25583_v4 = vld [vmem:[#allocation13_spill] sm:$0xff]  ;;  %v25586_v56 = vld [vmem:[#allocation16_spill] sm:$0xff] }
0x120f   :  { %6474 = vadd.xlane.f32.xlu0 %v6473_v16  ;;  %v17711_v23 = vpop.f32.mrf.mxu0 }
0x1210   :  { %v22379_v10 = vadd.f32 %v6441_v0, %v25571_v30  ;;  %v6444_v47 = vadd.f32 %v17711_v23, %v22079_v24  ;;  %v6482_v37 = vsel %vm252_vm2, %v22373_v57, 0.0  ;;  %v25575_v24 = vld [vmem:[#allocation9_spill] sm:$0xff] }
0x1211   :  { %6483 = vadd.xlane.f32.xlu1 %v6482_v37  ;;  %v6380_v25 = vpop.f32.mrf.mxu0 }
0x1212   :  { %v22387_v55 = vadd.f32 %v6444_v47, %v25574_v32  ;;  %v6443_v34 = vadd.f32 %v6380_v25, %v5029_v43  ;;  %v6479_v51 = vsel %vm252_vm2, %v22379_v10, 0.0  ;;  %v5037_v43 = vadd.f32 %v22105_v52, %v3609_v59  ;;  %v25590_v32 = vld [vmem:[#allocation18_spill] sm:$0xff] }
0x1213   :  { %6480 = vadd.xlane.f32.xlu0 %v6479_v51  ;;  %v17714_v62 = vpop.f32.mrf.mxu0 }
0x1214   :  { %v22393_v26 = vadd.f32 %v6443_v34, %v25575_v24  ;;  %v6446_v63 = vadd.f32 %v17714_v62, %v22085_v5  ;;  %v6488_v6 = vsel %vm252_vm2, %v22387_v55, 0.0 }
0x1215   :  { %6489 = vadd.xlane.f32.xlu1 %v6488_v6  ;;  %v6390_v14 = vpop.f32.mrf.mxu0 }
0x1216   :  { %v22399_v12 = vadd.f32 %v6446_v63, %v25576_v40  ;;  %v6445_v41 = vadd.f32 %v6390_v14, %v5031_v60  ;;  %v6485_v7 = vsel %vm252_vm2, %v22393_v26, 0.0  ;;  %v5039_v60 = vadd.f32 %v22111_v1, %v3619_v22  ;;  %v25592_v40 = vld [vmem:[#allocation20_spill] sm:$0xff] }
0x1217   :  { %6486 = vadd.xlane.f32.xlu0 %v6485_v7 }
0x1218   :  { %v22404_v29 = vadd.f32 %v6445_v41, %v25577_v11  ;;  %v6494_v20 = vsel %vm252_vm2, %v22399_v12, 0.0 }
0x1219   :  { %6495 = vadd.xlane.f32.xlu1 %v6494_v20  ;;  %v25593_v20 = vld [vmem:[#allocation19_spill] sm:$0xff] }
0x121a   :  { %v6491_v5 = vsel %vm252_vm2, %v22404_v29, 0.0 }
0x121b   :  { %6492 = vadd.xlane.f32.xlu0 %v6491_v5 }
0x1227   :  { %v17717_v3 = vpop.f32.mrf.mxu0 }
0x1228   :  { %v6448_v61 = vadd.f32 %v17717_v3, %v22091_v19 }
0x1229   :  { %v6400_v49 = vpop.f32.mrf.mxu0 }
0x122a   :  { %v22417_v8 = vadd.f32 %v6448_v61, %v25582_v13  ;;  %v6447_v42 = vadd.f32 %v6400_v49, %v5033_v33 }
0x122b   :  { %v17720_v35 = vpop.f32.mrf.mxu0 }
0x122c   :  { %v22421_v38 = vadd.f32 %v6447_v42, %v25583_v4  ;;  %v6450_v44 = vadd.f32 %v17720_v35, %v22097_v54  ;;  %v6500_v21 = vsel %vm252_vm2, %v22417_v8, 0.0  ;;  %v25587_v54 = vld [vmem:[#allocation15_spill] sm:$0xff] }
0x122d   :  { %6501 = vadd.xlane.f32.xlu1 %v6500_v21  ;;  %v6410_v19 = vpop.f32.mrf.mxu0 }
0x122e   :  { %v22429_v0 = vadd.f32 %v6450_v44, %v25586_v56  ;;  %v6449_v16 = vadd.f32 %v6410_v19, %v5035_v31  ;;  %v6497_v27 = vsel %vm252_vm2, %v22421_v38, 0.0 }
0x122f   :  { %6498 = vadd.xlane.f32.xlu0 %v6497_v27  ;;  %v17723_v23 = vpop.f32.mrf.mxu0 }
0x1230   :  { %v22435_v30 = vadd.f32 %v6449_v16, %v25587_v54  ;;  %v6452_v47 = vadd.f32 %v17723_v23, %v22103_v50  ;;  %v6506_v37 = vsel %vm252_vm2, %v22429_v0, 0.0  ;;  %v25591_v50 = vld [vmem:[#allocation17_spill] sm:$0xff] }
0x1231   :  { %6507 = vadd.xlane.f32.xlu1 %v6506_v37  ;;  %v6420_v25 = vpop.f32.mrf.mxu0 }
0x1232   :  { %v22443_v34 = vadd.f32 %v6452_v47, %v25590_v32  ;;  %v6451_v51 = vadd.f32 %v6420_v25, %v5037_v43  ;;  %v6503_v52 = vsel %vm252_vm2, %v22435_v30, 0.0 }
0x1233   :  { %6504 = vadd.xlane.f32.xlu0 %v6503_v52  ;;  %v17726_v62 = vpop.f32.mrf.mxu0 }
0x1234   :  { %v22449_v24 = vadd.f32 %v6451_v51, %v25591_v50  ;;  %v6454_v63 = vadd.f32 %v17726_v62, %v22109_v58  ;;  %v6512_v6 = vsel %vm252_vm2, %v22443_v34, 0.0 }
0x1235   :  { %6513 = vadd.xlane.f32.xlu1 %v6512_v6  ;;  %v6430_v14 = vpop.f32.mrf.mxu0  ;;  %v6728_v6 = vld [vmem:[%s25423_s6 + $0x38] sm:$0xff] }
0x1236   :  { %v22455_v41 = vadd.f32 %v6454_v63, %v25592_v40  ;;  %v6453_v7 = vadd.f32 %v6430_v14, %v5039_v60  ;;  %v6509_v11 = vsel %vm252_vm2, %v22449_v24, 0.0  ;;  %17727 = vmatprep.subr.mxu1 %v6728_v6  ;;  %v6727_v14 = vld [vmem:[%s25423_s6 + $0x30] sm:$0xff] }
0x1237   :  { %6510 = vadd.xlane.f32.xlu0 %v6509_v11  ;;  %17728 = vmatpush3.msra.mxu1 %v6728_v6  ;;  %v6726_v11 = vld [vmem:[%s25423_s6 + $0x28] sm:$0xff] }
0x1238   :  { %v22460_v1 = vadd.f32 %v6453_v7, %v25593_v20  ;;  %v6518_v5 = vsel %vm252_vm2, %v22455_v41, 0.0  ;;  %17729 = vmatprep.subr.mxu1 %v6727_v14 }
0x1239   :  { %6519 = vadd.xlane.f32.xlu1 %v6518_v5  ;;  %17730 = vmatpush3.msra.mxu1 %v6727_v14 }
0x123a   :  { %v6515_v58 = vsel %vm252_vm2, %v22460_v1, 0.0  ;;  %17731 = vmatprep.subr.mxu1 %v6726_v11 }
0x123b   :  { %6516 = vadd.xlane.f32.xlu0 %v6515_v58  ;;  %17732 = vmatpush3.msra.mxu1 %v6726_v11 }
0x1296   :  { %v6478_v39 = vpop.xlane.xlu1 %6477 }
0x1297   :  { %v6522_v45 = vmul.f32 0.015625, %v6478_v39  ;;  %v6725_v39 = vld [vmem:[%s25423_s6 + $0x20] sm:$0xff] }
0x1298   :  { %v6475_v46 = vpop.xlane.xlu0 %6474  ;;  %17733 = vmatprep.subr.mxu1 %v6725_v39 }
0x1299   :  { %v22467_v3 = vsub.f32 %v22361_v48, %v6522_v45  ;;  %v6521_v33 = vmul.f32 0.015625, %v6475_v46  ;;  %17734 = vmatpush3.msra.mxu1 %v6725_v39 }
0x129a   :  { %v6484_v61 = vpop.xlane.xlu1 %6483 }
0x129b   :  { %v22470_v49 = vsub.f32 %v22365_v17, %v6521_v33  ;;  %v6524_v28 = vmul.f32 0.015625, %v6484_v61  ;;  %v6554_v36 = vmul.f32 %v22467_v3, %v22467_v3 }
0x129c   :  { %v6481_v2 = vpop.xlane.xlu0 %6480 }
0x129d   :  { %v22475_v13 = vsub.f32 %v22373_v57, %v6524_v28  ;;  %v6523_v42 = vmul.f32 0.015625, %v6481_v2  ;;  %v6572_v35 = vsel %vm252_vm2, %v6554_v36, 0.0  ;;  %v6553_v31 = vmul.f32 %v22470_v49, %v22470_v49  ;;  %v6724_v28 = vld [vmem:[%s25423_s6 + $0x18] sm:$0xff] }
0x129e   :  { %v6490_v4 = vpop.xlane.xlu1 %6489  ;;  %6573 = vadd.xlane.f32.xlu1 %v6572_v35  ;;  %17735 = vmatprep.subr.mxu1 %v6724_v28 }
0x129f   :  { %v22481_v44 = vsub.f32 %v22379_v10, %v6523_v42  ;;  %v6526_v21 = vmul.f32 0.015625, %v6490_v4  ;;  %v6569_v19 = vsel %vm252_vm2, %v6553_v31, 0.0  ;;  %v6556_v9 = vmul.f32 %v22475_v13, %v22475_v13  ;;  %17736 = vmatpush3.msra.mxu1 %v6724_v28  ;;  %v6723_v4 = vld [vmem:[%s25423_s6 + $0x10] sm:$0xff] }
0x12a0   :  { %v6487_v15 = vpop.xlane.xlu0 %6486  ;;  %6570 = vadd.xlane.f32.xlu0 %v6569_v19  ;;  %17737 = vmatprep.subr.mxu1 %v6723_v4  ;;  %v6722_v19 = vld [vmem:[%s25423_s6 + $0x8] sm:$0xff] }
0x12a1   :  { %v22487_v59 = vsub.f32 %v22387_v55, %v6526_v21  ;;  %v6525_v56 = vmul.f32 0.015625, %v6487_v15  ;;  %v6578_v16 = vsel %vm252_vm2, %v6556_v9, 0.0  ;;  %v6555_v27 = vmul.f32 %v22481_v44, %v22481_v44  ;;  %17738 = vmatpush3.msra.mxu1 %v6723_v4 }
0x12a2   :  { %v6496_v23 = vpop.xlane.xlu1 %6495  ;;  %6579 = vadd.xlane.f32.xlu1 %v6578_v16  ;;  %17739 = vmatprep.subr.mxu1 %v6722_v19 }
0x12a3   :  { %v22493_v43 = vsub.f32 %v22393_v26, %v6525_v56  ;;  %v6528_v54 = vmul.f32 0.015625, %v6496_v23  ;;  %v6575_v47 = vsel %vm252_vm2, %v6555_v27, 0.0  ;;  %v6558_v37 = vmul.f32 %v22487_v59, %v22487_v59  ;;  %v6721_v27 = vld [vmem:[%s25423_s6] sm:$0xff]  ;;  %17740 = vmatpush3.msra.mxu1 %v6722_v19 }
0x12a4   :  { %v6493_v25 = vpop.xlane.xlu0 %6492  ;;  %6576 = vadd.xlane.f32.xlu0 %v6575_v47  ;;  %17741 = vmatprep.subr.mxu1 %v6721_v27 }
0x12a5   :  { %v22499_v18 = vsub.f32 %v22399_v12, %v6528_v54  ;;  %v6527_v53 = vmul.f32 0.015625, %v6493_v25  ;;  %v6584_v22 = vsel %vm252_vm2, %v6558_v37, 0.0  ;;  %v6557_v32 = vmul.f32 %v22493_v43, %v22493_v43  ;;  %17742 = vmatpush3.msra.mxu1 %v6721_v27 }
0x12a6   :  { %6585 = vadd.xlane.f32.xlu1 %v6584_v22 }
0x12a7   :  { %v22505_v51 = vsub.f32 %v22404_v29, %v6527_v53  ;;  %v6581_v52 = vsel %vm252_vm2, %v6557_v32, 0.0  ;;  %v6560_v62 = vmul.f32 %v22499_v18, %v22499_v18 }
0x12a8   :  { %6582 = vadd.xlane.f32.xlu0 %v6581_v52 }
0x12a9   :  { %v6590_v60 = vsel %vm252_vm2, %v6560_v62, 0.0  ;;  %v6559_v50 = vmul.f32 %v22505_v51, %v22505_v51 }
0x12aa   :  { %6591 = vadd.xlane.f32.xlu1 %v6590_v60 }
0x12ab   :  { %v6587_v63 = vsel %vm252_vm2, %v6559_v50, 0.0 }
0x12ac   :  { %6588 = vadd.xlane.f32.xlu0 %v6587_v63 }
0x12b6   :  { %v6502_v40 = vpop.xlane.xlu1 %6501 }
0x12b7   :  { %v6530_v7 = vmul.f32 0.015625, %v6502_v40 }
0x12b8   :  { %v6499_v20 = vpop.xlane.xlu0 %6498 }
0x12b9   :  { %v22524_v5 = vsub.f32 %v22417_v8, %v6530_v7  ;;  %v6529_v58 = vmul.f32 0.015625, %v6499_v20 }
0x12ba   :  { %v6508_v45 = vpop.xlane.xlu1 %6507 }
0x12bb   :  { %v22530_v46 = vsub.f32 %v22421_v38, %v6529_v58  ;;  %v6532_v33 = vmul.f32 0.015625, %v6508_v45  ;;  %v6562_v61 = vmul.f32 %v22524_v5, %v22524_v5  ;;  %v7022_v45 = vld [vmem:[%s25424_s7 + $0x78] sm:$0xff] }
0x12bc   :  { %v6505_v36 = vpop.xlane.xlu0 %6504  ;;  %17767 = vmatprep.subr.mxu0 %v7022_v45 }
0x12bd   :  { %v22538_v2 = vsub.f32 %v22429_v0, %v6532_v33  ;;  %v6531_v42 = vmul.f32 0.015625, %v6505_v36  ;;  %v6596_v35 = vsel %vm252_vm2, %v6562_v61, 0.0  ;;  %v6561_v31 = vmul.f32 %v22530_v46, %v22530_v46  ;;  %v7021_v33 = vld [vmem:[%s25424_s7 + $0x70] sm:$0xff]  ;;  %17768 = vmatpush3.msra.mxu0 %v7022_v45  ;;  %v7020_v61 = vld [vmem:[%s25424_s7 + $0x68] sm:$0xff] }
0x12be   :  { %v6514_v21 = vpop.xlane.xlu1 %6513  ;;  %6597 = vadd.xlane.f32.xlu1 %v6596_v35  ;;  %17769 = vmatprep.subr.mxu0 %v7021_v33 }
0x12bf   :  { %v22550_v9 = vsub.f32 %v22435_v30, %v6531_v42  ;;  %v6534_v15 = vmul.f32 0.015625, %v6514_v21  ;;  %v6593_v56 = vsel %vm252_vm2, %v6561_v31, 0.0  ;;  %v6564_v16 = vmul.f32 %v22538_v2, %v22538_v2  ;;  %17770 = vmatpush3.msra.mxu0 %v7021_v33 }
0x12c0   :  { %v6511_v23 = vpop.xlane.xlu0 %6510  ;;  %6594 = vadd.xlane.f32.xlu0 %v6593_v56  ;;  %17771 = vmatprep.subr.mxu0 %v7020_v61 }
0x12c1   :  { %v22559_v54 = vsub.f32 %v22443_v34, %v6534_v15  ;;  %v6533_v47 = vmul.f32 0.015625, %v6511_v23  ;;  %v6602_v37 = vsel %vm252_vm2, %v6564_v16, 0.0  ;;  %v6563_v25 = vmul.f32 %v22550_v9, %v22550_v9  ;;  %17772 = vmatpush3.msra.mxu0 %v7020_v61  ;;  %v22606_v61 = vld [vmem:[%s25419_s2 + $0xc] ss:$0 sm:$0xff] }
0x12c2   :  { %6603 = vadd.xlane.f32.xlu1 %v6602_v37  ;;  %v6520_v53 = vpop.xlane.xlu1 %6519 }
0x12c3   :  { %v22565_v22 = vsub.f32 %v22449_v24, %v6533_v47  ;;  %v6536_v32 = vmul.f32 0.015625, %v6520_v53  ;;  %v6599_v52 = vsel %vm252_vm2, %v6563_v25, 0.0  ;;  %v6566_v62 = vmul.f32 %v22559_v54, %v22559_v54 }
0x12c4   :  { %6600 = vadd.xlane.f32.xlu0 %v6599_v52  ;;  %v6517_v60 = vpop.xlane.xlu0 %6516 }
0x12c5   :  { %v22571_v50 = vsub.f32 %v22455_v41, %v6536_v32  ;;  %v6535_v63 = vmul.f32 0.015625, %v6517_v60  ;;  %v6608_v6 = vsel %vm252_vm2, %v6566_v62, 0.0  ;;  %v6565_v14 = vmul.f32 %v22565_v22, %v22565_v22 }
0x12c6   :  { %6609 = vadd.xlane.f32.xlu1 %v6608_v6 }
0x12c7   :  { %v22577_v40 = vsub.f32 %v22460_v1, %v6535_v63  ;;  %v6605_v7 = vsel %vm252_vm2, %v6565_v14, 0.0  ;;  %v6568_v11 = vmul.f32 %v22571_v50, %v22571_v50 }
0x12c8   :  { %6606 = vadd.xlane.f32.xlu0 %v6605_v7 }
0x12c9   :  { %v6614_v20 = vsel %vm252_vm2, %v6568_v11, 0.0  ;;  %v6567_v58 = vmul.f32 %v22577_v40, %v22577_v40  ;;  %v22598_v11 = vld [vmem:[%s25419_s2 + $0xb] ss:$0 sm:$0xff] }
0x12ca   :  { %6615 = vadd.xlane.f32.xlu1 %v6614_v20 }
0x12cb   :  { %v6611_v39 = vsel %vm252_vm2, %v6567_v58, 0.0 }
0x12cc   :  { %6612 = vadd.xlane.f32.xlu0 %v6611_v39 }
0x1327   :  { %v6574_v28 = vpop.xlane.xlu1 %6573 }
0x1328   :  { %v6618_v36 = vmul.f32 0.015625, %v6574_v28 }
0x1329   :  { %v6571_v42 = vpop.xlane.xlu0 %6570 }
0x132a   :  { %v6634_v35 = vadd.f32 1e-05, %v6618_v36  ;;  %v6617_v31 = vmul.f32 0.015625, %v6571_v42 }
0x132b   :  { %v6580_v4 = vpop.xlane.xlu1 %6579 }
0x132c   :  { %19337 = vrsqrt.f32 %v6634_v35  ;;  %v6633_v21 = vadd.f32 1e-05, %v6617_v31  ;;  %v6620_v19 = vmul.f32 0.015625, %v6580_v4 }
0x132d   :  { %v6577_v15 = vpop.xlane.xlu0 %6576 }
0x132e   :  { %19339 = vrsqrt.f32 %v6633_v21  ;;  %v6636_v56 = vadd.f32 1e-05, %v6620_v19  ;;  %v6619_v16 = vmul.f32 0.015625, %v6577_v15 }
0x132f   :  { %v6586_v27 = vpop.xlane.xlu1 %6585 }
0x1330   :  { %19341 = vrsqrt.f32 %v6636_v56  ;;  %v6635_v23 = vadd.f32 1e-05, %v6619_v16  ;;  %v6622_v47 = vmul.f32 0.015625, %v6586_v27 }
0x1331   :  { %v6583_v37 = vpop.xlane.xlu0 %6582 }
0x1332   :  { %19343 = vrsqrt.f32 %v6635_v23  ;;  %v6638_v25 = vadd.f32 1e-05, %v6622_v47  ;;  %v6621_v53 = vmul.f32 0.015625, %v6583_v37 }
0x1333   :  { %v6592_v32 = vpop.xlane.xlu1 %6591 }
0x1334   :  { %19345 = vrsqrt.f32 %v6638_v25  ;;  %v6637_v52 = vadd.f32 1e-05, %v6621_v53  ;;  %v6624_v62 = vmul.f32 0.015625, %v6592_v32 }
0x1335   :  { %v6589_v60 = vpop.xlane.xlu0 %6588 }
0x1336   :  { %19347 = vrsqrt.f32 %v6637_v52  ;;  %v6640_v63 = vadd.f32 1e-05, %v6624_v62  ;;  %v6623_v6 = vmul.f32 0.015625, %v6589_v60 }
0x1338   :  { %19349 = vrsqrt.f32 %v6640_v63  ;;  %v6639_v14 = vadd.f32 1e-05, %v6623_v6 }
0x1339   :  { %v19338_v7 = vpop.eup %19337 }
0x133a   :  { %v6666_v20 = vmul.f32 %v19338_v7, %v22467_v3  ;;  %19351 = vrsqrt.f32 %v6639_v14 }
0x133b   :  { %v19340_v58 = vpop.eup %19339 }
0x133c   :  { %v6665_v39 = vmul.f32 %v19340_v58, %v22470_v49  ;;  %v6686_v33 = vmul.f32 %v22598_v11, %v6666_v20 }
0x133d   :  { %v19342_v45 = vpop.eup %19341 }
0x133e   :  { %v6685_v28 = vmul.f32 %v22598_v11, %v6665_v39  ;;  %v6668_v36 = vmul.f32 %v19342_v45, %v22475_v13  ;;  %v6706_v49 = vadd.f32 %v22606_v61, %v6686_v33 }
0x133f   :  { %v19344_v42 = vpop.eup %19343 }
0x1340   :  { %v6705_v35 = vadd.f32 %v22606_v61, %v6685_v28  ;;  %v6667_v3 = vmul.f32 %v19344_v42, %v22481_v44  ;;  %v6688_v4 = vmul.f32 %v22598_v11, %v6668_v36 }
0x1341   :  { %v19346_v31 = vpop.eup %19345 }
0x1342   :  { %17743 = vmatprep.mubr.msk.f32.mxu1 %vm252_vm2, %v6705_v35  ;;  %v6687_v21 = vmul.f32 %v22598_v11, %v6667_v3  ;;  %v6670_v19 = vmul.f32 %v19346_v31, %v22487_v59  ;;  %v6708_v44 = vadd.f32 %v22606_v61, %v6688_v4 }
0x1343   :  { %v19348_v15 = vpop.eup %19347  ;;  %17744 = vmatmul.mubr.msk.f32.vlgmr.msra.gmra.mxu1 %vm252_vm2, %v6706_v49 }
0x1344   :  { %v6707_v13 = vadd.f32 %v22606_v61, %v6687_v21  ;;  %v6669_v56 = vmul.f32 %v19348_v15, %v22493_v43  ;;  %v6690_v27 = vmul.f32 %v22598_v11, %v6670_v19 }
0x1345   :  { %v19350_v16 = vpop.eup %19349 }
0x1346   :  { %17746 = vmatprep.mubr.msk.f32.mxu1 %vm252_vm2, %v6707_v13  ;;  %v6689_v23 = vmul.f32 %v22598_v11, %v6669_v56  ;;  %v6672_v47 = vmul.f32 %v19350_v16, %v22499_v18  ;;  %v6710_v52 = vadd.f32 %v22606_v61, %v6690_v27 }
0x1347   :  { %v19352_v37 = vpop.eup %19351  ;;  %v6598_v59 = vpop.xlane.xlu1 %6597  ;;  %17747 = vmatmul.mubr.msk.f32.gmra.mxu1 %vm252_vm2, %v6708_v44 }
0x1348   :  { %v6626_v25 = vmul.f32 0.015625, %v6598_v59  ;;  %v6709_v53 = vadd.f32 %v22606_v61, %v6689_v23  ;;  %v6671_v43 = vmul.f32 %v19352_v37, %v22505_v51  ;;  %v6692_v62 = vmul.f32 %v22598_v11, %v6672_v47 }
0x1349   :  { %v6595_v32 = vpop.xlane.xlu0 %6594 }
0x134a   :  { %v6642_v60 = vadd.f32 1e-05, %v6626_v25  ;;  %v6625_v63 = vmul.f32 0.015625, %v6595_v32  ;;  %17749 = vmatprep.mubr.msk.f32.mxu1 %vm252_vm2, %v6709_v53  ;;  %v6691_v18 = vmul.f32 %v22598_v11, %v6671_v43  ;;  %v6712_v58 = vadd.f32 %v22606_v61, %v6692_v62 }
0x134b   :  { %v6604_v6 = vpop.xlane.xlu1 %6603  ;;  %17750 = vmatmul.mubr.msk.f32.gmra.mxu1 %vm252_vm2, %v6710_v52 }
0x134c   :  { %19353 = vrsqrt.f32 %v6642_v60  ;;  %v6641_v14 = vadd.f32 1e-05, %v6625_v63  ;;  %v6628_v7 = vmul.f32 0.015625, %v6604_v6  ;;  %v6711_v20 = vadd.f32 %v22606_v61, %v6691_v18 }
0x134d   :  { %v6601_v51 = vpop.xlane.xlu0 %6600 }
0x134e   :  { %19355 = vrsqrt.f32 %v6641_v14  ;;  %v6644_v39 = vadd.f32 1e-05, %v6628_v7  ;;  %v6627_v45 = vmul.f32 0.015625, %v6601_v51  ;;  %17752 = vmatprep.mubr.msk.f32.mxu1 %vm252_vm2, %v6711_v20 }
0x134f   :  { %v6610_v33 = vpop.xlane.xlu1 %6609  ;;  %17753 = vmatmul.mubr.msk.f32.gmra.mxu1 %vm252_vm2, %v6712_v58 }
0x1350   :  { %19357 = vrsqrt.f32 %v6644_v39  ;;  %v6643_v28 = vadd.f32 1e-05, %v6627_v45  ;;  %v6630_v36 = vmul.f32 0.015625, %v6610_v33  ;;  %v7016_v33 = vld [vmem:[%s25424_s7 + $0x48] sm:$0xff] }
0x1351   :  { %v6607_v42 = vpop.xlane.xlu0 %6606 }
0x1352   :  { %19359 = vrsqrt.f32 %v6643_v28  ;;  %v6646_v35 = vadd.f32 1e-05, %v6630_v36  ;;  %v6629_v3 = vmul.f32 0.015625, %v6607_v42  ;;  %v7015_v28 = vld [vmem:[%s25424_s7 + $0x40] sm:$0xff]  ;;  %v7014_v36 = vld [vmem:[%s25424_s7 + $0x38] sm:$0xff]  ;;  %v7013_v42 = vld [vmem:[%s25424_s7 + $0x30] sm:$0xff] }
0x1353   :  { %v6616_v31 = vpop.xlane.xlu1 %6615 }
0x1354   :  { %19361 = vrsqrt.f32 %v6646_v35  ;;  %v6645_v49 = vadd.f32 1e-05, %v6629_v3  ;;  %v6632_v4 = vmul.f32 0.015625, %v6616_v31  ;;  %v7012_v35 = vld [vmem:[%s25424_s7 + $0x28] sm:$0xff]  ;;  %v7011_v3 = vld [vmem:[%s25424_s7 + $0x20] sm:$0xff]  ;;  %v7010_v31 = vld [vmem:[%s25424_s7 + $0x18] sm:$0xff] }
0x1355   :  { %v6613_v21 = vpop.xlane.xlu0 %6612 }
0x1356   :  { %19363 = vrsqrt.f32 %v6645_v49  ;;  %v6648_v19 = vadd.f32 1e-05, %v6632_v4  ;;  %v6631_v15 = vmul.f32 0.015625, %v6613_v21  ;;  %v7009_v49 = vld [vmem:[%s25424_s7 + $0x10] sm:$0xff]  ;;  %v7008_v4 = vld [vmem:[%s25424_s7 + $0x8] sm:$0xff]  ;;  %v7007_v21 = vld [vmem:[%s25424_s7] sm:$0xff] }
0x1358   :  { %19365 = vrsqrt.f32 %v6648_v19  ;;  %v6647_v13 = vadd.f32 1e-05, %v6631_v15  ;;  %v22711_v19 = vld [vmem:[%s25420_s3 + $0x40] ss:$0 sm:$0xff] }
0x1359   :  { %v19354_v56 = vpop.eup %19353 }
0x135a   :  { %19367 = vrsqrt.f32 %v6647_v13  ;;  %v6674_v16 = vmul.f32 %v19354_v56, %v22524_v5 }
0x135b   :  { %v19356_v44 = vpop.eup %19355 }
0x135c   :  { %v6673_v27 = vmul.f32 %v19356_v44, %v22530_v46  ;;  %v6694_v47 = vmul.f32 %v22598_v11, %v6674_v16 }
0x135d   :  { %v19358_v23 = vpop.eup %19357 }
0x135e   :  { %v6693_v37 = vmul.f32 %v22598_v11, %v6673_v27  ;;  %v6676_v59 = vmul.f32 %v19358_v23, %v22538_v2  ;;  %v6714_v52 = vadd.f32 %v22606_v61, %v6694_v47 }
0x135f   :  { %v19360_v25 = vpop.eup %19359 }
0x1360   :  { %v6713_v53 = vadd.f32 %v22606_v61, %v6693_v37  ;;  %v6675_v43 = vmul.f32 %v19360_v25, %v22550_v9  ;;  %v6696_v5 = vmul.f32 %v22598_v11, %v6676_v59 }
0x1361   :  { %v19362_v32 = vpop.eup %19361 }
0x1362   :  { %17755 = vmatprep.mubr.msk.f32.mxu1 %vm252_vm2, %v6713_v53  ;;  %v6695_v46 = vmul.f32 %v22598_v11, %v6675_v43  ;;  %v6678_v62 = vmul.f32 %v19362_v32, %v22559_v54  ;;  %v6716_v9 = vadd.f32 %v22606_v61, %v6696_v5 }
0x1363   :  { %v19364_v60 = vpop.eup %19363  ;;  %17756 = vmatmul.mubr.msk.f32.gmra.mxu1 %vm252_vm2, %v6714_v52 }
0x1364   :  { %v6715_v2 = vadd.f32 %v22606_v61, %v6695_v46  ;;  %v6677_v63 = vmul.f32 %v19364_v60, %v22565_v22  ;;  %v6698_v6 = vmul.f32 %v22598_v11, %v6678_v62 }
0x1365   :  { %v19366_v18 = vpop.eup %19365 }
0x1366   :  { %17758 = vmatprep.mubr.msk.f32.mxu1 %vm252_vm2, %v6715_v2  ;;  %v6697_v14 = vmul.f32 %v22598_v11, %v6677_v63  ;;  %v6680_v7 = vmul.f32 %v19366_v18, %v22571_v50  ;;  %v6718_v22 = vadd.f32 %v22606_v61, %v6698_v6 }
0x1367   :  { %v19368_v20 = vpop.eup %19367  ;;  %17759 = vmatmul.mubr.msk.f32.gmra.mxu1 %vm252_vm2, %v6716_v9 }
0x1368   :  { %v6717_v54 = vadd.f32 %v22606_v61, %v6697_v14  ;;  %v6679_v51 = vmul.f32 %v19368_v20, %v22577_v40  ;;  %v6700_v58 = vmul.f32 %v22598_v11, %v6680_v7  ;;  %v7019_v40 = vld [vmem:[%s25424_s7 + $0x60] sm:$0xff] }
0x1369   :  { %17773 = vmatprep.subr.mxu0 %v7019_v40 }
0x136a   :  { %17761 = vmatprep.mubr.msk.f32.mxu1 %vm252_vm2, %v6717_v54  ;;  %v6699_v39 = vmul.f32 %v22598_v11, %v6679_v51  ;;  %v6720_v50 = vadd.f32 %v22606_v61, %v6700_v58  ;;  %17774 = vmatpush3.msra.mxu0 %v7019_v40  ;;  %v7018_v11 = vld [vmem:[%s25424_s7 + $0x58] sm:$0xff] }
0x136b   :  { %17762 = vmatmul.mubr.msk.f32.gmra.mxu1 %vm252_vm2, %v6718_v22  ;;  %17775 = vmatprep.subr.mxu0 %v7018_v11 }
0x136c   :  { %v6719_v45 = vadd.f32 %v22606_v61, %v6699_v39  ;;  %17776 = vmatpush3.msra.mxu0 %v7018_v11  ;;  %v7017_v61 = vld [vmem:[%s25424_s7 + $0x50] sm:$0xff] }
0x136d   :  { %17777 = vmatprep.subr.mxu0 %v7017_v61 }
0x136e   :  { %17764 = vmatprep.mubr.msk.f32.mxu1 %vm252_vm2, %v6719_v45  ;;  %17778 = vmatpush3.msra.mxu0 %v7017_v61 }
0x136f   :  { %17765 = vmatmul.mubr.msk.f32.gmra.mxu1 %vm252_vm2, %v6720_v50  ;;  %17779 = vmatprep.subr.mxu0 %v7016_v33 }
0x1370   :  { %17780 = vmatpush3.msra.mxu0 %v7016_v33 }
0x1371   :  { %17781 = vmatprep.subr.mxu0 %v7015_v28 }
0x1372   :  { %17782 = vmatpush3.msra.mxu0 %v7015_v28 }
0x1373   :  { %17783 = vmatprep.subr.mxu0 %v7014_v36 }
0x1374   :  { %17784 = vmatpush3.msra.mxu0 %v7014_v36 }
0x1375   :  { %17785 = vmatprep.subr.mxu0 %v7013_v42 }
0x1376   :  { %17786 = vmatpush3.msra.mxu0 %v7013_v42 }
0x1377   :  { %17787 = vmatprep.subr.mxu0 %v7012_v35 }
0x1378   :  { %17788 = vmatpush3.msra.mxu0 %v7012_v35 }
0x1379   :  { %17789 = vmatprep.subr.mxu0 %v7011_v3 }
0x137a   :  { %17790 = vmatpush3.msra.mxu0 %v7011_v3 }
0x137b   :  { %17791 = vmatprep.subr.mxu0 %v7010_v31 }
0x137c   :  { %17792 = vmatpush3.msra.mxu0 %v7010_v31 }
0x137d   :  { %17793 = vmatprep.subr.mxu0 %v7009_v49 }
0x137e   :  { %17794 = vmatpush3.msra.mxu0 %v7009_v49 }
0x137f   :  { %17795 = vmatprep.subr.mxu0 %v7008_v4 }
0x1380   :  { %17796 = vmatpush3.msra.mxu0 %v7008_v4 }
0x1381   :  { %17797 = vmatprep.subr.mxu0 %v7007_v21 }
0x1382   :  { %17798 = vmatpush3.msra.mxu0 %v7007_v21 }
0x1403   :  { %v17745_v15 = vpop.f32.mrf.mxu1 }
0x1404   :  { %v6854_v13 = vadd.f32 %v17745_v15, %v22711_v19 }
0x1405   :  { %v6848_v56 = vpop.f32.mrf.mxu1 }
0x1406   :  { %v6944_v16 = vmul.f32 0.70710677, %v6854_v13  ;;  %v6849_v44 = vadd.f32 %v22711_v19, %v6848_v56  ;;  %v6928_v58 = vmul.f32 0.5, %v6854_v13 }
0x1407   :  { %v17748_v27 = vpop.f32.mrf.mxu1 }
0x1408   :  { %19369 = verf.f32 %v6944_v16  ;;  %v6943_v23 = vmul.f32 0.70710677, %v6849_v44  ;;  %v6864_v47 = vadd.f32 %v17748_v27, %v22711_v19  ;;  %v6927_v54 = vmul.f32 0.5, %v6849_v44 }
0x1409   :  { %v6858_v37 = vpop.f32.mrf.mxu1 }
0x140a   :  { %19371 = verf.f32 %v6943_v23  ;;  %v6946_v59 = vmul.f32 0.70710677, %v6864_v47  ;;  %v6859_v25 = vadd.f32 %v22711_v19, %v6858_v37  ;;  %v6930_v28 = vmul.f32 0.5, %v6864_v47 }
0x140b   :  { %v17751_v53 = vpop.f32.mrf.mxu1 }
0x140c   :  { %19373 = verf.f32 %v6946_v59  ;;  %v6945_v43 = vmul.f32 0.70710677, %v6859_v25  ;;  %v6874_v32 = vadd.f32 %v17751_v53, %v22711_v19  ;;  %v6929_v11 = vmul.f32 0.5, %v6859_v25 }
0x140d   :  { %v6868_v52 = vpop.f32.mrf.mxu1 }
0x140e   :  { %19375 = verf.f32 %v6945_v43  ;;  %v6948_v5 = vmul.f32 0.70710677, %v6874_v32  ;;  %v6869_v46 = vadd.f32 %v22711_v19, %v6868_v52  ;;  %v6932_v21 = vmul.f32 0.5, %v6874_v32 }
0x140f   :  { %v17754_v62 = vpop.f32.mrf.mxu1 }
0x1410   :  { %19377 = verf.f32 %v6948_v5  ;;  %v6947_v60 = vmul.f32 0.70710677, %v6869_v46  ;;  %v6884_v2 = vadd.f32 %v17754_v62, %v22711_v19  ;;  %v6931_v31 = vmul.f32 0.5, %v6869_v46 }
0x1411   :  { %v6878_v63 = vpop.f32.mrf.mxu1 }
0x1412   :  { %19379 = verf.f32 %v6947_v60  ;;  %v6950_v18 = vmul.f32 0.70710677, %v6884_v2  ;;  %v6879_v9 = vadd.f32 %v22711_v19, %v6878_v63  ;;  %v6934_v37 = vmul.f32 0.5, %v6884_v2 }
0x1414   :  { %19381 = verf.f32 %v6950_v18  ;;  %v6949_v6 = vmul.f32 0.70710677, %v6879_v9  ;;  %v6933_v27 = vmul.f32 0.5, %v6879_v9 }
0x1415   :  { %v19370_v14 = vpop.eup %19369 }
0x1416   :  { %19383 = verf.f32 %v6949_v6  ;;  %v6976_v20 = vadd.f32 1.0, %v19370_v14 }
0x1417   :  { %v19372_v7 = vpop.eup %19371 }
0x1418   :  { %v6975_v51 = vadd.f32 1.0, %v19372_v7  ;;  %v6992_v50 = vmul.f32 %v6976_v20, %v6928_v58 }
0x1419   :  { %v19374_v22 = vpop.eup %19373 }
0x141a   :  { %v6991_v39 = vmul.f32 %v6975_v51, %v6927_v54  ;;  %v6978_v40 = vadd.f32 1.0, %v19374_v22 }
0x141b   :  { %v19376_v45 = vpop.eup %19375 }
0x141c   :  { %17799 = vmatprep.mubr.f32.mxu0 %v6991_v39  ;;  %v6977_v61 = vadd.f32 1.0, %v19376_v45  ;;  %v6994_v35 = vmul.f32 %v6978_v40, %v6930_v28 }
0x141d   :  { %v19378_v33 = vpop.eup %19377  ;;  %17800 = vmatmul.mubr.f32.vlgmr.msra.gmra.mxu0 %v6992_v50 }
0x141e   :  { %v6993_v36 = vmul.f32 %v6977_v61, %v6929_v11  ;;  %v6980_v3 = vadd.f32 1.0, %v19378_v33 }
0x141f   :  { %v19380_v42 = vpop.eup %19379 }
0x1420   :  { %17802 = vmatprep.mubr.f32.mxu0 %v6993_v36  ;;  %v6979_v49 = vadd.f32 1.0, %v19380_v42  ;;  %v6996_v56 = vmul.f32 %v6980_v3, %v6932_v21 }
0x1421   :  { %v19382_v4 = vpop.eup %19381  ;;  %17803 = vmatmul.mubr.f32.gmra.mxu0 %v6994_v35 }
0x1422   :  { %v6995_v15 = vmul.f32 %v6979_v49, %v6931_v31  ;;  %v6982_v16 = vadd.f32 1.0, %v19382_v4 }
0x1423   :  { %v19384_v13 = vpop.eup %19383  ;;  %v17757_v44 = vpop.f32.mrf.mxu1 }
0x1424   :  { %v6894_v23 = vadd.f32 %v17757_v44, %v22711_v19  ;;  %17805 = vmatprep.mubr.f32.mxu0 %v6995_v15  ;;  %v6981_v47 = vadd.f32 1.0, %v19384_v13  ;;  %v6998_v52 = vmul.f32 %v6982_v16, %v6934_v37 }
0x1425   :  { %v6888_v59 = vpop.f32.mrf.mxu1  ;;  %17806 = vmatmul.mubr.f32.gmra.mxu0 %v6996_v56 }
0x1426   :  { %v6952_v25 = vmul.f32 0.70710677, %v6894_v23  ;;  %v6889_v53 = vadd.f32 %v22711_v19, %v6888_v59  ;;  %v6997_v43 = vmul.f32 %v6981_v47, %v6933_v27  ;;  %v6936_v36 = vmul.f32 0.5, %v6894_v23 }
0x1427   :  { %v17760_v32 = vpop.f32.mrf.mxu1 }
0x1428   :  { %19385 = verf.f32 %v6952_v25  ;;  %v6951_v5 = vmul.f32 0.70710677, %v6889_v53  ;;  %v6904_v46 = vadd.f32 %v17760_v32, %v22711_v19  ;;  %17808 = vmatprep.mubr.f32.mxu0 %v6997_v43  ;;  %v6935_v61 = vmul.f32 0.5, %v6889_v53 }
0x1429   :  { %v6898_v62 = vpop.f32.mrf.mxu1  ;;  %17809 = vmatmul.mubr.f32.gmra.mxu0 %v6998_v52 }
0x142a   :  { %19387 = verf.f32 %v6951_v5  ;;  %v6954_v60 = vmul.f32 0.70710677, %v6904_v46  ;;  %v6899_v63 = vadd.f32 %v22711_v19, %v6898_v62  ;;  %v6938_v15 = vmul.f32 0.5, %v6904_v46 }
0x142b   :  { %v17763_v2 = vpop.f32.mrf.mxu1 }
0x142c   :  { %19389 = verf.f32 %v6954_v60  ;;  %v6953_v18 = vmul.f32 0.70710677, %v6899_v63  ;;  %v6914_v9 = vadd.f32 %v17763_v2, %v22711_v19  ;;  %v6937_v49 = vmul.f32 0.5, %v6899_v63  ;;  %v22732_v60 = vld [vmem:[%s25419_s2 + $0xd] ss:$0 sm:$0xff] }
0x142d   :  { %v6908_v6 = vpop.f32.mrf.mxu1 }
0x142e   :  { %19391 = verf.f32 %v6953_v18  ;;  %v6956_v14 = vmul.f32 0.70710677, %v6914_v9  ;;  %v6909_v7 = vadd.f32 %v22711_v19, %v6908_v6  ;;  %v6940_v37 = vmul.f32 0.5, %v6914_v9 }
0x142f   :  { %v17766_v20 = vpop.f32.mrf.mxu1 }
0x1430   :  { %19393 = verf.f32 %v6956_v14  ;;  %v6955_v54 = vmul.f32 0.70710677, %v6909_v7  ;;  %v6924_v51 = vadd.f32 %v17766_v20, %v22711_v19  ;;  %v6939_v44 = vmul.f32 0.5, %v6909_v7 }
0x1431   :  { %v6918_v22 = vpop.f32.mrf.mxu1 }
0x1432   :  { %19395 = verf.f32 %v6955_v54  ;;  %v6958_v58 = vmul.f32 0.70710677, %v6924_v51  ;;  %v6919_v39 = vadd.f32 %v22711_v19, %v6918_v22  ;;  %v6942_v32 = vmul.f32 0.5, %v6924_v51 }
0x1434   :  { %19397 = verf.f32 %v6958_v58  ;;  %v6957_v45 = vmul.f32 0.70710677, %v6919_v39  ;;  %v6941_v43 = vmul.f32 0.5, %v6919_v39 }
0x1435   :  { %v19386_v50 = vpop.eup %19385 }
0x1436   :  { %19399 = verf.f32 %v6957_v45  ;;  %v6984_v11 = vadd.f32 1.0, %v19386_v50 }
0x1437   :  { %v19388_v40 = vpop.eup %19387 }
0x1438   :  { %v6983_v33 = vadd.f32 1.0, %v19388_v40  ;;  %v7000_v3 = vmul.f32 %v6984_v11, %v6936_v36 }
0x1439   :  { %v19390_v28 = vpop.eup %19389 }
0x143a   :  { %v6999_v42 = vmul.f32 %v6983_v33, %v6935_v61  ;;  %v6986_v31 = vadd.f32 1.0, %v19390_v28 }
0x143b   :  { %v19392_v35 = vpop.eup %19391 }
0x143c   :  { %17811 = vmatprep.mubr.f32.mxu0 %v6999_v42  ;;  %v6985_v4 = vadd.f32 1.0, %v19392_v35  ;;  %v7002_v56 = vmul.f32 %v6986_v31, %v6938_v15 }
0x143d   :  { %v19394_v21 = vpop.eup %19393  ;;  %17812 = vmatmul.mubr.f32.gmra.mxu0 %v7000_v3 }
0x143e   :  { %v7001_v19 = vmul.f32 %v6985_v4, %v6937_v49  ;;  %v6988_v16 = vadd.f32 1.0, %v19394_v21 }
0x143f   :  { %v19396_v13 = vpop.eup %19395 }
0x1440   :  { %17814 = vmatprep.mubr.f32.mxu0 %v7001_v19  ;;  %v6987_v27 = vadd.f32 1.0, %v19396_v13  ;;  %v7004_v25 = vmul.f32 %v6988_v16, %v6940_v37 }
0x1441   :  { %v19398_v47 = vpop.eup %19397  ;;  %17815 = vmatmul.mubr.f32.gmra.mxu0 %v7002_v56 }
0x1442   :  { %v7003_v23 = vmul.f32 %v6987_v27, %v6939_v44  ;;  %v6990_v53 = vadd.f32 1.0, %v19398_v47 }
0x1443   :  { %v19400_v59 = vpop.eup %19399 }
0x1444   :  { %17817 = vmatprep.mubr.f32.mxu0 %v7003_v23  ;;  %v6989_v52 = vadd.f32 1.0, %v19400_v59  ;;  %v7006_v46 = vmul.f32 %v6990_v53, %v6942_v32 }
0x1445   :  { %17818 = vmatmul.mubr.f32.gmra.mxu0 %v7004_v25 }
0x1446   :  { %v7005_v5 = vmul.f32 %v6989_v52, %v6941_v43 }
0x1448   :  { %17820 = vmatprep.mubr.f32.mxu0 %v7005_v5 }
0x1449   :  { %17821 = vmatmul.mubr.f32.gmra.mxu0 %v7006_v46 }
0x14dd   :  { %v17801_v62 = vpop.f32.mrf.mxu0 }
0x14de   :  { %v7169_v63 = vadd.f32 %v17801_v62, %v22361_v48 }
0x14df   :  { %v7089_v2 = vpop.f32.mrf.mxu0 }
0x14e0   :  { %v22736_v18 = vadd.f32 %v22732_v60, %v7169_v63  ;;  %v7168_v9 = vadd.f32 %v7089_v2, %v22365_v17  ;;  %v14704_v2 = vld [vmem:[%s25421_s4 + $0x338] sm:$0xff] }
0x14e1   :  { %v17804_v6 = vpop.f32.mrf.mxu0  ;;  %17863 = vmatprep.subr.mxu0 %v14704_v2 }
0x14e2   :  { %25594 = vst [vmem:[#allocation24_spill] sm:$0xff] %v22736_v18  ;;  %v22740_v14 = vadd.f32 %v22732_v60, %v7168_v9  ;;  %v7171_v7 = vadd.f32 %v17804_v6, %v22373_v57  ;;  %v7210_v20 = vsel %vm252_vm2, %v22736_v18, 0.0  ;;  %17864 = vmatpush3.msra.mxu0 %v14704_v2 }
0x14e3   :  { %7211 = vadd.xlane.f32.xlu1 %v7210_v20  ;;  %v7099_v54 = vpop.f32.mrf.mxu0 }
0x14e4   :  { %25595 = vst [vmem:[#allocation38_spill] sm:$0xff] %v22740_v14  ;;  %v22746_v51 = vadd.f32 %v22732_v60, %v7171_v7  ;;  %v7170_v48 = vadd.f32 %v7099_v54, %v22379_v10  ;;  %v7207_v22 = vsel %vm252_vm2, %v22740_v14, 0.0 }
0x14e5   :  { %7208 = vadd.xlane.f32.xlu0 %v7207_v22  ;;  %v17807_v17 = vpop.f32.mrf.mxu0 }
0x14e6   :  { %25596 = vst [vmem:[#allocation26_spill] sm:$0xff] %v22746_v51  ;;  %v22752_v58 = vadd.f32 %v22732_v60, %v7170_v48  ;;  %v7173_v57 = vadd.f32 %v17807_v17, %v22387_v55  ;;  %v7216_v39 = vsel %vm252_vm2, %v22746_v51, 0.0 }
0x14e7   :  { %7217 = vadd.xlane.f32.xlu1 %v7216_v39  ;;  %v7109_v45 = vpop.f32.mrf.mxu0 }
0x14e8   :  { %25597 = vst [vmem:[#allocation40_spill] sm:$0xff] %v22752_v58  ;;  %v22758_v50 = vadd.f32 %v22732_v60, %v7173_v57  ;;  %v7172_v10 = vadd.f32 %v7109_v45, %v22393_v26  ;;  %v7213_v40 = vsel %vm252_vm2, %v22752_v58, 0.0 }
0x14e9   :  { %7214 = vadd.xlane.f32.xlu0 %v7213_v40  ;;  %v17810_v11 = vpop.f32.mrf.mxu0 }
0x14ea   :  { %25598 = vst [vmem:[#allocation28_spill] sm:$0xff] %v22758_v50  ;;  %v22764_v61 = vadd.f32 %v22732_v60, %v7172_v10  ;;  %v7175_v55 = vadd.f32 %v17810_v11, %v22399_v12  ;;  %v7222_v33 = vsel %vm252_vm2, %v22758_v50, 0.0 }
0x14eb   :  { %7223 = vadd.xlane.f32.xlu1 %v7222_v33  ;;  %v7119_v28 = vpop.f32.mrf.mxu0 }
0x14ec   :  { %25599 = vst [vmem:[#allocation42_spill] sm:$0xff] %v22764_v61  ;;  %v22770_v36 = vadd.f32 %v22732_v60, %v7175_v55  ;;  %v7174_v26 = vadd.f32 %v7119_v28, %v22404_v29  ;;  %v7219_v42 = vsel %vm252_vm2, %v22764_v61, 0.0 }
0x14ed   :  { %7220 = vadd.xlane.f32.xlu0 %v7219_v42 }
0x14ee   :  { %25600 = vst [vmem:[#allocation30_spill] sm:$0xff] %v22770_v36  ;;  %v22776_v35 = vadd.f32 %v22732_v60, %v7174_v26  ;;  %v7228_v12 = vsel %vm252_vm2, %v22770_v36, 0.0 }
0x14ef   :  { %7229 = vadd.xlane.f32.xlu1 %v7228_v12 }
0x14f0   :  { %25601 = vst [vmem:[#allocation44_spill] sm:$0xff] %v22776_v35  ;;  %v7225_v3 = vsel %vm252_vm2, %v22776_v35, 0.0 }
0x14f1   :  { %7226 = vadd.xlane.f32.xlu0 %v7225_v3 }
0x14fd   :  { %v17813_v31 = vpop.f32.mrf.mxu0 }
0x14fe   :  { %v7177_v49 = vadd.f32 %v17813_v31, %v22417_v8 }
0x14ff   :  { %v7129_v4 = vpop.f32.mrf.mxu0 }
0x1500   :  { %v22784_v29 = vadd.f32 %v22732_v60, %v7177_v49  ;;  %v7176_v21 = vadd.f32 %v7129_v4, %v22421_v38 }
0x1501   :  { %v17816_v15 = vpop.f32.mrf.mxu0 }
0x1502   :  { %25602 = vst [vmem:[#allocation32_spill] sm:$0xff] %v22784_v29  ;;  %v22788_v19 = vadd.f32 %v22732_v60, %v7176_v21  ;;  %v7179_v13 = vadd.f32 %v17816_v15, %v22429_v0  ;;  %v7234_v56 = vsel %vm252_vm2, %v22784_v29, 0.0 }
0x1503   :  { %7235 = vadd.xlane.f32.xlu1 %v7234_v56  ;;  %v7139_v16 = vpop.f32.mrf.mxu0 }
0x1504   :  { %25603 = vst [vmem:[#allocation34_spill] sm:$0xff] %v22788_v19  ;;  %v22794_v44 = vadd.f32 %v22732_v60, %v7179_v13  ;;  %v7178_v8 = vadd.f32 %v7139_v16, %v22435_v30  ;;  %v7231_v27 = vsel %vm252_vm2, %v22788_v19, 0.0 }
0x1505   :  { %7232 = vadd.xlane.f32.xlu0 %v7231_v27  ;;  %v17819_v38 = vpop.f32.mrf.mxu0 }
0x1506   :  { %25604 = vst [vmem:[#allocation21_spill] sm:$0xff] %v22794_v44  ;;  %v22800_v47 = vadd.f32 %v22732_v60, %v7178_v8  ;;  %v7181_v0 = vadd.f32 %v17819_v38, %v22443_v34  ;;  %v7240_v37 = vsel %vm252_vm2, %v22794_v44, 0.0 }
0x1507   :  { %7241 = vadd.xlane.f32.xlu1 %v7240_v37  ;;  %v7149_v23 = vpop.f32.mrf.mxu0 }
0x1508   :  { %25605 = vst [vmem:[#allocation35_spill] sm:$0xff] %v22800_v47  ;;  %v22806_v59 = vadd.f32 %v22732_v60, %v7181_v0  ;;  %v7180_v30 = vadd.f32 %v7149_v23, %v22449_v24  ;;  %v7237_v25 = vsel %vm252_vm2, %v22800_v47, 0.0 }
0x1509   :  { %7238 = vadd.xlane.f32.xlu0 %v7237_v25  ;;  %v17822_v53 = vpop.f32.mrf.mxu0 }
0x150a   :  { %25606 = vst [vmem:[#allocation22_spill] sm:$0xff] %v22806_v59  ;;  %v22812_v43 = vadd.f32 %v22732_v60, %v7180_v30  ;;  %v7183_v34 = vadd.f32 %v17822_v53, %v22455_v41  ;;  %v7246_v52 = vsel %vm252_vm2, %v22806_v59, 0.0 }
0x150b   :  { %7247 = vadd.xlane.f32.xlu1 %v7246_v52  ;;  %v7159_v32 = vpop.f32.mrf.mxu0  ;;  %v14680_v52 = vld [vmem:[%s25421_s4 + $0x138] sm:$0xff] }
0x150c   :  { %25607 = vst [vmem:[#allocation6_spill] sm:$0xff] %v22812_v43  ;;  %v22818_v5 = vadd.f32 %v22732_v60, %v7183_v34  ;;  %v7182_v24 = vadd.f32 %v7159_v32, %v22460_v1  ;;  %v7243_v46 = vsel %vm252_vm2, %v22812_v43, 0.0  ;;  %v14703_v1 = vld [vmem:[%s25421_s4 + $0x330] sm:$0xff]  ;;  %17823 = vmatprep.subr.mxu1 %v14680_v52 }
0x150d   :  { %7244 = vadd.xlane.f32.xlu0 %v7243_v46  ;;  %17865 = vmatprep.subr.mxu0 %v14703_v1  ;;  %v14679_v32 = vld [vmem:[%s25421_s4 + $0x130] sm:$0xff] }
0x150e   :  { %25608 = vst [vmem:[#allocation5_spill] sm:$0xff] %v22818_v5  ;;  %v22824_v62 = vadd.f32 %v22732_v60, %v7182_v24  ;;  %v7252_v41 = vsel %vm252_vm2, %v22818_v5, 0.0  ;;  %17866 = vmatpush3.msra.mxu0 %v14703_v1  ;;  %17824 = vmatpush3.msra.mxu1 %v14680_v52 }
0x150f   :  { %7253 = vadd.xlane.f32.xlu1 %v7252_v41  ;;  %17825 = vmatprep.subr.mxu1 %v14679_v32  ;;  %v14702_v41 = vld [vmem:[%s25421_s4 + $0x328] sm:$0xff] }
0x1510   :  { %25609 = vst [vmem:[#allocation36_spill] sm:$0xff] %v22824_v62  ;;  %v7249_v63 = vsel %vm252_vm2, %v22824_v62, 0.0  ;;  %17826 = vmatpush3.msra.mxu1 %v14679_v32  ;;  %17867 = vmatprep.subr.mxu0 %v14702_v41 }
0x1511   :  { %7250 = vadd.xlane.f32.xlu0 %v7249_v63  ;;  %v14678_v63 = vld [vmem:[%s25421_s4 + $0x128] sm:$0xff]  ;;  %17868 = vmatpush3.msra.mxu0 %v14702_v41 }
0x1512   :  { %17827 = vmatprep.subr.mxu1 %v14678_v63 }
0x1513   :  { %17828 = vmatpush3.msra.mxu1 %v14678_v63 }
0x156c   :  { %v7212_v60 = vpop.xlane.xlu1 %7211 }
0x156d   :  { %v7256_v9 = vmul.f32 0.015625, %v7212_v60 }
0x156e   :  { %v7209_v6 = vpop.xlane.xlu0 %7208 }
0x156f   :  { %v22837_v7 = vsub.f32 %v22736_v18, %v7256_v9  ;;  %v7255_v20 = vmul.f32 0.015625, %v7209_v6  ;;  %v14701_v9 = vld [vmem:[%s25421_s4 + $0x320] sm:$0xff] }
0x1570   :  { %v7218_v54 = vpop.xlane.xlu1 %7217  ;;  %v14677_v6 = vld [vmem:[%s25421_s4 + $0x120] sm:$0xff]  ;;  %17869 = vmatprep.subr.mxu0 %v14701_v9 }
0x1571   :  { %v22840_v48 = vsub.f32 %v22740_v14, %v7255_v20  ;;  %v7258_v22 = vmul.f32 0.015625, %v7218_v54  ;;  %v7288_v17 = vmul.f32 %v22837_v7, %v22837_v7  ;;  %17829 = vmatprep.subr.mxu1 %v14677_v6  ;;  %17870 = vmatpush3.msra.mxu0 %v14701_v9 }
0x1572   :  { %v7215_v57 = vpop.xlane.xlu0 %7214  ;;  %17830 = vmatpush3.msra.mxu1 %v14677_v6 }
0x1573   :  { %v22845_v39 = vsub.f32 %v22746_v51, %v7258_v22  ;;  %v7257_v45 = vmul.f32 0.015625, %v7215_v57  ;;  %v7306_v10 = vsel %vm252_vm2, %v7288_v17, 0.0  ;;  %v7287_v40 = vmul.f32 %v22840_v48, %v22840_v48  ;;  %v14700_v57 = vld [vmem:[%s25421_s4 + $0x318] sm:$0xff] }
0x1574   :  { %v7224_v11 = vpop.xlane.xlu1 %7223  ;;  %7307 = vadd.xlane.f32.xlu1 %v7306_v10  ;;  %17871 = vmatprep.subr.mxu0 %v14700_v57 }
0x1575   :  { %v22851_v55 = vsub.f32 %v22752_v58, %v7257_v45  ;;  %v7260_v33 = vmul.f32 0.015625, %v7224_v11  ;;  %v7303_v28 = vsel %vm252_vm2, %v7287_v40, 0.0  ;;  %v7290_v26 = vmul.f32 %v22845_v39, %v22845_v39  ;;  %v14676_v45 = vld [vmem:[%s25421_s4 + $0x118] sm:$0xff]  ;;  %17872 = vmatpush3.msra.mxu0 %v14700_v57 }
0x1576   :  { %7304 = vadd.xlane.f32.xlu0 %v7303_v28  ;;  %v7221_v42 = vpop.xlane.xlu0 %7220  ;;  %17831 = vmatprep.subr.mxu1 %v14676_v45 }
0x1577   :  { %v22857_v12 = vsub.f32 %v22758_v50, %v7260_v33  ;;  %v7259_v3 = vmul.f32 0.015625, %v7221_v42  ;;  %v7312_v31 = vsel %vm252_vm2, %v7290_v26, 0.0  ;;  %v7289_v49 = vmul.f32 %v22851_v55, %v22851_v55  ;;  %v14699_v26 = vld [vmem:[%s25421_s4 + $0x310] sm:$0xff]  ;;  %17832 = vmatpush3.msra.mxu1 %v14676_v45  ;;  %v14728_v45 = vld [vmem:[%s25421_s4 + $0x538] sm:$0xff] }
0x1578   :  { %v7230_v4 = vpop.xlane.xlu1 %7229  ;;  %7313 = vadd.xlane.f32.xlu1 %v7312_v31  ;;  %v14675_v42 = vld [vmem:[%s25421_s4 + $0x110] sm:$0xff]  ;;  %17873 = vmatprep.subr.mxu0 %v14699_v26 }
0x1579   :  { %v22863_v21 = vsub.f32 %v22764_v61, %v7259_v3  ;;  %v7262_v15 = vmul.f32 0.015625, %v7230_v4  ;;  %v7309_v13 = vsel %vm252_vm2, %v7289_v49, 0.0  ;;  %v7292_v56 = vmul.f32 %v22857_v12, %v22857_v12  ;;  %17874 = vmatpush3.msra.mxu0 %v14699_v26  ;;  %17833 = vmatprep.subr.mxu1 %v14675_v42 }
0x157a   :  { %7310 = vadd.xlane.f32.xlu0 %v7309_v13  ;;  %v7227_v16 = vpop.xlane.xlu0 %7226  ;;  %v14698_v13 = vld [vmem:[%s25421_s4 + $0x308] sm:$0xff]  ;;  %17834 = vmatpush3.msra.mxu1 %v14675_v42 }
0x157b   :  { %v22869_v8 = vsub.f32 %v22770_v36, %v7262_v15  ;;  %v7261_v27 = vmul.f32 0.015625, %v7227_v16  ;;  %v7318_v38 = vsel %vm252_vm2, %v7292_v56, 0.0  ;;  %v7291_v0 = vmul.f32 %v22863_v21, %v22863_v21  ;;  %v14674_v56 = vld [vmem:[%s25421_s4 + $0x108] sm:$0xff]  ;;  %17875 = vmatprep.subr.mxu0 %v14698_v13 }
0x157c   :  { %7319 = vadd.xlane.f32.xlu1 %v7318_v38  ;;  %17876 = vmatpush3.msra.mxu0 %v14698_v13 }
0x157d   :  { %v22875_v37 = vsub.f32 %v22776_v35, %v7261_v27  ;;  %v7315_v23 = vsel %vm252_vm2, %v7291_v0, 0.0  ;;  %v7294_v30 = vmul.f32 %v22869_v8, %v22869_v8  ;;  %17835 = vmatprep.subr.mxu1 %v14674_v56 }
0x157e   :  { %7316 = vadd.xlane.f32.xlu0 %v7315_v23  ;;  %17836 = vmatpush3.msra.mxu1 %v14674_v56 }
0x157f   :  { %v7324_v25 = vsel %vm252_vm2, %v7294_v30, 0.0  ;;  %v7293_v53 = vmul.f32 %v22875_v37, %v22875_v37  ;;  %v14697_v30 = vld [vmem:[%s25421_s4 + $0x300] sm:$0xff] }
0x1580   :  { %7325 = vadd.xlane.f32.xlu1 %v7324_v25  ;;  %17877 = vmatprep.subr.mxu0 %v14697_v30 }
0x1581   :  { %v7321_v34 = vsel %vm252_vm2, %v7293_v53, 0.0  ;;  %v14673_v53 = vld [vmem:[%s25421_s4 + $0x100] sm:$0xff]  ;;  %17878 = vmatpush3.msra.mxu0 %v14697_v30 }
0x1582   :  { %7322 = vadd.xlane.f32.xlu0 %v7321_v34  ;;  %17837 = vmatprep.subr.mxu1 %v14673_v53 }
0x1583   :  { %17838 = vmatpush3.msra.mxu1 %v14673_v53 }
0x1584   :  { %17903 = vmatprep.subr.mxu1 %v14728_v45 }
0x158c   :  { %v7236_v24 = vpop.xlane.xlu1 %7235 }
0x158d   :  { %v7264_v46 = vmul.f32 0.015625, %v7236_v24 }
0x158e   :  { %v7233_v2 = vpop.xlane.xlu0 %7232 }
0x158f   :  { %v22897_v1 = vsub.f32 %v22784_v29, %v7264_v46  ;;  %v7263_v60 = vmul.f32 0.015625, %v7233_v2 }
0x1590   :  { %v7242_v20 = vpop.xlane.xlu1 %7241 }
0x1591   :  { %v22906_v54 = vsub.f32 %v22788_v19, %v7263_v60  ;;  %v7266_v22 = vmul.f32 0.015625, %v7242_v20  ;;  %v7296_v17 = vmul.f32 %v22897_v1, %v22897_v1 }
0x1592   :  { %v7239_v10 = vpop.xlane.xlu0 %7238 }
0x1593   :  { %v22917_v40 = vsub.f32 %v22794_v44, %v7266_v22  ;;  %v7265_v11 = vmul.f32 0.015625, %v7239_v10  ;;  %v7330_v33 = vsel %vm252_vm2, %v7296_v17, 0.0  ;;  %v7295_v28 = vmul.f32 %v22906_v54, %v22906_v54 }
0x1594   :  { %v7248_v3 = vpop.xlane.xlu1 %7247  ;;  %7331 = vadd.xlane.f32.xlu1 %v7330_v33 }
0x1595   :  { %v22929_v31 = vsub.f32 %v22800_v47, %v7265_v11  ;;  %v7268_v49 = vmul.f32 0.015625, %v7248_v3  ;;  %v7327_v4 = vsel %vm252_vm2, %v7295_v28, 0.0  ;;  %v7298_v15 = vmul.f32 %v22917_v40, %v22917_v40 }
0x1596   :  { %7328 = vadd.xlane.f32.xlu0 %v7327_v4  ;;  %v7245_v16 = vpop.xlane.xlu0 %7244 }
0x1597   :  { %v22941_v27 = vsub.f32 %v22806_v59, %v7268_v49  ;;  %v7267_v38 = vmul.f32 0.015625, %v7245_v16  ;;  %v7336_v0 = vsel %vm252_vm2, %v7298_v15, 0.0  ;;  %v7297_v23 = vmul.f32 %v22929_v31, %v22929_v31 }
0x1598   :  { %7337 = vadd.xlane.f32.xlu1 %v7336_v0  ;;  %v7254_v25 = vpop.xlane.xlu1 %7253 }
0x1599   :  { %v22953_v34 = vsub.f32 %v22812_v43, %v7267_v38  ;;  %v7270_v52 = vmul.f32 0.015625, %v7254_v25  ;;  %v7333_v32 = vsel %vm252_vm2, %v7297_v23, 0.0  ;;  %v7300_v24 = vmul.f32 %v22941_v27, %v22941_v27 }
0x159a   :  { %7334 = vadd.xlane.f32.xlu0 %v7333_v32  ;;  %v7251_v46 = vpop.xlane.xlu0 %7250 }
0x159b   :  { %v22959_v41 = vsub.f32 %v22818_v5, %v7270_v52  ;;  %v7269_v63 = vmul.f32 0.015625, %v7251_v46  ;;  %v7342_v2 = vsel %vm252_vm2, %v7300_v24, 0.0  ;;  %v7299_v60 = vmul.f32 %v22953_v34, %v22953_v34 }
0x159c   :  { %7343 = vadd.xlane.f32.xlu1 %v7342_v2 }
0x159d   :  { %v22965_v9 = vsub.f32 %v22824_v62, %v7269_v63  ;;  %v7339_v6 = vsel %vm252_vm2, %v7299_v60, 0.0  ;;  %v7302_v20 = vmul.f32 %v22959_v41, %v22959_v41  ;;  %v22980_v60 = vld [vmem:[%s25419_s2 + $0xe] ss:$0 sm:$0xff] }
0x159e   :  { %7340 = vadd.xlane.f32.xlu0 %v7339_v6 }
0x159f   :  { %v7348_v22 = vsel %vm252_vm2, %v7302_v20, 0.0  ;;  %v7301_v17 = vmul.f32 %v22965_v9, %v22965_v9 }
0x15a0   :  { %7349 = vadd.xlane.f32.xlu1 %v7348_v22 }
0x15a1   :  { %v7345_v57 = vsel %vm252_vm2, %v7301_v17, 0.0 }
0x15a2   :  { %7346 = vadd.xlane.f32.xlu0 %v7345_v57 }
0x15fd   :  { %v7308_v10 = vpop.xlane.xlu1 %7307 }
0x15fe   :  { %v7352_v11 = vmul.f32 0.015625, %v7308_v10  ;;  %v22988_v10 = vld [vmem:[%s25419_s2 + $0xf] ss:$0 sm:$0xff] }
0x15ff   :  { %v7305_v33 = vpop.xlane.xlu0 %7304 }
0x1600   :  { %v7368_v28 = vadd.f32 1e-05, %v7352_v11  ;;  %v7351_v26 = vmul.f32 0.015625, %v7305_v33 }
0x1601   :  { %v7314_v42 = vpop.xlane.xlu1 %7313 }
0x1602   :  { %19401 = vrsqrt.f32 %v7368_v28  ;;  %v7367_v3 = vadd.f32 1e-05, %v7351_v26  ;;  %v7354_v49 = vmul.f32 0.015625, %v7314_v42 }
0x1603   :  { %v7311_v4 = vpop.xlane.xlu0 %7310 }
0x1604   :  { %19403 = vrsqrt.f32 %v7367_v3  ;;  %v7370_v15 = vadd.f32 1e-05, %v7354_v49  ;;  %v7353_v13 = vmul.f32 0.015625, %v7311_v4 }
0x1605   :  { %v7320_v56 = vpop.xlane.xlu1 %7319 }
0x1606   :  { %19405 = vrsqrt.f32 %v7370_v15  ;;  %v7369_v16 = vadd.f32 1e-05, %v7353_v13  ;;  %v7356_v38 = vmul.f32 0.015625, %v7320_v56 }
0x1607   :  { %v7317_v0 = vpop.xlane.xlu0 %7316 }
0x1608   :  { %19407 = vrsqrt.f32 %v7369_v16  ;;  %v7372_v23 = vadd.f32 1e-05, %v7356_v38  ;;  %v7355_v30 = vmul.f32 0.015625, %v7317_v0 }
0x1609   :  { %v7326_v25 = vpop.xlane.xlu1 %7325 }
0x160a   :  { %19409 = vrsqrt.f32 %v7372_v23  ;;  %v7371_v53 = vadd.f32 1e-05, %v7355_v30  ;;  %v7358_v52 = vmul.f32 0.015625, %v7326_v25 }
0x160b   :  { %v7323_v32 = vpop.xlane.xlu0 %7322 }
0x160c   :  { %19411 = vrsqrt.f32 %v7371_v53  ;;  %v7374_v24 = vadd.f32 1e-05, %v7358_v52  ;;  %v7357_v46 = vmul.f32 0.015625, %v7323_v32 }
0x160e   :  { %19413 = vrsqrt.f32 %v7374_v24  ;;  %v7373_v63 = vadd.f32 1e-05, %v7357_v46 }
0x160f   :  { %v19402_v2 = vpop.eup %19401 }
0x1610   :  { %v7400_v6 = vmul.f32 %v19402_v2, %v22837_v7  ;;  %19415 = vrsqrt.f32 %v7373_v63 }
0x1611   :  { %v19404_v20 = vpop.eup %19403 }
0x1612   :  { %v7399_v22 = vmul.f32 %v19404_v20, %v22840_v48  ;;  %v7420_v57 = vmul.f32 %v22980_v60, %v7400_v6 }
0x1613   :  { %v19406_v17 = vpop.eup %19405 }
0x1614   :  { %v7419_v11 = vmul.f32 %v22980_v60, %v7399_v22  ;;  %v7402_v33 = vmul.f32 %v19406_v17, %v22845_v39  ;;  %v22997_v48 = vadd.f32 %v22988_v10, %v7420_v57  ;;  %v14727_v39 = vld [vmem:[%s25421_s4 + $0x530] sm:$0xff] }
0x1615   :  { %v19408_v28 = vpop.eup %19407 }
0x1616   :  { %v22993_v26 = vadd.f32 %v22988_v10, %v7419_v11  ;;  %v7401_v7 = vmul.f32 %v19408_v28, %v22851_v55  ;;  %v7422_v3 = vmul.f32 %v22980_v60, %v7402_v33  ;;  %v14724_v28 = vld [vmem:[%s25421_s4 + $0x518] sm:$0xff] }
0x1617   :  { %v19410_v42 = vpop.eup %19409 }
0x1618   :  { %v7421_v49 = vmul.f32 %v22980_v60, %v7401_v7  ;;  %v7404_v4 = vmul.f32 %v19410_v42, %v22857_v12  ;;  %17839 = vmatprep.mubr.msk.f32.mxu1 %vm252_vm2, %v22993_v26  ;;  %17879 = vmatprep.mubr.msk.f32.mxu0 %vm252_vm2, %v22993_v26  ;;  %v23018_v56 = vadd.f32 %v22988_v10, %v7422_v3 }
0x1619   :  { %v19412_v55 = vpop.eup %19411  ;;  %17840 = vmatmul.mubr.msk.f32.vlgmr.msra.gmra.mxu1 %vm252_vm2, %v22997_v48  ;;  %17880 = vmatmul.mubr.msk.f32.vlgmr.msra.gmra.mxu0 %vm252_vm2, %v22997_v48 }
0x161a   :  { %v23014_v15 = vadd.f32 %v22988_v10, %v7421_v49  ;;  %v7403_v12 = vmul.f32 %v19412_v55, %v22863_v21  ;;  %17904 = vmatpush3.msra.mxu1 %v14728_v45  ;;  %v7424_v16 = vmul.f32 %v22980_v60, %v7404_v4  ;;  %v14726_v21 = vld [vmem:[%s25421_s4 + $0x528] sm:$0xff]  ;;  %v14723_v49 = vld [vmem:[%s25421_s4 + $0x510] sm:$0xff] }
0x161b   :  { %v19414_v13 = vpop.eup %19413  ;;  %17905 = vmatprep.subr.mxu1 %v14727_v39 }
0x161c   :  { %v7423_v38 = vmul.f32 %v22980_v60, %v7403_v12  ;;  %v7406_v0 = vmul.f32 %v19414_v13, %v22869_v8  ;;  %17842 = vmatprep.mubr.msk.f32.mxu1 %vm252_vm2, %v23014_v15  ;;  %17882 = vmatprep.mubr.msk.f32.mxu0 %vm252_vm2, %v23014_v15  ;;  %v23039_v53 = vadd.f32 %v22988_v10, %v7424_v16  ;;  %v14722_v12 = vld [vmem:[%s25421_s4 + $0x508] sm:$0xff] }
0x161d   :  { %v19416_v45 = vpop.eup %19415  ;;  %v7332_v23 = vpop.xlane.xlu1 %7331  ;;  %17843 = vmatmul.mubr.msk.f32.gmra.mxu1 %vm252_vm2, %v23018_v56  ;;  %17883 = vmatmul.mubr.msk.f32.gmra.mxu0 %vm252_vm2, %v23018_v56 }
0x161e   :  { %v23035_v8 = vadd.f32 %v22988_v10, %v7423_v38  ;;  %v7405_v30 = vmul.f32 %v19416_v45, %v22875_v37  ;;  %v7360_v25 = vmul.f32 0.015625, %v7332_v23  ;;  %17906 = vmatpush3.msra.mxu1 %v14727_v39  ;;  %v7426_v52 = vmul.f32 %v22980_v60, %v7406_v0  ;;  %v14725_v37 = vld [vmem:[%s25421_s4 + $0x520] sm:$0xff] }
0x161f   :  { %v7329_v32 = vpop.xlane.xlu0 %7328  ;;  %17907 = vmatprep.subr.mxu1 %v14726_v21  ;;  %v14721_v0 = vld [vmem:[%s25421_s4 + $0x500] sm:$0xff] }
0x1620   :  { %v7425_v24 = vmul.f32 %v22980_v60, %v7405_v30  ;;  %v7376_v46 = vadd.f32 1e-05, %v7360_v25  ;;  %v7359_v63 = vmul.f32 0.015625, %v7329_v32  ;;  %17845 = vmatprep.mubr.msk.f32.mxu1 %vm252_vm2, %v23035_v8  ;;  %17885 = vmatprep.mubr.msk.f32.mxu0 %vm252_vm2, %v23035_v8  ;;  %v23058_v17 = vadd.f32 %v22988_v10, %v7426_v52 }
0x1621   :  { %v7338_v2 = vpop.xlane.xlu1 %7337  ;;  %17846 = vmatmul.mubr.msk.f32.gmra.mxu1 %vm252_vm2, %v23039_v53  ;;  %17886 = vmatmul.mubr.msk.f32.gmra.mxu0 %vm252_vm2, %v23039_v53 }
0x1622   :  { %v23055_v6 = vadd.f32 %v22988_v10, %v7425_v24  ;;  %19417 = vrsqrt.f32 %v7376_v46  ;;  %v7375_v20 = vadd.f32 1e-05, %v7359_v63  ;;  %v7362_v22 = vmul.f32 0.015625, %v7338_v2  ;;  %17908 = vmatpush3.msra.mxu1 %v14726_v21  ;;  %25610 = vst [vmem:[#allocation23_spill] sm:$0xff] %v23058_v17 }
0x1623   :  { %v7335_v57 = vpop.xlane.xlu0 %7334  ;;  %17909 = vmatprep.subr.mxu1 %v14725_v37 }
0x1624   :  { %19419 = vrsqrt.f32 %v7375_v20  ;;  %v7378_v11 = vadd.f32 1e-05, %v7362_v22  ;;  %v7361_v33 = vmul.f32 0.015625, %v7335_v57  ;;  %17848 = vmatprep.mubr.msk.f32.mxu1 %vm252_vm2, %v23055_v6  ;;  %17888 = vmatprep.mubr.msk.f32.mxu0 %vm252_vm2, %v23055_v6 }
0x1625   :  { %v7344_v7 = vpop.xlane.xlu1 %7343  ;;  %17849 = vmatmul.mubr.msk.f32.gmra.mxu1 %vm252_vm2, %v23058_v17  ;;  %17889 = vmatmul.mubr.msk.f32.gmra.mxu0 %vm252_vm2, %v23058_v17 }
0x1626   :  { %19421 = vrsqrt.f32 %v7378_v11  ;;  %v7377_v42 = vadd.f32 1e-05, %v7361_v33  ;;  %v7364_v3 = vmul.f32 0.015625, %v7344_v7  ;;  %17910 = vmatpush3.msra.mxu1 %v14725_v37 }
0x1627   :  { %v7341_v4 = vpop.xlane.xlu0 %7340  ;;  %17911 = vmatprep.subr.mxu1 %v14724_v28 }
0x1628   :  { %19423 = vrsqrt.f32 %v7377_v42  ;;  %v7380_v39 = vadd.f32 1e-05, %v7364_v3  ;;  %v7363_v55 = vmul.f32 0.015625, %v7341_v4  ;;  %17912 = vmatpush3.msra.mxu1 %v14724_v28 }
0x1629   :  { %v7350_v13 = vpop.xlane.xlu1 %7349  ;;  %17913 = vmatprep.subr.mxu1 %v14723_v49 }
0x162a   :  { %19425 = vrsqrt.f32 %v7380_v39  ;;  %v7379_v16 = vadd.f32 1e-05, %v7363_v55  ;;  %v7366_v38 = vmul.f32 0.015625, %v7350_v13  ;;  %17914 = vmatpush3.msra.mxu1 %v14723_v49 }
0x162b   :  { %v7347_v21 = vpop.xlane.xlu0 %7346  ;;  %17915 = vmatprep.subr.mxu1 %v14722_v12 }
0x162c   :  { %19427 = vrsqrt.f32 %v7379_v16  ;;  %v7382_v45 = vadd.f32 1e-05, %v7366_v38  ;;  %v7365_v23 = vmul.f32 0.015625, %v7347_v21  ;;  %17916 = vmatpush3.msra.mxu1 %v14722_v12 }
0x162d   :  { %17917 = vmatprep.subr.mxu1 %v14721_v0 }
0x162e   :  { %19429 = vrsqrt.f32 %v7382_v45  ;;  %v7381_v30 = vadd.f32 1e-05, %v7365_v23  ;;  %17918 = vmatpush3.msra.mxu1 %v14721_v0 }
0x162f   :  { %v19418_v25 = vpop.eup %19417 }
0x1630   :  { %v7408_v52 = vmul.f32 %v19418_v25, %v22897_v1  ;;  %19431 = vrsqrt.f32 %v7381_v30 }
0x1631   :  { %v19420_v32 = vpop.eup %19419 }
0x1632   :  { %v7407_v24 = vmul.f32 %v19420_v32, %v22906_v54  ;;  %v7428_v63 = vmul.f32 %v22980_v60, %v7408_v52 }
0x1633   :  { %v19422_v46 = vpop.eup %19421 }
0x1634   :  { %v7427_v37 = vmul.f32 %v22980_v60, %v7407_v24  ;;  %v7410_v2 = vmul.f32 %v19422_v46, %v22917_v40  ;;  %v23090_v1 = vadd.f32 %v22988_v10, %v7428_v63 }
0x1635   :  { %v19424_v20 = vpop.eup %19423 }
0x1636   :  { %v23086_v22 = vadd.f32 %v22988_v10, %v7427_v37  ;;  %v7409_v57 = vmul.f32 %v19424_v20, %v22929_v31  ;;  %25612 = vst [vmem:[#allocation7_spill] sm:$0xff] %v23090_v1  ;;  %v7430_v33 = vmul.f32 %v22980_v60, %v7410_v2 }
0x1637   :  { %v19426_v11 = vpop.eup %19425 }
0x1638   :  { %25611 = vst [vmem:[#allocation8_spill] sm:$0xff] %v23086_v22  ;;  %v7429_v54 = vmul.f32 %v22980_v60, %v7409_v57  ;;  %v7412_v28 = vmul.f32 %v19426_v11, %v22941_v27  ;;  %17851 = vmatprep.mubr.msk.f32.mxu1 %vm252_vm2, %v23086_v22  ;;  %17891 = vmatprep.mubr.msk.f32.mxu0 %vm252_vm2, %v23086_v22 }
0x1639   :  { %v19428_v40 = vpop.eup %19427  ;;  %17852 = vmatmul.mubr.msk.f32.gmra.mxu1 %vm252_vm2, %v23090_v1  ;;  %17892 = vmatmul.mubr.msk.f32.gmra.mxu0 %vm252_vm2, %v23090_v1  ;;  %v23108_v27 = vadd.f32 %v22988_v10, %v7430_v33 }
0x163a   :  { %v23104_v31 = vadd.f32 %v22988_v10, %v7429_v54  ;;  %v7411_v7 = vmul.f32 %v19428_v40, %v22953_v34  ;;  %v7432_v3 = vmul.f32 %v22980_v60, %v7412_v28 }
0x163b   :  { %v19430_v42 = vpop.eup %19429  ;;  %25614 = vst [vmem:[#allocation25_spill] sm:$0xff] %v23108_v27 }
0x163c   :  { %25613 = vst [vmem:[#allocation37_spill] sm:$0xff] %v23104_v31  ;;  %v7431_v49 = vmul.f32 %v22980_v60, %v7411_v7  ;;  %v7414_v4 = vmul.f32 %v19430_v42, %v22959_v41  ;;  %17854 = vmatprep.mubr.msk.f32.mxu1 %vm252_vm2, %v23104_v31  ;;  %17894 = vmatprep.mubr.msk.f32.mxu0 %vm252_vm2, %v23104_v31 }
0x163d   :  { %v19432_v39 = vpop.eup %19431  ;;  %17855 = vmatmul.mubr.msk.f32.gmra.mxu1 %vm252_vm2, %v23108_v27  ;;  %17895 = vmatmul.mubr.msk.f32.gmra.mxu0 %vm252_vm2, %v23108_v27  ;;  %v23126_v41 = vadd.f32 %v22988_v10, %v7432_v3 }
0x163e   :  { %v23122_v34 = vadd.f32 %v22988_v10, %v7431_v49  ;;  %v7413_v55 = vmul.f32 %v19432_v39, %v22965_v9  ;;  %v7434_v12 = vmul.f32 %v22980_v60, %v7414_v4 }
0x163f   :  { %25616 = vst [vmem:[#allocation9_spill] sm:$0xff] %v23126_v41 }
0x1640   :  { %25615 = vst [vmem:[#allocation10_spill] sm:$0xff] %v23122_v34  ;;  %v7433_v13 = vmul.f32 %v22980_v60, %v7413_v55  ;;  %17857 = vmatprep.mubr.msk.f32.mxu1 %vm252_vm2, %v23122_v34  ;;  %17897 = vmatprep.mubr.msk.f32.mxu0 %vm252_vm2, %v23122_v34  ;;  %v23142_v16 = vadd.f32 %v22988_v10, %v7434_v12 }
0x1641   :  { %17858 = vmatmul.mubr.msk.f32.gmra.mxu1 %vm252_vm2, %v23126_v41  ;;  %17898 = vmatmul.mubr.msk.f32.gmra.mxu0 %vm252_vm2, %v23126_v41 }
0x1642   :  { %v23139_v9 = vadd.f32 %v22988_v10, %v7433_v13  ;;  %25618 = vst [vmem:[#allocation11_spill] sm:$0xff] %v23142_v16 }
0x1644   :  { %25617 = vst [vmem:[#allocation12_spill] sm:$0xff] %v23139_v9  ;;  %17860 = vmatprep.mubr.msk.f32.mxu1 %vm252_vm2, %v23139_v9  ;;  %17900 = vmatprep.mubr.msk.f32.mxu0 %vm252_vm2, %v23139_v9 }
0x1645   :  { %17861 = vmatmul.mubr.msk.f32.gmra.mxu1 %vm252_vm2, %v23142_v16  ;;  %17901 = vmatmul.mubr.msk.f32.gmra.mxu0 %vm252_vm2, %v23142_v16 }
0x1646   :  { %17919 = vmatprep.mubr.msk.f32.mxu1 %vm252_vm2, %v22993_v26 }
0x1649   :  { %17920 = vmatmul.mubr.msk.f32.vlgmr.msra.gmra.mxu1 %vm252_vm2, %v22997_v48 }
0x164a   :  { %17922 = vmatprep.mubr.msk.f32.mxu1 %vm252_vm2, %v23014_v15 }
0x164d   :  { %17923 = vmatmul.mubr.msk.f32.gmra.mxu1 %vm252_vm2, %v23018_v56 }
0x164e   :  { %17925 = vmatprep.mubr.msk.f32.mxu1 %vm252_vm2, %v23035_v8 }
0x1651   :  { %17926 = vmatmul.mubr.msk.f32.gmra.mxu1 %vm252_vm2, %v23039_v53 }
0x1652   :  { %17928 = vmatprep.mubr.msk.f32.mxu1 %vm252_vm2, %v23055_v6 }
0x1655   :  { %17929 = vmatmul.mubr.msk.f32.gmra.mxu1 %vm252_vm2, %v23058_v17 }
0x1656   :  { %17931 = vmatprep.mubr.msk.f32.mxu1 %vm252_vm2, %v23086_v22 }
0x1659   :  { %17932 = vmatmul.mubr.msk.f32.gmra.mxu1 %vm252_vm2, %v23090_v1 }
0x165a   :  { %17934 = vmatprep.mubr.msk.f32.mxu1 %vm252_vm2, %v23104_v31 }
0x165d   :  { %17935 = vmatmul.mubr.msk.f32.gmra.mxu1 %vm252_vm2, %v23108_v27 }
0x165e   :  { %17937 = vmatprep.mubr.msk.f32.mxu1 %vm252_vm2, %v23122_v34 }
0x1661   :  { %17938 = vmatmul.mubr.msk.f32.gmra.mxu1 %vm252_vm2, %v23126_v41 }
0x1662   :  { %17940 = vmatprep.mubr.msk.f32.mxu1 %vm252_vm2, %v23139_v9 }
0x1665   :  { %17941 = vmatmul.mubr.msk.f32.gmra.mxu1 %vm252_vm2, %v23142_v16 }
0x16d9   :  { %v17841_v60 = vpop.f32.mrf.mxu1  ;;  %v17881_v10 = vpop.f32.mrf.mxu0 }
0x16db   :  { %v7578_v38 = vpop.f32.mrf.mxu1  ;;  %v7732_v0 = vpop.f32.mrf.mxu0 }
0x16dc   :  { %17959 = vmatprep.mubr.msk.f32.mxu0 %vm1293_vm3, %v7578_v38 }
0x16dd   :  { %v17884_v21 = vpop.f32.mrf.mxu0  ;;  %v17844_v30 = vpop.f32.mrf.mxu1 }
0x16df   :  { %v7742_v45 = vpop.f32.mrf.mxu0  ;;  %v7588_v32 = vpop.f32.mrf.mxu1 }
0x16e1   :  { %v17887_v23 = vpop.f32.mrf.mxu0  ;;  %v17847_v46 = vpop.f32.mrf.mxu1 }
0x16e3   :  { %v7752_v25 = vpop.f32.mrf.mxu0  ;;  %v7598_v63 = vpop.f32.mrf.mxu1 }
0x16e5   :  { %v17890_v52 = vpop.f32.mrf.mxu0  ;;  %v17850_v37 = vpop.f32.mrf.mxu1 }
0x16e6   :  { %17943 = vmatprep.subr.msk.mxu0 %vm1293_vm3, %v17890_v52 }
0x16e7   :  { %v7762_v24 = vpop.f32.mrf.mxu0  ;;  %17944 = vmatpush3.xpose.msk.msra.mxu0 %vm1293_vm3, %v17890_v52  ;;  %v7608_v2 = vpop.f32.mrf.mxu1 }
0x16e8   :  { %17945 = vmatprep.subr.msk.mxu0 %vm1293_vm3, %v7762_v24 }
0x16eb   :  { %17946 = vmatpush3.xpose.msk.msra.mxu0 %vm1293_vm3, %v7762_v24 }
0x16ec   :  { %17947 = vmatprep.subr.msk.mxu0 %vm1293_vm3, %v17887_v23 }
0x16ef   :  { %17948 = vmatpush3.xpose.msk.msra.mxu0 %vm1293_vm3, %v17887_v23 }
0x16f0   :  { %17949 = vmatprep.subr.msk.mxu0 %vm1293_vm3, %v7752_v25 }
0x16f3   :  { %17950 = vmatpush3.xpose.msk.msra.mxu0 %vm1293_vm3, %v7752_v25 }
0x16f4   :  { %17951 = vmatprep.subr.msk.mxu0 %vm1293_vm3, %v17884_v21 }
0x16f7   :  { %17952 = vmatpush3.xpose.msk.msra.mxu0 %vm1293_vm3, %v17884_v21 }
0x16f8   :  { %17953 = vmatprep.subr.msk.mxu0 %vm1293_vm3, %v7742_v45 }
0x16f9   :  { %v23196_v20 = vpop.f32.mrf.mxu1  ;;  %v23198_v57 = vpop.f32.mrf.mxu0 }
0x16fb   :  { %v7618_v11 = vpop.f32.mrf.mxu1  ;;  %v23200_v33 = vpop.f32.mrf.mxu0  ;;  %17954 = vmatpush3.xpose.msk.msra.mxu0 %vm1293_vm3, %v7742_v45 }
0x16fc   :  { %17955 = vmatprep.subr.msk.mxu0 %vm1293_vm3, %v17881_v10 }
0x16fd   :  { %v23204_v54 = vpop.f32.mrf.mxu1  ;;  %v17896_v28 = vpop.f32.mrf.mxu0 }
0x16ff   :  { %v23206_v40 = vpop.f32.mrf.mxu1  ;;  %v7782_v7 = vpop.f32.mrf.mxu0  ;;  %17956 = vmatpush3.xpose.msk.msra.mxu0 %vm1293_vm3, %v17881_v10 }
0x1700   :  { %17957 = vmatprep.subr.msk.mxu0 %vm1293_vm3, %v7732_v0 }
0x1701   :  { %v23210_v42 = vpop.f32.mrf.mxu1  ;;  %v17899_v3 = vpop.f32.mrf.mxu0 }
0x1703   :  { %v23212_v49 = vpop.f32.mrf.mxu1  ;;  %v7792_v4 = vpop.f32.mrf.mxu0  ;;  %17958 = vmatpush3.xpose.msk.msra.mxu0 %vm1293_vm3, %v7732_v0 }
0x1705   :  { %v23215_v39 = vpop.f32.mrf.mxu1  ;;  %v17902_v55 = vpop.f32.mrf.mxu0 }
0x1706   :  { %17960 = vmatmul.mubr.msk.f32.vlgmr.msra.gmra.mxu0 %vm1293_vm3, %v17841_v60  ;;  %17999 = vmatprep.subr.msk.mxu0 %vm1293_vm3, %v17902_v55 }
0x1707   :  { %v23219_v12 = vpop.f32.mrf.mxu1  ;;  %v7802_v13 = vpop.f32.mrf.mxu0  ;;  %17962 = vmatprep.mubr.msk.f32.mxu0 %vm1293_vm3, %v7588_v32  ;;  %18000 = vmatpush3.xpose.msk.msra.mxu0 %vm1293_vm3, %v17902_v55 }
0x1708   :  { %18001 = vmatprep.subr.msk.mxu0 %vm1293_vm3, %v7802_v13 }
0x1709   :  { %v17921_v10 = vpop.f32.mrf.mxu1 }
0x170a   :  { %17963 = vmatmul.mubr.msk.f32.gmra.mxu0 %vm1293_vm3, %v17844_v30 }
0x170b   :  { %v7886_v38 = vpop.f32.mrf.mxu1  ;;  %17965 = vmatprep.mubr.msk.f32.mxu0 %vm1293_vm3, %v7598_v63  ;;  %18002 = vmatpush3.xpose.msk.msra.mxu0 %vm1293_vm3, %v7802_v13  ;;  %v14826_v63 = vld [vmem:[%s25421_s4 + $0x378] sm:$0xff] }
0x170c   :  { %18003 = vmatprep.subr.msk.mxu0 %vm1293_vm3, %v17899_v3 }
0x170d   :  { %v17924_v60 = vpop.f32.mrf.mxu1 }
0x170e   :  { %17966 = vmatmul.mubr.msk.f32.gmra.mxu0 %vm1293_vm3, %v17847_v46 }
0x170f   :  { %v7896_v0 = vpop.f32.mrf.mxu1  ;;  %17968 = vmatprep.mubr.msk.f32.mxu0 %vm1293_vm3, %v7608_v2  ;;  %18004 = vmatpush3.xpose.msk.msra.mxu0 %vm1293_vm3, %v17899_v3 }
0x1710   :  { %18005 = vmatprep.subr.msk.mxu0 %vm1293_vm3, %v7792_v4 }
0x1711   :  { %v17927_v21 = vpop.f32.mrf.mxu1 }
0x1712   :  { %17969 = vmatmul.mubr.msk.f32.gmra.mxu0 %vm1293_vm3, %v17850_v37 }
0x1713   :  { %v7906_v45 = vpop.f32.mrf.mxu1  ;;  %18006 = vmatpush3.xpose.msk.msra.mxu0 %vm1293_vm3, %v7792_v4  ;;  %18015 = vmatprep.mubr.msk.f32.mxu0 %vm1293_vm3, %v7618_v11  ;;  %v14824_v11 = vld [vmem:[%s25421_s4 + $0x368] sm:$0xff] }
0x1714   :  { %18007 = vmatprep.subr.msk.mxu0 %vm1293_vm3, %v17896_v28 }
0x1715   :  { %v17930_v23 = vpop.f32.mrf.mxu1 }
0x1716   :  { %17971 = vmatprep.subr.mxu1 %v17930_v23 }
0x1717   :  { %v7916_v30 = vpop.f32.mrf.mxu1  ;;  %17972 = vmatpush3.msra.mxu1 %v17930_v23  ;;  %18008 = vmatpush3.xpose.msk.msra.mxu0 %vm1293_vm3, %v17896_v28  ;;  %v14821_v28 = vld [vmem:[%s25421_s4 + $0x350] sm:$0xff] }
0x1718   :  { %17973 = vmatprep.subr.mxu1 %v7916_v30  ;;  %18009 = vmatprep.subr.msk.mxu0 %vm1293_vm3, %v7782_v7 }
0x1719   :  { %v23238_v25 = vpop.f32.mrf.mxu1  ;;  %17974 = vmatpush3.msra.mxu1 %v7916_v30 }
0x171a   :  { %17975 = vmatprep.subr.mxu1 %v17927_v21 }
0x171b   :  { %v23240_v52 = vpop.f32.mrf.mxu1  ;;  %17976 = vmatpush3.msra.mxu1 %v17927_v21  ;;  %18010 = vmatpush3.xpose.msk.msra.mxu0 %vm1293_vm3, %v7782_v7 }
0x171c   :  { %17977 = vmatprep.subr.mxu1 %v7906_v45  ;;  %18011 = vmatprep.subr.msk.mxu0 %vm1293_vm3, %v23198_v57 }
0x171d   :  { %v23245_v32 = vpop.f32.mrf.mxu1  ;;  %17978 = vmatpush3.msra.mxu1 %v7906_v45 }
0x171e   :  { %17979 = vmatprep.subr.mxu1 %v17924_v60 }
0x171f   :  { %v23247_v24 = vpop.f32.mrf.mxu1  ;;  %17980 = vmatpush3.msra.mxu1 %v17924_v60  ;;  %18012 = vmatpush3.xpose.msk.msra.mxu0 %vm1293_vm3, %v23198_v57  ;;  %v14825_v57 = vld [vmem:[%s25421_s4 + $0x370] sm:$0xff] }
0x1720   :  { %17981 = vmatprep.subr.mxu1 %v7896_v0  ;;  %18013 = vmatprep.subr.msk.mxu0 %vm1293_vm3, %v23200_v33 }
0x1721   :  { %v23253_v46 = vpop.f32.mrf.mxu1  ;;  %17982 = vmatpush3.msra.mxu1 %v7896_v0 }
0x1722   :  { %17983 = vmatprep.subr.mxu1 %v17921_v10 }
0x1723   :  { %v23258_v37 = vpop.f32.mrf.mxu1  ;;  %17984 = vmatpush3.msra.mxu1 %v17921_v10  ;;  %18014 = vmatpush3.xpose.msk.msra.mxu0 %vm1293_vm3, %v23200_v33  ;;  %v14823_v33 = vld [vmem:[%s25421_s4 + $0x360] sm:$0xff] }
0x1724   :  { %17985 = vmatprep.subr.mxu1 %v7886_v38  ;;  %18095 = vmatprep.subr.mxu0 %v14826_v63 }
0x1725   :  { %v23262_v2 = vpop.f32.mrf.mxu1  ;;  %17986 = vmatpush3.msra.mxu1 %v7886_v38 }
0x1726   :  { %18016 = vmatmul.mubr.msk.f32.vlgmr.msra.gmra.mxu0 %vm1293_vm3, %v23196_v20  ;;  %18027 = vmatprep.subr.mxu1 %v23262_v2  ;;  %v14822_v20 = vld [vmem:[%s25421_s4 + $0x358] sm:$0xff] }
0x1727   :  { %18018 = vmatprep.mubr.msk.f32.mxu0 %vm1293_vm3, %v23206_v40  ;;  %18096 = vmatpush3.msra.mxu0 %v14826_v63  ;;  %v14819_v40 = vld [vmem:[%s25421_s4 + $0x340] sm:$0xff] }
0x1728   :  { %18097 = vmatprep.subr.mxu0 %v14825_v57 }
0x1729   :  { %18098 = vmatpush3.msra.mxu0 %v14825_v57 }
0x172a   :  { %18019 = vmatmul.mubr.msk.f32.gmra.mxu0 %vm1293_vm3, %v23204_v54  ;;  %18099 = vmatprep.subr.mxu0 %v14824_v11  ;;  %v14820_v54 = vld [vmem:[%s25421_s4 + $0x348] sm:$0xff] }
0x172b   :  { %18021 = vmatprep.mubr.msk.f32.mxu0 %vm1293_vm3, %v23212_v49  ;;  %18100 = vmatpush3.msra.mxu0 %v14824_v11 }
0x172c   :  { %18101 = vmatprep.subr.mxu0 %v14823_v33 }
0x172d   :  { %18102 = vmatpush3.msra.mxu0 %v14823_v33 }
0x172e   :  { %18022 = vmatmul.mubr.msk.f32.gmra.mxu0 %vm1293_vm3, %v23210_v42  ;;  %18103 = vmatprep.subr.mxu0 %v14822_v20 }
0x172f   :  { %18024 = vmatprep.mubr.msk.f32.mxu0 %vm1293_vm3, %v23219_v12  ;;  %18104 = vmatpush3.msra.mxu0 %v14822_v20 }
0x1730   :  { %18105 = vmatprep.subr.mxu0 %v14821_v28 }
0x1731   :  { %18106 = vmatpush3.msra.mxu0 %v14821_v28 }
0x1732   :  { %18025 = vmatmul.mubr.msk.f32.gmra.mxu0 %vm1293_vm3, %v23215_v39  ;;  %18107 = vmatprep.subr.mxu0 %v14820_v54 }
0x1733   :  { %18108 = vmatpush3.msra.mxu0 %v14820_v54  ;;  %18111 = vmatprep.mubr.msk.f32.mxu0 %vm252_vm2, %v22993_v26 }
0x1734   :  { %18109 = vmatprep.subr.mxu0 %v14819_v40 }
0x1735   :  { %18110 = vmatpush3.msra.mxu0 %v14819_v40 }
0x1736   :  { %18112 = vmatmul.mubr.msk.f32.vlgmr.msra.gmra.mxu0 %vm252_vm2, %v22997_v48 }
0x1737   :  { %18114 = vmatprep.mubr.msk.f32.mxu0 %vm252_vm2, %v23014_v15 }
0x173a   :  { %18115 = vmatmul.mubr.msk.f32.gmra.mxu0 %vm252_vm2, %v23018_v56 }
0x173b   :  { %18117 = vmatprep.mubr.msk.f32.mxu0 %vm252_vm2, %v23035_v8 }
0x173e   :  { %18118 = vmatmul.mubr.msk.f32.gmra.mxu0 %vm252_vm2, %v23039_v53 }
0x173f   :  { %18120 = vmatprep.mubr.msk.f32.mxu0 %vm252_vm2, %v23055_v6 }
0x1742   :  { %18121 = vmatmul.mubr.msk.f32.gmra.mxu0 %vm252_vm2, %v23058_v17 }
0x1743   :  { %18123 = vmatprep.mubr.msk.f32.mxu0 %vm252_vm2, %v23086_v22 }
0x1746   :  { %18124 = vmatmul.mubr.msk.f32.gmra.mxu0 %vm252_vm2, %v23090_v1 }
0x1747   :  { %18126 = vmatprep.mubr.msk.f32.mxu0 %vm252_vm2, %v23104_v31 }
0x174a   :  { %18127 = vmatmul.mubr.msk.f32.gmra.mxu0 %vm252_vm2, %v23108_v27 }
0x174b   :  { %18129 = vmatprep.mubr.msk.f32.mxu0 %vm252_vm2, %v23122_v34 }
0x174e   :  { %18130 = vmatmul.mubr.msk.f32.gmra.mxu0 %vm252_vm2, %v23126_v41 }
0x174f   :  { %18132 = vmatprep.mubr.msk.f32.mxu0 %vm252_vm2, %v23139_v9 }
0x1752   :  { %18133 = vmatmul.mubr.msk.f32.gmra.mxu0 %vm252_vm2, %v23142_v16 }
0x17c6   :  { %v23332_v7 = vpop.f32.mrf.mxu0 }
0x17c7   :  { %v8121_v42 = vsel %vm252_vm2, %v23332_v7, -inf }
0x17c8   :  { %8122 = vmax.xlane.f32.xlu1 %v8121_v42  ;;  %v23336_v3 = vpop.f32.mrf.mxu0 }
0x17c9   :  { %v8118_v49 = vsel %vm252_vm2, %v23336_v3, -inf }
0x17ca   :  { %8119 = vmax.xlane.f32.xlu0 %v8118_v49  ;;  %v23340_v4 = vpop.f32.mrf.mxu0 }
0x17cb   :  { %v8127_v39 = vsel %vm252_vm2, %v23340_v4, -inf }
0x17cc   :  { %8128 = vmax.xlane.f32.xlu1 %v8127_v39  ;;  %v23344_v55 = vpop.f32.mrf.mxu0 }
0x17cd   :  { %v8124_v12 = vsel %vm252_vm2, %v23344_v55, -inf }
0x17ce   :  { %8125 = vmax.xlane.f32.xlu0 %v8124_v12  ;;  %v23348_v13 = vpop.f32.mrf.mxu0 }
0x17cf   :  { %v8133_v10 = vsel %vm252_vm2, %v23348_v13, -inf }
0x17d0   :  { %8134 = vmax.xlane.f32.xlu1 %v8133_v10  ;;  %v23352_v38 = vpop.f32.mrf.mxu0 }
0x17d1   :  { %v8130_v60 = vsel %vm252_vm2, %v23352_v38, -inf }
0x17d2   :  { %8131 = vmax.xlane.f32.xlu0 %v8130_v60  ;;  %v23356_v0 = vpop.f32.mrf.mxu0 }
0x17d3   :  { %v8139_v21 = vsel %vm252_vm2, %v23356_v0, -inf }
0x17d4   :  { %8140 = vmax.xlane.f32.xlu1 %v8139_v21  ;;  %v23360_v45 = vpop.f32.mrf.mxu0 }
0x17d5   :  { %v8136_v23 = vsel %vm252_vm2, %v23360_v45, -inf }
0x17d6   :  { %8137 = vmax.xlane.f32.xlu0 %v8136_v23 }
0x17e6   :  { %v23364_v30 = vpop.f32.mrf.mxu0 }
0x17e7   :  { %v8491_v63 = vsel %vm252_vm2, %v23364_v30, -inf }
0x17e8   :  { %8492 = vmax.xlane.f32.xlu1 %v8491_v63  ;;  %v23368_v57 = vpop.f32.mrf.mxu0 }
0x17e9   :  { %v8488_v11 = vsel %vm252_vm2, %v23368_v57, -inf }
0x17ea   :  { %v23372_v33 = vpop.f32.mrf.mxu0  ;;  %8489 = vmax.xlane.f32.xlu0 %v8488_v11 }
0x17eb   :  { %v8497_v20 = vsel %vm252_vm2, %v23372_v33, -inf }
0x17ec   :  { %8498 = vmax.xlane.f32.xlu1 %v8497_v20  ;;  %v23376_v28 = vpop.f32.mrf.mxu0 }
0x17ed   :  { %v8494_v54 = vsel %vm252_vm2, %v23376_v28, -inf }
0x17ee   :  { %v23380_v40 = vpop.f32.mrf.mxu0  ;;  %8495 = vmax.xlane.f32.xlu0 %v8494_v54 }
0x17ef   :  { %v8503_v42 = vsel %vm252_vm2, %v23380_v40, -inf }
0x17f0   :  { %8504 = vmax.xlane.f32.xlu1 %v8503_v42  ;;  %v23384_v49 = vpop.f32.mrf.mxu0 }
0x17f1   :  { %v8500_v39 = vsel %vm252_vm2, %v23384_v49, -inf }
0x17f2   :  { %8501 = vmax.xlane.f32.xlu0 %v8500_v39  ;;  %v23388_v12 = vpop.f32.mrf.mxu0 }
0x17f3   :  { %v8509_v10 = vsel %vm252_vm2, %v23388_v12, -inf }
0x17f4   :  { %8510 = vmax.xlane.f32.xlu1 %v8509_v10  ;;  %v23392_v60 = vpop.f32.mrf.mxu0 }
0x17f5   :  { %v8506_v21 = vsel %vm252_vm2, %v23392_v60, -inf }
0x17f6   :  { %v18113_v23 = vpop.f32.mrf.mxu0  ;;  %8507 = vmax.xlane.f32.xlu0 %v8506_v21 }
0x17f8   :  { %v8937_v63 = vpop.f32.mrf.mxu0 }
0x17fa   :  { %v18116_v11 = vpop.f32.mrf.mxu0 }
0x17fc   :  { %v8947_v20 = vpop.f32.mrf.mxu0 }
0x17fe   :  { %v18119_v54 = vpop.f32.mrf.mxu0 }
0x1800   :  { %v8957_v42 = vpop.f32.mrf.mxu0 }
0x1802   :  { %v18122_v62 = vpop.f32.mrf.mxu0 }
0x1803   :  { %18175 = vmatprep.subr.msk.mxu0 %vm1293_vm3, %v18122_v62 }
0x1804   :  { %v8967_v39 = vpop.f32.mrf.mxu0  ;;  %18176 = vmatpush3.xpose.msk.msra.mxu0 %vm1293_vm3, %v18122_v62 }
0x1805   :  { %18177 = vmatprep.subr.msk.mxu0 %vm1293_vm3, %v8967_v39 }
0x1808   :  { %18178 = vmatpush3.xpose.msk.msra.mxu0 %vm1293_vm3, %v8967_v39 }
0x1809   :  { %18179 = vmatprep.subr.msk.mxu0 %vm1293_vm3, %v18119_v54 }
0x180c   :  { %18180 = vmatpush3.xpose.msk.msra.mxu0 %vm1293_vm3, %v18119_v54 }
0x180d   :  { %18181 = vmatprep.subr.msk.mxu0 %vm1293_vm3, %v8957_v42 }
0x1810   :  { %18182 = vmatpush3.xpose.msk.msra.mxu0 %vm1293_vm3, %v8957_v42 }
0x1811   :  { %18183 = vmatprep.subr.msk.mxu0 %vm1293_vm3, %v18116_v11 }
0x1814   :  { %18184 = vmatpush3.xpose.msk.msra.mxu0 %vm1293_vm3, %v18116_v11 }
0x1815   :  { %18185 = vmatprep.subr.msk.mxu0 %vm1293_vm3, %v8947_v20 }
0x1818   :  { %18186 = vmatpush3.xpose.msk.msra.mxu0 %vm1293_vm3, %v8947_v20 }
0x1819   :  { %18187 = vmatprep.subr.msk.mxu0 %vm1293_vm3, %v18113_v23 }
0x181c   :  { %18188 = vmatpush3.xpose.msk.msra.mxu0 %vm1293_vm3, %v18113_v23 }
0x181d   :  { %18189 = vmatprep.subr.msk.mxu0 %vm1293_vm3, %v8937_v63 }
0x1820   :  { %18190 = vmatpush3.xpose.msk.msra.mxu0 %vm1293_vm3, %v8937_v63 }
0x1851   :  { %v8123_v62 = vpop.xlane.xlu1 %8122 }
0x1852   :  { %v8143_v10 = vsub.f32 %v23332_v7, %v8123_v62 }
0x1853   :  { %v8120_v21 = vpop.xlane.xlu0 %8119 }
0x1854   :  { %v8152_v54 = vmul.f32 1.442695, %v8143_v10  ;;  %v8142_v42 = vsub.f32 %v23336_v3, %v8120_v21 }
0x1855   :  { %v8129_v11 = vpop.xlane.xlu1 %8128 }
0x1856   :  { %19433 = vpow2.f32 %v8152_v54  ;;  %v8150_v39 = vmul.f32 1.442695, %v8142_v42  ;;  %v8145_v20 = vsub.f32 %v23340_v4, %v8129_v11 }
0x1857   :  { %v8126_v5 = vpop.xlane.xlu0 %8125 }
0x1858   :  { %19435 = vpow2.f32 %v8150_v39  ;;  %v8156_v43 = vmul.f32 1.442695, %v8145_v20  ;;  %v8144_v23 = vsub.f32 %v23344_v55, %v8126_v5 }
0x1859   :  { %v8135_v59 = vpop.xlane.xlu1 %8134 }
0x185a   :  { %19437 = vpow2.f32 %v8156_v43  ;;  %v8154_v63 = vmul.f32 1.442695, %v8144_v23  ;;  %v8147_v47 = vsub.f32 %v23348_v13, %v8135_v59 }
0x185b   :  { %v8132_v7 = vpop.xlane.xlu0 %8131 }
0x185c   :  { %19439 = vpow2.f32 %v8154_v63  ;;  %v8160_v62 = vmul.f32 1.442695, %v8147_v47  ;;  %v8146_v3 = vsub.f32 %v23352_v38, %v8132_v7 }
0x185d   :  { %v8141_v10 = vpop.xlane.xlu1 %8140 }
0x185e   :  { %19441 = vpow2.f32 %v8160_v62  ;;  %v8158_v21 = vmul.f32 1.442695, %v8146_v3  ;;  %v8149_v4 = vsub.f32 %v23356_v0, %v8141_v10 }
0x185f   :  { %v8138_v54 = vpop.xlane.xlu0 %8137 }
0x1860   :  { %19443 = vpow2.f32 %v8158_v21  ;;  %v8164_v42 = vmul.f32 1.442695, %v8149_v4  ;;  %v8148_v5 = vsub.f32 %v23360_v45, %v8138_v54 }
0x1862   :  { %19445 = vpow2.f32 %v8164_v42  ;;  %v8162_v43 = vmul.f32 1.442695, %v8148_v5 }
0x1863   :  { %v23420_v55 = vpop.eup %19433 }
0x1864   :  { %19447 = vpow2.f32 %v8162_v43  ;;  %v8169_v47 = vsel %vm252_vm2, %v23420_v55, 0.0 }
0x1865   :  { %v23424_v59 = vpop.eup %19435  ;;  %8170 = vadd.xlane.f32.xlu1 %v8169_v47 }
0x1866   :  { %v8166_v13 = vsel %vm252_vm2, %v23424_v59, 0.0 }
0x1867   :  { %v23428_v38 = vpop.eup %19437  ;;  %8167 = vadd.xlane.f32.xlu0 %v8166_v13 }
0x1868   :  { %v8175_v0 = vsel %vm252_vm2, %v23428_v38, 0.0 }
0x1869   :  { %v23432_v45 = vpop.eup %19439  ;;  %8176 = vadd.xlane.f32.xlu1 %v8175_v0 }
0x186a   :  { %v8172_v11 = vsel %vm252_vm2, %v23432_v45, 0.0 }
0x186b   :  { %v23436_v39 = vpop.eup %19441  ;;  %8173 = vadd.xlane.f32.xlu0 %v8172_v11 }
0x186c   :  { %v8181_v20 = vsel %vm252_vm2, %v23436_v39, 0.0 }
0x186d   :  { %v23440_v23 = vpop.eup %19443  ;;  %8182 = vadd.xlane.f32.xlu1 %v8181_v20 }
0x186e   :  { %v8178_v63 = vsel %vm252_vm2, %v23440_v23, 0.0 }
0x186f   :  { %v23444_v7 = vpop.eup %19445  ;;  %8179 = vadd.xlane.f32.xlu0 %v8178_v63 }
0x1870   :  { %v8187_v62 = vsel %vm252_vm2, %v23444_v7, 0.0 }
0x1871   :  { %v23448_v3 = vpop.eup %19447  ;;  %v8493_v10 = vpop.xlane.xlu1 %8492  ;;  %8188 = vadd.xlane.f32.xlu1 %v8187_v62 }
0x1872   :  { %v8513_v21 = vsub.f32 %v23364_v30, %v8493_v10  ;;  %v8184_v4 = vsel %vm252_vm2, %v23448_v3, 0.0 }
0x1873   :  { %v8490_v54 = vpop.xlane.xlu0 %8489  ;;  %8185 = vadd.xlane.f32.xlu0 %v8184_v4 }
0x1874   :  { %v8522_v42 = vmul.f32 1.442695, %v8513_v21  ;;  %v8512_v5 = vsub.f32 %v23368_v57, %v8490_v54 }
0x1875   :  { %v8499_v43 = vpop.xlane.xlu1 %8498 }
0x1876   :  { %19449 = vpow2.f32 %v8522_v42  ;;  %v8520_v47 = vmul.f32 1.442695, %v8512_v5  ;;  %v8515_v13 = vsub.f32 %v23372_v33, %v8499_v43 }
0x1877   :  { %v8496_v0 = vpop.xlane.xlu0 %8495 }
0x1878   :  { %19451 = vpow2.f32 %v8520_v47  ;;  %v8526_v11 = vmul.f32 1.442695, %v8515_v13  ;;  %v8514_v20 = vsub.f32 %v23376_v28, %v8496_v0 }
0x1879   :  { %v8505_v63 = vpop.xlane.xlu1 %8504 }
0x187a   :  { %19453 = vpow2.f32 %v8526_v11  ;;  %v8524_v30 = vmul.f32 1.442695, %v8514_v20  ;;  %v8517_v62 = vsub.f32 %v23380_v40, %v8505_v63 }
0x187b   :  { %v8502_v10 = vpop.xlane.xlu0 %8501 }
0x187c   :  { %19455 = vpow2.f32 %v8524_v30  ;;  %v8530_v21 = vmul.f32 1.442695, %v8517_v62  ;;  %v8516_v57 = vsub.f32 %v23384_v49, %v8502_v10 }
0x187d   :  { %v8511_v4 = vpop.xlane.xlu1 %8510 }
0x187e   :  { %19457 = vpow2.f32 %v8530_v21  ;;  %v8528_v54 = vmul.f32 1.442695, %v8516_v57  ;;  %v8519_v33 = vsub.f32 %v23388_v12, %v8511_v4 }
0x187f   :  { %v8508_v42 = vpop.xlane.xlu0 %8507 }
0x1880   :  { %19459 = vpow2.f32 %v8528_v54  ;;  %v8534_v5 = vmul.f32 1.442695, %v8519_v33  ;;  %v8518_v28 = vsub.f32 %v23392_v60, %v8508_v42 }
0x1882   :  { %19461 = vpow2.f32 %v8534_v5  ;;  %v8532_v43 = vmul.f32 1.442695, %v8518_v28 }
0x1883   :  { %v23460_v47 = vpop.eup %19449 }
0x1884   :  { %19463 = vpow2.f32 %v8532_v43  ;;  %v8539_v40 = vsel %vm252_vm2, %v23460_v47, 0.0 }
0x1885   :  { %v23464_v13 = vpop.eup %19451  ;;  %8540 = vadd.xlane.f32.xlu1 %v8539_v40 }
0x1886   :  { %v8536_v49 = vsel %vm252_vm2, %v23464_v13, 0.0 }
0x1887   :  { %v23468_v12 = vpop.eup %19453  ;;  %8537 = vadd.xlane.f32.xlu0 %v8536_v49 }
0x1888   :  { %v8545_v60 = vsel %vm252_vm2, %v23468_v12, 0.0 }
0x1889   :  { %v23472_v0 = vpop.eup %19455  ;;  %8546 = vadd.xlane.f32.xlu1 %v8545_v60 }
0x188a   :  { %v8542_v11 = vsel %vm252_vm2, %v23472_v0, 0.0 }
0x188b   :  { %v23476_v20 = vpop.eup %19457  ;;  %8543 = vadd.xlane.f32.xlu0 %v8542_v11 }
0x188c   :  { %v8551_v63 = vsel %vm252_vm2, %v23476_v20, 0.0 }
0x188d   :  { %v23480_v30 = vpop.eup %19459  ;;  %8552 = vadd.xlane.f32.xlu1 %v8551_v63 }
0x188e   :  { %v8548_v62 = vsel %vm252_vm2, %v23480_v30, 0.0 }
0x188f   :  { %v23484_v10 = vpop.eup %19461  ;;  %8549 = vadd.xlane.f32.xlu0 %v8548_v62 }
0x1890   :  { %v8557_v21 = vsel %vm252_vm2, %v23484_v10, 0.0 }
0x1891   :  { %v23488_v57 = vpop.eup %19463  ;;  %8558 = vadd.xlane.f32.xlu1 %v8557_v21 }
0x1892   :  { %v8554_v4 = vsel %vm252_vm2, %v23488_v57, 0.0 }
0x1893   :  { %8555 = vadd.xlane.f32.xlu0 %v8554_v4 }
0x18ee   :  { %v8171_v54 = vpop.xlane.xlu1 %8170 }
0x18ef   :  { %19465 = vrcp.f32 %v8171_v54  ;;  %v7956_v54 = vpop.f32.mrf.mxu1 }
0x18f0   :  { %v8168_v33 = vpop.xlane.xlu0 %8167 }
0x18f1   :  { %19467 = vrcp.f32 %v8168_v33 }
0x18f2   :  { %v8177_v42 = vpop.xlane.xlu1 %8176 }
0x18f3   :  { %19469 = vrcp.f32 %v8177_v42 }
0x18f4   :  { %v8174_v5 = vpop.xlane.xlu0 %8173 }
0x18f5   :  { %19471 = vrcp.f32 %v8174_v5 }
0x18f6   :  { %v8183_v28 = vpop.xlane.xlu1 %8182 }
0x18f7   :  { %19473 = vrcp.f32 %v8183_v28 }
0x18f8   :  { %v8180_v43 = vpop.xlane.xlu0 %8179 }
0x18f9   :  { %19475 = vrcp.f32 %v8180_v43 }
0x18fa   :  { %v8189_v40 = vpop.xlane.xlu1 %8188 }
0x18fb   :  { %19477 = vrcp.f32 %v8189_v40 }
0x18fc   :  { %v8186_v49 = vpop.xlane.xlu0 %8185  ;;  %v19466_v60 = vpop.eup %19465 }
0x18fd   :  { %19479 = vrcp.f32 %v8186_v49  ;;  %v8193_v62 = vmul.f32 %v19466_v60, %v23420_v55 }
0x18fe   :  { %v19468_v11 = vpop.eup %19467 }
0x18ff   :  { %v8191_v63 = vmul.f32 %v19468_v11, %v23424_v59 }
0x1900   :  { %v19470_v21 = vpop.eup %19469 }
0x1901   :  { %17987 = vmatprep.mubr.msk.f32.mxu1 %vm252_vm2, %v8191_v63  ;;  %v8197_v42 = vmul.f32 %v19470_v21, %v23428_v38  ;;  %v14801_v63 = vld [vmem:[%s25421_s4 + $0x170] sm:$0xff] }
0x1902   :  { %v19472_v4 = vpop.eup %19471  ;;  %17988 = vmatmul.mubr.msk.f32.vlgmr.msra.gmra.mxu1 %vm252_vm2, %v8193_v62 }
0x1903   :  { %18028 = vmatpush3.msra.mxu1 %v23262_v2  ;;  %v8195_v33 = vmul.f32 %v19472_v4, %v23432_v45  ;;  %v14800_v4 = vld [vmem:[%s25421_s4 + $0x168] sm:$0xff] }
0x1904   :  { %18029 = vmatprep.subr.mxu1 %v7956_v54  ;;  %v19474_v5 = vpop.eup %19473 }
0x1905   :  { %18030 = vmatpush3.msra.mxu1 %v7956_v54  ;;  %17990 = vmatprep.mubr.msk.f32.mxu1 %vm252_vm2, %v8195_v33  ;;  %v8201_v2 = vmul.f32 %v19474_v5, %v23436_v39  ;;  %v14799_v54 = vld [vmem:[%s25421_s4 + $0x160] sm:$0xff] }
0x1906   :  { %v19476_v59 = vpop.eup %19475  ;;  %18031 = vmatprep.subr.mxu1 %v23253_v46  ;;  %17991 = vmatmul.mubr.msk.f32.gmra.mxu1 %vm252_vm2, %v8197_v42  ;;  %v14798_v42 = vld [vmem:[%s25421_s4 + $0x158] sm:$0xff] }
0x1907   :  { %18032 = vmatpush3.msra.mxu1 %v23253_v46  ;;  %v8199_v55 = vmul.f32 %v19476_v59, %v23440_v23  ;;  %v23546_v59 = vpop.f32.mrf.mxu0 }
0x1908   :  { %18033 = vmatprep.subr.mxu1 %v23258_v37  ;;  %v19478_v45 = vpop.eup %19477 }
0x1909   :  { %18034 = vmatpush3.msra.mxu1 %v23258_v37  ;;  %17993 = vmatprep.mubr.msk.f32.mxu1 %vm252_vm2, %v8199_v55  ;;  %v8205_v23 = vmul.f32 %v19478_v45, %v23444_v7  ;;  %v14797_v55 = vld [vmem:[%s25421_s4 + $0x150] sm:$0xff] }
0x190a   :  { %v19480_v38 = vpop.eup %19479  ;;  %18035 = vmatprep.subr.mxu1 %v23245_v32  ;;  %17994 = vmatmul.mubr.msk.f32.gmra.mxu1 %vm252_vm2, %v8201_v2 }
0x190b   :  { %18036 = vmatpush3.msra.mxu1 %v23245_v32  ;;  %v8203_v46 = vmul.f32 %v19480_v38, %v23448_v3  ;;  %v14802_v32 = vld [vmem:[%s25421_s4 + $0x178] sm:$0xff]  ;;  %v23558_v38 = vpop.f32.mrf.mxu0 }
0x190c   :  { %18037 = vmatprep.subr.mxu1 %v23247_v24 }
0x190d   :  { %18038 = vmatpush3.msra.mxu1 %v23247_v24  ;;  %17996 = vmatprep.mubr.msk.f32.mxu1 %vm252_vm2, %v8203_v46  ;;  %v14795_v46 = vld [vmem:[%s25421_s4 + $0x140] sm:$0xff] }
0x190e   :  { %18039 = vmatprep.subr.mxu1 %v23238_v25  ;;  %v8541_v37 = vpop.xlane.xlu1 %8540  ;;  %17997 = vmatmul.mubr.msk.f32.gmra.mxu1 %vm252_vm2, %v8205_v23  ;;  %v14849_v23 = vld [vmem:[%s25421_s4 + $0x570] sm:$0xff] }
0x190f   :  { %18040 = vmatpush3.msra.mxu1 %v23238_v25  ;;  %19481 = vrcp.f32 %v8541_v37  ;;  %v14848_v37 = vld [vmem:[%s25421_s4 + $0x568] sm:$0xff] }
0x1910   :  { %18041 = vmatprep.subr.mxu1 %v23240_v52  ;;  %v8538_v39 = vpop.xlane.xlu0 %8537 }
0x1911   :  { %19483 = vrcp.f32 %v8538_v39  ;;  %18042 = vmatpush3.msra.mxu1 %v23240_v52  ;;  %v14847_v39 = vld [vmem:[%s25421_s4 + $0x560] sm:$0xff] }
0x1912   :  { %v8547_v24 = vpop.xlane.xlu1 %8546  ;;  %18055 = vmatprep.subr.mxu1 %v14802_v32 }
0x1913   :  { %19485 = vrcp.f32 %v8547_v24  ;;  %v14846_v24 = vld [vmem:[%s25421_s4 + $0x558] sm:$0xff] }
0x1914   :  { %v8544_v7 = vpop.xlane.xlu0 %8543 }
0x1915   :  { %19487 = vrcp.f32 %v8544_v7 }
0x1916   :  { %v8553_v3 = vpop.xlane.xlu1 %8552 }
0x1917   :  { %19489 = vrcp.f32 %v8553_v3  ;;  %v14845_v3 = vld [vmem:[%s25421_s4 + $0x550] sm:$0xff] }
0x1918   :  { %v8550_v28 = vpop.xlane.xlu0 %8549 }
0x1919   :  { %19491 = vrcp.f32 %v8550_v28  ;;  %v14844_v28 = vld [vmem:[%s25421_s4 + $0x548] sm:$0xff] }
0x191a   :  { %v8559_v25 = vpop.xlane.xlu1 %8558 }
0x191b   :  { %19493 = vrcp.f32 %v8559_v25 }
0x191c   :  { %v8556_v43 = vpop.xlane.xlu0 %8555  ;;  %v19482_v40 = vpop.eup %19481 }
0x191d   :  { %19495 = vrcp.f32 %v8556_v43  ;;  %v8563_v11 = vmul.f32 %v19482_v40, %v23460_v47  ;;  %v14843_v43 = vld [vmem:[%s25421_s4 + $0x540] sm:$0xff] }
0x191e   :  { %v19484_v49 = vpop.eup %19483 }
0x191f   :  { %v8561_v60 = vmul.f32 %v19484_v49, %v23464_v13 }
0x1920   :  { %v19486_v52 = vpop.eup %19485 }
0x1921   :  { %18043 = vmatprep.mubr.msk.f32.mxu1 %vm252_vm2, %v8561_v60  ;;  %v8567_v47 = vmul.f32 %v19486_v52, %v23468_v12 }
0x1922   :  { %v19488_v62 = vpop.eup %19487  ;;  %18044 = vmatmul.mubr.msk.f32.vlgmr.msra.gmra.mxu1 %vm252_vm2, %v8563_v11 }
0x1923   :  { %18056 = vmatpush3.msra.mxu1 %v14802_v32  ;;  %v8565_v21 = vmul.f32 %v19488_v62, %v23472_v0 }
0x1924   :  { %18057 = vmatprep.subr.mxu1 %v14801_v63  ;;  %v19490_v13 = vpop.eup %19489 }
0x1925   :  { %18058 = vmatpush3.msra.mxu1 %v14801_v63  ;;  %18046 = vmatprep.mubr.msk.f32.mxu1 %vm252_vm2, %v8565_v21  ;;  %v8571_v12 = vmul.f32 %v19490_v13, %v23476_v20  ;;  %v14796_v20 = vld [vmem:[%s25421_s4 + $0x148] sm:$0xff] }
0x1926   :  { %v19492_v33 = vpop.eup %19491  ;;  %18059 = vmatprep.subr.mxu1 %v14800_v4  ;;  %18047 = vmatmul.mubr.msk.f32.gmra.mxu1 %vm252_vm2, %v8567_v47 }
0x1927   :  { %18060 = vmatpush3.msra.mxu1 %v14800_v4  ;;  %v8569_v0 = vmul.f32 %v19492_v33, %v23480_v30 }
0x1928   :  { %18061 = vmatprep.subr.mxu1 %v14799_v54  ;;  %v19494_v5 = vpop.eup %19493 }
0x1929   :  { %18062 = vmatpush3.msra.mxu1 %v14799_v54  ;;  %18049 = vmatprep.mubr.msk.f32.mxu1 %vm252_vm2, %v8569_v0  ;;  %v8575_v45 = vmul.f32 %v19494_v5, %v23484_v10  ;;  %v14850_v10 = vld [vmem:[%s25421_s4 + $0x578] sm:$0xff] }
0x192a   :  { %v19496_v2 = vpop.eup %19495  ;;  %18063 = vmatprep.subr.mxu1 %v14798_v42  ;;  %18050 = vmatmul.mubr.msk.f32.gmra.mxu1 %vm252_vm2, %v8571_v12 }
0x192b   :  { %18064 = vmatpush3.msra.mxu1 %v14798_v42  ;;  %v8573_v30 = vmul.f32 %v19496_v2, %v23488_v57  ;;  %v23570_v57 = vpop.f32.mrf.mxu0 }
0x192c   :  { %18065 = vmatprep.subr.mxu1 %v14797_v55 }
0x192d   :  { %18066 = vmatpush3.msra.mxu1 %v14797_v55  ;;  %18052 = vmatprep.mubr.msk.f32.mxu1 %vm252_vm2, %v8573_v30  ;;  %v8987_v32 = vpop.f32.mrf.mxu0 }
0x192e   :  { %18067 = vmatprep.subr.mxu1 %v14796_v20  ;;  %18053 = vmatmul.mubr.msk.f32.gmra.mxu1 %vm252_vm2, %v8575_v45 }
0x192f   :  { %18068 = vmatpush3.msra.mxu1 %v14796_v20  ;;  %18071 = vmatprep.mubr.msk.f32.mxu1 %vm252_vm2, %v22993_v26  ;;  %v18131_v7 = vpop.f32.mrf.mxu0 }
0x1930   :  { %18069 = vmatprep.subr.mxu1 %v14795_v46 }
0x1931   :  { %18070 = vmatpush3.msra.mxu1 %v14795_v46  ;;  %v8997_v25 = vpop.f32.mrf.mxu0 }
0x1932   :  { %18135 = vmatprep.subr.mxu1 %v14850_v10  ;;  %18072 = vmatmul.mubr.msk.f32.vlgmr.msra.gmra.mxu1 %vm252_vm2, %v22997_v48 }
0x1933   :  { %18136 = vmatpush3.msra.mxu1 %v14850_v10  ;;  %18074 = vmatprep.mubr.msk.f32.mxu1 %vm252_vm2, %v23014_v15  ;;  %v18134_v40 = vpop.f32.mrf.mxu0 }
0x1934   :  { %18137 = vmatprep.subr.mxu1 %v14849_v23 }
0x1935   :  { %18138 = vmatpush3.msra.mxu1 %v14849_v23  ;;  %v9007_v49 = vpop.f32.mrf.mxu0 }
0x1936   :  { %18139 = vmatprep.subr.mxu1 %v14848_v37  ;;  %18075 = vmatmul.mubr.msk.f32.gmra.mxu1 %vm252_vm2, %v23018_v56 }
0x1937   :  { %18140 = vmatpush3.msra.mxu1 %v14848_v37  ;;  %18077 = vmatprep.mubr.msk.f32.mxu1 %vm252_vm2, %v23035_v8 }
0x1938   :  { %18141 = vmatprep.subr.mxu1 %v14847_v39 }
0x1939   :  { %18142 = vmatpush3.msra.mxu1 %v14847_v39 }
0x193a   :  { %18143 = vmatprep.subr.mxu1 %v14846_v24  ;;  %18078 = vmatmul.mubr.msk.f32.gmra.mxu1 %vm252_vm2, %v23039_v53 }
0x193b   :  { %18144 = vmatpush3.msra.mxu1 %v14846_v24  ;;  %18080 = vmatprep.mubr.msk.f32.mxu1 %vm252_vm2, %v23055_v6 }
0x193c   :  { %18145 = vmatprep.subr.mxu1 %v14845_v3 }
0x193d   :  { %18146 = vmatpush3.msra.mxu1 %v14845_v3 }
0x193e   :  { %18147 = vmatprep.subr.mxu1 %v14844_v28  ;;  %18081 = vmatmul.mubr.msk.f32.gmra.mxu1 %vm252_vm2, %v23058_v17 }
0x193f   :  { %18148 = vmatpush3.msra.mxu1 %v14844_v28  ;;  %18083 = vmatprep.mubr.msk.f32.mxu1 %vm252_vm2, %v23086_v22 }
0x1940   :  { %18149 = vmatprep.subr.mxu1 %v14843_v43 }
0x1941   :  { %18150 = vmatpush3.msra.mxu1 %v14843_v43 }
0x1942   :  { %18231 = vmatprep.subr.msk.mxu1 %vm1293_vm3, %v18134_v40  ;;  %18084 = vmatmul.mubr.msk.f32.gmra.mxu1 %vm252_vm2, %v23090_v1 }
0x1943   :  { %18086 = vmatprep.mubr.msk.f32.mxu1 %vm252_vm2, %v23104_v31 }
0x1946   :  { %18087 = vmatmul.mubr.msk.f32.gmra.mxu1 %vm252_vm2, %v23108_v27 }
0x1947   :  { %18089 = vmatprep.mubr.msk.f32.mxu1 %vm252_vm2, %v23122_v34 }
0x194a   :  { %18090 = vmatmul.mubr.msk.f32.gmra.mxu1 %vm252_vm2, %v23126_v41 }
0x194b   :  { %18092 = vmatprep.mubr.msk.f32.mxu1 %vm252_vm2, %v23139_v9 }
0x194e   :  { %18093 = vmatmul.mubr.msk.f32.gmra.mxu1 %vm252_vm2, %v23142_v16 }
0x194f   :  { %18151 = vmatprep.mubr.msk.f32.mxu1 %vm252_vm2, %v22993_v26 }
0x1952   :  { %18152 = vmatmul.mubr.msk.f32.vlgmr.msra.gmra.mxu1 %vm252_vm2, %v22997_v48 }
0x1953   :  { %18232 = vmatpush3.xpose.msk.msra.mxu1 %vm1293_vm3, %v18134_v40  ;;  %18154 = vmatprep.mubr.msk.f32.mxu1 %vm252_vm2, %v23014_v15 }
0x1954   :  { %18233 = vmatprep.subr.msk.mxu1 %vm1293_vm3, %v9007_v49 }
0x1956   :  { %18155 = vmatmul.mubr.msk.f32.gmra.mxu1 %vm252_vm2, %v23018_v56 }
0x1957   :  { %18234 = vmatpush3.xpose.msk.msra.mxu1 %vm1293_vm3, %v9007_v49  ;;  %18157 = vmatprep.mubr.msk.f32.mxu1 %vm252_vm2, %v23035_v8 }
0x1958   :  { %18235 = vmatprep.subr.msk.mxu1 %vm1293_vm3, %v18131_v7 }
0x195a   :  { %18158 = vmatmul.mubr.msk.f32.gmra.mxu1 %vm252_vm2, %v23039_v53 }
0x195b   :  { %18236 = vmatpush3.xpose.msk.msra.mxu1 %vm1293_vm3, %v18131_v7  ;;  %18160 = vmatprep.mubr.msk.f32.mxu1 %vm252_vm2, %v23055_v6 }
0x195c   :  { %18237 = vmatprep.subr.msk.mxu1 %vm1293_vm3, %v8997_v25 }
0x195e   :  { %18161 = vmatmul.mubr.msk.f32.gmra.mxu1 %vm252_vm2, %v23058_v17 }
0x195f   :  { %18238 = vmatpush3.xpose.msk.msra.mxu1 %vm1293_vm3, %v8997_v25  ;;  %18163 = vmatprep.mubr.msk.f32.mxu1 %vm252_vm2, %v23086_v22 }
0x1960   :  { %18239 = vmatprep.subr.msk.mxu1 %vm1293_vm3, %v23570_v57 }
0x1962   :  { %18164 = vmatmul.mubr.msk.f32.gmra.mxu1 %vm252_vm2, %v23090_v1 }
0x1963   :  { %18240 = vmatpush3.xpose.msk.msra.mxu1 %vm1293_vm3, %v23570_v57  ;;  %18166 = vmatprep.mubr.msk.f32.mxu1 %vm252_vm2, %v23104_v31 }
0x1964   :  { %18241 = vmatprep.subr.msk.mxu1 %vm1293_vm3, %v8987_v32 }
0x1966   :  { %18167 = vmatmul.mubr.msk.f32.gmra.mxu1 %vm252_vm2, %v23108_v27 }
0x1967   :  { %18242 = vmatpush3.xpose.msk.msra.mxu1 %vm1293_vm3, %v8987_v32  ;;  %18169 = vmatprep.mubr.msk.f32.mxu1 %vm252_vm2, %v23122_v34 }
0x1968   :  { %18243 = vmatprep.subr.msk.mxu1 %vm1293_vm3, %v23546_v59 }
0x196a   :  { %18170 = vmatmul.mubr.msk.f32.gmra.mxu1 %vm252_vm2, %v23126_v41 }
0x196b   :  { %18244 = vmatpush3.xpose.msk.msra.mxu1 %vm1293_vm3, %v23546_v59  ;;  %18172 = vmatprep.mubr.msk.f32.mxu1 %vm252_vm2, %v23139_v9 }
0x196c   :  { %18245 = vmatprep.subr.msk.mxu1 %vm1293_vm3, %v23558_v38 }
0x196e   :  { %18173 = vmatmul.mubr.msk.f32.gmra.mxu1 %vm252_vm2, %v23142_v16 }
0x196f   :  { %18246 = vmatpush3.xpose.msk.msra.mxu1 %vm1293_vm3, %v23558_v38 }
0x19c2   :  { %v23677_v60 = vpop.f32.mrf.mxu1 }
0x19c4   :  { %v23679_v11 = vpop.f32.mrf.mxu1 }
0x19c6   :  { %v23681_v52 = vpop.f32.mrf.mxu1 }
0x19c8   :  { %v23683_v63 = vpop.f32.mrf.mxu1 }
0x19ca   :  { %v23685_v62 = vpop.f32.mrf.mxu1 }
0x19cc   :  { %v23687_v21 = vpop.f32.mrf.mxu1 }
0x19ce   :  { %v23689_v4 = vpop.f32.mrf.mxu1 }
0x19d0   :  { %v23691_v47 = vpop.f32.mrf.mxu1 }
0x19e2   :  { %v23693_v13 = vpop.f32.mrf.mxu1 }
0x19e4   :  { %v23695_v54 = vpop.f32.mrf.mxu1 }
0x19e6   :  { %v23697_v33 = vpop.f32.mrf.mxu1 }
0x19e8   :  { %v23699_v0 = vpop.f32.mrf.mxu1 }
0x19ea   :  { %v23701_v42 = vpop.f32.mrf.mxu1 }
0x19ec   :  { %v23703_v12 = vpop.f32.mrf.mxu1 }
0x19ee   :  { %v23705_v5 = vpop.f32.mrf.mxu1 }
0x19f0   :  { %v23707_v59 = vpop.f32.mrf.mxu1 }
0x19f2   :  { %v18073_v55 = vpop.f32.mrf.mxu1 }
0x19f4   :  { %v8783_v2 = vpop.f32.mrf.mxu1 }
0x19f5   :  { %18191 = vmatprep.mubr.msk.f32.mxu0 %vm1293_vm3, %v8783_v2 }
0x19f6   :  { %v18076_v30 = vpop.f32.mrf.mxu1  ;;  %18192 = vmatmul.mubr.msk.f32.vlgmr.msra.gmra.mxu0 %vm1293_vm3, %v18073_v55 }
0x19f8   :  { %v8793_v20 = vpop.f32.mrf.mxu1 }
0x19f9   :  { %18194 = vmatprep.mubr.msk.f32.mxu0 %vm1293_vm3, %v8793_v20 }
0x19fa   :  { %v18079_v45 = vpop.f32.mrf.mxu1  ;;  %18195 = vmatmul.mubr.msk.f32.gmra.mxu0 %vm1293_vm3, %v18076_v30 }
0x19fc   :  { %v8803_v38 = vpop.f32.mrf.mxu1 }
0x19fd   :  { %18197 = vmatprep.mubr.msk.f32.mxu0 %vm1293_vm3, %v8803_v38 }
0x19fe   :  { %v18082_v46 = vpop.f32.mrf.mxu1  ;;  %18198 = vmatmul.mubr.msk.f32.gmra.mxu0 %vm1293_vm3, %v18079_v45 }
0x1a00   :  { %v8813_v10 = vpop.f32.mrf.mxu1 }
0x1a01   :  { %18200 = vmatprep.mubr.msk.f32.mxu0 %vm1293_vm3, %v8813_v10 }
0x1a02   :  { %v18085_v57 = vpop.f32.mrf.mxu1  ;;  %18201 = vmatmul.mubr.msk.f32.gmra.mxu0 %vm1293_vm3, %v18082_v46 }
0x1a04   :  { %v8823_v23 = vpop.f32.mrf.mxu1 }
0x1a05   :  { %18247 = vmatprep.mubr.msk.f32.mxu1 %vm1293_vm3, %v8823_v23 }
0x1a06   :  { %v18088_v37 = vpop.f32.mrf.mxu1  ;;  %18248 = vmatmul.mubr.msk.f32.vlgmr.msra.gmra.mxu1 %vm1293_vm3, %v18085_v57 }
0x1a08   :  { %v8833_v32 = vpop.f32.mrf.mxu1 }
0x1a09   :  { %18250 = vmatprep.mubr.msk.f32.mxu1 %vm1293_vm3, %v8833_v32 }
0x1a0a   :  { %v18091_v39 = vpop.f32.mrf.mxu1  ;;  %18251 = vmatmul.mubr.msk.f32.gmra.mxu1 %vm1293_vm3, %v18088_v37 }
0x1a0c   :  { %v8843_v24 = vpop.f32.mrf.mxu1 }
0x1a0d   :  { %18253 = vmatprep.mubr.msk.f32.mxu1 %vm1293_vm3, %v8843_v24 }
0x1a0e   :  { %v18094_v7 = vpop.f32.mrf.mxu1  ;;  %18254 = vmatmul.mubr.msk.f32.gmra.mxu1 %vm1293_vm3, %v18091_v39 }
0x1a10   :  { %v8853_v3 = vpop.f32.mrf.mxu1 }
0x1a11   :  { %18256 = vmatprep.mubr.msk.f32.mxu1 %vm1293_vm3, %v8853_v3 }
0x1a12   :  { %v18153_v28 = vpop.f32.mrf.mxu1  ;;  %18257 = vmatmul.mubr.msk.f32.gmra.mxu1 %vm1293_vm3, %v18094_v7 }
0x1a14   :  { %v9091_v25 = vpop.f32.mrf.mxu1 }
0x1a16   :  { %v18156_v43 = vpop.f32.mrf.mxu1 }
0x1a18   :  { %v9101_v40 = vpop.f32.mrf.mxu1 }
0x1a1a   :  { %v18159_v49 = vpop.f32.mrf.mxu1 }
0x1a1c   :  { %v9111_v55 = vpop.f32.mrf.mxu1 }
0x1a1e   :  { %v18162_v2 = vpop.f32.mrf.mxu1 }
0x1a1f   :  { %18203 = vmatprep.subr.mxu0 %v18162_v2 }
0x1a20   :  { %v9121_v30 = vpop.f32.mrf.mxu1  ;;  %18204 = vmatpush3.msra.mxu0 %v18162_v2 }
0x1a21   :  { %18205 = vmatprep.subr.mxu0 %v9121_v30 }
0x1a22   :  { %v23725_v20 = vpop.f32.mrf.mxu1  ;;  %18206 = vmatpush3.msra.mxu0 %v9121_v30 }
0x1a23   :  { %18207 = vmatprep.subr.mxu0 %v18159_v49 }
0x1a24   :  { %v23727_v45 = vpop.f32.mrf.mxu1  ;;  %18208 = vmatpush3.msra.mxu0 %v18159_v49 }
0x1a25   :  { %18209 = vmatprep.subr.mxu0 %v9111_v55 }
0x1a26   :  { %v23729_v38 = vpop.f32.mrf.mxu1  ;;  %18210 = vmatpush3.msra.mxu0 %v9111_v55 }
0x1a27   :  { %18211 = vmatprep.subr.mxu0 %v18156_v43 }
0x1a28   :  { %v23731_v46 = vpop.f32.mrf.mxu1  ;;  %18212 = vmatpush3.msra.mxu0 %v18156_v43 }
0x1a29   :  { %18213 = vmatprep.subr.mxu0 %v9101_v40 }
0x1a2a   :  { %v23733_v10 = vpop.f32.mrf.mxu1  ;;  %18214 = vmatpush3.msra.mxu0 %v9101_v40 }
0x1a2b   :  { %18215 = vmatprep.subr.mxu0 %v18153_v28 }
0x1a2c   :  { %v23735_v57 = vpop.f32.mrf.mxu1  ;;  %18216 = vmatpush3.msra.mxu0 %v18153_v28 }
0x1a2d   :  { %18217 = vmatprep.subr.mxu0 %v9091_v25 }
0x1a2e   :  { %v23737_v23 = vpop.f32.mrf.mxu1  ;;  %18218 = vmatpush3.msra.mxu0 %v9091_v25 }
0x1a2f   :  { %18259 = vmatprep.subr.mxu0 %v23737_v23 }
0x1ab6   :  { %v18193_v37 = vpop.f32.mrf.mxu0 }
0x1ab7   :  { %v9326_v32 = vsel %vm252_vm2, %v18193_v37, -inf }
0x1ab8   :  { %9327 = vmax.xlane.f32.xlu1 %v9326_v32  ;;  %v9284_v39 = vpop.f32.mrf.mxu0  ;;  %v23747_v32 = vpop.f32.mrf.mxu1 }
0x1ab9   :  { %v9323_v24 = vsel %vm252_vm2, %v9284_v39, -inf }
0x1aba   :  { %9324 = vmax.xlane.f32.xlu0 %v9323_v24  ;;  %v18196_v7 = vpop.f32.mrf.mxu0 }
0x1abb   :  { %v9332_v3 = vsel %vm252_vm2, %v18196_v7, -inf }
0x1abc   :  { %9333 = vmax.xlane.f32.xlu1 %v9332_v3  ;;  %v9294_v43 = vpop.f32.mrf.mxu0 }
0x1abd   :  { %v9329_v28 = vsel %vm252_vm2, %v9294_v43, -inf }
0x1abe   :  { %9330 = vmax.xlane.f32.xlu0 %v9329_v28  ;;  %v18199_v40 = vpop.f32.mrf.mxu0 }
0x1abf   :  { %v9338_v25 = vsel %vm252_vm2, %v18199_v40, -inf }
0x1ac0   :  { %9339 = vmax.xlane.f32.xlu1 %v9338_v25  ;;  %v9304_v49 = vpop.f32.mrf.mxu0 }
0x1ac1   :  { %v9335_v55 = vsel %vm252_vm2, %v9304_v49, -inf }
0x1ac2   :  { %9336 = vmax.xlane.f32.xlu0 %v9335_v55  ;;  %v18202_v2 = vpop.f32.mrf.mxu0 }
0x1ac3   :  { %v9344_v30 = vsel %vm252_vm2, %v18202_v2, -inf }
0x1ac4   :  { %9345 = vmax.xlane.f32.xlu1 %v9344_v30  ;;  %v9314_v24 = vpop.f32.mrf.mxu0 }
0x1ac5   :  { %v9341_v3 = vsel %vm252_vm2, %v9314_v24, -inf }
0x1ac6   :  { %9342 = vmax.xlane.f32.xlu0 %v9341_v3  ;;  %v18249_v44 = vpop.f32.mrf.mxu1 }
0x1ac7   :  { %v9696_v28 = vsel %vm252_vm2, %v18249_v44, -inf }
0x1ac8   :  { %9697 = vmax.xlane.f32.xlu1 %v9696_v28  ;;  %v23751_v19 = vpop.f32.mrf.mxu1 }
0x1ac9   :  { %v9693_v25 = vsel %vm252_vm2, %v23751_v19, -inf }
0x1aca   :  { %9694 = vmax.xlane.f32.xlu0 %v9693_v25  ;;  %v23755_v55 = vpop.f32.mrf.mxu1 }
0x1acb   :  { %v9702_v29 = vsel %vm252_vm2, %v23755_v55, -inf }
0x1acc   :  { %9703 = vmax.xlane.f32.xlu1 %v9702_v29  ;;  %v23759_v30 = vpop.f32.mrf.mxu1 }
0x1acd   :  { %v9699_v3 = vsel %vm252_vm2, %v23759_v30, -inf }
0x1ace   :  { %9700 = vmax.xlane.f32.xlu0 %v9699_v3  ;;  %v23763_v35 = vpop.f32.mrf.mxu1 }
0x1acf   :  { %v9708_v28 = vsel %vm252_vm2, %v23763_v35, -inf }
0x1ad0   :  { %9709 = vmax.xlane.f32.xlu1 %v9708_v28  ;;  %v23767_v36 = vpop.f32.mrf.mxu1 }
0x1ad1   :  { %v9705_v25 = vsel %vm252_vm2, %v23767_v36, -inf }
0x1ad2   :  { %9706 = vmax.xlane.f32.xlu0 %v9705_v25  ;;  %v23771_v61 = vpop.f32.mrf.mxu1 }
0x1ad3   :  { %v9714_v29 = vsel %vm252_vm2, %v23771_v61, -inf }
0x1ad4   :  { %9715 = vmax.xlane.f32.xlu1 %v9714_v29  ;;  %v23775_v50 = vpop.f32.mrf.mxu1 }
0x1ad5   :  { %v9711_v3 = vsel %vm252_vm2, %v23775_v50, -inf }
0x1ad6   :  { %9712 = vmax.xlane.f32.xlu0 %v9711_v3 }
0x1b41   :  { %v9328_v58 = vpop.xlane.xlu1 %9327 }
0x1b42   :  { %v9348_v28 = vsub.f32 %v18193_v37, %v9328_v58 }
0x1b43   :  { %v9325_v51 = vpop.xlane.xlu0 %9324 }
0x1b44   :  { %v9357_v14 = vmul.f32 1.442695, %v9348_v28  ;;  %v9347_v18 = vsub.f32 %v9284_v39, %v9325_v51 }
0x1b45   :  { %v9334_v16 = vpop.xlane.xlu1 %9333 }
0x1b46   :  { %19497 = vpow2.f32 %v9357_v14  ;;  %v9355_v25 = vmul.f32 1.442695, %v9347_v18  ;;  %v9350_v9 = vsub.f32 %v18196_v7, %v9334_v16 }
0x1b47   :  { %v9331_v41 = vpop.xlane.xlu0 %9330 }
0x1b48   :  { %19499 = vpow2.f32 %v9355_v25  ;;  %v9361_v34 = vmul.f32 1.442695, %v9350_v9  ;;  %v9349_v27 = vsub.f32 %v9294_v43, %v9331_v41 }
0x1b49   :  { %v9340_v29 = vpop.xlane.xlu1 %9339 }
0x1b4a   :  { %19501 = vpow2.f32 %v9361_v34  ;;  %v9359_v31 = vmul.f32 1.442695, %v9349_v27  ;;  %v9352_v1 = vsub.f32 %v18199_v40, %v9340_v29 }
0x1b4b   :  { %v9337_v22 = vpop.xlane.xlu0 %9336 }
0x1b4c   :  { %19503 = vpow2.f32 %v9359_v31  ;;  %v9365_v3 = vmul.f32 1.442695, %v9352_v1  ;;  %v9351_v17 = vsub.f32 %v9304_v49, %v9337_v22 }
0x1b4d   :  { %v9346_v58 = vpop.xlane.xlu1 %9345 }
0x1b4e   :  { %19505 = vpow2.f32 %v9365_v3  ;;  %v9363_v37 = vmul.f32 1.442695, %v9351_v17  ;;  %v9354_v51 = vsub.f32 %v18202_v2, %v9346_v58 }
0x1b4f   :  { %v9343_v39 = vpop.xlane.xlu0 %9342 }
0x1b50   :  { %19507 = vpow2.f32 %v9363_v37  ;;  %v9369_v18 = vmul.f32 1.442695, %v9354_v51  ;;  %v9353_v14 = vsub.f32 %v9314_v24, %v9343_v39 }
0x1b51   :  { %v9698_v16 = vpop.xlane.xlu1 %9697 }
0x1b52   :  { %19509 = vpow2.f32 %v9369_v18  ;;  %v9367_v9 = vmul.f32 1.442695, %v9353_v14  ;;  %v9718_v41 = vsub.f32 %v18249_v44, %v9698_v16 }
0x1b53   :  { %v23779_v7 = vpop.eup %19497  ;;  %v9695_v27 = vpop.xlane.xlu0 %9694 }
0x1b54   :  { %19511 = vpow2.f32 %v9367_v9  ;;  %v9727_v34 = vmul.f32 1.442695, %v9718_v41  ;;  %v9717_v1 = vsub.f32 %v23751_v19, %v9695_v27  ;;  %v9374_v22 = vsel %vm252_vm2, %v23779_v7, 0.0 }
0x1b55   :  { %v23784_v17 = vpop.eup %19499  ;;  %v9704_v31 = vpop.xlane.xlu1 %9703  ;;  %9375 = vadd.xlane.f32.xlu1 %v9374_v22 }
0x1b56   :  { %19513 = vpow2.f32 %v9727_v34  ;;  %v9725_v43 = vmul.f32 1.442695, %v9717_v1  ;;  %v9720_v40 = vsub.f32 %v23755_v55, %v9704_v31  ;;  %v9371_v44 = vsel %vm252_vm2, %v23784_v17, 0.0 }
0x1b57   :  { %v23789_v49 = vpop.eup %19501  ;;  %v9701_v2 = vpop.xlane.xlu0 %9700  ;;  %9372 = vadd.xlane.f32.xlu0 %v9371_v44 }
0x1b58   :  { %19515 = vpow2.f32 %v9725_v43  ;;  %v9731_v19 = vmul.f32 1.442695, %v9720_v40  ;;  %v9719_v24 = vsub.f32 %v23759_v30, %v9701_v2  ;;  %v9380_v28 = vsel %vm252_vm2, %v23789_v49, 0.0 }
0x1b59   :  { %v23794_v25 = vpop.eup %19503  ;;  %v9710_v29 = vpop.xlane.xlu1 %9709  ;;  %9381 = vadd.xlane.f32.xlu1 %v9380_v28 }
0x1b5a   :  { %19517 = vpow2.f32 %v9731_v19  ;;  %v9729_v55 = vmul.f32 1.442695, %v9719_v24  ;;  %v9722_v3 = vsub.f32 %v23763_v35, %v9710_v29  ;;  %v9377_v58 = vsel %vm252_vm2, %v23794_v25, 0.0 }
0x1b5b   :  { %v23799_v37 = vpop.eup %19505  ;;  %v9707_v51 = vpop.xlane.xlu0 %9706  ;;  %9378 = vadd.xlane.f32.xlu0 %v9377_v58 }
0x1b5c   :  { %19519 = vpow2.f32 %v9729_v55  ;;  %v9735_v30 = vmul.f32 1.442695, %v9722_v3  ;;  %v9721_v39 = vsub.f32 %v23767_v36, %v9707_v51  ;;  %v9386_v18 = vsel %vm252_vm2, %v23799_v37, 0.0 }
0x1b5d   :  { %v23804_v14 = vpop.eup %19507  ;;  %9387 = vadd.xlane.f32.xlu1 %v9386_v18  ;;  %v9716_v16 = vpop.xlane.xlu1 %9715 }
0x1b5e   :  { %19521 = vpow2.f32 %v9735_v30  ;;  %v9733_v35 = vmul.f32 1.442695, %v9721_v39  ;;  %v9724_v9 = vsub.f32 %v23771_v61, %v9716_v16  ;;  %v9383_v41 = vsel %vm252_vm2, %v23804_v14, 0.0 }
0x1b5f   :  { %v23809_v27 = vpop.eup %19509  ;;  %9384 = vadd.xlane.f32.xlu0 %v9383_v41  ;;  %v9713_v34 = vpop.xlane.xlu0 %9712 }
0x1b60   :  { %19523 = vpow2.f32 %v9733_v35  ;;  %v9739_v36 = vmul.f32 1.442695, %v9724_v9  ;;  %v9723_v1 = vsub.f32 %v23775_v50, %v9713_v34  ;;  %v9392_v22 = vsel %vm252_vm2, %v23809_v27, 0.0  ;;  %v14916_v35 = vld [vmem:[%s25422_s5 + $0x58] sm:$0xff]  ;;  %v14915_v9 = vld [vmem:[%s25422_s5 + $0x50] sm:$0xff] }
0x1b61   :  { %v23814_v31 = vpop.eup %19511  ;;  %9393 = vadd.xlane.f32.xlu1 %v9392_v22  ;;  %18287 = vmatprep.subr.mxu1 %v14916_v35 }
0x1b62   :  { %19525 = vpow2.f32 %v9739_v36  ;;  %v9737_v43 = vmul.f32 1.442695, %v9723_v1  ;;  %v9389_v61 = vsel %vm252_vm2, %v23814_v31, 0.0  ;;  %18288 = vmatpush3.msra.mxu1 %v14916_v35 }
0x1b63   :  { %v23818_v40 = vpop.eup %19513  ;;  %9390 = vadd.xlane.f32.xlu0 %v9389_v61  ;;  %18289 = vmatprep.subr.mxu1 %v14915_v9 }
0x1b64   :  { %19527 = vpow2.f32 %v9737_v43  ;;  %v9744_v44 = vsel %vm252_vm2, %v23818_v40, 0.0  ;;  %18290 = vmatpush3.msra.mxu1 %v14915_v9 }
0x1b65   :  { %v23822_v2 = vpop.eup %19515  ;;  %9745 = vadd.xlane.f32.xlu1 %v9744_v44 }
0x1b66   :  { %v9741_v50 = vsel %vm252_vm2, %v23822_v2, 0.0 }
0x1b67   :  { %v23826_v19 = vpop.eup %19517  ;;  %9742 = vadd.xlane.f32.xlu0 %v9741_v50 }
0x1b68   :  { %v9750_v24 = vsel %vm252_vm2, %v23826_v19, 0.0 }
0x1b69   :  { %v23830_v28 = vpop.eup %19519  ;;  %9751 = vadd.xlane.f32.xlu1 %v9750_v24 }
0x1b6a   :  { %v9747_v29 = vsel %vm252_vm2, %v23830_v28, 0.0 }
0x1b6b   :  { %v23834_v55 = vpop.eup %19521  ;;  %9748 = vadd.xlane.f32.xlu0 %v9747_v29 }
0x1b6c   :  { %v9756_v3 = vsel %vm252_vm2, %v23834_v55, 0.0 }
0x1b6d   :  { %v23838_v58 = vpop.eup %19523  ;;  %9757 = vadd.xlane.f32.xlu1 %v9756_v3 }
0x1b6e   :  { %v9753_v51 = vsel %vm252_vm2, %v23838_v58, 0.0 }
0x1b6f   :  { %v23842_v30 = vpop.eup %19525  ;;  %9754 = vadd.xlane.f32.xlu0 %v9753_v51 }
0x1b70   :  { %v9762_v39 = vsel %vm252_vm2, %v23842_v30, 0.0 }
0x1b71   :  { %v23846_v18 = vpop.eup %19527  ;;  %9763 = vadd.xlane.f32.xlu1 %v9762_v39 }
0x1b72   :  { %v9759_v16 = vsel %vm252_vm2, %v23846_v18, 0.0 }
0x1b73   :  { %9760 = vadd.xlane.f32.xlu0 %v9759_v16 }
0x1bde   :  { %v9376_v41 = vpop.xlane.xlu1 %9375 }
0x1bdf   :  { %19529 = vrcp.f32 %v9376_v41 }
0x1be0   :  { %v9373_v34 = vpop.xlane.xlu0 %9372 }
0x1be1   :  { %19531 = vrcp.f32 %v9373_v34 }
0x1be2   :  { %v9382_v36 = vpop.xlane.xlu1 %9381 }
0x1be3   :  { %19533 = vrcp.f32 %v9382_v36 }
0x1be4   :  { %v9379_v1 = vpop.xlane.xlu0 %9378 }
0x1be5   :  { %19535 = vrcp.f32 %v9379_v1 }
0x1be6   :  { %v9388_v22 = vpop.xlane.xlu1 %9387 }
0x1be7   :  { %19537 = vrcp.f32 %v9388_v22 }
0x1be8   :  { %v9385_v43 = vpop.xlane.xlu0 %9384 }
0x1be9   :  { %19539 = vrcp.f32 %v9385_v43 }
0x1bea   :  { %v9394_v61 = vpop.xlane.xlu1 %9393 }
0x1beb   :  { %19541 = vrcp.f32 %v9394_v61 }
0x1bec   :  { %v9391_v44 = vpop.xlane.xlu0 %9390  ;;  %v19530_v50 = vpop.eup %19529 }
0x1bed   :  { %19543 = vrcp.f32 %v9391_v44  ;;  %v9398_v51 = vmul.f32 %v19530_v50, %v23779_v7  ;;  %v14793_v44 = vld [vmem:[%s25422_s5 + $0x40] sm:$0xff] }
0x1bee   :  { %v19532_v24 = vpop.eup %19531  ;;  %v9746_v29 = vpop.xlane.xlu1 %9745 }
0x1bef   :  { %v9396_v3 = vmul.f32 %v19532_v24, %v23784_v17  ;;  %19545 = vrcp.f32 %v9746_v29 }
0x1bf0   :  { %v9743_v39 = vpop.xlane.xlu0 %9742  ;;  %v19534_v16 = vpop.eup %19533 }
0x1bf1   :  { %19547 = vrcp.f32 %v9743_v39  ;;  %18219 = vmatprep.mubr.msk.f32.mxu0 %vm252_vm2, %v9396_v3  ;;  %v9402_v7 = vmul.f32 %v19534_v16, %v23789_v49 }
0x1bf2   :  { %v19536_v35 = vpop.eup %19535  ;;  %v9752_v9 = vpop.xlane.xlu1 %9751  ;;  %18220 = vmatmul.mubr.msk.f32.vlgmr.msra.gmra.mxu0 %vm252_vm2, %v9398_v51 }
0x1bf3   :  { %18260 = vmatpush3.msra.mxu0 %v23737_v23  ;;  %v9400_v41 = vmul.f32 %v19536_v35, %v23794_v25  ;;  %19549 = vrcp.f32 %v9752_v9  ;;  %v14954_v35 = vld [vmem:[%s25421_s4 + $0x1a8] sm:$0xff] }
0x1bf4   :  { %18261 = vmatprep.subr.mxu0 %v23747_v32  ;;  %v9749_v17 = vpop.xlane.xlu0 %9748  ;;  %v19538_v34 = vpop.eup %19537 }
0x1bf5   :  { %18262 = vmatpush3.msra.mxu0 %v23747_v32  ;;  %19551 = vrcp.f32 %v9749_v17  ;;  %18222 = vmatprep.mubr.msk.f32.mxu0 %vm252_vm2, %v9400_v41  ;;  %v9406_v25 = vmul.f32 %v19538_v34, %v23799_v37  ;;  %v14953_v41 = vld [vmem:[%s25421_s4 + $0x1a0] sm:$0xff] }
0x1bf6   :  { %v19540_v36 = vpop.eup %19539  ;;  %18263 = vmatprep.subr.mxu0 %v23733_v10  ;;  %v9758_v1 = vpop.xlane.xlu1 %9757  ;;  %18223 = vmatmul.mubr.msk.f32.gmra.mxu0 %vm252_vm2, %v9402_v7  ;;  %v14952_v7 = vld [vmem:[%s25421_s4 + $0x198] sm:$0xff] }
0x1bf7   :  { %18264 = vmatpush3.msra.mxu0 %v23733_v10  ;;  %v9404_v23 = vmul.f32 %v19540_v36, %v23804_v14  ;;  %19553 = vrcp.f32 %v9758_v1  ;;  %v14951_v36 = vld [vmem:[%s25421_s4 + $0x190] sm:$0xff] }
0x1bf8   :  { %18265 = vmatprep.subr.mxu0 %v23735_v57  ;;  %v9755_v49 = vpop.xlane.xlu0 %9754  ;;  %v19542_v32 = vpop.eup %19541 }
0x1bf9   :  { %18266 = vmatpush3.msra.mxu0 %v23735_v57  ;;  %19555 = vrcp.f32 %v9755_v49  ;;  %18225 = vmatprep.mubr.msk.f32.mxu0 %vm252_vm2, %v9404_v23  ;;  %v9410_v14 = vmul.f32 %v19542_v32, %v23809_v27  ;;  %v14950_v23 = vld [vmem:[%s25421_s4 + $0x188] sm:$0xff] }
0x1bfa   :  { %v19544_v22 = vpop.eup %19543  ;;  %18267 = vmatprep.subr.mxu0 %v23729_v38  ;;  %v9764_v43 = vpop.xlane.xlu1 %9763  ;;  %18226 = vmatmul.mubr.msk.f32.gmra.mxu0 %vm252_vm2, %v9406_v25  ;;  %v14949_v25 = vld [vmem:[%s25421_s4 + $0x180] sm:$0xff] }
0x1bfb   :  { %18268 = vmatpush3.msra.mxu0 %v23729_v38  ;;  %v9408_v10 = vmul.f32 %v19544_v22, %v23814_v31  ;;  %19557 = vrcp.f32 %v9764_v43  ;;  %v14794_v31 = vld [vmem:[%s25422_s5 + $0x48] sm:$0xff]  ;;  %v15004_v22 = vld [vmem:[%s25421_s4 + $0x5b8] sm:$0xff] }
0x1bfc   :  { %18269 = vmatprep.subr.mxu0 %v23731_v46  ;;  %v9761_v37 = vpop.xlane.xlu0 %9760  ;;  %v19546_v57 = vpop.eup %19545 }
0x1bfd   :  { %18270 = vmatpush3.msra.mxu0 %v23731_v46  ;;  %19559 = vrcp.f32 %v9761_v37  ;;  %18228 = vmatprep.mubr.msk.f32.mxu0 %vm252_vm2, %v9408_v10  ;;  %v9768_v27 = vmul.f32 %v19546_v57, %v23818_v40  ;;  %v14980_v40 = vld [vmem:[%s25421_s4 + $0x3b8] sm:$0xff] }
0x1bfe   :  { %v19548_v61 = vpop.eup %19547  ;;  %18271 = vmatprep.subr.mxu0 %v23725_v20  ;;  %18229 = vmatmul.mubr.msk.f32.gmra.mxu0 %vm252_vm2, %v9410_v14 }
0x1bff   :  { %18272 = vmatpush3.msra.mxu0 %v23725_v20  ;;  %v9766_v38 = vmul.f32 %v19548_v61, %v23822_v2 }
0x1c00   :  { %18273 = vmatprep.subr.mxu0 %v23727_v45  ;;  %v19550_v46 = vpop.eup %19549 }
0x1c01   :  { %18274 = vmatpush3.msra.mxu0 %v23727_v45  ;;  %18275 = vmatprep.mubr.msk.f32.mxu0 %vm252_vm2, %v9766_v38  ;;  %v9772_v50 = vmul.f32 %v19550_v46, %v23826_v19  ;;  %v15003_v46 = vld [vmem:[%s25421_s4 + $0x5b0] sm:$0xff] }
0x1c02   :  { %v19552_v20 = vpop.eup %19551  ;;  %18276 = vmatmul.mubr.msk.f32.vlgmr.msra.gmra.mxu0 %vm252_vm2, %v9768_v27  ;;  %18315 = vmatprep.subr.mxu0 %v14794_v31 }
0x1c03   :  { %v9770_v2 = vmul.f32 %v19552_v20, %v23830_v28  ;;  %18316 = vmatpush3.msra.mxu0 %v14794_v31  ;;  %v15002_v20 = vld [vmem:[%s25421_s4 + $0x5a8] sm:$0xff] }
0x1c04   :  { %18317 = vmatprep.subr.mxu0 %v14793_v44  ;;  %v19554_v45 = vpop.eup %19553 }
0x1c05   :  { %18278 = vmatprep.mubr.msk.f32.mxu0 %vm252_vm2, %v9770_v2  ;;  %18318 = vmatpush3.msra.mxu0 %v14793_v44  ;;  %v9776_v28 = vmul.f32 %v19554_v45, %v23834_v55  ;;  %v14979_v55 = vld [vmem:[%s25421_s4 + $0x3b0] sm:$0xff]  ;;  %v15000_v45 = vld [vmem:[%s25421_s4 + $0x598] sm:$0xff] }
0x1c06   :  { %v19556_v24 = vpop.eup %19555  ;;  %18279 = vmatmul.mubr.msk.f32.gmra.mxu0 %vm252_vm2, %v9772_v50  ;;  %18383 = vmatprep.subr.mxu0 %v14980_v40 }
0x1c07   :  { %v9774_v29 = vmul.f32 %v19556_v24, %v23838_v58  ;;  %v14978_v58 = vld [vmem:[%s25421_s4 + $0x3a8] sm:$0xff] }
0x1c08   :  { %v19558_v3 = vpop.eup %19557 }
0x1c09   :  { %18281 = vmatprep.mubr.msk.f32.mxu0 %vm252_vm2, %v9774_v29  ;;  %v9780_v39 = vmul.f32 %v19558_v3, %v23842_v30  ;;  %v14999_v29 = vld [vmem:[%s25421_s4 + $0x590] sm:$0xff]  ;;  %v14998_v3 = vld [vmem:[%s25421_s4 + $0x588] sm:$0xff] }
0x1c0a   :  { %v19560_v51 = vpop.eup %19559  ;;  %18282 = vmatmul.mubr.msk.f32.gmra.mxu0 %vm252_vm2, %v9776_v28 }
0x1c0b   :  { %v9778_v19 = vmul.f32 %v19560_v51, %v23846_v18  ;;  %v14955_v18 = vld [vmem:[%s25421_s4 + $0x1b0] sm:$0xff] }
0x1c0d   :  { %18284 = vmatprep.mubr.msk.f32.mxu0 %vm252_vm2, %v9778_v19  ;;  %v14997_v19 = vld [vmem:[%s25421_s4 + $0x580] sm:$0xff] }
0x1c0e   :  { %18285 = vmatmul.mubr.msk.f32.gmra.mxu0 %vm252_vm2, %v9780_v39 }
0x1c0f   :  { %18319 = vmatprep.mubr.msk.f32.mxu0 %vm1293_vm3, %v23679_v11  ;;  %v14977_v11 = vld [vmem:[%s25421_s4 + $0x3a0] sm:$0xff] }
0x1c12   :  { %18320 = vmatmul.mubr.msk.f32.vlgmr.msra.gmra.mxu0 %vm1293_vm3, %v23677_v60  ;;  %v14976_v60 = vld [vmem:[%s25421_s4 + $0x398] sm:$0xff] }
0x1c13   :  { %18322 = vmatprep.mubr.msk.f32.mxu0 %vm1293_vm3, %v23683_v63  ;;  %18384 = vmatpush3.msra.mxu0 %v14980_v40  ;;  %v14975_v63 = vld [vmem:[%s25421_s4 + $0x390] sm:$0xff]  ;;  %v15001_v40 = vld [vmem:[%s25421_s4 + $0x5a0] sm:$0xff] }
0x1c14   :  { %18385 = vmatprep.subr.mxu0 %v14979_v55 }
0x1c15   :  { %18386 = vmatpush3.msra.mxu0 %v14979_v55 }
0x1c16   :  { %18323 = vmatmul.mubr.msk.f32.gmra.mxu0 %vm1293_vm3, %v23681_v52  ;;  %18387 = vmatprep.subr.mxu0 %v14978_v58  ;;  %v14974_v52 = vld [vmem:[%s25421_s4 + $0x388] sm:$0xff] }
0x1c17   :  { %18325 = vmatprep.mubr.msk.f32.mxu0 %vm1293_vm3, %v23687_v21  ;;  %18388 = vmatpush3.msra.mxu0 %v14978_v58  ;;  %v14973_v21 = vld [vmem:[%s25421_s4 + $0x380] sm:$0xff] }
0x1c18   :  { %18389 = vmatprep.subr.mxu0 %v14977_v11 }
0x1c19   :  { %18390 = vmatpush3.msra.mxu0 %v14977_v11 }
0x1c1a   :  { %18326 = vmatmul.mubr.msk.f32.gmra.mxu0 %vm1293_vm3, %v23685_v62  ;;  %18391 = vmatprep.subr.mxu0 %v14976_v60  ;;  %v14956_v62 = vld [vmem:[%s25421_s4 + $0x1b8] sm:$0xff] }
0x1c1b   :  { %18328 = vmatprep.mubr.msk.f32.mxu0 %vm1293_vm3, %v23691_v47  ;;  %18392 = vmatpush3.msra.mxu0 %v14976_v60  ;;  %v25620_v47 = vld [vmem:[#allocation8_spill] sm:$0xff] }
0x1c1c   :  { %18393 = vmatprep.subr.mxu0 %v14975_v63  ;;  %18343 = vmatprep.subr.mxu1 %v14956_v62 }
0x1c1d   :  { %18394 = vmatpush3.msra.mxu0 %v14975_v63 }
0x1c1e   :  { %18329 = vmatmul.mubr.msk.f32.gmra.mxu0 %vm1293_vm3, %v23689_v4  ;;  %18395 = vmatprep.subr.mxu0 %v14974_v52  ;;  %v25619_v4 = vld [vmem:[#allocation23_spill] sm:$0xff] }
0x1c1f   :  { %18331 = vmatprep.mubr.msk.f32.mxu0 %vm1293_vm3, %v23695_v54  ;;  %18396 = vmatpush3.msra.mxu0 %v14974_v52  ;;  %v25622_v54 = vld [vmem:[#allocation37_spill] sm:$0xff] }
0x1c20   :  { %18397 = vmatprep.subr.mxu0 %v14973_v21 }
0x1c21   :  { %18398 = vmatpush3.msra.mxu0 %v14973_v21 }
0x1c22   :  { %18332 = vmatmul.mubr.msk.f32.gmra.mxu0 %vm1293_vm3, %v23693_v13  ;;  %v25621_v13 = vld [vmem:[#allocation7_spill] sm:$0xff] }
0x1c23   :  { %18334 = vmatprep.mubr.msk.f32.mxu0 %vm1293_vm3, %v23699_v0  ;;  %v25624_v0 = vld [vmem:[#allocation10_spill] sm:$0xff] }
0x1c26   :  { %18335 = vmatmul.mubr.msk.f32.gmra.mxu0 %vm1293_vm3, %v23697_v33  ;;  %v25623_v33 = vld [vmem:[#allocation25_spill] sm:$0xff] }
0x1c27   :  { %18337 = vmatprep.mubr.msk.f32.mxu0 %vm1293_vm3, %v23703_v12  ;;  %v25626_v12 = vld [vmem:[#allocation12_spill] sm:$0xff] }
0x1c2a   :  { %18338 = vmatmul.mubr.msk.f32.gmra.mxu0 %vm1293_vm3, %v23701_v42  ;;  %v25625_v42 = vld [vmem:[#allocation9_spill] sm:$0xff] }
0x1c2b   :  { %18340 = vmatprep.mubr.msk.f32.mxu0 %vm1293_vm3, %v23707_v59 }
0x1c2e   :  { %18341 = vmatmul.mubr.msk.f32.gmra.mxu0 %vm1293_vm3, %v23705_v5  ;;  %v25627_v5 = vld [vmem:[#allocation11_spill] sm:$0xff] }
0x1c2f   :  { %18399 = vmatprep.mubr.msk.f32.mxu0 %vm252_vm2, %v22993_v26 }
0x1c32   :  { %18400 = vmatmul.mubr.msk.f32.vlgmr.msra.gmra.mxu0 %vm252_vm2, %v22997_v48 }
0x1c33   :  { %18402 = vmatprep.mubr.msk.f32.mxu0 %vm252_vm2, %v23014_v15 }
0x1c36   :  { %18403 = vmatmul.mubr.msk.f32.gmra.mxu0 %vm252_vm2, %v23018_v56 }
0x1c37   :  { %18405 = vmatprep.mubr.msk.f32.mxu0 %vm252_vm2, %v23035_v8 }
0x1c3a   :  { %18406 = vmatmul.mubr.msk.f32.gmra.mxu0 %vm252_vm2, %v23039_v53 }
0x1c3b   :  { %18408 = vmatprep.mubr.msk.f32.mxu0 %vm252_vm2, %v23055_v6 }
0x1c3e   :  { %18409 = vmatmul.mubr.msk.f32.gmra.mxu0 %vm252_vm2, %v25619_v4 }
0x1c3f   :  { %18411 = vmatprep.mubr.msk.f32.mxu0 %vm252_vm2, %v25620_v47 }
0x1c42   :  { %18412 = vmatmul.mubr.msk.f32.gmra.mxu0 %vm252_vm2, %v25621_v13 }
0x1c43   :  { %18414 = vmatprep.mubr.msk.f32.mxu0 %vm252_vm2, %v25622_v54 }
0x1c46   :  { %18415 = vmatmul.mubr.msk.f32.gmra.mxu0 %vm252_vm2, %v25623_v33 }
0x1c47   :  { %18417 = vmatprep.mubr.msk.f32.mxu0 %vm252_vm2, %v25624_v0 }
0x1c4a   :  { %18418 = vmatmul.mubr.msk.f32.gmra.mxu0 %vm252_vm2, %v25625_v42 }
0x1c4b   :  { %18420 = vmatprep.mubr.msk.f32.mxu0 %vm252_vm2, %v25626_v12 }
0x1c4e   :  { %18421 = vmatmul.mubr.msk.f32.gmra.mxu0 %vm252_vm2, %v25627_v5 }
0x1cb2   :  { %v18221_v59 = vpop.f32.mrf.mxu0 }
0x1cb4   :  { %v9501_v30 = vpop.f32.mrf.mxu0 }
0x1cb5   :  { %18291 = vmatprep.mubr.msk.f32.mxu1 %vm1293_vm3, %v9501_v30 }
0x1cb6   :  { %v18224_v16 = vpop.f32.mrf.mxu0  ;;  %18292 = vmatmul.mubr.msk.f32.vlgmr.msra.gmra.mxu1 %vm1293_vm3, %v18221_v59 }
0x1cb7   :  { %18344 = vmatpush3.msra.mxu1 %v14956_v62 }
0x1cb8   :  { %v9511_v9 = vpop.f32.mrf.mxu0  ;;  %18345 = vmatprep.subr.mxu1 %v14955_v18 }
0x1cb9   :  { %18294 = vmatprep.mubr.msk.f32.mxu1 %vm1293_vm3, %v9511_v9  ;;  %18346 = vmatpush3.msra.mxu1 %v14955_v18 }
0x1cba   :  { %v18227_v17 = vpop.f32.mrf.mxu0  ;;  %18295 = vmatmul.mubr.msk.f32.gmra.mxu1 %vm1293_vm3, %v18224_v16  ;;  %18347 = vmatprep.subr.mxu1 %v14954_v35 }
0x1cbb   :  { %18348 = vmatpush3.msra.mxu1 %v14954_v35 }
0x1cbc   :  { %v9521_v34 = vpop.f32.mrf.mxu0  ;;  %18349 = vmatprep.subr.mxu1 %v14953_v41 }
0x1cbd   :  { %18297 = vmatprep.mubr.msk.f32.mxu1 %vm1293_vm3, %v9521_v34  ;;  %18350 = vmatpush3.msra.mxu1 %v14953_v41 }
0x1cbe   :  { %v18230_v1 = vpop.f32.mrf.mxu0  ;;  %18298 = vmatmul.mubr.msk.f32.gmra.mxu1 %vm1293_vm3, %v18227_v17  ;;  %18351 = vmatprep.subr.mxu1 %v14952_v7 }
0x1cbf   :  { %18352 = vmatpush3.msra.mxu1 %v14952_v7 }
0x1cc0   :  { %v9531_v49 = vpop.f32.mrf.mxu0  ;;  %18353 = vmatprep.subr.mxu1 %v14951_v36 }
0x1cc1   :  { %18300 = vmatprep.mubr.msk.f32.mxu1 %vm1293_vm3, %v9531_v49  ;;  %18354 = vmatpush3.msra.mxu1 %v14951_v36 }
0x1cc2   :  { %v18277_v32 = vpop.f32.mrf.mxu0  ;;  %18301 = vmatmul.mubr.msk.f32.gmra.mxu1 %vm1293_vm3, %v18230_v1  ;;  %18355 = vmatprep.subr.mxu1 %v14950_v23 }
0x1cc3   :  { %18356 = vmatpush3.msra.mxu1 %v14950_v23 }
0x1cc4   :  { %v9871_v43 = vpop.f32.mrf.mxu0  ;;  %18357 = vmatprep.subr.mxu1 %v14949_v25 }
0x1cc5   :  { %18303 = vmatprep.mubr.msk.f32.mxu1 %vm1293_vm3, %v9871_v43  ;;  %18358 = vmatpush3.msra.mxu1 %v14949_v25 }
0x1cc6   :  { %v18280_v10 = vpop.f32.mrf.mxu0  ;;  %18304 = vmatmul.mubr.msk.f32.gmra.mxu1 %vm1293_vm3, %v18277_v32  ;;  %18423 = vmatprep.subr.mxu1 %v15004_v22 }
0x1cc8   :  { %v9881_v37 = vpop.f32.mrf.mxu0 }
0x1cc9   :  { %18306 = vmatprep.mubr.msk.f32.mxu1 %vm1293_vm3, %v9881_v37 }
0x1cca   :  { %v18283_v14 = vpop.f32.mrf.mxu0  ;;  %18307 = vmatmul.mubr.msk.f32.gmra.mxu1 %vm1293_vm3, %v18280_v10 }
0x1ccc   :  { %v9891_v57 = vpop.f32.mrf.mxu0 }
0x1ccd   :  { %18309 = vmatprep.mubr.msk.f32.mxu1 %vm1293_vm3, %v9891_v57 }
0x1cce   :  { %v18286_v61 = vpop.f32.mrf.mxu0  ;;  %18310 = vmatmul.mubr.msk.f32.gmra.mxu1 %vm1293_vm3, %v18283_v14 }
0x1cd0   :  { %v9901_v38 = vpop.f32.mrf.mxu0 }
0x1cd1   :  { %18312 = vmatprep.mubr.msk.f32.mxu1 %vm1293_vm3, %v9901_v38 }
0x1cd2   :  { %18313 = vmatmul.mubr.msk.f32.gmra.mxu1 %vm1293_vm3, %v18286_v61  ;;  %v24040_v31 = vpop.f32.mrf.mxu0 }
0x1cd3   :  { %18359 = vmatprep.mubr.msk.f32.mxu1 %vm252_vm2, %v22993_v26 }
0x1cd4   :  { %v24044_v27 = vpop.f32.mrf.mxu0 }
0x1cd5   :  { %25628 = vst [vmem:[#allocation39_spill] sm:$0xff] %v24044_v27 }
0x1cd6   :  { %v24049_v44 = vpop.f32.mrf.mxu0  ;;  %18360 = vmatmul.mubr.msk.f32.vlgmr.msra.gmra.mxu1 %vm252_vm2, %v22997_v48 }
0x1cd7   :  { %18362 = vmatprep.mubr.msk.f32.mxu1 %vm252_vm2, %v23014_v15  ;;  %18424 = vmatpush3.msra.mxu1 %v15004_v22 }
0x1cd8   :  { %v24058_v2 = vpop.f32.mrf.mxu0  ;;  %18425 = vmatprep.subr.mxu1 %v15003_v46 }
0x1cd9   :  { %25629 = vst [vmem:[#allocation27_spill] sm:$0xff] %v24058_v2  ;;  %18426 = vmatpush3.msra.mxu1 %v15003_v46 }
0x1cda   :  { %v24063_v50 = vpop.f32.mrf.mxu0  ;;  %18363 = vmatmul.mubr.msk.f32.gmra.mxu1 %vm252_vm2, %v23018_v56  ;;  %18427 = vmatprep.subr.mxu1 %v15002_v20 }
0x1cdb   :  { %18365 = vmatprep.mubr.msk.f32.mxu1 %vm252_vm2, %v23035_v8  ;;  %18428 = vmatpush3.msra.mxu1 %v15002_v20 }
0x1cdc   :  { %v24072_v24 = vpop.f32.mrf.mxu0  ;;  %18429 = vmatprep.subr.mxu1 %v15001_v40 }
0x1cdd   :  { %25630 = vst [vmem:[#allocation41_spill] sm:$0xff] %v24072_v24  ;;  %18430 = vmatpush3.msra.mxu1 %v15001_v40 }
0x1cde   :  { %v24077_v28 = vpop.f32.mrf.mxu0  ;;  %18366 = vmatmul.mubr.msk.f32.gmra.mxu1 %vm252_vm2, %v23039_v53  ;;  %18431 = vmatprep.subr.mxu1 %v15000_v45 }
0x1cdf   :  { %25631 = vst [vmem:[#allocation29_spill] sm:$0xff] %v24077_v28  ;;  %18368 = vmatprep.mubr.msk.f32.mxu1 %vm252_vm2, %v23055_v6  ;;  %18432 = vmatpush3.msra.mxu1 %v15000_v45 }
0x1ce0   :  { %v24086_v51 = vpop.f32.mrf.mxu0  ;;  %18433 = vmatprep.subr.mxu1 %v14999_v29 }
0x1ce1   :  { %25632 = vst [vmem:[#allocation14_spill] sm:$0xff] %v24086_v51  ;;  %18434 = vmatpush3.msra.mxu1 %v14999_v29 }
0x1ce2   :  { %v24091_v39 = vpop.f32.mrf.mxu0  ;;  %18369 = vmatmul.mubr.msk.f32.gmra.mxu1 %vm252_vm2, %v25619_v4  ;;  %18435 = vmatprep.subr.mxu1 %v14998_v3 }
0x1ce3   :  { %25633 = vst [vmem:[#allocation13_spill] sm:$0xff] %v24091_v39  ;;  %18371 = vmatprep.mubr.msk.f32.mxu1 %vm252_vm2, %v25620_v47  ;;  %18436 = vmatpush3.msra.mxu1 %v14998_v3 }
0x1ce4   :  { %v24097_v55 = vpop.f32.mrf.mxu0  ;;  %18437 = vmatprep.subr.mxu1 %v14997_v19 }
0x1ce5   :  { %25634 = vst [vmem:[#allocation43_spill] sm:$0xff] %v24097_v55  ;;  %18438 = vmatpush3.msra.mxu1 %v14997_v19 }
0x1ce6   :  { %v24099_v58 = vpop.f32.mrf.mxu0  ;;  %18372 = vmatmul.mubr.msk.f32.gmra.mxu1 %vm252_vm2, %v25621_v13 }
0x1ce7   :  { %25635 = vst [vmem:[#allocation31_spill] sm:$0xff] %v24099_v58  ;;  %18374 = vmatprep.mubr.msk.f32.mxu1 %vm252_vm2, %v25622_v54 }
0x1ce8   :  { %v24105_v11 = vpop.f32.mrf.mxu0 }
0x1ce9   :  { %25636 = vst [vmem:[#allocation16_spill] sm:$0xff] %v24105_v11 }
0x1cea   :  { %v24107_v60 = vpop.f32.mrf.mxu0  ;;  %18375 = vmatmul.mubr.msk.f32.gmra.mxu1 %vm252_vm2, %v25623_v33 }
0x1ceb   :  { %25637 = vst [vmem:[#allocation15_spill] sm:$0xff] %v24107_v60  ;;  %18377 = vmatprep.mubr.msk.f32.mxu1 %vm252_vm2, %v25624_v0 }
0x1cec   :  { %v24113_v63 = vpop.f32.mrf.mxu0 }
0x1ced   :  { %25638 = vst [vmem:[#allocation45_spill] sm:$0xff] %v24113_v63 }
0x1cee   :  { %v24115_v52 = vpop.f32.mrf.mxu0  ;;  %18378 = vmatmul.mubr.msk.f32.gmra.mxu1 %vm252_vm2, %v25625_v42 }
0x1cef   :  { %25639 = vst [vmem:[#allocation33_spill] sm:$0xff] %v24115_v52  ;;  %18380 = vmatprep.mubr.msk.f32.mxu1 %vm252_vm2, %v25626_v12 }
0x1cf0   :  { %v24121_v21 = vpop.f32.mrf.mxu0 }
0x1cf1   :  { %25640 = vst [vmem:[#allocation18_spill] sm:$0xff] %v24121_v21 }
0x1cf2   :  { %18381 = vmatmul.mubr.msk.f32.gmra.mxu1 %vm252_vm2, %v25627_v5  ;;  %v18401_v62 = vpop.f32.mrf.mxu0 }
0x1cf3   :  { %18439 = vmatprep.mubr.msk.f32.mxu1 %vm252_vm2, %v22993_v26 }
0x1cf4   :  { %v10528_v59 = vpop.f32.mrf.mxu0 }
0x1cf6   :  { %v18404_v30 = vpop.f32.mrf.mxu0  ;;  %18440 = vmatmul.mubr.msk.f32.vlgmr.msra.gmra.mxu1 %vm252_vm2, %v22997_v48 }
0x1cf7   :  { %18442 = vmatprep.mubr.msk.f32.mxu1 %vm252_vm2, %v23014_v15 }
0x1cf8   :  { %v10538_v18 = vpop.f32.mrf.mxu0 }
0x1cfa   :  { %v18407_v16 = vpop.f32.mrf.mxu0  ;;  %18443 = vmatmul.mubr.msk.f32.gmra.mxu1 %vm252_vm2, %v23018_v56 }
0x1cfb   :  { %18445 = vmatprep.mubr.msk.f32.mxu1 %vm252_vm2, %v23035_v8 }
0x1cfc   :  { %v10548_v35 = vpop.f32.mrf.mxu0 }
0x1cfe   :  { %v18410_v9 = vpop.f32.mrf.mxu0  ;;  %18446 = vmatmul.mubr.msk.f32.gmra.mxu1 %vm252_vm2, %v23039_v53 }
0x1cff   :  { %18448 = vmatprep.mubr.msk.f32.mxu1 %vm252_vm2, %v23055_v6  ;;  %18463 = vmatprep.subr.msk.mxu0 %vm1293_vm3, %v18410_v9 }
0x1d00   :  { %v10558_v41 = vpop.f32.mrf.mxu0  ;;  %18464 = vmatpush3.xpose.msk.msra.mxu0 %vm1293_vm3, %v18410_v9 }
0x1d01   :  { %18465 = vmatprep.subr.msk.mxu0 %vm1293_vm3, %v10558_v41 }
0x1d02   :  { %v18413_v17 = vpop.f32.mrf.mxu0  ;;  %18449 = vmatmul.mubr.msk.f32.gmra.mxu1 %vm252_vm2, %v25619_v4 }
0x1d03   :  { %18451 = vmatprep.mubr.msk.f32.mxu1 %vm252_vm2, %v25620_v47 }
0x1d04   :  { %v10568_v7 = vpop.f32.mrf.mxu0  ;;  %18466 = vmatpush3.xpose.msk.msra.mxu0 %vm1293_vm3, %v10558_v41 }
0x1d05   :  { %18467 = vmatprep.subr.msk.mxu0 %vm1293_vm3, %v18407_v16 }
0x1d06   :  { %v18416_v34 = vpop.f32.mrf.mxu0  ;;  %18452 = vmatmul.mubr.msk.f32.gmra.mxu1 %vm252_vm2, %v25621_v13 }
0x1d07   :  { %18454 = vmatprep.mubr.msk.f32.mxu1 %vm252_vm2, %v25622_v54 }
0x1d08   :  { %v10578_v36 = vpop.f32.mrf.mxu0  ;;  %18468 = vmatpush3.xpose.msk.msra.mxu0 %vm1293_vm3, %v18407_v16 }
0x1d09   :  { %18469 = vmatprep.subr.msk.mxu0 %vm1293_vm3, %v10548_v35 }
0x1d0a   :  { %v18419_v1 = vpop.f32.mrf.mxu0  ;;  %18455 = vmatmul.mubr.msk.f32.gmra.mxu1 %vm252_vm2, %v25623_v33 }
0x1d0b   :  { %18457 = vmatprep.mubr.msk.f32.mxu1 %vm252_vm2, %v25624_v0 }
0x1d0c   :  { %v10588_v23 = vpop.f32.mrf.mxu0  ;;  %18470 = vmatpush3.xpose.msk.msra.mxu0 %vm1293_vm3, %v10548_v35 }
0x1d0d   :  { %18471 = vmatprep.subr.msk.mxu0 %vm1293_vm3, %v18404_v30 }
0x1d0e   :  { %v18422_v49 = vpop.f32.mrf.mxu0  ;;  %18458 = vmatmul.mubr.msk.f32.gmra.mxu1 %vm252_vm2, %v25625_v42 }
0x1d0f   :  { %18460 = vmatprep.mubr.msk.f32.mxu1 %vm252_vm2, %v25626_v12  ;;  %18519 = vmatprep.subr.msk.mxu1 %vm1293_vm3, %v18422_v49 }
0x1d10   :  { %v10598_v25 = vpop.f32.mrf.mxu0  ;;  %18472 = vmatpush3.xpose.msk.msra.mxu0 %vm1293_vm3, %v18404_v30  ;;  %18520 = vmatpush3.xpose.msk.msra.mxu1 %vm1293_vm3, %v18422_v49 }
0x1d11   :  { %18473 = vmatprep.subr.msk.mxu0 %vm1293_vm3, %v10538_v18  ;;  %18521 = vmatprep.subr.msk.mxu1 %vm1293_vm3, %v10598_v25 }
0x1d12   :  { %18461 = vmatmul.mubr.msk.f32.gmra.mxu1 %vm252_vm2, %v25627_v5 }
0x1d14   :  { %18474 = vmatpush3.xpose.msk.msra.mxu0 %vm1293_vm3, %v10538_v18  ;;  %18522 = vmatpush3.xpose.msk.msra.mxu1 %vm1293_vm3, %v10598_v25 }
0x1d15   :  { %18475 = vmatprep.subr.msk.mxu0 %vm1293_vm3, %v18401_v62  ;;  %18523 = vmatprep.subr.msk.mxu1 %vm1293_vm3, %v18419_v1 }
0x1d18   :  { %18476 = vmatpush3.xpose.msk.msra.mxu0 %vm1293_vm3, %v18401_v62  ;;  %18524 = vmatpush3.xpose.msk.msra.mxu1 %vm1293_vm3, %v18419_v1 }
0x1d19   :  { %18477 = vmatprep.subr.msk.mxu0 %vm1293_vm3, %v10528_v59  ;;  %18525 = vmatprep.subr.msk.mxu1 %vm1293_vm3, %v10588_v23 }
0x1d1c   :  { %18478 = vmatpush3.xpose.msk.msra.mxu0 %vm1293_vm3, %v10528_v59  ;;  %18526 = vmatpush3.xpose.msk.msra.mxu1 %vm1293_vm3, %v10588_v23 }
0x1d1d   :  { %18527 = vmatprep.subr.msk.mxu1 %vm1293_vm3, %v18416_v34 }
0x1d20   :  { %18528 = vmatpush3.xpose.msk.msra.mxu1 %vm1293_vm3, %v18416_v34 }
0x1d21   :  { %18529 = vmatprep.subr.msk.mxu1 %vm1293_vm3, %v10578_v36 }
0x1d24   :  { %18530 = vmatpush3.xpose.msk.msra.mxu1 %vm1293_vm3, %v10578_v36 }
0x1d25   :  { %18531 = vmatprep.subr.msk.mxu1 %vm1293_vm3, %v18413_v17 }
0x1d28   :  { %18532 = vmatpush3.xpose.msk.msra.mxu1 %vm1293_vm3, %v18413_v17 }
0x1d29   :  { %18533 = vmatprep.subr.msk.mxu1 %vm1293_vm3, %v10568_v7 }
0x1d2c   :  { %18534 = vmatpush3.xpose.msk.msra.mxu1 %vm1293_vm3, %v10568_v7 }
0x1d76   :  { %v24189_v32 = vpop.f32.mrf.mxu1 }
0x1d78   :  { %v24191_v22 = vpop.f32.mrf.mxu1 }
0x1d79   :  { %25641 = vst [vmem:[#allocation17_spill] sm:$0xff] %v24191_v22 }
0x1d7a   :  { %v24193_v43 = vpop.f32.mrf.mxu1 }
0x1d7c   :  { %v24195_v10 = vpop.f32.mrf.mxu1 }
0x1d7d   :  { %25642 = vst [vmem:[#allocation20_spill] sm:$0xff] %v24195_v10 }
0x1d7e   :  { %v24197_v37 = vpop.f32.mrf.mxu1 }
0x1d80   :  { %v24199_v14 = vpop.f32.mrf.mxu1 }
0x1d81   :  { %25643 = vst [vmem:[#allocation19_spill] sm:$0xff] %v24199_v14 }
0x1d82   :  { %v24201_v57 = vpop.f32.mrf.mxu1 }
0x1d84   :  { %v24203_v61 = vpop.f32.mrf.mxu1 }
0x1d85   :  { %25644 = vst [vmem:[#allocation23_spill] sm:$0xff] %v24203_v61 }
0x1d86   :  { %v24205_v38 = vpop.f32.mrf.mxu1 }
0x1d87   :  { %25645 = vst [vmem:[#allocation8_spill] sm:$0xff] %v24205_v38 }
0x1d88   :  { %v24207_v46 = vpop.f32.mrf.mxu1 }
0x1d89   :  { %25646 = vst [vmem:[#allocation7_spill] sm:$0xff] %v24207_v46 }
0x1d8a   :  { %v24209_v20 = vpop.f32.mrf.mxu1 }
0x1d8b   :  { %25647 = vst [vmem:[#allocation37_spill] sm:$0xff] %v24209_v20 }
0x1d8c   :  { %v24211_v40 = vpop.f32.mrf.mxu1 }
0x1d8d   :  { %25648 = vst [vmem:[#allocation25_spill] sm:$0xff] %v24211_v40 }
0x1d8e   :  { %v24213_v45 = vpop.f32.mrf.mxu1 }
0x1d8f   :  { %25649 = vst [vmem:[#allocation10_spill] sm:$0xff] %v24213_v45 }
0x1d90   :  { %v24215_v29 = vpop.f32.mrf.mxu1 }
0x1d91   :  { %25650 = vst [vmem:[#allocation9_spill] sm:$0xff] %v24215_v29 }
0x1d92   :  { %v24217_v3 = vpop.f32.mrf.mxu1 }
0x1d93   :  { %25651 = vst [vmem:[#allocation12_spill] sm:$0xff] %v24217_v3 }
0x1d94   :  { %v24219_v19 = vpop.f32.mrf.mxu1 }
0x1d95   :  { %25652 = vst [vmem:[#allocation11_spill] sm:$0xff] %v24219_v19 }
0x1d96   :  { %v18361_v62 = vpop.f32.mrf.mxu1 }
0x1d98   :  { %v10374_v59 = vpop.f32.mrf.mxu1 }
0x1d99   :  { %18479 = vmatprep.mubr.msk.f32.mxu0 %vm1293_vm3, %v10374_v59 }
0x1d9a   :  { %v18364_v30 = vpop.f32.mrf.mxu1  ;;  %18480 = vmatmul.mubr.msk.f32.vlgmr.msra.gmra.mxu0 %vm1293_vm3, %v18361_v62 }
0x1d9c   :  { %v10384_v18 = vpop.f32.mrf.mxu1 }
0x1d9d   :  { %18482 = vmatprep.mubr.msk.f32.mxu0 %vm1293_vm3, %v10384_v18 }
0x1d9e   :  { %v18367_v16 = vpop.f32.mrf.mxu1  ;;  %18483 = vmatmul.mubr.msk.f32.gmra.mxu0 %vm1293_vm3, %v18364_v30 }
0x1da0   :  { %v10394_v35 = vpop.f32.mrf.mxu1 }
0x1da1   :  { %18485 = vmatprep.mubr.msk.f32.mxu0 %vm1293_vm3, %v10394_v35 }
0x1da2   :  { %v18370_v9 = vpop.f32.mrf.mxu1  ;;  %18486 = vmatmul.mubr.msk.f32.gmra.mxu0 %vm1293_vm3, %v18367_v16 }
0x1da4   :  { %v10404_v41 = vpop.f32.mrf.mxu1 }
0x1da5   :  { %18488 = vmatprep.mubr.msk.f32.mxu0 %vm1293_vm3, %v10404_v41 }
0x1da6   :  { %v18373_v17 = vpop.f32.mrf.mxu1  ;;  %18489 = vmatmul.mubr.msk.f32.gmra.mxu0 %vm1293_vm3, %v18370_v9 }
0x1da8   :  { %v10414_v7 = vpop.f32.mrf.mxu1 }
0x1da9   :  { %18535 = vmatprep.mubr.msk.f32.mxu1 %vm1293_vm3, %v10414_v7 }
0x1daa   :  { %v18376_v34 = vpop.f32.mrf.mxu1  ;;  %18536 = vmatmul.mubr.msk.f32.vlgmr.msra.gmra.mxu1 %vm1293_vm3, %v18373_v17 }
0x1dac   :  { %v10424_v36 = vpop.f32.mrf.mxu1 }
0x1dad   :  { %18538 = vmatprep.mubr.msk.f32.mxu1 %vm1293_vm3, %v10424_v36 }
0x1dae   :  { %v18379_v1 = vpop.f32.mrf.mxu1  ;;  %18539 = vmatmul.mubr.msk.f32.gmra.mxu1 %vm1293_vm3, %v18376_v34 }
0x1db0   :  { %v10434_v23 = vpop.f32.mrf.mxu1 }
0x1db1   :  { %18541 = vmatprep.mubr.msk.f32.mxu1 %vm1293_vm3, %v10434_v23 }
0x1db2   :  { %v18382_v49 = vpop.f32.mrf.mxu1  ;;  %18542 = vmatmul.mubr.msk.f32.gmra.mxu1 %vm1293_vm3, %v18379_v1 }
0x1db4   :  { %v10444_v25 = vpop.f32.mrf.mxu1 }
0x1db5   :  { %18544 = vmatprep.mubr.msk.f32.mxu1 %vm1293_vm3, %v10444_v25 }
0x1db6   :  { %v18441_v62 = vpop.f32.mrf.mxu1  ;;  %18545 = vmatmul.mubr.msk.f32.gmra.mxu1 %vm1293_vm3, %v18382_v49 }
0x1db8   :  { %v10682_v59 = vpop.f32.mrf.mxu1 }
0x1dba   :  { %v18444_v30 = vpop.f32.mrf.mxu1 }
0x1dbc   :  { %v10692_v18 = vpop.f32.mrf.mxu1 }
0x1dbe   :  { %v18447_v16 = vpop.f32.mrf.mxu1 }
0x1dc0   :  { %v10702_v35 = vpop.f32.mrf.mxu1 }
0x1dc2   :  { %v18450_v9 = vpop.f32.mrf.mxu1 }
0x1dc3   :  { %18491 = vmatprep.subr.mxu0 %v18450_v9 }
0x1dc4   :  { %v10712_v41 = vpop.f32.mrf.mxu1  ;;  %18492 = vmatpush3.msra.mxu0 %v18450_v9 }
0x1dc5   :  { %18493 = vmatprep.subr.mxu0 %v10712_v41 }
0x1dc6   :  { %v24237_v17 = vpop.f32.mrf.mxu1  ;;  %18494 = vmatpush3.msra.mxu0 %v10712_v41 }
0x1dc7   :  { %18495 = vmatprep.subr.mxu0 %v18447_v16 }
0x1dc8   :  { %v24239_v7 = vpop.f32.mrf.mxu1  ;;  %18496 = vmatpush3.msra.mxu0 %v18447_v16 }
0x1dc9   :  { %18497 = vmatprep.subr.mxu0 %v10702_v35 }
0x1dca   :  { %v24241_v34 = vpop.f32.mrf.mxu1  ;;  %18498 = vmatpush3.msra.mxu0 %v10702_v35 }
0x1dcb   :  { %18499 = vmatprep.subr.mxu0 %v18444_v30 }
0x1dcc   :  { %v24243_v36 = vpop.f32.mrf.mxu1  ;;  %18500 = vmatpush3.msra.mxu0 %v18444_v30 }
0x1dcd   :  { %18501 = vmatprep.subr.mxu0 %v10692_v18 }
0x1dce   :  { %v24245_v1 = vpop.f32.mrf.mxu1  ;;  %18502 = vmatpush3.msra.mxu0 %v10692_v18 }
0x1dcf   :  { %18503 = vmatprep.subr.mxu0 %v18441_v62 }
0x1dd0   :  { %v24247_v23 = vpop.f32.mrf.mxu1  ;;  %18504 = vmatpush3.msra.mxu0 %v18441_v62 }
0x1dd1   :  { %18505 = vmatprep.subr.mxu0 %v10682_v59 }
0x1dd2   :  { %v24249_v49 = vpop.f32.mrf.mxu1  ;;  %18506 = vmatpush3.msra.mxu0 %v10682_v59 }
0x1dd3   :  { %18547 = vmatprep.subr.mxu0 %v24249_v49 }
0x1e5a   :  { %v18481_v25 = vpop.f32.mrf.mxu0 }
0x1e5b   :  { %v10917_v16 = vsel %vm252_vm2, %v18481_v25, -inf }
0x1e5c   :  { %10918 = vmax.xlane.f32.xlu1 %v10917_v16  ;;  %v10875_v35 = vpop.f32.mrf.mxu0 }
0x1e5d   :  { %v10914_v30 = vsel %vm252_vm2, %v10875_v35, -inf }
0x1e5e   :  { %10915 = vmax.xlane.f32.xlu0 %v10914_v30  ;;  %v18484_v9 = vpop.f32.mrf.mxu0  ;;  %v24259_v30 = vpop.f32.mrf.mxu1 }
0x1e5f   :  { %v10923_v18 = vsel %vm252_vm2, %v18484_v9, -inf }
0x1e60   :  { %10924 = vmax.xlane.f32.xlu1 %v10923_v18  ;;  %v10885_v41 = vpop.f32.mrf.mxu0 }
0x1e61   :  { %v10920_v62 = vsel %vm252_vm2, %v10885_v41, -inf }
0x1e62   :  { %10921 = vmax.xlane.f32.xlu0 %v10920_v62  ;;  %v18487_v11 = vpop.f32.mrf.mxu0 }
0x1e63   :  { %v10929_v59 = vsel %vm252_vm2, %v18487_v11, -inf }
0x1e64   :  { %10930 = vmax.xlane.f32.xlu1 %v10929_v59  ;;  %v10895_v40 = vpop.f32.mrf.mxu0 }
0x1e65   :  { %v10926_v55 = vsel %vm252_vm2, %v10895_v40, -inf }
0x1e66   :  { %10927 = vmax.xlane.f32.xlu0 %v10926_v55  ;;  %v18490_v16 = vpop.f32.mrf.mxu0 }
0x1e67   :  { %v10935_v46 = vsel %vm252_vm2, %v18490_v16, -inf }
0x1e68   :  { %10936 = vmax.xlane.f32.xlu1 %v10935_v46  ;;  %v10905_v51 = vpop.f32.mrf.mxu0 }
0x1e69   :  { %v10932_v18 = vsel %vm252_vm2, %v10905_v51, -inf }
0x1e6a   :  { %10933 = vmax.xlane.f32.xlu0 %v10932_v18  ;;  %v18537_v61 = vpop.f32.mrf.mxu1 }
0x1e6b   :  { %v11287_v62 = vsel %vm252_vm2, %v18537_v61, -inf }
0x1e6c   :  { %11288 = vmax.xlane.f32.xlu1 %v11287_v62  ;;  %v24263_v24 = vpop.f32.mrf.mxu1 }
0x1e6d   :  { %v11284_v59 = vsel %vm252_vm2, %v24263_v24, -inf }
0x1e6e   :  { %11285 = vmax.xlane.f32.xlu0 %v11284_v59  ;;  %v24267_v55 = vpop.f32.mrf.mxu1 }
0x1e6f   :  { %v11293_v14 = vsel %vm252_vm2, %v24267_v55, -inf }
0x1e70   :  { %11294 = vmax.xlane.f32.xlu1 %v11293_v14  ;;  %v24271_v46 = vpop.f32.mrf.mxu1 }
0x1e71   :  { %v11290_v18 = vsel %vm252_vm2, %v24271_v46, -inf }
0x1e72   :  { %11291 = vmax.xlane.f32.xlu0 %v11290_v18  ;;  %v24275_v2 = vpop.f32.mrf.mxu1 }
0x1e73   :  { %v11299_v62 = vsel %vm252_vm2, %v24275_v2, -inf }
0x1e74   :  { %11300 = vmax.xlane.f32.xlu1 %v11299_v62  ;;  %v24279_v10 = vpop.f32.mrf.mxu1 }
0x1e75   :  { %v11296_v59 = vsel %vm252_vm2, %v24279_v10, -inf }
0x1e76   :  { %11297 = vmax.xlane.f32.xlu0 %v11296_v59  ;;  %v24283_v27 = vpop.f32.mrf.mxu1 }
0x1e77   :  { %v11305_v14 = vsel %vm252_vm2, %v24283_v27, -inf }
0x1e78   :  { %11306 = vmax.xlane.f32.xlu1 %v11305_v14  ;;  %v24287_v22 = vpop.f32.mrf.mxu1 }
0x1e79   :  { %v11302_v18 = vsel %vm252_vm2, %v24287_v22, -inf }
0x1e7a   :  { %11303 = vmax.xlane.f32.xlu0 %v11302_v18 }
0x1ee5   :  { %v10919_v21 = vpop.xlane.xlu1 %10918 }
0x1ee6   :  { %v10939_v62 = vsub.f32 %v18481_v25, %v10919_v21 }
0x1ee7   :  { %v10916_v19 = vpop.xlane.xlu0 %10915 }
0x1ee8   :  { %v10948_v52 = vmul.f32 1.442695, %v10939_v62  ;;  %v10938_v3 = vsub.f32 %v10875_v35, %v10916_v19 }
0x1ee9   :  { %v10925_v63 = vpop.xlane.xlu1 %10924 }
0x1eea   :  { %19561 = vpow2.f32 %v10948_v52  ;;  %v10946_v59 = vmul.f32 1.442695, %v10938_v3  ;;  %v10941_v29 = vsub.f32 %v18484_v9, %v10925_v63 }
0x1eeb   :  { %v10922_v60 = vpop.xlane.xlu0 %10921 }
0x1eec   :  { %19563 = vpow2.f32 %v10946_v59  ;;  %v10952_v45 = vmul.f32 1.442695, %v10941_v29  ;;  %v10940_v58 = vsub.f32 %v10885_v41, %v10922_v60 }
0x1eed   :  { %v10931_v14 = vpop.xlane.xlu1 %10930 }
0x1eee   :  { %19565 = vpow2.f32 %v10952_v45  ;;  %v10950_v20 = vmul.f32 1.442695, %v10940_v58  ;;  %v10943_v39 = vsub.f32 %v18487_v11, %v10931_v14 }
0x1eef   :  { %v10928_v38 = vpop.xlane.xlu0 %10927 }
0x1ef0   :  { %19567 = vpow2.f32 %v10950_v20  ;;  %v10956_v18 = vmul.f32 1.442695, %v10943_v39  ;;  %v10942_v28 = vsub.f32 %v10895_v40, %v10928_v38 }
0x1ef1   :  { %v10937_v21 = vpop.xlane.xlu1 %10936 }
0x1ef2   :  { %19569 = vpow2.f32 %v10956_v18  ;;  %v10954_v25 = vmul.f32 1.442695, %v10942_v28  ;;  %v10945_v19 = vsub.f32 %v18490_v16, %v10937_v21 }
0x1ef3   :  { %v10934_v35 = vpop.xlane.xlu0 %10933 }
0x1ef4   :  { %19571 = vpow2.f32 %v10954_v25  ;;  %v10960_v52 = vmul.f32 1.442695, %v10945_v19  ;;  %v10944_v63 = vsub.f32 %v10905_v51, %v10934_v35 }
0x1ef5   :  { %v11289_v3 = vpop.xlane.xlu1 %11288 }
0x1ef6   :  { %19573 = vpow2.f32 %v10960_v52  ;;  %v10958_v29 = vmul.f32 1.442695, %v10944_v63  ;;  %v11309_v60 = vsub.f32 %v18537_v61, %v11289_v3 }
0x1ef7   :  { %v24291_v9 = vpop.eup %19561  ;;  %v11286_v58 = vpop.xlane.xlu0 %11285 }
0x1ef8   :  { %19575 = vpow2.f32 %v10958_v29  ;;  %v11318_v11 = vmul.f32 1.442695, %v11309_v60  ;;  %v11308_v39 = vsub.f32 %v24263_v24, %v11286_v58  ;;  %v10965_v38 = vsel %vm252_vm2, %v24291_v9, 0.0 }
0x1ef9   :  { %v24296_v28 = vpop.eup %19563  ;;  %v11295_v20 = vpop.xlane.xlu1 %11294  ;;  %10966 = vadd.xlane.f32.xlu1 %v10965_v38 }
0x1efa   :  { %19577 = vpow2.f32 %v11318_v11  ;;  %v11316_v51 = vmul.f32 1.442695, %v11308_v39  ;;  %v11311_v40 = vsub.f32 %v24267_v55, %v11295_v20  ;;  %v10962_v61 = vsel %vm252_vm2, %v24296_v28, 0.0 }
0x1efb   :  { %v24301_v45 = vpop.eup %19565  ;;  %v11292_v41 = vpop.xlane.xlu0 %11291  ;;  %10963 = vadd.xlane.f32.xlu0 %v10962_v61 }
0x1efc   :  { %19579 = vpow2.f32 %v11316_v51  ;;  %v11322_v24 = vmul.f32 1.442695, %v11311_v40  ;;  %v11310_v16 = vsub.f32 %v24271_v46, %v11292_v41  ;;  %v10971_v62 = vsel %vm252_vm2, %v24301_v45, 0.0 }
0x1efd   :  { %v24306_v59 = vpop.eup %19567  ;;  %v11301_v14 = vpop.xlane.xlu1 %11300  ;;  %10972 = vadd.xlane.f32.xlu1 %v10971_v62 }
0x1efe   :  { %19581 = vpow2.f32 %v11322_v24  ;;  %v11320_v55 = vmul.f32 1.442695, %v11310_v16  ;;  %v11313_v18 = vsub.f32 %v24275_v2, %v11301_v14  ;;  %v10968_v21 = vsel %vm252_vm2, %v24306_v59, 0.0 }
0x1eff   :  { %v24311_v25 = vpop.eup %19569  ;;  %v11298_v19 = vpop.xlane.xlu0 %11297  ;;  %10969 = vadd.xlane.f32.xlu0 %v10968_v21 }
0x1f00   :  { %19583 = vpow2.f32 %v11320_v55  ;;  %v11326_v46 = vmul.f32 1.442695, %v11313_v18  ;;  %v11312_v35 = vsub.f32 %v24279_v10, %v11298_v19  ;;  %v10977_v52 = vsel %vm252_vm2, %v24311_v25, 0.0 }
0x1f01   :  { %v24316_v63 = vpop.eup %19571  ;;  %10978 = vadd.xlane.f32.xlu1 %v10977_v52  ;;  %v11307_v3 = vpop.xlane.xlu1 %11306 }
0x1f02   :  { %19585 = vpow2.f32 %v11326_v46  ;;  %v11324_v2 = vmul.f32 1.442695, %v11312_v35  ;;  %v11315_v29 = vsub.f32 %v24283_v27, %v11307_v3  ;;  %v10974_v60 = vsel %vm252_vm2, %v24316_v63, 0.0 }
0x1f03   :  { %v24321_v58 = vpop.eup %19573  ;;  %10975 = vadd.xlane.f32.xlu0 %v10974_v60  ;;  %v11304_v11 = vpop.xlane.xlu0 %11303 }
0x1f04   :  { %19587 = vpow2.f32 %v11324_v2  ;;  %v11330_v10 = vmul.f32 1.442695, %v11315_v29  ;;  %v11314_v39 = vsub.f32 %v24287_v22, %v11304_v11  ;;  %v10983_v38 = vsel %vm252_vm2, %v24321_v58, 0.0  ;;  %v15070_v2 = vld [vmem:[%s25422_s5 + $0x68] sm:$0xff]  ;;  %v15069_v29 = vld [vmem:[%s25422_s5 + $0x60] sm:$0xff] }
0x1f05   :  { %v24326_v20 = vpop.eup %19575  ;;  %10984 = vadd.xlane.f32.xlu1 %v10983_v38  ;;  %18575 = vmatprep.subr.mxu1 %v15070_v2 }
0x1f06   :  { %19589 = vpow2.f32 %v11330_v10  ;;  %v11328_v51 = vmul.f32 1.442695, %v11314_v39  ;;  %v10980_v27 = vsel %vm252_vm2, %v24326_v20, 0.0  ;;  %18576 = vmatpush3.msra.mxu1 %v15070_v2 }
0x1f07   :  { %v24330_v40 = vpop.eup %19577  ;;  %10981 = vadd.xlane.f32.xlu0 %v10980_v27  ;;  %18577 = vmatprep.subr.mxu1 %v15069_v29 }
0x1f08   :  { %19591 = vpow2.f32 %v11328_v51  ;;  %v11335_v61 = vsel %vm252_vm2, %v24330_v40, 0.0  ;;  %18578 = vmatpush3.msra.mxu1 %v15069_v29 }
0x1f09   :  { %v24334_v41 = vpop.eup %19579  ;;  %11336 = vadd.xlane.f32.xlu1 %v11335_v61 }
0x1f0a   :  { %v11332_v22 = vsel %vm252_vm2, %v24334_v41, 0.0 }
0x1f0b   :  { %v24338_v24 = vpop.eup %19581  ;;  %11333 = vadd.xlane.f32.xlu0 %v11332_v22 }
0x1f0c   :  { %v11341_v16 = vsel %vm252_vm2, %v24338_v24, 0.0 }
0x1f0d   :  { %v24342_v62 = vpop.eup %19583  ;;  %11342 = vadd.xlane.f32.xlu1 %v11341_v16 }
0x1f0e   :  { %v11338_v14 = vsel %vm252_vm2, %v24342_v62, 0.0 }
0x1f0f   :  { %v24346_v55 = vpop.eup %19585  ;;  %11339 = vadd.xlane.f32.xlu0 %v11338_v14 }
0x1f10   :  { %v11347_v18 = vsel %vm252_vm2, %v24346_v55, 0.0 }
0x1f11   :  { %v24350_v21 = vpop.eup %19587  ;;  %11348 = vadd.xlane.f32.xlu1 %v11347_v18 }
0x1f12   :  { %v11344_v19 = vsel %vm252_vm2, %v24350_v21, 0.0 }
0x1f13   :  { %v24354_v46 = vpop.eup %19589  ;;  %11345 = vadd.xlane.f32.xlu0 %v11344_v19 }
0x1f14   :  { %v11353_v35 = vsel %vm252_vm2, %v24354_v46, 0.0 }
0x1f15   :  { %v24358_v52 = vpop.eup %19591  ;;  %11354 = vadd.xlane.f32.xlu1 %v11353_v35 }
0x1f16   :  { %v11350_v3 = vsel %vm252_vm2, %v24358_v52, 0.0 }
0x1f17   :  { %11351 = vadd.xlane.f32.xlu0 %v11350_v3 }
0x1f82   :  { %v10967_v60 = vpop.xlane.xlu1 %10966 }
0x1f83   :  { %19593 = vrcp.f32 %v10967_v60 }
0x1f84   :  { %v10964_v11 = vpop.xlane.xlu0 %10963 }
0x1f85   :  { %19595 = vrcp.f32 %v10964_v11 }
0x1f86   :  { %v10973_v10 = vpop.xlane.xlu1 %10972 }
0x1f87   :  { %19597 = vrcp.f32 %v10973_v10 }
0x1f88   :  { %v10970_v39 = vpop.xlane.xlu0 %10969 }
0x1f89   :  { %19599 = vrcp.f32 %v10970_v39 }
0x1f8a   :  { %v10979_v38 = vpop.xlane.xlu1 %10978 }
0x1f8b   :  { %19601 = vrcp.f32 %v10979_v38 }
0x1f8c   :  { %v10976_v51 = vpop.xlane.xlu0 %10975 }
0x1f8d   :  { %19603 = vrcp.f32 %v10976_v51 }
0x1f8e   :  { %v10985_v27 = vpop.xlane.xlu1 %10984 }
0x1f8f   :  { %19605 = vrcp.f32 %v10985_v27 }
0x1f90   :  { %v10982_v61 = vpop.xlane.xlu0 %10981  ;;  %v19594_v22 = vpop.eup %19593 }
0x1f91   :  { %19607 = vrcp.f32 %v10982_v61  ;;  %v10989_v19 = vmul.f32 %v19594_v22, %v24291_v9  ;;  %v15093_v61 = vld [vmem:[%s25421_s4 + $0x1f0] sm:$0xff] }
0x1f92   :  { %v19596_v16 = vpop.eup %19595  ;;  %v11337_v14 = vpop.xlane.xlu1 %11336 }
0x1f93   :  { %v10987_v18 = vmul.f32 %v19596_v16, %v24296_v28  ;;  %19609 = vrcp.f32 %v11337_v14  ;;  %v15091_v16 = vld [vmem:[%s25421_s4 + $0x1e0] sm:$0xff] }
0x1f94   :  { %v11334_v35 = vpop.xlane.xlu0 %11333  ;;  %v19598_v3 = vpop.eup %19597 }
0x1f95   :  { %19611 = vrcp.f32 %v11334_v35  ;;  %18507 = vmatprep.mubr.msk.f32.mxu0 %vm252_vm2, %v10987_v18  ;;  %v10993_v9 = vmul.f32 %v19598_v3, %v24301_v45  ;;  %v15090_v18 = vld [vmem:[%s25421_s4 + $0x1d8] sm:$0xff]  ;;  %v15089_v35 = vld [vmem:[%s25421_s4 + $0x1d0] sm:$0xff] }
0x1f96   :  { %v19600_v2 = vpop.eup %19599  ;;  %v11343_v29 = vpop.xlane.xlu1 %11342  ;;  %18508 = vmatmul.mubr.msk.f32.vlgmr.msra.gmra.mxu0 %vm252_vm2, %v10989_v19 }
0x1f97   :  { %18548 = vmatpush3.msra.mxu0 %v24249_v49  ;;  %v10991_v60 = vmul.f32 %v19600_v2, %v24306_v59  ;;  %19613 = vrcp.f32 %v11343_v29  ;;  %v15088_v2 = vld [vmem:[%s25421_s4 + $0x1c8] sm:$0xff]  ;;  %v15087_v29 = vld [vmem:[%s25421_s4 + $0x1c0] sm:$0xff] }
0x1f98   :  { %18549 = vmatprep.subr.mxu0 %v24259_v30  ;;  %v11340_v28 = vpop.xlane.xlu0 %11339  ;;  %v19602_v11 = vpop.eup %19601 }
0x1f99   :  { %18550 = vmatpush3.msra.mxu0 %v24259_v30  ;;  %19615 = vrcp.f32 %v11340_v28  ;;  %18510 = vmatprep.mubr.msk.f32.mxu0 %vm252_vm2, %v10991_v60  ;;  %v10997_v59 = vmul.f32 %v19602_v11, %v24311_v25  ;;  %v15140_v60 = vld [vmem:[%s25421_s4 + $0x5e8] sm:$0xff]  ;;  %v15139_v28 = vld [vmem:[%s25421_s4 + $0x5e0] sm:$0xff]  ;;  %v15137_v11 = vld [vmem:[%s25421_s4 + $0x5d0] sm:$0xff] }
0x1f9a   :  { %v19604_v10 = vpop.eup %19603  ;;  %18551 = vmatprep.subr.mxu0 %v24245_v1  ;;  %v11349_v39 = vpop.xlane.xlu1 %11348  ;;  %18511 = vmatmul.mubr.msk.f32.gmra.mxu0 %vm252_vm2, %v10993_v9  ;;  %v15138_v9 = vld [vmem:[%s25421_s4 + $0x5d8] sm:$0xff] }
0x1f9b   :  { %18552 = vmatpush3.msra.mxu0 %v24245_v1  ;;  %v10995_v49 = vmul.f32 %v19604_v10, %v24316_v63  ;;  %19617 = vrcp.f32 %v11349_v39  ;;  %v15136_v10 = vld [vmem:[%s25421_s4 + $0x5c8] sm:$0xff]  ;;  %v15135_v39 = vld [vmem:[%s25421_s4 + $0x5c0] sm:$0xff] }
0x1f9c   :  { %18553 = vmatprep.subr.mxu0 %v24247_v23  ;;  %v11346_v45 = vpop.xlane.xlu0 %11345  ;;  %v19606_v30 = vpop.eup %19605 }
0x1f9d   :  { %18554 = vmatpush3.msra.mxu0 %v24247_v23  ;;  %19619 = vrcp.f32 %v11346_v45  ;;  %18513 = vmatprep.mubr.msk.f32.mxu0 %vm252_vm2, %v10995_v49  ;;  %v11001_v63 = vmul.f32 %v19606_v30, %v24321_v58  ;;  %v15118_v49 = vld [vmem:[%s25421_s4 + $0x3f8] sm:$0xff]  ;;  %v15117_v30 = vld [vmem:[%s25421_s4 + $0x3f0] sm:$0xff] }
0x1f9e   :  { %v19608_v38 = vpop.eup %19607  ;;  %18555 = vmatprep.subr.mxu0 %v24241_v34  ;;  %v11355_v51 = vpop.xlane.xlu1 %11354  ;;  %18514 = vmatmul.mubr.msk.f32.gmra.mxu0 %vm252_vm2, %v10997_v59 }
0x1f9f   :  { %18556 = vmatpush3.msra.mxu0 %v24241_v34  ;;  %v10999_v1 = vmul.f32 %v19608_v38, %v24326_v20  ;;  %19621 = vrcp.f32 %v11355_v51  ;;  %v15094_v20 = vld [vmem:[%s25421_s4 + $0x1f8] sm:$0xff]  ;;  %18643 = vmatprep.subr.mxu1 %v15118_v49  ;;  %v15116_v51 = vld [vmem:[%s25421_s4 + $0x3e8] sm:$0xff] }
0x1fa0   :  { %18557 = vmatprep.subr.mxu0 %v24243_v36  ;;  %v11352_v25 = vpop.xlane.xlu0 %11351  ;;  %v19610_v23 = vpop.eup %19609 }
0x1fa1   :  { %18558 = vmatpush3.msra.mxu0 %v24243_v36  ;;  %19623 = vrcp.f32 %v11352_v25  ;;  %18516 = vmatprep.mubr.msk.f32.mxu0 %vm252_vm2, %v10999_v1  ;;  %v11359_v58 = vmul.f32 %v19610_v23, %v24330_v40  ;;  %v15092_v40 = vld [vmem:[%s25421_s4 + $0x1e8] sm:$0xff]  ;;  %v15115_v25 = vld [vmem:[%s25421_s4 + $0x3e0] sm:$0xff]  ;;  %v15114_v23 = vld [vmem:[%s25421_s4 + $0x3d8] sm:$0xff] }
0x1fa2   :  { %v19612_v27 = vpop.eup %19611  ;;  %18559 = vmatprep.subr.mxu0 %v24237_v17  ;;  %18517 = vmatmul.mubr.msk.f32.gmra.mxu0 %vm252_vm2, %v11001_v63 }
0x1fa3   :  { %18560 = vmatpush3.msra.mxu0 %v24237_v17  ;;  %v11357_v34 = vmul.f32 %v19612_v27, %v24334_v41 }
0x1fa4   :  { %18561 = vmatprep.subr.mxu0 %v24239_v7  ;;  %v19614_v36 = vpop.eup %19613 }
0x1fa5   :  { %18562 = vmatpush3.msra.mxu0 %v24239_v7  ;;  %18563 = vmatprep.mubr.msk.f32.mxu0 %vm252_vm2, %v11357_v34  ;;  %v11363_v7 = vmul.f32 %v19614_v36, %v24338_v24  ;;  %v15113_v34 = vld [vmem:[%s25421_s4 + $0x3d0] sm:$0xff] }
0x1fa6   :  { %v19616_v17 = vpop.eup %19615  ;;  %18564 = vmatmul.mubr.msk.f32.vlgmr.msra.gmra.mxu0 %vm252_vm2, %v11359_v58  ;;  %18603 = vmatprep.subr.mxu0 %v15094_v20  ;;  %v15112_v58 = vld [vmem:[%s25421_s4 + $0x3c8] sm:$0xff] }
0x1fa7   :  { %18604 = vmatpush3.msra.mxu0 %v15094_v20  ;;  %v11361_v41 = vmul.f32 %v19616_v17, %v24342_v62 }
0x1fa8   :  { %18605 = vmatprep.subr.mxu0 %v15093_v61  ;;  %v19618_v22 = vpop.eup %19617 }
0x1fa9   :  { %18566 = vmatprep.mubr.msk.f32.mxu0 %vm252_vm2, %v11361_v41  ;;  %18606 = vmatpush3.msra.mxu0 %v15093_v61  ;;  %v11367_v24 = vmul.f32 %v19618_v22, %v24346_v55  ;;  %v15111_v61 = vld [vmem:[%s25421_s4 + $0x3c0] sm:$0xff] }
0x1faa   :  { %v19620_v14 = vpop.eup %19619  ;;  %18567 = vmatmul.mubr.msk.f32.gmra.mxu0 %vm252_vm2, %v11363_v7  ;;  %18607 = vmatprep.subr.mxu0 %v15092_v40 }
0x1fab   :  { %18608 = vmatpush3.msra.mxu0 %v15092_v40  ;;  %v11365_v62 = vmul.f32 %v19620_v14, %v24350_v21 }
0x1fac   :  { %18609 = vmatprep.subr.mxu0 %v15091_v16  ;;  %v19622_v19 = vpop.eup %19621 }
0x1fad   :  { %18569 = vmatprep.mubr.msk.f32.mxu0 %vm252_vm2, %v11365_v62  ;;  %18610 = vmatpush3.msra.mxu0 %v15091_v16  ;;  %v11371_v55 = vmul.f32 %v19622_v19, %v24354_v46  ;;  %v15141_v46 = vld [vmem:[%s25421_s4 + $0x5f0] sm:$0xff] }
0x1fae   :  { %v19624_v3 = vpop.eup %19623  ;;  %18570 = vmatmul.mubr.msk.f32.gmra.mxu0 %vm252_vm2, %v11367_v24  ;;  %18611 = vmatprep.subr.mxu0 %v15090_v18 }
0x1faf   :  { %18612 = vmatpush3.msra.mxu0 %v15090_v18  ;;  %v11369_v21 = vmul.f32 %v19624_v3, %v24358_v52  ;;  %v15142_v52 = vld [vmem:[%s25421_s4 + $0x5f8] sm:$0xff]  ;;  %s19780_s4 = smov [#allocation2]  }
0x1fb0   :  { %18613 = vmatprep.subr.mxu0 %v15089_v35  ;;  %s14079_s27 = sshll.u32 %s19780_s4, 4  ;;  %s14080_s27 = int_to_ptr.vmem [resolvable:$true] %s14079_s27 }
0x1fb1   :  { %18572 = vmatprep.mubr.msk.f32.mxu0 %vm252_vm2, %v11369_v21  ;;  %18614 = vmatpush3.msra.mxu0 %v15089_v35  ;;  %s19755_s28 = scalar_lea.vmem %s14080_s27, 32  ;;  %p19760_p1 = scmp.lt.s32.totalorder %s14080_s27, %s14080_s27 }
0x1fb2   :  { %18573 = vmatmul.mubr.msk.f32.gmra.mxu0 %vm252_vm2, %v11371_v55  ;;  %18615 = vmatprep.subr.mxu0 %v15088_v2  ;;  %p19756_p0 = scmp.ne.s32.totalorder %s14080_s27, %s19755_s28  ;;  %p19761_p2 = scmp.lt.s32.totalorder %s19755_s28, %s19755_s28 }
0x1fb3   :  { %18616 = vmatpush3.msra.mxu0 %v15088_v2  ;;  %18619 = vmatprep.mubr.msk.f32.mxu0 %vm252_vm2, %v22993_v26 }
0x1fb4   :  { %18617 = vmatprep.subr.mxu0 %v15087_v29  ;;  %p19762_p3 = por %p19761_p2, %p19760_p1 }
0x1fb5   :  { %18618 = vmatpush3.msra.mxu0 %v15087_v29 }
0x1fb6   :  { %18620 = vmatmul.mubr.msk.f32.vlgmr.msra.gmra.mxu0 %vm252_vm2, %v22997_v48  ;;  %18683 = vmatprep.subr.mxu0 %v15142_v52  ;;  %p19763_p4 = pnand %p19762_p3, %p19756_p0 }
0x1fb7   :  { %18622 = vmatprep.mubr.msk.f32.mxu0 %vm252_vm2, %v23014_v15  ;;  %18684 = vmatpush3.msra.mxu0 %v15142_v52 }
0x1fb8   :  { %18685 = vmatprep.subr.mxu0 %v15141_v46 }
0x1fb9   :  { %18686 = vmatpush3.msra.mxu0 %v15141_v46 }
0x1fba   :  { %18623 = vmatmul.mubr.msk.f32.gmra.mxu0 %vm252_vm2, %v23018_v56  ;;  %18687 = vmatprep.subr.mxu0 %v15140_v60 }
0x1fbb   :  { %18625 = vmatprep.mubr.msk.f32.mxu0 %vm252_vm2, %v23035_v8  ;;  %18688 = vmatpush3.msra.mxu0 %v15140_v60 }
0x1fbc   :  { %18689 = vmatprep.subr.mxu0 %v15139_v28 }
0x1fbd   :  { %18690 = vmatpush3.msra.mxu0 %v15139_v28 }
0x1fbe   :  { %18626 = vmatmul.mubr.msk.f32.gmra.mxu0 %vm252_vm2, %v23039_v53  ;;  %18691 = vmatprep.subr.mxu0 %v15138_v9 }
0x1fbf   :  { %18628 = vmatprep.mubr.msk.f32.mxu0 %vm252_vm2, %v23055_v6  ;;  %18692 = vmatpush3.msra.mxu0 %v15138_v9 }
0x1fc0   :  { %18693 = vmatprep.subr.mxu0 %v15137_v11 }
0x1fc1   :  { %18694 = vmatpush3.msra.mxu0 %v15137_v11 }
0x1fc2   :  { %18629 = vmatmul.mubr.msk.f32.gmra.mxu0 %vm252_vm2, %v25619_v4  ;;  %18695 = vmatprep.subr.mxu0 %v15136_v10 }
0x1fc3   :  { %18631 = vmatprep.mubr.msk.f32.mxu0 %vm252_vm2, %v25620_v47  ;;  %18696 = vmatpush3.msra.mxu0 %v15136_v10  ;;  %v10226_v10 = vadd.f32 %v24040_v31, %v24189_v32  ;;  %v25653_v32 = vld [vmem:[#allocation29_spill] sm:$0xff] }
0x1fc4   :  { %18697 = vmatprep.subr.mxu0 %v15135_v39 }
0x1fc5   :  { %18698 = vmatpush3.msra.mxu0 %v15135_v39 }
0x1fc6   :  { %18632 = vmatmul.mubr.msk.f32.gmra.mxu0 %vm252_vm2, %v25621_v13 }
0x1fc7   :  { %18634 = vmatprep.mubr.msk.f32.mxu0 %vm252_vm2, %v25622_v54 }
0x1fca   :  { %18635 = vmatmul.mubr.msk.f32.gmra.mxu0 %vm252_vm2, %v25623_v33 }
0x1fcb   :  { %18637 = vmatprep.mubr.msk.f32.mxu0 %vm252_vm2, %v25624_v0 }
0x1fce   :  { %18638 = vmatmul.mubr.msk.f32.gmra.mxu0 %vm252_vm2, %v25625_v42 }
0x1fcf   :  { %18640 = vmatprep.mubr.msk.f32.mxu0 %vm252_vm2, %v25626_v12 }
0x1fd2   :  { %18641 = vmatmul.mubr.msk.f32.gmra.mxu0 %vm252_vm2, %v25627_v5 }
0x1fd3   :  { %18699 = vmatprep.mubr.msk.f32.mxu0 %vm252_vm2, %v22993_v26 }
0x1fd6   :  { %18700 = vmatmul.mubr.msk.f32.vlgmr.msra.gmra.mxu0 %vm252_vm2, %v22997_v48 }
0x1fd7   :  { %18702 = vmatprep.mubr.msk.f32.mxu0 %vm252_vm2, %v23014_v15 }
0x1fda   :  { %18703 = vmatmul.mubr.msk.f32.gmra.mxu0 %vm252_vm2, %v23018_v56 }
0x1fdb   :  { %18705 = vmatprep.mubr.msk.f32.mxu0 %vm252_vm2, %v23035_v8 }
0x1fde   :  { %18706 = vmatmul.mubr.msk.f32.gmra.mxu0 %vm252_vm2, %v23039_v53 }
0x1fdf   :  { %18708 = vmatprep.mubr.msk.f32.mxu0 %vm252_vm2, %v23055_v6 }
0x1fe2   :  { %18709 = vmatmul.mubr.msk.f32.gmra.mxu0 %vm252_vm2, %v25619_v4 }
0x1fe3   :  { %18711 = vmatprep.mubr.msk.f32.mxu0 %vm252_vm2, %v25620_v47 }
0x1fe6   :  { %18712 = vmatmul.mubr.msk.f32.gmra.mxu0 %vm252_vm2, %v25621_v13 }
0x1fe7   :  { %18714 = vmatprep.mubr.msk.f32.mxu0 %vm252_vm2, %v25622_v54 }
0x1fea   :  { %18715 = vmatmul.mubr.msk.f32.gmra.mxu0 %vm252_vm2, %v25623_v33 }
0x1feb   :  { %18717 = vmatprep.mubr.msk.f32.mxu0 %vm252_vm2, %v25624_v0 }
0x1fee   :  { %18718 = vmatmul.mubr.msk.f32.gmra.mxu0 %vm252_vm2, %v25625_v42 }
0x1fef   :  { %18720 = vmatprep.mubr.msk.f32.mxu0 %vm252_vm2, %v25626_v12 }
0x1ff2   :  { %18721 = vmatmul.mubr.msk.f32.gmra.mxu0 %vm252_vm2, %v25627_v5 }
0x2056   :  { %v18509_v45 = vpop.f32.mrf.mxu0 }
0x2058   :  { %v11092_v59 = vpop.f32.mrf.mxu0 }
0x2059   :  { %18579 = vmatprep.mubr.msk.f32.mxu1 %vm1293_vm3, %v11092_v59  ;;  %v10236_v59 = vadd.f32 %v24049_v44, %v24193_v43  ;;  %v25654_v43 = vld [vmem:[#allocation8_spill] sm:$0xff] }
0x205a   :  { %v18512_v38 = vpop.f32.mrf.mxu0  ;;  %18580 = vmatmul.mubr.msk.f32.vlgmr.msra.gmra.mxu1 %vm1293_vm3, %v18509_v45 }
0x205b   :  { %18644 = vmatpush3.msra.mxu1 %v15118_v49 }
0x205c   :  { %v11102_v1 = vpop.f32.mrf.mxu0  ;;  %18645 = vmatprep.subr.mxu1 %v15117_v30 }
0x205d   :  { %18582 = vmatprep.mubr.msk.f32.mxu1 %vm1293_vm3, %v11102_v1  ;;  %18646 = vmatpush3.msra.mxu1 %v15117_v30  ;;  %v10246_v1 = vadd.f32 %v24063_v50, %v24197_v37  ;;  %v25656_v37 = vld [vmem:[#allocation37_spill] sm:$0xff] }
0x205e   :  { %v18515_v63 = vpop.f32.mrf.mxu0  ;;  %18583 = vmatmul.mubr.msk.f32.gmra.mxu1 %vm1293_vm3, %v18512_v38  ;;  %18647 = vmatprep.subr.mxu1 %v15116_v51 }
0x205f   :  { %18648 = vmatpush3.msra.mxu1 %v15116_v51 }
0x2060   :  { %v11112_v27 = vpop.f32.mrf.mxu0  ;;  %18649 = vmatprep.subr.mxu1 %v15115_v25 }
0x2061   :  { %18585 = vmatprep.mubr.msk.f32.mxu1 %vm1293_vm3, %v11112_v27  ;;  %18650 = vmatpush3.msra.mxu1 %v15115_v25 }
0x2062   :  { %v18518_v20 = vpop.f32.mrf.mxu0  ;;  %18586 = vmatmul.mubr.msk.f32.gmra.mxu1 %vm1293_vm3, %v18515_v63  ;;  %18651 = vmatprep.subr.mxu1 %v15114_v23 }
0x2063   :  { %18652 = vmatpush3.msra.mxu1 %v15114_v23  ;;  %v10256_v23 = vadd.f32 %v25653_v32, %v24201_v57 }
0x2064   :  { %v11122_v36 = vpop.f32.mrf.mxu0  ;;  %18653 = vmatprep.subr.mxu1 %v15113_v34 }
0x2065   :  { %18588 = vmatprep.mubr.msk.f32.mxu1 %vm1293_vm3, %v11122_v36  ;;  %18654 = vmatpush3.msra.mxu1 %v15113_v34 }
0x2066   :  { %v18565_v17 = vpop.f32.mrf.mxu0  ;;  %18589 = vmatmul.mubr.msk.f32.gmra.mxu1 %vm1293_vm3, %v18518_v20  ;;  %18655 = vmatprep.subr.mxu1 %v15112_v58  ;;  %v25655_v20 = vld [vmem:[#allocation13_spill] sm:$0xff] }
0x2067   :  { %18656 = vmatpush3.msra.mxu1 %v15112_v58  ;;  %v10266_v58 = vadd.f32 %v25655_v20, %v25654_v43 }
0x2068   :  { %v11462_v41 = vpop.f32.mrf.mxu0  ;;  %18657 = vmatprep.subr.mxu1 %v15111_v61 }
0x2069   :  { %18591 = vmatprep.mubr.msk.f32.mxu1 %vm1293_vm3, %v11462_v41  ;;  %18658 = vmatpush3.msra.mxu1 %v15111_v61 }
0x206a   :  { %v18568_v40 = vpop.f32.mrf.mxu0  ;;  %18592 = vmatmul.mubr.msk.f32.gmra.mxu1 %vm1293_vm3, %v18565_v17  ;;  %v25657_v17 = vld [vmem:[#allocation31_spill] sm:$0xff] }
0x206b   :  { %v10276_v41 = vadd.f32 %v25657_v17, %v25656_v37 }
0x206c   :  { %v11472_v7 = vpop.f32.mrf.mxu0 }
0x206d   :  { %18594 = vmatprep.mubr.msk.f32.mxu1 %vm1293_vm3, %v11472_v7 }
0x206e   :  { %v18571_v22 = vpop.f32.mrf.mxu0  ;;  %18595 = vmatmul.mubr.msk.f32.gmra.mxu1 %vm1293_vm3, %v18568_v40 }
0x2070   :  { %v11482_v16 = vpop.f32.mrf.mxu0 }
0x2071   :  { %18597 = vmatprep.mubr.msk.f32.mxu1 %vm1293_vm3, %v11482_v16  ;;  %v25659_v16 = vld [vmem:[#allocation15_spill] sm:$0xff] }
0x2072   :  { %v18574_v14 = vpop.f32.mrf.mxu0  ;;  %18598 = vmatmul.mubr.msk.f32.gmra.mxu1 %vm1293_vm3, %v18571_v22  ;;  %v25658_v22 = vld [vmem:[#allocation10_spill] sm:$0xff] }
0x2074   :  { %v11492_v62 = vpop.f32.mrf.mxu0 }
0x2075   :  { %18600 = vmatprep.mubr.msk.f32.mxu1 %vm1293_vm3, %v11492_v62 }
0x2076   :  { %18601 = vmatmul.mubr.msk.f32.gmra.mxu1 %vm1293_vm3, %v18574_v14  ;;  %v24567_v18 = vpop.f32.mrf.mxu0  ;;  %v10286_v14 = vadd.f32 %v25659_v16, %v25658_v22 }
0x2077   :  { %18659 = vmatprep.mubr.msk.f32.mxu1 %vm252_vm2, %v22993_v26 }
0x2078   :  { %v11788_v24 = vpop.f32.mrf.mxu0 }
0x207a   :  { %v24571_v19 = vpop.f32.mrf.mxu0  ;;  %18660 = vmatmul.mubr.msk.f32.vlgmr.msra.gmra.mxu1 %vm252_vm2, %v22997_v48 }
0x207b   :  { %18662 = vmatprep.mubr.msk.f32.mxu1 %vm252_vm2, %v23014_v15 }
0x207c   :  { %v24577_v35 = vpop.f32.mrf.mxu0 }
0x207e   :  { %v24579_v3 = vpop.f32.mrf.mxu0  ;;  %18663 = vmatmul.mubr.msk.f32.gmra.mxu1 %vm252_vm2, %v23018_v56 }
0x207f   :  { %18665 = vmatprep.mubr.msk.f32.mxu1 %vm252_vm2, %v23035_v8 }
0x2080   :  { %v24585_v26 = vpop.f32.mrf.mxu0 }
0x2082   :  { %v24587_v21 = vpop.f32.mrf.mxu0  ;;  %18666 = vmatmul.mubr.msk.f32.gmra.mxu1 %vm252_vm2, %v23039_v53 }
0x2083   :  { %18668 = vmatprep.mubr.msk.f32.mxu1 %vm252_vm2, %v23055_v6 }
0x2084   :  { %v24593_v48 = vpop.f32.mrf.mxu0 }
0x2086   :  { %v24595_v15 = vpop.f32.mrf.mxu0  ;;  %18669 = vmatmul.mubr.msk.f32.gmra.mxu1 %vm252_vm2, %v25619_v4 }
0x2087   :  { %18671 = vmatprep.mubr.msk.f32.mxu1 %vm252_vm2, %v25620_v47 }
0x2088   :  { %v24601_v56 = vpop.f32.mrf.mxu0 }
0x208a   :  { %v24603_v8 = vpop.f32.mrf.mxu0  ;;  %18672 = vmatmul.mubr.msk.f32.gmra.mxu1 %vm252_vm2, %v25621_v13 }
0x208b   :  { %18674 = vmatprep.mubr.msk.f32.mxu1 %vm252_vm2, %v25622_v54 }
0x208c   :  { %v24609_v53 = vpop.f32.mrf.mxu0 }
0x208e   :  { %v24611_v6 = vpop.f32.mrf.mxu0  ;;  %18675 = vmatmul.mubr.msk.f32.gmra.mxu1 %vm252_vm2, %v25623_v33 }
0x208f   :  { %18677 = vmatprep.mubr.msk.f32.mxu1 %vm252_vm2, %v25624_v0 }
0x2090   :  { %v24617_v4 = vpop.f32.mrf.mxu0 }
0x2092   :  { %v24619_v47 = vpop.f32.mrf.mxu0  ;;  %18678 = vmatmul.mubr.msk.f32.gmra.mxu1 %vm252_vm2, %v25625_v42 }
0x2093   :  { %18680 = vmatprep.mubr.msk.f32.mxu1 %vm252_vm2, %v25626_v12 }
0x2094   :  { %v24625_v13 = vpop.f32.mrf.mxu0 }
0x2096   :  { %18681 = vmatmul.mubr.msk.f32.gmra.mxu1 %vm252_vm2, %v25627_v5  ;;  %v18701_v54 = vpop.f32.mrf.mxu0 }
0x2097   :  { %18739 = vmatprep.mubr.msk.f32.mxu1 %vm1293_vm3, %v11788_v24  ;;  %v25660_v24 = vld [vmem:[#allocation9_spill] sm:$0xff] }
0x2098   :  { %v12096_v33 = vpop.f32.mrf.mxu0 }
0x209a   :  { %v18704_v0 = vpop.f32.mrf.mxu0 }
0x209c   :  { %v12106_v2 = vpop.f32.mrf.mxu0 }
0x209e   :  { %v18707_v55 = vpop.f32.mrf.mxu0 }
0x20a0   :  { %v12116_v29 = vpop.f32.mrf.mxu0 }
0x20a2   :  { %v18710_v52 = vpop.f32.mrf.mxu0 }
0x20a3   :  { %18751 = vmatprep.subr.mxu0 %v18710_v52 }
0x20a4   :  { %v12126_v46 = vpop.f32.mrf.mxu0  ;;  %18752 = vmatpush3.msra.mxu0 %v18710_v52 }
0x20a5   :  { %18753 = vmatprep.subr.mxu0 %v12126_v46 }
0x20a6   :  { %v24630_v42 = vpop.f32.mrf.mxu0  ;;  %18754 = vmatpush3.msra.mxu0 %v12126_v46 }
0x20a7   :  { %18755 = vmatprep.subr.mxu0 %v18707_v55 }
0x20a8   :  { %v24632_v12 = vpop.f32.mrf.mxu0  ;;  %18756 = vmatpush3.msra.mxu0 %v18707_v55  ;;  %v25662_v55 = vld [vmem:[#allocation12_spill] sm:$0xff] }
0x20a9   :  { %18757 = vmatprep.subr.mxu0 %v12116_v29 }
0x20aa   :  { %v24634_v5 = vpop.f32.mrf.mxu0  ;;  %18758 = vmatpush3.msra.mxu0 %v12116_v29  ;;  %v25663_v29 = vld [vmem:[#allocation33_spill] sm:$0xff] }
0x20ab   :  { %18759 = vmatprep.subr.mxu0 %v18704_v0  ;;  %v10296_v52 = vadd.f32 %v25663_v29, %v25662_v55 }
0x20ac   :  { %v24636_v60 = vpop.f32.mrf.mxu0  ;;  %18760 = vmatpush3.msra.mxu0 %v18704_v0 }
0x20ad   :  { %18761 = vmatprep.subr.mxu0 %v12106_v2 }
0x20ae   :  { %v24638_v28 = vpop.f32.mrf.mxu0  ;;  %18762 = vmatpush3.msra.mxu0 %v12106_v2 }
0x20af   :  { %18763 = vmatprep.subr.mxu0 %v18701_v54 }
0x20b0   :  { %v24640_v9 = vpop.f32.mrf.mxu0  ;;  %18764 = vmatpush3.msra.mxu0 %v18701_v54  ;;  %v25661_v54 = vld [vmem:[#allocation45_spill] sm:$0xff] }
0x20b1   :  { %18765 = vmatprep.subr.mxu0 %v12096_v33 }
0x20b2   :  { %v24642_v11 = vpop.f32.mrf.mxu0  ;;  %18766 = vmatpush3.msra.mxu0 %v12096_v33  ;;  %v10281_v33 = vadd.f32 %v25661_v54, %v25660_v24 }
0x20b3   :  { %18807 = vmatprep.subr.mxu0 %v24642_v11 }
0x211a   :  { %v18581_v39 = vpop.f32.mrf.mxu1 }
0x211b   :  { %v24647_v49 = vadd.f32 %v18581_v39, %v10226_v10  ;;  %v25664_v39 = vld [vmem:[#allocation11_spill] sm:$0xff] }
0x211c   :  { %v24649_v45 = vpop.f32.mrf.mxu1 }
0x211e   :  { %v18584_v30 = vpop.f32.mrf.mxu1 }
0x211f   :  { %v24653_v38 = vadd.f32 %v18584_v30, %v10236_v59  ;;  %v25665_v59 = vld [vmem:[#allocation18_spill] sm:$0xff] }
0x2120   :  { %v24655_v51 = vpop.f32.mrf.mxu1  ;;  %v10291_v30 = vadd.f32 %v25665_v59, %v25664_v39 }
0x2122   :  { %v18587_v25 = vpop.f32.mrf.mxu1 }
0x2123   :  { %v24659_v63 = vadd.f32 %v18587_v25, %v10246_v1 }
0x2124   :  { %v24661_v31 = vpop.f32.mrf.mxu1 }
0x2126   :  { %v18590_v27 = vpop.f32.mrf.mxu1 }
0x2127   :  { %v24665_v34 = vadd.f32 %v18590_v27, %v10256_v23 }
0x2128   :  { %v24667_v44 = vpop.f32.mrf.mxu1 }
0x212a   :  { %v18593_v36 = vpop.f32.mrf.mxu1 }
0x212b   :  { %v24671_v61 = vadd.f32 %v18593_v36, %v10266_v58 }
0x212c   :  { %v24673_v50 = vpop.f32.mrf.mxu1 }
0x212e   :  { %v18596_v40 = vpop.f32.mrf.mxu1 }
0x212f   :  { %v24677_v7 = vadd.f32 %v18596_v40, %v10276_v41 }
0x2130   :  { %v24679_v57 = vpop.f32.mrf.mxu1 }
0x2132   :  { %v18599_v62 = vpop.f32.mrf.mxu1 }
0x2133   :  { %v24685_v0 = vadd.f32 %v18599_v62, %v10286_v14 }
0x2134   :  { %v11678_v2 = vpop.f32.mrf.mxu1 }
0x2135   :  { %v24689_v46 = vadd.f32 %v11678_v2, %v10281_v33 }
0x2136   :  { %v18602_v10 = vpop.f32.mrf.mxu1 }
0x2137   :  { %v24693_v1 = vadd.f32 %v18602_v10, %v10296_v52 }
0x2138   :  { %v11688_v25 = vpop.f32.mrf.mxu1 }
0x2139   :  { %v24695_v32 = vadd.f32 %v11688_v25, %v10291_v30 }
0x213a   :  { %v18661_v23 = vpop.f32.mrf.mxu1 }
0x213c   :  { %v11942_v27 = vpop.f32.mrf.mxu1 }
0x213e   :  { %v18664_v43 = vpop.f32.mrf.mxu1 }
0x2140   :  { %v11952_v20 = vpop.f32.mrf.mxu1 }
0x2142   :  { %v18667_v58 = vpop.f32.mrf.mxu1 }
0x2144   :  { %v11962_v36 = vpop.f32.mrf.mxu1 }
0x2146   :  { %v18670_v37 = vpop.f32.mrf.mxu1 }
0x2147   :  { %18723 = vmatprep.subr.msk.mxu1 %vm1293_vm3, %v18670_v37 }
0x2148   :  { %v11972_v17 = vpop.f32.mrf.mxu1  ;;  %18724 = vmatpush3.xpose.msk.msra.mxu1 %vm1293_vm3, %v18670_v37 }
0x2149   :  { %18725 = vmatprep.subr.msk.mxu1 %vm1293_vm3, %v11972_v17 }
0x214a   :  { %v18673_v41 = vpop.f32.mrf.mxu1 }
0x214c   :  { %18726 = vmatpush3.xpose.msk.msra.mxu1 %vm1293_vm3, %v11972_v17  ;;  %v11982_v40 = vpop.f32.mrf.mxu1 }
0x214d   :  { %18727 = vmatprep.subr.msk.mxu1 %vm1293_vm3, %v18667_v58 }
0x214e   :  { %v18676_v22 = vpop.f32.mrf.mxu1 }
0x2150   :  { %18728 = vmatpush3.xpose.msk.msra.mxu1 %vm1293_vm3, %v18667_v58  ;;  %v11992_v16 = vpop.f32.mrf.mxu1 }
0x2151   :  { %18729 = vmatprep.subr.msk.mxu1 %vm1293_vm3, %v11962_v36 }
0x2152   :  { %v18679_v14 = vpop.f32.mrf.mxu1 }
0x2154   :  { %18730 = vmatpush3.xpose.msk.msra.mxu1 %vm1293_vm3, %v11962_v36  ;;  %v12002_v62 = vpop.f32.mrf.mxu1 }
0x2155   :  { %18731 = vmatprep.subr.msk.mxu1 %vm1293_vm3, %v18664_v43 }
0x2156   :  { %v18682_v24 = vpop.f32.mrf.mxu1 }
0x2158   :  { %18732 = vmatpush3.xpose.msk.msra.mxu1 %vm1293_vm3, %v18664_v43  ;;  %v12012_v54 = vpop.f32.mrf.mxu1 }
0x2159   :  { %18733 = vmatprep.subr.msk.mxu1 %vm1293_vm3, %v11952_v20 }
0x215c   :  { %18734 = vmatpush3.xpose.msk.msra.mxu1 %vm1293_vm3, %v11952_v20 }
0x215d   :  { %18735 = vmatprep.subr.msk.mxu1 %vm1293_vm3, %v18661_v23 }
0x2160   :  { %18736 = vmatpush3.xpose.msk.msra.mxu1 %vm1293_vm3, %v18661_v23 }
0x2161   :  { %18737 = vmatprep.subr.msk.mxu1 %vm1293_vm3, %v11942_v27 }
0x2164   :  { %18738 = vmatpush3.xpose.msk.msra.mxu1 %vm1293_vm3, %v11942_v27 }
0x2165   :  { %18779 = vmatprep.subr.msk.mxu1 %vm1293_vm3, %v18682_v24 }
0x2167   :  { %18740 = vmatmul.mubr.msk.f32.vlgmr.msra.gmra.mxu1 %vm1293_vm3, %v24567_v18 }
0x2168   :  { %18742 = vmatprep.mubr.msk.f32.mxu1 %vm1293_vm3, %v24577_v35  ;;  %18780 = vmatpush3.xpose.msk.msra.mxu1 %vm1293_vm3, %v18682_v24 }
0x2169   :  { %18781 = vmatprep.subr.msk.mxu1 %vm1293_vm3, %v12012_v54 }
0x216b   :  { %18743 = vmatmul.mubr.msk.f32.gmra.mxu1 %vm1293_vm3, %v24571_v19 }
0x216c   :  { %18745 = vmatprep.mubr.msk.f32.mxu1 %vm1293_vm3, %v24585_v26  ;;  %18782 = vmatpush3.xpose.msk.msra.mxu1 %vm1293_vm3, %v12012_v54 }
0x216d   :  { %18783 = vmatprep.subr.msk.mxu1 %vm1293_vm3, %v18679_v14 }
0x216f   :  { %18746 = vmatmul.mubr.msk.f32.gmra.mxu1 %vm1293_vm3, %v24579_v3 }
0x2170   :  { %18748 = vmatprep.mubr.msk.f32.mxu1 %vm1293_vm3, %v24593_v48  ;;  %18784 = vmatpush3.xpose.msk.msra.mxu1 %vm1293_vm3, %v18679_v14 }
0x2171   :  { %18785 = vmatprep.subr.msk.mxu1 %vm1293_vm3, %v12002_v62 }
0x2173   :  { %18749 = vmatmul.mubr.msk.f32.gmra.mxu1 %vm1293_vm3, %v24587_v21 }
0x2174   :  { %18786 = vmatpush3.xpose.msk.msra.mxu1 %vm1293_vm3, %v12002_v62  ;;  %18795 = vmatprep.mubr.msk.f32.mxu1 %vm1293_vm3, %v24601_v56 }
0x2175   :  { %18787 = vmatprep.subr.msk.mxu1 %vm1293_vm3, %v18676_v22 }
0x2178   :  { %18788 = vmatpush3.xpose.msk.msra.mxu1 %vm1293_vm3, %v18676_v22 }
0x2179   :  { %18789 = vmatprep.subr.msk.mxu1 %vm1293_vm3, %v11992_v16 }
0x217c   :  { %18790 = vmatpush3.xpose.msk.msra.mxu1 %vm1293_vm3, %v11992_v16 }
0x217d   :  { %18791 = vmatprep.subr.msk.mxu1 %vm1293_vm3, %v18673_v41 }
0x2180   :  { %18792 = vmatpush3.xpose.msk.msra.mxu1 %vm1293_vm3, %v18673_v41 }
0x2181   :  { %18793 = vmatprep.subr.msk.mxu1 %vm1293_vm3, %v11982_v40 }
0x2184   :  { %18794 = vmatpush3.xpose.msk.msra.mxu1 %vm1293_vm3, %v11982_v40 }
0x2187   :  { %18796 = vmatmul.mubr.msk.f32.vlgmr.msra.gmra.mxu1 %vm1293_vm3, %v24595_v15 }
0x2188   :  { %18798 = vmatprep.mubr.msk.f32.mxu1 %vm1293_vm3, %v24609_v53 }
0x218b   :  { %18799 = vmatmul.mubr.msk.f32.gmra.mxu1 %vm1293_vm3, %v24603_v8 }
0x218c   :  { %18801 = vmatprep.mubr.msk.f32.mxu1 %vm1293_vm3, %v24617_v4 }
0x218f   :  { %18802 = vmatmul.mubr.msk.f32.gmra.mxu1 %vm1293_vm3, %v24611_v6 }
0x2190   :  { %18804 = vmatprep.mubr.msk.f32.mxu1 %vm1293_vm3, %v24625_v13 }
0x2193   :  { %18805 = vmatmul.mubr.msk.f32.gmra.mxu1 %vm1293_vm3, %v24619_v47 }
0x2227   :  { %v18741_v18 = vpop.f32.mrf.mxu1 }
0x2228   :  { %v12331_v19 = vsel %vm252_vm2, %v18741_v18, -inf }
0x2229   :  { %12332 = vmax.xlane.f32.xlu1 %v12331_v19  ;;  %v12289_v35 = vpop.f32.mrf.mxu1 }
0x222a   :  { %v12328_v3 = vsel %vm252_vm2, %v12289_v35, -inf }
0x222b   :  { %12329 = vmax.xlane.f32.xlu0 %v12328_v3  ;;  %v18744_v26 = vpop.f32.mrf.mxu1 }
0x222c   :  { %v12337_v21 = vsel %vm252_vm2, %v18744_v26, -inf }
0x222d   :  { %12338 = vmax.xlane.f32.xlu1 %v12337_v21  ;;  %v12299_v48 = vpop.f32.mrf.mxu1 }
0x222e   :  { %v12334_v15 = vsel %vm252_vm2, %v12299_v48, -inf }
0x222f   :  { %12335 = vmax.xlane.f32.xlu0 %v12334_v15  ;;  %v18747_v56 = vpop.f32.mrf.mxu1 }
0x2230   :  { %v12343_v8 = vsel %vm252_vm2, %v18747_v56, -inf }
0x2231   :  { %12344 = vmax.xlane.f32.xlu1 %v12343_v8  ;;  %v12309_v53 = vpop.f32.mrf.mxu1 }
0x2232   :  { %v12340_v6 = vsel %vm252_vm2, %v12309_v53, -inf }
0x2233   :  { %12341 = vmax.xlane.f32.xlu0 %v12340_v6  ;;  %v18750_v4 = vpop.f32.mrf.mxu1 }
0x2234   :  { %v12349_v47 = vsel %vm252_vm2, %v18750_v4, -inf }
0x2235   :  { %12350 = vmax.xlane.f32.xlu1 %v12349_v47  ;;  %v12319_v13 = vpop.f32.mrf.mxu1 }
0x2236   :  { %v12346_v33 = vsel %vm252_vm2, %v12319_v13, -inf }
0x2237   :  { %12347 = vmax.xlane.f32.xlu0 %v12346_v33 }
0x2247   :  { %v24767_v2 = vpop.f32.mrf.mxu1 }
0x2248   :  { %v12701_v55 = vsel %vm252_vm2, %v24767_v2, -inf }
0x2249   :  { %12702 = vmax.xlane.f32.xlu1 %v12701_v55  ;;  %v24771_v29 = vpop.f32.mrf.mxu1 }
0x224a   :  { %v12698_v52 = vsel %vm252_vm2, %v24771_v29, -inf }
0x224b   :  { %v24775_v10 = vpop.f32.mrf.mxu1  ;;  %12699 = vmax.xlane.f32.xlu0 %v12698_v52 }
0x224c   :  { %v12707_v39 = vsel %vm252_vm2, %v24775_v10, -inf }
0x224d   :  { %12708 = vmax.xlane.f32.xlu1 %v12707_v39  ;;  %v24779_v59 = vpop.f32.mrf.mxu1 }
0x224e   :  { %v12704_v30 = vsel %vm252_vm2, %v24779_v59, -inf }
0x224f   :  { %v24783_v25 = vpop.f32.mrf.mxu1  ;;  %12705 = vmax.xlane.f32.xlu0 %v12704_v30 }
0x2250   :  { %v12713_v23 = vsel %vm252_vm2, %v24783_v25, -inf }
0x2251   :  { %12714 = vmax.xlane.f32.xlu1 %v12713_v23  ;;  %v24787_v27 = vpop.f32.mrf.mxu1 }
0x2252   :  { %v12710_v43 = vsel %vm252_vm2, %v24787_v27, -inf }
0x2253   :  { %v24791_v20 = vpop.f32.mrf.mxu1  ;;  %12711 = vmax.xlane.f32.xlu0 %v12710_v43 }
0x2254   :  { %v12719_v58 = vsel %vm252_vm2, %v24791_v20, -inf }
0x2255   :  { %12720 = vmax.xlane.f32.xlu1 %v12719_v58  ;;  %v24795_v36 = vpop.f32.mrf.mxu1 }
0x2256   :  { %v12716_v37 = vsel %vm252_vm2, %v24795_v36, -inf }
0x2257   :  { %12717 = vmax.xlane.f32.xlu0 %v12716_v37 }
0x22b2   :  { %v12333_v17 = vpop.xlane.xlu1 %12332 }
0x22b3   :  { %v12353_v41 = vsub.f32 %v18741_v18, %v12333_v17 }
0x22b4   :  { %v12330_v40 = vpop.xlane.xlu0 %12329 }
0x22b5   :  { %v12362_v22 = vmul.f32 1.442695, %v12353_v41  ;;  %v12352_v16 = vsub.f32 %v12289_v35, %v12330_v40 }
0x22b6   :  { %v12339_v14 = vpop.xlane.xlu1 %12338 }
0x22b7   :  { %19625 = vpow2.f32 %v12362_v22  ;;  %v12360_v62 = vmul.f32 1.442695, %v12352_v16  ;;  %v12355_v24 = vsub.f32 %v18744_v26, %v12339_v14 }
0x22b8   :  { %v12336_v54 = vpop.xlane.xlu0 %12335 }
0x22b9   :  { %19627 = vpow2.f32 %v12360_v62  ;;  %v12366_v19 = vmul.f32 1.442695, %v12355_v24  ;;  %v12354_v3 = vsub.f32 %v12299_v48, %v12336_v54 }
0x22ba   :  { %v12345_v21 = vpop.xlane.xlu1 %12344 }
0x22bb   :  { %19629 = vpow2.f32 %v12366_v19  ;;  %v12364_v15 = vmul.f32 1.442695, %v12354_v3  ;;  %v12357_v8 = vsub.f32 %v18747_v56, %v12345_v21 }
0x22bc   :  { %v12342_v6 = vpop.xlane.xlu0 %12341 }
0x22bd   :  { %19631 = vpow2.f32 %v12364_v15  ;;  %v12370_v47 = vmul.f32 1.442695, %v12357_v8  ;;  %v12356_v33 = vsub.f32 %v12309_v53, %v12342_v6 }
0x22be   :  { %v12351_v18 = vpop.xlane.xlu1 %12350 }
0x22bf   :  { %19633 = vpow2.f32 %v12370_v47  ;;  %v12368_v55 = vmul.f32 1.442695, %v12356_v33  ;;  %v12359_v35 = vsub.f32 %v18750_v4, %v12351_v18 }
0x22c0   :  { %v12348_v52 = vpop.xlane.xlu0 %12347 }
0x22c1   :  { %19635 = vpow2.f32 %v12368_v55  ;;  %v12374_v39 = vmul.f32 1.442695, %v12359_v35  ;;  %v12358_v26 = vsub.f32 %v12319_v13, %v12348_v52 }
0x22c3   :  { %19637 = vpow2.f32 %v12374_v39  ;;  %v12372_v30 = vmul.f32 1.442695, %v12358_v26 }
0x22c4   :  { %v24799_v23 = vpop.eup %19625 }
0x22c5   :  { %19639 = vpow2.f32 %v12372_v30  ;;  %v12379_v48 = vsel %vm252_vm2, %v24799_v23, 0.0 }
0x22c6   :  { %v24803_v56 = vpop.eup %19627  ;;  %12380 = vadd.xlane.f32.xlu1 %v12379_v48 }
0x22c7   :  { %v12376_v53 = vsel %vm252_vm2, %v24803_v56, 0.0 }
0x22c8   :  { %v24807_v43 = vpop.eup %19629  ;;  %12377 = vadd.xlane.f32.xlu0 %v12376_v53 }
0x22c9   :  { %v12385_v4 = vsel %vm252_vm2, %v24807_v43, 0.0 }
0x22ca   :  { %v24811_v13 = vpop.eup %19631  ;;  %12386 = vadd.xlane.f32.xlu1 %v12385_v4 }
0x22cb   :  { %v12382_v58 = vsel %vm252_vm2, %v24811_v13, 0.0 }
0x22cc   :  { %v24815_v37 = vpop.eup %19633  ;;  %12383 = vadd.xlane.f32.xlu0 %v12382_v58 }
0x22cd   :  { %v12391_v17 = vsel %vm252_vm2, %v24815_v37, 0.0 }
0x22ce   :  { %v24819_v41 = vpop.eup %19635  ;;  %12392 = vadd.xlane.f32.xlu1 %v12391_v17 }
0x22cf   :  { %v12388_v40 = vsel %vm252_vm2, %v24819_v41, 0.0 }
0x22d0   :  { %v24823_v22 = vpop.eup %19637  ;;  %12389 = vadd.xlane.f32.xlu0 %v12388_v40 }
0x22d1   :  { %v12397_v16 = vsel %vm252_vm2, %v24823_v22, 0.0 }
0x22d2   :  { %v24827_v14 = vpop.eup %19639  ;;  %v12703_v62 = vpop.xlane.xlu1 %12702  ;;  %12398 = vadd.xlane.f32.xlu1 %v12397_v16 }
0x22d3   :  { %v12723_v24 = vsub.f32 %v24767_v2, %v12703_v62  ;;  %v12394_v54 = vsel %vm252_vm2, %v24827_v14, 0.0 }
0x22d4   :  { %12395 = vadd.xlane.f32.xlu0 %v12394_v54  ;;  %v12700_v19 = vpop.xlane.xlu0 %12699 }
0x22d5   :  { %v12732_v3 = vmul.f32 1.442695, %v12723_v24  ;;  %v12722_v21 = vsub.f32 %v24771_v29, %v12700_v19 }
0x22d6   :  { %v12709_v15 = vpop.xlane.xlu1 %12708 }
0x22d7   :  { %19641 = vpow2.f32 %v12732_v3  ;;  %v12730_v8 = vmul.f32 1.442695, %v12722_v21  ;;  %v12725_v6 = vsub.f32 %v24775_v10, %v12709_v15 }
0x22d8   :  { %v12706_v47 = vpop.xlane.xlu0 %12705 }
0x22d9   :  { %19643 = vpow2.f32 %v12730_v8  ;;  %v12736_v33 = vmul.f32 1.442695, %v12725_v6  ;;  %v12724_v18 = vsub.f32 %v24779_v59, %v12706_v47 }
0x22da   :  { %v12715_v55 = vpop.xlane.xlu1 %12714 }
0x22db   :  { %19645 = vpow2.f32 %v12736_v33  ;;  %v12734_v2 = vmul.f32 1.442695, %v12724_v18  ;;  %v12727_v35 = vsub.f32 %v24783_v25, %v12715_v55 }
0x22dc   :  { %v12712_v52 = vpop.xlane.xlu0 %12711 }
0x22dd   :  { %19647 = vpow2.f32 %v12734_v2  ;;  %v12740_v39 = vmul.f32 1.442695, %v12727_v35  ;;  %v12726_v29 = vsub.f32 %v24787_v27, %v12712_v52 }
0x22de   :  { %v12721_v26 = vpop.xlane.xlu1 %12720 }
0x22df   :  { %19649 = vpow2.f32 %v12740_v39  ;;  %v12738_v30 = vmul.f32 1.442695, %v12726_v29  ;;  %v12729_v10 = vsub.f32 %v24791_v20, %v12721_v26 }
0x22e0   :  { %v12718_v48 = vpop.xlane.xlu0 %12717 }
0x22e1   :  { %19651 = vpow2.f32 %v12738_v30  ;;  %v12744_v53 = vmul.f32 1.442695, %v12729_v10  ;;  %v12728_v59 = vsub.f32 %v24795_v36, %v12718_v48 }
0x22e3   :  { %19653 = vpow2.f32 %v12744_v53  ;;  %v12742_v4 = vmul.f32 1.442695, %v12728_v59  ;;  %v12166_v53 = vpop.f32.mrf.mxu0 }
0x22e4   :  { %v24839_v58 = vpop.eup %19641 }
0x22e5   :  { %19655 = vpow2.f32 %v12742_v4  ;;  %v12749_v25 = vsel %vm252_vm2, %v24839_v58, 0.0 }
0x22e6   :  { %v24843_v17 = vpop.eup %19643  ;;  %12750 = vadd.xlane.f32.xlu1 %v12749_v25 }
0x22e7   :  { %v12746_v27 = vsel %vm252_vm2, %v24843_v17, 0.0 }
0x22e8   :  { %v24847_v20 = vpop.eup %19645  ;;  %12747 = vadd.xlane.f32.xlu0 %v12746_v27 }
0x22e9   :  { %v12755_v36 = vsel %vm252_vm2, %v24847_v20, 0.0 }
0x22ea   :  { %v24851_v40 = vpop.eup %19647  ;;  %12756 = vadd.xlane.f32.xlu1 %v12755_v36 }
0x22eb   :  { %v12752_v16 = vsel %vm252_vm2, %v24851_v40, 0.0 }
0x22ec   :  { %v24855_v62 = vpop.eup %19649  ;;  %12753 = vadd.xlane.f32.xlu0 %v12752_v16 }
0x22ed   :  { %v12761_v24 = vsel %vm252_vm2, %v24855_v62, 0.0 }
0x22ee   :  { %v24859_v54 = vpop.eup %19651  ;;  %12762 = vadd.xlane.f32.xlu1 %v12761_v24 }
0x22ef   :  { %v12758_v19 = vsel %vm252_vm2, %v24859_v54, 0.0 }
0x22f0   :  { %v24863_v3 = vpop.eup %19653  ;;  %12759 = vadd.xlane.f32.xlu0 %v12758_v19 }
0x22f1   :  { %v12767_v21 = vsel %vm252_vm2, %v24863_v3, 0.0 }
0x22f2   :  { %v24867_v15 = vpop.eup %19655  ;;  %12768 = vadd.xlane.f32.xlu1 %v12767_v21 }
0x22f3   :  { %v12764_v8 = vsel %vm252_vm2, %v24867_v15, 0.0 }
0x22f4   :  { %12765 = vadd.xlane.f32.xlu0 %v12764_v8 }
0x234f   :  { %v12381_v6 = vpop.xlane.xlu1 %12380 }
0x2350   :  { %19657 = vrcp.f32 %v12381_v6 }
0x2351   :  { %v12378_v47 = vpop.xlane.xlu0 %12377 }
0x2352   :  { %19659 = vrcp.f32 %v12378_v47 }
0x2353   :  { %v12387_v33 = vpop.xlane.xlu1 %12386 }
0x2354   :  { %19661 = vrcp.f32 %v12387_v33 }
0x2355   :  { %v12384_v18 = vpop.xlane.xlu0 %12383 }
0x2356   :  { %19663 = vrcp.f32 %v12384_v18 }
0x2357   :  { %v12393_v55 = vpop.xlane.xlu1 %12392 }
0x2358   :  { %19665 = vrcp.f32 %v12393_v55 }
0x2359   :  { %v12390_v2 = vpop.xlane.xlu0 %12389 }
0x235a   :  { %19667 = vrcp.f32 %v12390_v2 }
0x235b   :  { %v12399_v35 = vpop.xlane.xlu1 %12398 }
0x235c   :  { %19669 = vrcp.f32 %v12399_v35 }
0x235d   :  { %v12396_v52 = vpop.xlane.xlu0 %12395  ;;  %v19658_v39 = vpop.eup %19657 }
0x235e   :  { %19671 = vrcp.f32 %v12396_v52  ;;  %v12403_v30 = vmul.f32 %v19658_v39, %v24799_v23 }
0x235f   :  { %v19660_v29 = vpop.eup %19659 }
0x2360   :  { %v12401_v26 = vmul.f32 %v19660_v29, %v24803_v56 }
0x2361   :  { %v19662_v10 = vpop.eup %19661 }
0x2362   :  { %18767 = vmatprep.mubr.msk.f32.mxu0 %vm252_vm2, %v12401_v26  ;;  %v12407_v4 = vmul.f32 %v19662_v10, %v24807_v43 }
0x2363   :  { %v19664_v48 = vpop.eup %19663  ;;  %18768 = vmatmul.mubr.msk.f32.vlgmr.msra.gmra.mxu0 %vm252_vm2, %v12403_v30 }
0x2364   :  { %18808 = vmatpush3.msra.mxu0 %v24642_v11  ;;  %v12405_v59 = vmul.f32 %v19664_v48, %v24811_v13 }
0x2365   :  { %18809 = vmatprep.subr.mxu0 %v12166_v53  ;;  %v19666_v25 = vpop.eup %19665 }
0x2366   :  { %18810 = vmatpush3.msra.mxu0 %v12166_v53  ;;  %18770 = vmatprep.mubr.msk.f32.mxu0 %vm252_vm2, %v12405_v59  ;;  %v12411_v11 = vmul.f32 %v19666_v25, %v24815_v37 }
0x2367   :  { %v19668_v56 = vpop.eup %19667  ;;  %18811 = vmatprep.subr.mxu0 %v24638_v28  ;;  %18771 = vmatmul.mubr.msk.f32.gmra.mxu0 %vm252_vm2, %v12407_v4 }
0x2368   :  { %18812 = vmatpush3.msra.mxu0 %v24638_v28  ;;  %v12409_v23 = vmul.f32 %v19668_v56, %v24819_v41 }
0x2369   :  { %18813 = vmatprep.subr.mxu0 %v24640_v9  ;;  %v19670_v13 = vpop.eup %19669 }
0x236a   :  { %18814 = vmatpush3.msra.mxu0 %v24640_v9  ;;  %18773 = vmatprep.mubr.msk.f32.mxu0 %vm252_vm2, %v12409_v23  ;;  %v12415_v41 = vmul.f32 %v19670_v13, %v24823_v22  ;;  %v25666_v23 = vld [vmem:[#allocation17_spill] sm:$0xff] }
0x236b   :  { %v19672_v43 = vpop.eup %19671  ;;  %18815 = vmatprep.subr.mxu0 %v24634_v5  ;;  %18774 = vmatmul.mubr.msk.f32.gmra.mxu0 %vm252_vm2, %v12411_v11  ;;  %v25667_v11 = vld [vmem:[#allocation39_spill] sm:$0xff] }
0x236c   :  { %18816 = vmatpush3.msra.mxu0 %v24634_v5  ;;  %v12413_v28 = vmul.f32 %v19672_v43, %v24827_v14  ;;  %v10221_v13 = vadd.f32 %v25667_v11, %v25666_v23  ;;  %v25682_v23 = vld [vmem:[#allocation7_spill] sm:$0xff] }
0x236d   :  { %18817 = vmatprep.subr.mxu0 %v24636_v60  ;;  %v25683_v11 = vld [vmem:[#allocation43_spill] sm:$0xff] }
0x236e   :  { %18818 = vmatpush3.msra.mxu0 %v24636_v60  ;;  %18776 = vmatprep.mubr.msk.f32.mxu0 %vm252_vm2, %v12413_v28  ;;  %v11697_v28 = vadd.f32 %v24649_v45, %v10221_v13  ;;  %v10261_v13 = vadd.f32 %v25683_v11, %v25682_v23 }
0x236f   :  { %18819 = vmatprep.subr.mxu0 %v24630_v42  ;;  %v12751_v9 = vpop.xlane.xlu1 %12750  ;;  %18777 = vmatmul.mubr.msk.f32.gmra.mxu0 %vm252_vm2, %v12415_v41 }
0x2370   :  { %18820 = vmatpush3.msra.mxu0 %v24630_v42  ;;  %19673 = vrcp.f32 %v12751_v9 }
0x2371   :  { %18821 = vmatprep.subr.mxu0 %v24632_v12  ;;  %v12748_v5 = vpop.xlane.xlu0 %12747 }
0x2372   :  { %18822 = vmatpush3.msra.mxu0 %v24632_v12  ;;  %19675 = vrcp.f32 %v12748_v5  ;;  %v25668_v5 = vld [vmem:[#allocation20_spill] sm:$0xff] }
0x2373   :  { %v12757_v37 = vpop.xlane.xlu1 %12756 }
0x2374   :  { %19677 = vrcp.f32 %v12757_v37  ;;  %v25669_v37 = vld [vmem:[#allocation27_spill] sm:$0xff] }
0x2375   :  { %v12754_v22 = vpop.xlane.xlu0 %12753 }
0x2376   :  { %19679 = vrcp.f32 %v12754_v22  ;;  %v10231_v22 = vadd.f32 %v25669_v37, %v25668_v5  ;;  %v25684_v5 = vld [vmem:[#allocation25_spill] sm:$0xff]  ;;  %v25685_v37 = vld [vmem:[#allocation16_spill] sm:$0xff] }
0x2377   :  { %v12763_v60 = vpop.xlane.xlu1 %12762 }
0x2378   :  { %19681 = vrcp.f32 %v12763_v60  ;;  %v25670_v60 = vld [vmem:[#allocation24_spill] sm:$0xff] }
0x2379   :  { %v12760_v14 = vpop.xlane.xlu0 %12759 }
0x237a   :  { %19683 = vrcp.f32 %v12760_v14 }
0x237b   :  { %v12769_v27 = vpop.xlane.xlu1 %12768 }
0x237c   :  { %19685 = vrcp.f32 %v12769_v27 }
0x237d   :  { %v12766_v36 = vpop.xlane.xlu0 %12765  ;;  %v19674_v16 = vpop.eup %19673 }
0x237e   :  { %19687 = vrcp.f32 %v12766_v36  ;;  %v12773_v19 = vmul.f32 %v19674_v16, %v24839_v58  ;;  %v11699_v16 = vadd.f32 %v24655_v51, %v10231_v22  ;;  %v10271_v22 = vadd.f32 %v25685_v37, %v25684_v5 }
0x237f   :  { %v19676_v42 = vpop.eup %19675 }
0x2380   :  { %v12771_v24 = vmul.f32 %v19676_v42, %v24843_v17  ;;  %v25671_v42 = vld [vmem:[#allocation38_spill] sm:$0xff] }
0x2381   :  { %v19678_v12 = vpop.eup %19677 }
0x2382   :  { %18823 = vmatprep.mubr.msk.f32.mxu0 %vm252_vm2, %v12771_v24  ;;  %v12777_v6 = vmul.f32 %v19678_v12, %v24847_v20  ;;  %v25672_v12 = vld [vmem:[#allocation19_spill] sm:$0xff] }
0x2383   :  { %v19680_v21 = vpop.eup %19679  ;;  %18824 = vmatmul.mubr.msk.f32.vlgmr.msra.gmra.mxu0 %vm252_vm2, %v12773_v19 }
0x2384   :  { %v12775_v8 = vmul.f32 %v19680_v21, %v24851_v40  ;;  %v25673_v21 = vld [vmem:[#allocation41_spill] sm:$0xff] }
0x2385   :  { %v19682_v47 = vpop.eup %19681 }
0x2386   :  { %18826 = vmatprep.mubr.msk.f32.mxu0 %vm252_vm2, %v12775_v8  ;;  %v12781_v58 = vmul.f32 %v19682_v47, %v24855_v62  ;;  %v15207_v62 = vld [vmem:[%s25422_s5 + $0x70] sm:$0xff]  ;;  %v10241_v8 = vadd.f32 %v25673_v21, %v25672_v12  ;;  %v25688_v12 = vld [vmem:[#allocation21_spill] sm:$0xff] }
0x2387   :  { %v19684_v33 = vpop.eup %19683  ;;  %18827 = vmatmul.mubr.msk.f32.gmra.mxu0 %vm252_vm2, %v12777_v6  ;;  %v25674_v6 = vld [vmem:[#allocation26_spill] sm:$0xff] }
0x2388   :  { %v12779_v17 = vmul.f32 %v19684_v33, %v24859_v54  ;;  %v15208_v54 = vld [vmem:[%s25422_s5 + $0x78] sm:$0xff] }
0x2389   :  { %v19686_v18 = vpop.eup %19685  ;;  %18835 = vmatprep.subr.mxu0 %v15208_v54 }
0x238a   :  { %18829 = vmatprep.mubr.msk.f32.mxu0 %vm252_vm2, %v12779_v17  ;;  %v12785_v20 = vmul.f32 %v19686_v18, %v24863_v3  ;;  %18836 = vmatpush3.msra.mxu0 %v15208_v54  ;;  %v25676_v54 = vld [vmem:[#allocation23_spill] sm:$0xff] }
0x238b   :  { %v19688_v55 = vpop.eup %19687  ;;  %18830 = vmatmul.mubr.msk.f32.gmra.mxu0 %vm252_vm2, %v12781_v58  ;;  %18837 = vmatprep.subr.mxu0 %v15207_v62  ;;  %v11701_v58 = vadd.f32 %v24661_v31, %v10241_v8 }
0x238c   :  { %v12783_v40 = vmul.f32 %v19688_v55, %v24867_v15  ;;  %18838 = vmatpush3.msra.mxu0 %v15207_v62  ;;  %v25677_v62 = vld [vmem:[#allocation14_spill] sm:$0xff] }
0x238e   :  { %18832 = vmatprep.mubr.msk.f32.mxu0 %vm252_vm2, %v12783_v40 }
0x238f   :  { %18833 = vmatmul.mubr.msk.f32.gmra.mxu0 %vm252_vm2, %v12785_v20 }
0x2423   :  { %v18769_v2 = vpop.f32.mrf.mxu0 }
0x2425   :  { %v12506_v15 = vpop.f32.mrf.mxu0 }
0x2426   :  { %18839 = vmatprep.mubr.msk.f32.mxu0 %vm1293_vm3, %v12506_v15  ;;  %v25678_v15 = vld [vmem:[#allocation28_spill] sm:$0xff] }
0x2427   :  { %v18772_v3 = vpop.f32.mrf.mxu0  ;;  %18840 = vmatmul.mubr.msk.f32.vlgmr.msra.gmra.mxu0 %vm1293_vm3, %v18769_v2  ;;  %v10251_v2 = vadd.f32 %v25677_v62, %v25676_v54  ;;  %v25691_v62 = vld [vmem:[#allocation6_spill] sm:$0xff] }
0x2429   :  { %v12516_v35 = vpop.f32.mrf.mxu0 }
0x242a   :  { %18842 = vmatprep.mubr.msk.f32.mxu0 %vm1293_vm3, %v12516_v35 }
0x242b   :  { %v18775_v52 = vpop.f32.mrf.mxu0  ;;  %18843 = vmatmul.mubr.msk.f32.gmra.mxu0 %vm1293_vm3, %v18772_v3 }
0x242d   :  { %v12526_v39 = vpop.f32.mrf.mxu0 }
0x242e   :  { %18845 = vmatprep.mubr.msk.f32.mxu0 %vm1293_vm3, %v12526_v39  ;;  %v11703_v39 = vadd.f32 %v24667_v44, %v10251_v2 }
0x242f   :  { %v18778_v29 = vpop.f32.mrf.mxu0  ;;  %18846 = vmatmul.mubr.msk.f32.gmra.mxu0 %vm1293_vm3, %v18775_v52 }
0x2431   :  { %v12536_v26 = vpop.f32.mrf.mxu0 }
0x2432   :  { %18848 = vmatprep.mubr.msk.f32.mxu0 %vm1293_vm3, %v12536_v26 }
0x2433   :  { %18849 = vmatmul.mubr.msk.f32.gmra.mxu0 %vm1293_vm3, %v18778_v29 }
0x2443   :  { %v18825_v30 = vpop.f32.mrf.mxu0 }
0x2445   :  { %v12876_v10 = vpop.f32.mrf.mxu0 }
0x2446   :  { %18851 = vmatprep.mubr.msk.f32.mxu0 %vm1293_vm3, %v12876_v10 }
0x2447   :  { %v18828_v48 = vpop.f32.mrf.mxu0  ;;  %18852 = vmatmul.mubr.msk.f32.gmra.mxu0 %vm1293_vm3, %v18825_v30 }
0x2449   :  { %v12886_v53 = vpop.f32.mrf.mxu0 }
0x244a   :  { %18854 = vmatprep.mubr.msk.f32.mxu0 %vm1293_vm3, %v12886_v53 }
0x244b   :  { %v18831_v59 = vpop.f32.mrf.mxu0  ;;  %18855 = vmatmul.mubr.msk.f32.gmra.mxu0 %vm1293_vm3, %v18828_v48  ;;  %v25680_v48 = vld [vmem:[#allocation30_spill] sm:$0xff] }
0x244d   :  { %v12896_v4 = vpop.f32.mrf.mxu0 }
0x244e   :  { %18857 = vmatprep.mubr.msk.f32.mxu0 %vm1293_vm3, %v12896_v4 }
0x244f   :  { %v18834_v25 = vpop.f32.mrf.mxu0  ;;  %18858 = vmatmul.mubr.msk.f32.gmra.mxu0 %vm1293_vm3, %v18831_v59 }
0x2451   :  { %v12906_v56 = vpop.f32.mrf.mxu0 }
0x2452   :  { %18860 = vmatprep.mubr.msk.f32.mxu0 %vm1293_vm3, %v12906_v56 }
0x2453   :  { %18861 = vmatmul.mubr.msk.f32.gmra.mxu0 %vm1293_vm3, %v18834_v25  ;;  %v25681_v25 = vld [vmem:[#allocation44_spill] sm:$0xff] }
0x24e7   :  { %v18841_v43 = vpop.f32.mrf.mxu0 }
0x24e8   :  { %v13112_v41 = vadd.f32 %v18841_v43, %v24647_v49 }
0x24e9   :  { %v13032_v9 = vpop.f32.mrf.mxu0 }
0x24ea   :  { %v24945_v14 = vadd.f32 %v13112_v41, %v25670_v60  ;;  %v13111_v27 = vadd.f32 %v13032_v9, %v11697_v28  ;;  %v11705_v28 = vadd.f32 %v24673_v50, %v10261_v13  ;;  %v25686_v60 = vld [vmem:[#allocation32_spill] sm:$0xff] }
0x24eb   :  { %v18844_v36 = vpop.f32.mrf.mxu0 }
0x24ec   :  { %v24949_v24 = vadd.f32 %v13111_v27, %v25671_v42  ;;  %v13114_v19 = vadd.f32 %v18844_v36, %v24653_v38  ;;  %v13148_v45 = vsel %vm252_vm2, %v24945_v14, 0.0  ;;  %v25675_v38 = vld [vmem:[#allocation40_spill] sm:$0xff]  ;;  %v11707_v42 = vadd.f32 %v24679_v57, %v10271_v22  ;;  %v25689_v57 = vld [vmem:[#allocation35_spill] sm:$0xff] }
0x24ed   :  { %13149 = vadd.xlane.f32.xlu1 %v13148_v45  ;;  %v13042_v49 = vpop.f32.mrf.mxu0 }
0x24ee   :  { %v24957_v47 = vadd.f32 %v13114_v19, %v25674_v6  ;;  %v13113_v33 = vadd.f32 %v13042_v49, %v11699_v16  ;;  %v13145_v51 = vsel %vm252_vm2, %v24949_v24, 0.0  ;;  %v25687_v19 = vld [vmem:[#allocation34_spill] sm:$0xff] }
0x24ef   :  { %13146 = vadd.xlane.f32.xlu0 %v13145_v51  ;;  %v18847_v17 = vpop.f32.mrf.mxu0 }
0x24f0   :  { %v24963_v18 = vadd.f32 %v13113_v33, %v25675_v38  ;;  %v13116_v55 = vadd.f32 %v18847_v17, %v24659_v63  ;;  %v13154_v40 = vsel %vm252_vm2, %v24957_v47, 0.0  ;;  %v25679_v63 = vld [vmem:[#allocation42_spill] sm:$0xff] }
0x24f1   :  { %13155 = vadd.xlane.f32.xlu1 %v13154_v40  ;;  %v13052_v20 = vpop.f32.mrf.mxu0  ;;  %v25690_v38 = vld [vmem:[#allocation22_spill] sm:$0xff] }
0x24f2   :  { %v24971_v3 = vadd.f32 %v13116_v55, %v25678_v15  ;;  %v13115_v35 = vadd.f32 %v13052_v20, %v11701_v58  ;;  %v13151_v31 = vsel %vm252_vm2, %v24963_v18, 0.0 }
0x24f3   :  { %13152 = vadd.xlane.f32.xlu0 %v13151_v31  ;;  %v18850_v52 = vpop.f32.mrf.mxu0  ;;  %v25692_v31 = vld [vmem:[#allocation5_spill] sm:$0xff] }
0x24f4   :  { %v24977_v29 = vadd.f32 %v13115_v35, %v25679_v63  ;;  %v13118_v26 = vadd.f32 %v18850_v52, %v24665_v34  ;;  %v13160_v30 = vsel %vm252_vm2, %v24971_v3, 0.0  ;;  %v25693_v63 = vld [vmem:[#allocation36_spill] sm:$0xff] }
0x24f5   :  { %13161 = vadd.xlane.f32.xlu1 %v13160_v30  ;;  %v13062_v10 = vpop.f32.mrf.mxu0 }
0x24f6   :  { %v24983_v53 = vadd.f32 %v13118_v26, %v25680_v48  ;;  %v13117_v59 = vadd.f32 %v13062_v10, %v11703_v39  ;;  %v13157_v4 = vsel %vm252_vm2, %v24977_v29, 0.0 }
0x24f7   :  { %13158 = vadd.xlane.f32.xlu0 %v13157_v4 }
0x24f8   :  { %v24988_v44 = vadd.f32 %v13117_v59, %v25681_v25  ;;  %v13166_v56 = vsel %vm252_vm2, %v24983_v53, 0.0 }
0x24f9   :  { %13167 = vadd.xlane.f32.xlu1 %v13166_v56 }
0x24fa   :  { %v13163_v34 = vsel %vm252_vm2, %v24988_v44, 0.0 }
0x24fb   :  { %13164 = vadd.xlane.f32.xlu0 %v13163_v34 }
0x2507   :  { %v18853_v43 = vpop.f32.mrf.mxu0 }
0x2508   :  { %v13120_v41 = vadd.f32 %v18853_v43, %v24671_v61 }
0x2509   :  { %v13072_v9 = vpop.f32.mrf.mxu0 }
0x250a   :  { %v25001_v27 = vadd.f32 %v13120_v41, %v25686_v60  ;;  %v13119_v36 = vadd.f32 %v13072_v9, %v11705_v28 }
0x250b   :  { %v18856_v16 = vpop.f32.mrf.mxu0 }
0x250c   :  { %v25005_v45 = vadd.f32 %v13119_v36, %v25687_v19  ;;  %v13122_v49 = vadd.f32 %v18856_v16, %v24677_v7  ;;  %v13172_v50 = vsel %vm252_vm2, %v25001_v27, 0.0 }
0x250d   :  { %13173 = vadd.xlane.f32.xlu1 %v13172_v50  ;;  %v13082_v61 = vpop.f32.mrf.mxu0 }
0x250e   :  { %v25011_v21 = vadd.f32 %v13122_v49, %v25688_v12  ;;  %v13121_v8 = vadd.f32 %v13082_v61, %v11707_v42  ;;  %v13169_v6 = vsel %vm252_vm2, %v25005_v45, 0.0 }
0x250f   :  { %13170 = vadd.xlane.f32.xlu0 %v13169_v6  ;;  %v18859_v33 = vpop.f32.mrf.mxu0 }
0x2510   :  { %v25016_v51 = vadd.f32 %v13121_v8, %v25689_v57  ;;  %v13124_v17 = vadd.f32 %v18859_v33, %v24685_v0  ;;  %v13178_v7 = vsel %vm252_vm2, %v25011_v21, 0.0 }
0x2511   :  { %13179 = vadd.xlane.f32.xlu1 %v13178_v7  ;;  %v13092_v58 = vpop.f32.mrf.mxu0 }
0x2512   :  { %v25022_v55 = vadd.f32 %v13124_v17, %v25690_v38  ;;  %v13123_v40 = vadd.f32 %v13092_v58, %v24689_v46  ;;  %v13175_v20 = vsel %vm252_vm2, %v25016_v51, 0.0 }
0x2513   :  { %13176 = vadd.xlane.f32.xlu0 %v13175_v20  ;;  %v18862_v54 = vpop.f32.mrf.mxu0 }
0x2514   :  { %v25028_v2 = vadd.f32 %v13123_v40, %v25691_v62  ;;  %v13126_v0 = vadd.f32 %v18862_v54, %v24693_v1  ;;  %v13184_v15 = vsel %vm252_vm2, %v25022_v55, 0.0 }
0x2515   :  { %13185 = vadd.xlane.f32.xlu1 %v13184_v15  ;;  %v13102_v35 = vpop.f32.mrf.mxu0  ;;  %v15234_v15 = vld [vmem:[%s25423_s6 + $0x78] sm:$0xff] }
0x2516   :  { %v25034_v52 = vadd.f32 %v13126_v0, %v25692_v31  ;;  %v13125_v46 = vadd.f32 %v13102_v35, %v24695_v32  ;;  %v13181_v39 = vsel %vm252_vm2, %v25028_v2, 0.0  ;;  %18863 = vmatprep.subr.mxu1 %v15234_v15  ;;  %v15233_v35 = vld [vmem:[%s25423_s6 + $0x70] sm:$0xff] }
0x2517   :  { %13182 = vadd.xlane.f32.xlu0 %v13181_v39  ;;  %18864 = vmatpush3.msra.mxu1 %v15234_v15  ;;  %v15232_v39 = vld [vmem:[%s25423_s6 + $0x68] sm:$0xff] }
0x2518   :  { %v25040_v26 = vadd.f32 %v13125_v46, %v25693_v63  ;;  %v13190_v1 = vsel %vm252_vm2, %v25034_v52, 0.0  ;;  %18865 = vmatprep.subr.mxu1 %v15233_v35 }
0x2519   :  { %13191 = vadd.xlane.f32.xlu1 %v13190_v1  ;;  %18866 = vmatpush3.msra.mxu1 %v15233_v35 }
0x251a   :  { %v13187_v30 = vsel %vm252_vm2, %v25040_v26, 0.0  ;;  %18867 = vmatprep.subr.mxu1 %v15232_v39 }
0x251b   :  { %13188 = vadd.xlane.f32.xlu0 %v13187_v30  ;;  %18868 = vmatpush3.msra.mxu1 %v15232_v39 }
0x2576   :  { %v13150_v10 = vpop.xlane.xlu1 %13149 }
0x2577   :  { %v13194_v48 = vmul.f32 0.015625, %v13150_v10  ;;  %v15231_v10 = vld [vmem:[%s25423_s6 + $0x60] sm:$0xff] }
0x2578   :  { %v13147_v59 = vpop.xlane.xlu0 %13146  ;;  %18869 = vmatprep.subr.mxu1 %v15231_v10 }
0x2579   :  { %v25047_v32 = vsub.f32 %v24945_v14, %v13194_v48  ;;  %v13193_v4 = vmul.f32 0.015625, %v13147_v59  ;;  %18870 = vmatpush3.msra.mxu1 %v15231_v10 }
0x257a   :  { %v13156_v25 = vpop.xlane.xlu1 %13155 }
0x257b   :  { %v25050_v56 = vsub.f32 %v24949_v24, %v13193_v4  ;;  %v13196_v34 = vmul.f32 0.015625, %v13156_v25  ;;  %v13226_v23 = vmul.f32 %v25047_v32, %v25047_v32 }
0x257c   :  { %v13153_v11 = vpop.xlane.xlu0 %13152 }
0x257d   :  { %v25055_v13 = vsub.f32 %v24957_v47, %v13196_v34  ;;  %v13195_v43 = vmul.f32 0.015625, %v13153_v11  ;;  %v13244_v28 = vsel %vm252_vm2, %v13226_v23, 0.0  ;;  %v13225_v41 = vmul.f32 %v25050_v56, %v25050_v56  ;;  %v15230_v34 = vld [vmem:[%s25423_s6 + $0x58] sm:$0xff] }
0x257e   :  { %v13162_v9 = vpop.xlane.xlu1 %13161  ;;  %13245 = vadd.xlane.f32.xlu1 %v13244_v28  ;;  %18871 = vmatprep.subr.mxu1 %v15230_v34 }
0x257f   :  { %v25061_v5 = vsub.f32 %v24963_v18, %v13195_v43  ;;  %v13198_v37 = vmul.f32 0.015625, %v13162_v9  ;;  %v13241_v22 = vsel %vm252_vm2, %v13225_v41, 0.0  ;;  %v13228_v60 = vmul.f32 %v25055_v13, %v25055_v13  ;;  %18872 = vmatpush3.msra.mxu1 %v15230_v34  ;;  %v15229_v9 = vld [vmem:[%s25423_s6 + $0x50] sm:$0xff] }
0x2580   :  { %v13159_v36 = vpop.xlane.xlu0 %13158  ;;  %13242 = vadd.xlane.f32.xlu0 %v13241_v22  ;;  %18873 = vmatprep.subr.mxu1 %v15229_v9 }
0x2581   :  { %v25067_v16 = vsub.f32 %v24971_v3, %v13198_v37  ;;  %v13197_v42 = vmul.f32 0.015625, %v13159_v36  ;;  %v13250_v19 = vsel %vm252_vm2, %v13228_v60, 0.0  ;;  %v13227_v49 = vmul.f32 %v25061_v5, %v25061_v5  ;;  %18874 = vmatpush3.msra.mxu1 %v15229_v9 }
0x2582   :  { %v13168_v50 = vpop.xlane.xlu1 %13167  ;;  %13251 = vadd.xlane.f32.xlu1 %v13250_v19  ;;  %v15228_v19 = vld [vmem:[%s25423_s6 + $0x48] sm:$0xff] }
0x2583   :  { %v25073_v61 = vsub.f32 %v24977_v29, %v13197_v42  ;;  %v13200_v12 = vmul.f32 0.015625, %v13168_v50  ;;  %v13247_v8 = vsel %vm252_vm2, %v13227_v49, 0.0  ;;  %v13230_v6 = vmul.f32 %v25067_v16, %v25067_v16  ;;  %18875 = vmatprep.subr.mxu1 %v15228_v19 }
0x2584   :  { %v13165_v33 = vpop.xlane.xlu0 %13164  ;;  %13248 = vadd.xlane.f32.xlu0 %v13247_v8  ;;  %18876 = vmatpush3.msra.mxu1 %v15228_v19 }
0x2585   :  { %v25079_v57 = vsub.f32 %v24983_v53, %v13200_v12  ;;  %v13199_v17 = vmul.f32 0.015625, %v13165_v33  ;;  %v13256_v7 = vsel %vm252_vm2, %v13230_v6, 0.0  ;;  %v13229_v58 = vmul.f32 %v25073_v61, %v25073_v61  ;;  %v15227_v33 = vld [vmem:[%s25423_s6 + $0x40] sm:$0xff] }
0x2586   :  { %13257 = vadd.xlane.f32.xlu1 %v13256_v7  ;;  %18877 = vmatprep.subr.mxu1 %v15227_v33 }
0x2587   :  { %v25085_v38 = vsub.f32 %v24988_v44, %v13199_v17  ;;  %v13253_v40 = vsel %vm252_vm2, %v13229_v58, 0.0  ;;  %v13232_v20 = vmul.f32 %v25079_v57, %v25079_v57  ;;  %18878 = vmatpush3.msra.mxu1 %v15227_v33 }
0x2588   :  { %13254 = vadd.xlane.f32.xlu0 %v13253_v40 }
0x2589   :  { %v13262_v54 = vsel %vm252_vm2, %v13232_v20, 0.0  ;;  %v13231_v62 = vmul.f32 %v25085_v38, %v25085_v38 }
0x258a   :  { %13263 = vadd.xlane.f32.xlu1 %v13262_v54 }
0x258b   :  { %v13259_v0 = vsel %vm252_vm2, %v13231_v62, 0.0 }
0x258c   :  { %13260 = vadd.xlane.f32.xlu0 %v13259_v0 }
0x2596   :  { %v13174_v31 = vpop.xlane.xlu1 %13173 }
0x2597   :  { %v13202_v46 = vmul.f32 0.015625, %v13174_v31 }
0x2598   :  { %v13171_v63 = vpop.xlane.xlu0 %13170 }
0x2599   :  { %v25104_v1 = vsub.f32 %v25001_v27, %v13202_v46  ;;  %v13201_v30 = vmul.f32 0.015625, %v13171_v63 }
0x259a   :  { %v13180_v48 = vpop.xlane.xlu1 %13179 }
0x259b   :  { %v25110_v59 = vsub.f32 %v25005_v45, %v13201_v30  ;;  %v13204_v4 = vmul.f32 0.015625, %v13180_v48  ;;  %v13234_v25 = vmul.f32 %v25104_v1, %v25104_v1  ;;  %v15267_v48 = vld [vmem:[%s25424_s7 + $0xf8] sm:$0xff] }
0x259c   :  { %v13177_v23 = vpop.xlane.xlu0 %13176  ;;  %18903 = vmatprep.subr.mxu0 %v15267_v48 }
0x259d   :  { %v25118_v11 = vsub.f32 %v25011_v21, %v13204_v4  ;;  %v13203_v43 = vmul.f32 0.015625, %v13177_v23  ;;  %v13268_v28 = vsel %vm252_vm2, %v13234_v25, 0.0  ;;  %v13233_v41 = vmul.f32 %v25110_v59, %v25110_v59  ;;  %v15266_v4 = vld [vmem:[%s25424_s7 + $0xf0] sm:$0xff]  ;;  %18904 = vmatpush3.msra.mxu0 %v15267_v48  ;;  %v15265_v25 = vld [vmem:[%s25424_s7 + $0xe8] sm:$0xff] }
0x259e   :  { %v13186_v37 = vpop.xlane.xlu1 %13185  ;;  %13269 = vadd.xlane.f32.xlu1 %v13268_v28  ;;  %18905 = vmatprep.subr.mxu0 %v15266_v4 }
0x259f   :  { %v25127_v22 = vsub.f32 %v25016_v51, %v13203_v43  ;;  %v13206_v60 = vmul.f32 0.015625, %v13186_v37  ;;  %v13265_v36 = vsel %vm252_vm2, %v13233_v41, 0.0  ;;  %v13236_v42 = vmul.f32 %v25118_v11, %v25118_v11  ;;  %18906 = vmatpush3.msra.mxu0 %v15266_v4 }
0x25a0   :  { %v13183_v49 = vpop.xlane.xlu0 %13182  ;;  %13266 = vadd.xlane.f32.xlu0 %v13265_v36  ;;  %18907 = vmatprep.subr.mxu0 %v15265_v25 }
0x25a1   :  { %v25136_v50 = vsub.f32 %v25022_v55, %v13206_v60  ;;  %v13205_v12 = vmul.f32 0.015625, %v13183_v49  ;;  %v13274_v8 = vsel %vm252_vm2, %v13236_v42, 0.0  ;;  %v13235_v6 = vmul.f32 %v25127_v22, %v25127_v22  ;;  %18908 = vmatpush3.msra.mxu0 %v15265_v25  ;;  %v25186_v25 = vld [vmem:[%s25419_s2 + $0x11] ss:$0 sm:$0xff] }
0x25a2   :  { %13275 = vadd.xlane.f32.xlu1 %v13274_v8  ;;  %v13192_v17 = vpop.xlane.xlu1 %13191 }
0x25a3   :  { %v25145_v7 = vsub.f32 %v25028_v2, %v13205_v12  ;;  %v13208_v58 = vmul.f32 0.015625, %v13192_v17  ;;  %v13271_v40 = vsel %vm252_vm2, %v13235_v6, 0.0  ;;  %v13238_v20 = vmul.f32 %v25136_v50, %v25136_v50 }
0x25a4   :  { %13272 = vadd.xlane.f32.xlu0 %v13271_v40  ;;  %v13189_v54 = vpop.xlane.xlu0 %13188 }
0x25a5   :  { %v25151_v62 = vsub.f32 %v25034_v52, %v13208_v58  ;;  %v13207_v0 = vmul.f32 0.015625, %v13189_v54  ;;  %v13280_v15 = vsel %vm252_vm2, %v13238_v20, 0.0  ;;  %v13237_v35 = vmul.f32 %v25145_v7, %v25145_v7 }
0x25a6   :  { %13281 = vadd.xlane.f32.xlu1 %v13280_v15 }
0x25a7   :  { %v25157_v31 = vsub.f32 %v25040_v26, %v13207_v0  ;;  %v13277_v46 = vsel %vm252_vm2, %v13237_v35, 0.0  ;;  %v13240_v39 = vmul.f32 %v25151_v62, %v25151_v62 }
0x25a8   :  { %13278 = vadd.xlane.f32.xlu0 %v13277_v46 }
0x25a9   :  { %v13286_v63 = vsel %vm252_vm2, %v13240_v39, 0.0  ;;  %v13239_v30 = vmul.f32 %v25157_v31, %v25157_v31  ;;  %v25178_v39 = vld [vmem:[%s25419_s2 + $0x10] ss:$0 sm:$0xff] }
0x25aa   :  { %13287 = vadd.xlane.f32.xlu1 %v13286_v63 }
0x25ab   :  { %v13283_v10 = vsel %vm252_vm2, %v13239_v30, 0.0 }
0x25ac   :  { %13284 = vadd.xlane.f32.xlu0 %v13283_v10 }
0x2607   :  { %v13246_v34 = vpop.xlane.xlu1 %13245 }
0x2608   :  { %v13290_v23 = vmul.f32 0.015625, %v13246_v34 }
0x2609   :  { %v13243_v43 = vpop.xlane.xlu0 %13242 }
0x260a   :  { %v13306_v28 = vadd.f32 1e-05, %v13290_v23  ;;  %v13289_v41 = vmul.f32 0.015625, %v13243_v43 }
0x260b   :  { %v13252_v9 = vpop.xlane.xlu1 %13251 }
0x260c   :  { %19689 = vrsqrt.f32 %v13306_v28  ;;  %v13305_v37 = vadd.f32 1e-05, %v13289_v41  ;;  %v13292_v60 = vmul.f32 0.015625, %v13252_v9 }
0x260d   :  { %v13249_v36 = vpop.xlane.xlu0 %13248 }
0x260e   :  { %19691 = vrsqrt.f32 %v13305_v37  ;;  %v13308_v42 = vadd.f32 1e-05, %v13292_v60  ;;  %v13291_v19 = vmul.f32 0.015625, %v13249_v36 }
0x260f   :  { %v13258_v49 = vpop.xlane.xlu1 %13257 }
0x2610   :  { %19693 = vrsqrt.f32 %v13308_v42  ;;  %v13307_v12 = vadd.f32 1e-05, %v13291_v19  ;;  %v13294_v8 = vmul.f32 0.015625, %v13258_v49 }
0x2611   :  { %v13255_v6 = vpop.xlane.xlu0 %13254 }
0x2612   :  { %19695 = vrsqrt.f32 %v13307_v12  ;;  %v13310_v33 = vadd.f32 1e-05, %v13294_v8  ;;  %v13293_v17 = vmul.f32 0.015625, %v13255_v6 }
0x2613   :  { %v13264_v58 = vpop.xlane.xlu1 %13263 }
0x2614   :  { %19697 = vrsqrt.f32 %v13310_v33  ;;  %v13309_v40 = vadd.f32 1e-05, %v13293_v17  ;;  %v13296_v20 = vmul.f32 0.015625, %v13264_v58 }
0x2615   :  { %v13261_v54 = vpop.xlane.xlu0 %13260 }
0x2616   :  { %19699 = vrsqrt.f32 %v13309_v40  ;;  %v13312_v0 = vadd.f32 1e-05, %v13296_v20  ;;  %v13295_v15 = vmul.f32 0.015625, %v13261_v54 }
0x2618   :  { %19701 = vrsqrt.f32 %v13312_v0  ;;  %v13311_v35 = vadd.f32 1e-05, %v13295_v15 }
0x2619   :  { %v19690_v46 = vpop.eup %19689 }
0x261a   :  { %v13338_v63 = vmul.f32 %v19690_v46, %v25047_v32  ;;  %19703 = vrsqrt.f32 %v13311_v35 }
0x261b   :  { %v19692_v30 = vpop.eup %19691 }
0x261c   :  { %v13337_v10 = vmul.f32 %v19692_v30, %v25050_v56  ;;  %v13358_v4 = vmul.f32 %v25178_v39, %v13338_v63 }
0x261d   :  { %v19694_v48 = vpop.eup %19693 }
0x261e   :  { %v13340_v34 = vmul.f32 %v19694_v48, %v25055_v13  ;;  %v13357_v23 = vmul.f32 %v25178_v39, %v13337_v10  ;;  %v13378_v56 = vadd.f32 %v25186_v25, %v13358_v4 }
0x261f   :  { %v19696_v43 = vpop.eup %19695 }
0x2620   :  { %v13377_v28 = vadd.f32 %v25186_v25, %v13357_v23  ;;  %v13339_v32 = vmul.f32 %v19696_v43, %v25061_v5  ;;  %v13360_v9 = vmul.f32 %v25178_v39, %v13340_v34 }
0x2621   :  { %v19698_v41 = vpop.eup %19697 }
0x2622   :  { %v13342_v37 = vmul.f32 %v19698_v41, %v25067_v16  ;;  %18879 = vmatprep.mubr.msk.f32.mxu1 %vm252_vm2, %v13377_v28  ;;  %v13359_v60 = vmul.f32 %v25178_v39, %v13339_v32  ;;  %v13380_v5 = vadd.f32 %v25186_v25, %v13360_v9 }
0x2623   :  { %v19700_v36 = vpop.eup %19699  ;;  %18880 = vmatmul.mubr.msk.f32.vlgmr.msra.gmra.mxu1 %vm252_vm2, %v13378_v56 }
0x2624   :  { %v13379_v13 = vadd.f32 %v25186_v25, %v13359_v60  ;;  %v13341_v42 = vmul.f32 %v19700_v36, %v25073_v61  ;;  %v13362_v49 = vmul.f32 %v25178_v39, %v13342_v37 }
0x2625   :  { %v19702_v19 = vpop.eup %19701 }
0x2626   :  { %v13344_v12 = vmul.f32 %v19702_v19, %v25079_v57  ;;  %18882 = vmatprep.mubr.msk.f32.mxu1 %vm252_vm2, %v13379_v13  ;;  %v13361_v16 = vmul.f32 %v25178_v39, %v13341_v42  ;;  %v13382_v40 = vadd.f32 %v25186_v25, %v13362_v49 }
0x2627   :  { %v19704_v8 = vpop.eup %19703  ;;  %v13270_v6 = vpop.xlane.xlu1 %13269  ;;  %18883 = vmatmul.mubr.msk.f32.gmra.mxu1 %vm252_vm2, %v13380_v5 }
0x2628   :  { %v13298_v33 = vmul.f32 0.015625, %v13270_v6  ;;  %v13381_v17 = vadd.f32 %v25186_v25, %v13361_v16  ;;  %v13343_v61 = vmul.f32 %v19704_v8, %v25085_v38  ;;  %v13364_v20 = vmul.f32 %v25178_v39, %v13344_v12 }
0x2629   :  { %v13267_v58 = vpop.xlane.xlu0 %13266 }
0x262a   :  { %v13314_v54 = vadd.f32 1e-05, %v13298_v33  ;;  %v13297_v57 = vmul.f32 0.015625, %v13267_v58  ;;  %18885 = vmatprep.mubr.msk.f32.mxu1 %vm252_vm2, %v13381_v17  ;;  %v13363_v0 = vmul.f32 %v25178_v39, %v13343_v61  ;;  %v13384_v30 = vadd.f32 %v25186_v25, %v13364_v20 }
0x262b   :  { %v13276_v15 = vpop.xlane.xlu1 %13275  ;;  %18886 = vmatmul.mubr.msk.f32.gmra.mxu1 %vm252_vm2, %v13382_v40 }
0x262c   :  { %19705 = vrsqrt.f32 %v13314_v54  ;;  %v13313_v35 = vadd.f32 1e-05, %v13297_v57  ;;  %v13300_v46 = vmul.f32 0.015625, %v13276_v15  ;;  %v13383_v63 = vadd.f32 %v25186_v25, %v13363_v0 }
0x262d   :  { %v13273_v38 = vpop.xlane.xlu0 %13272 }
0x262e   :  { %19707 = vrsqrt.f32 %v13313_v35  ;;  %v13316_v10 = vadd.f32 1e-05, %v13300_v46  ;;  %v13299_v48 = vmul.f32 0.015625, %v13273_v38  ;;  %18888 = vmatprep.mubr.msk.f32.mxu1 %vm252_vm2, %v13383_v63 }
0x262f   :  { %v13282_v4 = vpop.xlane.xlu1 %13281  ;;  %18889 = vmatmul.mubr.msk.f32.gmra.mxu1 %vm252_vm2, %v13384_v30 }
0x2630   :  { %19709 = vrsqrt.f32 %v13316_v10  ;;  %v13315_v34 = vadd.f32 1e-05, %v13299_v48  ;;  %v13302_v23 = vmul.f32 0.015625, %v13282_v4  ;;  %v15261_v4 = vld [vmem:[%s25424_s7 + $0xc8] sm:$0xff] }
0x2631   :  { %v13279_v43 = vpop.xlane.xlu0 %13278 }
0x2632   :  { %19711 = vrsqrt.f32 %v13315_v34  ;;  %v13318_v28 = vadd.f32 1e-05, %v13302_v23  ;;  %v13301_v32 = vmul.f32 0.015625, %v13279_v43  ;;  %v15260_v34 = vld [vmem:[%s25424_s7 + $0xc0] sm:$0xff]  ;;  %v15259_v23 = vld [vmem:[%s25424_s7 + $0xb8] sm:$0xff]  ;;  %v15258_v43 = vld [vmem:[%s25424_s7 + $0xb0] sm:$0xff] }
0x2633   :  { %v13288_v41 = vpop.xlane.xlu1 %13287 }
0x2634   :  { %19713 = vrsqrt.f32 %v13318_v28  ;;  %v13317_v56 = vadd.f32 1e-05, %v13301_v32  ;;  %v13304_v9 = vmul.f32 0.015625, %v13288_v41  ;;  %v15257_v28 = vld [vmem:[%s25424_s7 + $0xa8] sm:$0xff]  ;;  %v15256_v32 = vld [vmem:[%s25424_s7 + $0xa0] sm:$0xff]  ;;  %v15255_v41 = vld [vmem:[%s25424_s7 + $0x98] sm:$0xff] }
0x2635   :  { %v13285_v37 = vpop.xlane.xlu0 %13284 }
0x2636   :  { %19715 = vrsqrt.f32 %v13317_v56  ;;  %v13320_v60 = vadd.f32 1e-05, %v13304_v9  ;;  %v13303_v36 = vmul.f32 0.015625, %v13285_v37  ;;  %v15254_v56 = vld [vmem:[%s25424_s7 + $0x90] sm:$0xff]  ;;  %v15253_v9 = vld [vmem:[%s25424_s7 + $0x88] sm:$0xff]  ;;  %v15252_v37 = vld [vmem:[%s25424_s7 + $0x80] sm:$0xff] }
0x2638   :  { %19717 = vrsqrt.f32 %v13320_v60  ;;  %v13319_v13 = vadd.f32 1e-05, %v13303_v36  ;;  %v25291_v60 = vld [vmem:[%s25420_s3 + $0x41] ss:$0 sm:$0xff] }
0x2639   :  { %v19706_v42 = vpop.eup %19705 }
0x263a   :  { %v13346_v19 = vmul.f32 %v19706_v42, %v25104_v1  ;;  %19719 = vrsqrt.f32 %v13319_v13 }
0x263b   :  { %v19708_v5 = vpop.eup %19707 }
0x263c   :  { %v13345_v49 = vmul.f32 %v19708_v5, %v25110_v59  ;;  %v13366_v16 = vmul.f32 %v25178_v39, %v13346_v19 }
0x263d   :  { %v19710_v12 = vpop.eup %19709 }
0x263e   :  { %v13348_v8 = vmul.f32 %v19710_v12, %v25118_v11  ;;  %v13365_v6 = vmul.f32 %v25178_v39, %v13345_v49  ;;  %v13386_v40 = vadd.f32 %v25186_v25, %v13366_v16 }
0x263f   :  { %v19712_v33 = vpop.eup %19711 }
0x2640   :  { %v13385_v17 = vadd.f32 %v25186_v25, %v13365_v6  ;;  %v13347_v61 = vmul.f32 %v19712_v33, %v25127_v22  ;;  %v13368_v1 = vmul.f32 %v25178_v39, %v13348_v8 }
0x2641   :  { %v19714_v58 = vpop.eup %19713 }
0x2642   :  { %v13350_v20 = vmul.f32 %v19714_v58, %v25136_v50  ;;  %18891 = vmatprep.mubr.msk.f32.mxu1 %vm252_vm2, %v13385_v17  ;;  %v13367_v59 = vmul.f32 %v25178_v39, %v13347_v61  ;;  %v13388_v22 = vadd.f32 %v25186_v25, %v13368_v1 }
0x2643   :  { %v19716_v54 = vpop.eup %19715  ;;  %18892 = vmatmul.mubr.msk.f32.gmra.mxu1 %vm252_vm2, %v13386_v40 }
0x2644   :  { %v13387_v11 = vadd.f32 %v25186_v25, %v13367_v59  ;;  %v13349_v57 = vmul.f32 %v19716_v54, %v25145_v7  ;;  %v13370_v15 = vmul.f32 %v25178_v39, %v13350_v20 }
0x2645   :  { %v19718_v0 = vpop.eup %19717 }
0x2646   :  { %v13352_v35 = vmul.f32 %v19718_v0, %v25151_v62  ;;  %18894 = vmatprep.mubr.msk.f32.mxu1 %vm252_vm2, %v13387_v11  ;;  %v13369_v50 = vmul.f32 %v25178_v39, %v13349_v57  ;;  %v13390_v7 = vadd.f32 %v25186_v25, %v13370_v15 }
0x2647   :  { %v19720_v46 = vpop.eup %19719  ;;  %18895 = vmatmul.mubr.msk.f32.gmra.mxu1 %vm252_vm2, %v13388_v22 }
0x2648   :  { %v13389_v63 = vadd.f32 %v25186_v25, %v13369_v50  ;;  %v13351_v38 = vmul.f32 %v19720_v46, %v25157_v31  ;;  %v13372_v30 = vmul.f32 %v25178_v39, %v13352_v35  ;;  %v15264_v31 = vld [vmem:[%s25424_s7 + $0xe0] sm:$0xff] }
0x2649   :  { %18909 = vmatprep.subr.mxu0 %v15264_v31 }
0x264a   :  { %18897 = vmatprep.mubr.msk.f32.mxu1 %vm252_vm2, %v13389_v63  ;;  %v13371_v10 = vmul.f32 %v25178_v39, %v13351_v38  ;;  %v13392_v48 = vadd.f32 %v25186_v25, %v13372_v30  ;;  %18910 = vmatpush3.msra.mxu0 %v15264_v31  ;;  %v15263_v39 = vld [vmem:[%s25424_s7 + $0xd8] sm:$0xff] }
0x264b   :  { %18898 = vmatmul.mubr.msk.f32.gmra.mxu1 %vm252_vm2, %v13390_v7  ;;  %18911 = vmatprep.subr.mxu0 %v15263_v39 }
0x264c   :  { %v13391_v62 = vadd.f32 %v25186_v25, %v13371_v10  ;;  %18912 = vmatpush3.msra.mxu0 %v15263_v39  ;;  %v15262_v25 = vld [vmem:[%s25424_s7 + $0xd0] sm:$0xff] }
0x264d   :  { %18913 = vmatprep.subr.mxu0 %v15262_v25 }
0x264e   :  { %18900 = vmatprep.mubr.msk.f32.mxu1 %vm252_vm2, %v13391_v62  ;;  %18914 = vmatpush3.msra.mxu0 %v15262_v25 }
0x264f   :  { %18901 = vmatmul.mubr.msk.f32.gmra.mxu1 %vm252_vm2, %v13392_v48  ;;  %18915 = vmatprep.subr.mxu0 %v15261_v4 }
0x2650   :  { %18916 = vmatpush3.msra.mxu0 %v15261_v4 }
0x2651   :  { %18917 = vmatprep.subr.mxu0 %v15260_v34 }
0x2652   :  { %18918 = vmatpush3.msra.mxu0 %v15260_v34 }
0x2653   :  { %18919 = vmatprep.subr.mxu0 %v15259_v23 }
0x2654   :  { %18920 = vmatpush3.msra.mxu0 %v15259_v23 }
0x2655   :  { %18921 = vmatprep.subr.mxu0 %v15258_v43 }
0x2656   :  { %18922 = vmatpush3.msra.mxu0 %v15258_v43 }
0x2657   :  { %18923 = vmatprep.subr.mxu0 %v15257_v28 }
0x2658   :  { %18924 = vmatpush3.msra.mxu0 %v15257_v28 }
0x2659   :  { %18925 = vmatprep.subr.mxu0 %v15256_v32 }
0x265a   :  { %18926 = vmatpush3.msra.mxu0 %v15256_v32 }
0x265b   :  { %18927 = vmatprep.subr.mxu0 %v15255_v41 }
0x265c   :  { %18928 = vmatpush3.msra.mxu0 %v15255_v41 }
0x265d   :  { %18929 = vmatprep.subr.mxu0 %v15254_v56 }
0x265e   :  { %18930 = vmatpush3.msra.mxu0 %v15254_v56 }
0x265f   :  { %18931 = vmatprep.subr.mxu0 %v15253_v9 }
0x2660   :  { %18932 = vmatpush3.msra.mxu0 %v15253_v9 }
0x2661   :  { %18933 = vmatprep.subr.mxu0 %v15252_v37 }
0x2662   :  { %18934 = vmatpush3.msra.mxu0 %v15252_v37 }
0x26e3   :  { %v18881_v36 = vpop.f32.mrf.mxu1 }
0x26e4   :  { %v13527_v13 = vadd.f32 %v18881_v36, %v25291_v60 }
0x26e5   :  { %v13521_v42 = vpop.f32.mrf.mxu1 }
0x26e6   :  { %v13617_v19 = vmul.f32 0.70710677, %v13527_v13  ;;  %v13522_v5 = vadd.f32 %v25291_v60, %v13521_v42  ;;  %v13601_v30 = vmul.f32 0.5, %v13527_v13 }
0x26e7   :  { %v18884_v49 = vpop.f32.mrf.mxu1 }
0x26e8   :  { %19721 = verf.f32 %v13617_v19  ;;  %v13616_v12 = vmul.f32 0.70710677, %v13522_v5  ;;  %v13537_v16 = vadd.f32 %v18884_v49, %v25291_v60  ;;  %v13600_v63 = vmul.f32 0.5, %v13522_v5 }
0x26e9   :  { %v13531_v8 = vpop.f32.mrf.mxu1 }
0x26ea   :  { %19723 = verf.f32 %v13616_v12  ;;  %v13619_v6 = vmul.f32 0.70710677, %v13537_v16  ;;  %v13532_v33 = vadd.f32 %v25291_v60, %v13531_v8  ;;  %v13603_v34 = vmul.f32 0.5, %v13537_v16 }
0x26eb   :  { %v18887_v17 = vpop.f32.mrf.mxu1 }
0x26ec   :  { %19725 = verf.f32 %v13619_v6  ;;  %v13618_v61 = vmul.f32 0.70710677, %v13532_v33  ;;  %v13547_v58 = vadd.f32 %v18887_v17, %v25291_v60  ;;  %v13602_v39 = vmul.f32 0.5, %v13532_v33 }
0x26ed   :  { %v13541_v40 = vpop.f32.mrf.mxu1 }
0x26ee   :  { %19727 = verf.f32 %v13618_v61  ;;  %v13621_v1 = vmul.f32 0.70710677, %v13547_v58  ;;  %v13542_v20 = vadd.f32 %v25291_v60, %v13541_v40  ;;  %v13605_v37 = vmul.f32 0.5, %v13547_v58 }
0x26ef   :  { %v18890_v59 = vpop.f32.mrf.mxu1 }
0x26f0   :  { %19729 = verf.f32 %v13621_v1  ;;  %v13620_v54 = vmul.f32 0.70710677, %v13542_v20  ;;  %v13557_v11 = vadd.f32 %v18890_v59, %v25291_v60  ;;  %v13604_v41 = vmul.f32 0.5, %v13542_v20 }
0x26f1   :  { %v13551_v57 = vpop.f32.mrf.mxu1 }
0x26f2   :  { %19731 = verf.f32 %v13620_v54  ;;  %v13623_v0 = vmul.f32 0.70710677, %v13557_v11  ;;  %v13552_v22 = vadd.f32 %v25291_v60, %v13551_v57  ;;  %v13607_v8 = vmul.f32 0.5, %v13557_v11 }
0x26f4   :  { %19733 = verf.f32 %v13623_v0  ;;  %v13622_v15 = vmul.f32 0.70710677, %v13552_v22  ;;  %v13606_v49 = vmul.f32 0.5, %v13552_v22 }
0x26f5   :  { %v19722_v35 = vpop.eup %19721 }
0x26f6   :  { %19735 = verf.f32 %v13622_v15  ;;  %v13649_v46 = vadd.f32 1.0, %v19722_v35 }
0x26f7   :  { %v19724_v50 = vpop.eup %19723 }
0x26f8   :  { %v13648_v38 = vadd.f32 1.0, %v19724_v50  ;;  %v13665_v48 = vmul.f32 %v13649_v46, %v13601_v30 }
0x26f9   :  { %v19726_v7 = vpop.eup %19725 }
0x26fa   :  { %v13664_v10 = vmul.f32 %v13648_v38, %v13600_v63  ;;  %v13651_v31 = vadd.f32 1.0, %v19726_v7 }
0x26fb   :  { %v19728_v62 = vpop.eup %19727 }
0x26fc   :  { %18935 = vmatprep.mubr.f32.mxu0 %v13664_v10  ;;  %v13650_v25 = vadd.f32 1.0, %v19728_v62  ;;  %v13667_v28 = vmul.f32 %v13651_v31, %v13603_v34 }
0x26fd   :  { %v19730_v4 = vpop.eup %19729  ;;  %18936 = vmatmul.mubr.f32.vlgmr.msra.gmra.mxu0 %v13665_v48 }
0x26fe   :  { %v13666_v23 = vmul.f32 %v13650_v25, %v13602_v39  ;;  %v13653_v32 = vadd.f32 1.0, %v19730_v4 }
0x26ff   :  { %v19732_v43 = vpop.eup %19731 }
0x2700   :  { %18938 = vmatprep.mubr.f32.mxu0 %v13666_v23  ;;  %v13652_v56 = vadd.f32 1.0, %v19732_v43  ;;  %v13669_v42 = vmul.f32 %v13653_v32, %v13605_v37 }
0x2701   :  { %v19734_v9 = vpop.eup %19733  ;;  %18939 = vmatmul.mubr.f32.gmra.mxu0 %v13667_v28 }
0x2702   :  { %v13668_v36 = vmul.f32 %v13652_v56, %v13604_v41  ;;  %v13655_v19 = vadd.f32 1.0, %v19734_v9 }
0x2703   :  { %v19736_v13 = vpop.eup %19735  ;;  %v18893_v5 = vpop.f32.mrf.mxu1 }
0x2704   :  { %v13567_v12 = vadd.f32 %v18893_v5, %v25291_v60  ;;  %18941 = vmatprep.mubr.f32.mxu0 %v13668_v36  ;;  %v13654_v16 = vadd.f32 1.0, %v19736_v13  ;;  %v13671_v40 = vmul.f32 %v13655_v19, %v13607_v8 }
0x2705   :  { %v13561_v6 = vpop.f32.mrf.mxu1  ;;  %18942 = vmatmul.mubr.f32.gmra.mxu0 %v13669_v42 }
0x2706   :  { %v13625_v33 = vmul.f32 0.70710677, %v13567_v12  ;;  %v13562_v17 = vadd.f32 %v25291_v60, %v13561_v6  ;;  %v13670_v61 = vmul.f32 %v13654_v16, %v13606_v49  ;;  %v13609_v23 = vmul.f32 0.5, %v13567_v12 }
0x2707   :  { %v18896_v58 = vpop.f32.mrf.mxu1 }
0x2708   :  { %19737 = verf.f32 %v13625_v33  ;;  %v13624_v1 = vmul.f32 0.70710677, %v13562_v17  ;;  %v13577_v20 = vadd.f32 %v18896_v58, %v25291_v60  ;;  %18944 = vmatprep.mubr.f32.mxu0 %v13670_v61  ;;  %v13608_v25 = vmul.f32 0.5, %v13562_v17 }
0x2709   :  { %v13571_v59 = vpop.f32.mrf.mxu1  ;;  %18945 = vmatmul.mubr.f32.gmra.mxu0 %v13671_v40 }
0x270a   :  { %19739 = verf.f32 %v13624_v1  ;;  %v13627_v54 = vmul.f32 0.70710677, %v13577_v20  ;;  %v13572_v57 = vadd.f32 %v25291_v60, %v13571_v59  ;;  %v13611_v36 = vmul.f32 0.5, %v13577_v20 }
0x270b   :  { %v18899_v11 = vpop.f32.mrf.mxu1  ;;  %v19777_v59 = vmov 0.0  }
0x270c   :  { %19741 = verf.f32 %v13627_v54  ;;  %v13626_v0 = vmul.f32 0.70710677, %v13572_v57  ;;  %v13587_v22 = vadd.f32 %v18899_v11, %v25291_v60  ;;  %v13610_v56 = vmul.f32 0.5, %v13572_v57  ;;  %18959 = vmatprep.subr.mxu1 %v19777_v59  ;;  %18991 = vmatprep.mubr.msk.f32.mxu1 %vm19778_vm4, %v19777_v59 }
0x270d   :  { %v13581_v15 = vpop.f32.mrf.mxu1 }
0x270e   :  { %19743 = verf.f32 %v13626_v0  ;;  %v13629_v35 = vmul.f32 0.70710677, %v13587_v22  ;;  %v13582_v50 = vadd.f32 %v25291_v60, %v13581_v15  ;;  %v13613_v8 = vmul.f32 0.5, %v13587_v22 }
0x270f   :  { %v18902_v46 = vpop.f32.mrf.mxu1 }
0x2710   :  { %19745 = verf.f32 %v13629_v35  ;;  %v13628_v63 = vmul.f32 0.70710677, %v13582_v50  ;;  %v13597_v38 = vadd.f32 %v18902_v46, %v25291_v60  ;;  %v13612_v5 = vmul.f32 0.5, %v13582_v50 }
0x2711   :  { %v13591_v7 = vpop.f32.mrf.mxu1 }
0x2712   :  { %19747 = verf.f32 %v13628_v63  ;;  %v13631_v30 = vmul.f32 0.70710677, %v13597_v38  ;;  %v13592_v10 = vadd.f32 %v25291_v60, %v13591_v7  ;;  %v13615_v58 = vmul.f32 0.5, %v13597_v38 }
0x2714   :  { %19749 = verf.f32 %v13631_v30  ;;  %v13630_v62 = vmul.f32 0.70710677, %v13592_v10  ;;  %v13614_v61 = vmul.f32 0.5, %v13592_v10 }
0x2715   :  { %v19738_v48 = vpop.eup %19737 }
0x2716   :  { %19751 = verf.f32 %v13630_v62  ;;  %v13657_v39 = vadd.f32 1.0, %v19738_v48 }
0x2717   :  { %v19740_v31 = vpop.eup %19739 }
0x2718   :  { %v13656_v4 = vadd.f32 1.0, %v19740_v31  ;;  %v13673_v32 = vmul.f32 %v13657_v39, %v13609_v23  ;;  %v25320_v31 = vld [vmem:[%s25419_s2 + $0x12] ss:$0 sm:$0xff] }
0x2719   :  { %v19742_v34 = vpop.eup %19741 }
0x271a   :  { %v13672_v43 = vmul.f32 %v13656_v4, %v13608_v25  ;;  %v13659_v41 = vadd.f32 1.0, %v19742_v34 }
0x271b   :  { %v19744_v28 = vpop.eup %19743 }
0x271c   :  { %18947 = vmatprep.mubr.f32.mxu0 %v13672_v43  ;;  %v13658_v9 = vadd.f32 1.0, %v19744_v28  ;;  %v13675_v42 = vmul.f32 %v13659_v41, %v13611_v36 }
0x271d   :  { %v19746_v37 = vpop.eup %19745  ;;  %18948 = vmatmul.mubr.f32.gmra.mxu0 %v13673_v32 }
0x271e   :  { %v13674_v60 = vmul.f32 %v13658_v9, %v13610_v56  ;;  %v13661_v19 = vadd.f32 1.0, %v19746_v37 }
0x271f   :  { %v19748_v13 = vpop.eup %19747 }
0x2720   :  { %18950 = vmatprep.mubr.f32.mxu0 %v13674_v60  ;;  %v13660_v49 = vadd.f32 1.0, %v19748_v13  ;;  %v13677_v33 = vmul.f32 %v13661_v19, %v13613_v8 }
0x2721   :  { %v19750_v16 = vpop.eup %19749  ;;  %18951 = vmatmul.mubr.f32.gmra.mxu0 %v13675_v42 }
0x2722   :  { %v13676_v12 = vmul.f32 %v13660_v49, %v13612_v5  ;;  %v13663_v17 = vadd.f32 1.0, %v19750_v16 }
0x2723   :  { %v19752_v6 = vpop.eup %19751 }
0x2724   :  { %18953 = vmatprep.mubr.f32.mxu0 %v13676_v12  ;;  %v13662_v40 = vadd.f32 1.0, %v19752_v6  ;;  %v13679_v20 = vmul.f32 %v13663_v17, %v13615_v58 }
0x2725   :  { %18954 = vmatmul.mubr.f32.gmra.mxu0 %v13677_v33 }
0x2726   :  { %v13678_v1 = vmul.f32 %v13662_v40, %v13614_v61 }
0x2728   :  { %18956 = vmatprep.mubr.f32.mxu0 %v13678_v1 }
0x2729   :  { %18957 = vmatmul.mubr.f32.gmra.mxu0 %v13679_v20 }
0x27bd   :  { %v25312_v54 = vpop.f32.mrf.mxu0 }
0x27be   :  { %v13843_v8 = vadd.f32 %v25312_v54, %v24945_v14 }
0x27bf   :  { %v25314_v57 = vpop.f32.mrf.mxu0 }
0x27c0   :  { %v13842_v12 = vadd.f32 %v25314_v57, %v24949_v24  ;;  %v13864_v6 = vadd.f32 %v25320_v31, %v13843_v8  ;;  %v19779_v24 = vmov 0.015625   ;;  %v13993_v57 = vld [vmem:[%s25420_s3 + $0x38] sm:$0xff] }
0x27c1   :  { %v18940_v11 = vpop.f32.mrf.mxu0 }
0x27c2   :  { %v13845_v42 = vadd.f32 %v18940_v11, %v24957_v47  ;;  %v13863_v14 = vadd.f32 %v25320_v31, %v13842_v12  ;;  %v13992_v11 = vld [vmem:[%s25420_s3 + $0x30] sm:$0xff] }
0x27c3   :  { %v13773_v0 = vpop.f32.mrf.mxu0 }
0x27c4   :  { %v13866_v47 = vadd.f32 %v25320_v31, %v13845_v42 }
0x27c5   :  { %v18943_v22 = vpop.f32.mrf.mxu0 }
0x27c6   :  { %v13847_v36 = vadd.f32 %v18943_v22, %v24971_v3  ;;  %v13844_v3 = vadd.f32 %v13773_v0, %v24963_v18  ;;  %v13991_v0 = vld [vmem:[%s25420_s3 + $0x28] sm:$0xff]  ;;  %v13990_v22 = vld [vmem:[%s25420_s3 + $0x20] sm:$0xff] }
0x27c7   :  { %v13783_v15 = vpop.f32.mrf.mxu0 }
0x27c8   :  { %v13868_v19 = vadd.f32 %v25320_v31, %v13847_v36  ;;  %v13865_v18 = vadd.f32 %v25320_v31, %v13844_v3 }
0x27c9   :  { %v18946_v35 = vpop.f32.mrf.mxu0 }
0x27ca   :  { %v13849_v56 = vadd.f32 %v18946_v35, %v24983_v53  ;;  %v13846_v53 = vadd.f32 %v13783_v15, %v24977_v29  ;;  %v13989_v15 = vld [vmem:[%s25420_s3 + $0x18] sm:$0xff]  ;;  %v13988_v35 = vld [vmem:[%s25420_s3 + $0x10] sm:$0xff] }
0x27cb   :  { %v13793_v50 = vpop.f32.mrf.mxu0 }
0x27cc   :  { %v13870_v60 = vadd.f32 %v25320_v31, %v13849_v56  ;;  %v13867_v5 = vadd.f32 %v25320_v31, %v13846_v53 }
0x27dd   :  { %v18949_v46 = vpop.f32.mrf.mxu0 }
0x27df   :  { %v13803_v63 = vpop.f32.mrf.mxu0 }
0x27e1   :  { %v18952_v38 = vpop.f32.mrf.mxu0 }
0x27e3   :  { %v13813_v7 = vpop.f32.mrf.mxu0 }
0x27e5   :  { %v18955_v30 = vpop.f32.mrf.mxu0 }
0x27e6   :  { %v13855_v25 = vadd.f32 %v18955_v30, %v25022_v55  ;;  %v13852_v55 = vadd.f32 %v13813_v7, %v25016_v51  ;;  %v13879_v51 = vlaneseq }
0x27e7   :  { %v13823_v10 = vpop.f32.mrf.mxu0 }
0x27e8   :  { %v13854_v23 = vadd.f32 %v13823_v10, %v25028_v2  ;;  %v13876_v28 = vadd.f32 %v25320_v31, %v13855_v25  ;;  %v13851_v2 = vadd.f32 %v18949_v46, %v25001_v27  ;;  %v13873_v41 = vadd.f32 %v25320_v31, %v13852_v55  ;;  %v13986_v46 = vld [vmem:[%s25420_s3] sm:$0xff] }
0x27e9   :  { %v18958_v62 = vpop.f32.mrf.mxu0  ;;  %v13848_v27 = vadd.f32 %v13793_v50, %v24988_v44  ;;  %v13882_v29 = vand.u32 127, %v13879_v51  ;;  %v13987_v50 = vld [vmem:[%s25420_s3 + $0x8] sm:$0xff]  ;;  %v15270_v10 = vld [vmem:[%s25419_s2 + $0x7] ss:$0 sm:$0xff] }
0x27ea   :  { %v13857_v48 = vadd.f32 %v18958_v62, %v25034_v52  ;;  %v13853_v52 = vadd.f32 %v18952_v38, %v25011_v21  ;;  %v13875_v32 = vadd.f32 %v25320_v31, %v13854_v23  ;;  %v13850_v21 = vadd.f32 %v13803_v63, %v25005_v45 }
0x27eb   :  { %v13833_v39 = vpop.f32.mrf.mxu0  ;;  %v13872_v9 = vadd.f32 %v25320_v31, %v13851_v2  ;;  %v13880_v45 = vshrl.u32 %v13879_v51, 7  ;;  %v13869_v13 = vadd.f32 %v25320_v31, %v13848_v27 }
0x27ec   :  { %v13878_v4 = vadd.f32 %v25320_v31, %v13857_v48  ;;  %v13856_v34 = vadd.f32 %v13833_v39, %v25040_v26  ;;  %v13874_v26 = vadd.f32 %v25320_v31, %v13853_v52  ;;  %v13871_v37 = vadd.f32 %v25320_v31, %v13850_v21  ;;  %v15271_v48 = vld [vmem:[%s25419_s2 + $0x8] ss:$0 sm:$0xff] }
0x27ed   :  { %v13885_v44 = vadd.s32 1, %v13880_v45  ;;  %v13883_v49 = vmul.u32 64, %v13880_v45 }
0x27ee   :  { %v13877_v43 = vadd.f32 %v25320_v31, %v13856_v34  ;;  %18960 = vmatpush3.msra.mxu1 %v13878_v4 }
0x27ef   :  { %18961 = vmatprep.subr.mxu1 %v19777_v59  ;;  %v13886_v16 = vmul.u32 64, %v13885_v44  ;;  %vm13884_vm5 = vcmp.ge.s32.totalorder %v13882_v29, %v13883_v49 }
0x27f0   :  { %18962 = vmatpush3.msra.mxu1 %v13877_v43 }
0x27f1   :  { %18963 = vmatprep.subr.mxu1 %v19777_v59  ;;  %vm13887_vm6 = vcmp.lt.s32.totalorder %v13882_v29, %v13886_v16 }
0x27f2   :  { %18964 = vmatpush3.msra.mxu1 %v13876_v28  ;;  %vm13888_vm7 = vmand %vm13884_vm5, %vm13887_vm6 }
0x27f3   :  { %18965 = vmatprep.subr.mxu1 %v19777_v59 }
0x27f4   :  { %18966 = vmatpush3.msra.mxu1 %v13875_v32 }
0x27f5   :  { %18967 = vmatprep.subr.mxu1 %v19777_v59 }
0x27f6   :  { %18968 = vmatpush3.msra.mxu1 %v13874_v26 }
0x27f7   :  { %18969 = vmatprep.subr.mxu1 %v19777_v59 }
0x27f8   :  { %18970 = vmatpush3.msra.mxu1 %v13873_v41 }
0x27f9   :  { %18971 = vmatprep.subr.mxu1 %v19777_v59 }
0x27fa   :  { %18972 = vmatpush3.msra.mxu1 %v13872_v9 }
0x27fb   :  { %18973 = vmatprep.subr.mxu1 %v19777_v59 }
0x27fc   :  { %18974 = vmatpush3.msra.mxu1 %v13871_v37 }
0x27fd   :  { %18975 = vmatprep.subr.mxu1 %v19777_v59 }
0x27fe   :  { %18976 = vmatpush3.msra.mxu1 %v13870_v60 }
0x27ff   :  { %18977 = vmatprep.subr.mxu1 %v19777_v59 }
0x2800   :  { %18978 = vmatpush3.msra.mxu1 %v13869_v13 }
0x2801   :  { %18979 = vmatprep.subr.mxu1 %v19777_v59 }
0x2802   :  { %18980 = vmatpush3.msra.mxu1 %v13868_v19 }
0x2803   :  { %18981 = vmatprep.subr.mxu1 %v19777_v59 }
0x2804   :  { %18982 = vmatpush3.msra.mxu1 %v13867_v5 }
0x2805   :  { %18983 = vmatprep.subr.mxu1 %v19777_v59 }
0x2806   :  { %18984 = vmatpush3.msra.mxu1 %v13866_v47 }
0x2807   :  { %18985 = vmatprep.subr.mxu1 %v19777_v59 }
0x2808   :  { %18986 = vmatpush3.msra.mxu1 %v13865_v18 }
0x2809   :  { %18987 = vmatprep.subr.mxu1 %v19777_v59 }
0x280a   :  { %18988 = vmatpush3.msra.mxu1 %v13864_v6 }
0x280b   :  { %18989 = vmatprep.subr.mxu1 %v19777_v59 }
0x280c   :  { %18990 = vmatpush3.msra.mxu1 %v13863_v14 }
0x280d   :  { %18992 = vmatmul.mubr.msk.f32.vlgmr.msra.gmra.mxu1 %vm13888_vm7, %v19779_v24  ;;  %18994 = vmatprep.subr.mxu1 %v19777_v59 }
0x280e   :  { %19010 = vmatprep.mubr.msk.f32.mxu1 %vm19778_vm4, %v19777_v59  ;;  %18995 = vmatpush3.msra.mxu1 %v13993_v57 }
0x280f   :  { %18996 = vmatprep.subr.mxu1 %v19777_v59 }
0x2810   :  { %18997 = vmatpush3.msra.mxu1 %v13992_v11 }
0x2811   :  { %18998 = vmatprep.subr.mxu1 %v19777_v59 }
0x2812   :  { %18999 = vmatpush3.msra.mxu1 %v13991_v0 }
0x2813   :  { %19000 = vmatprep.subr.mxu1 %v19777_v59 }
0x2814   :  { %19001 = vmatpush3.msra.mxu1 %v13990_v22 }
0x2815   :  { %19002 = vmatprep.subr.mxu1 %v19777_v59 }
0x2816   :  { %19003 = vmatpush3.msra.mxu1 %v13989_v15 }
0x2817   :  { %19004 = vmatprep.subr.mxu1 %v19777_v59 }
0x2818   :  { %19005 = vmatpush3.msra.mxu1 %v13988_v35 }
0x2819   :  { %19006 = vmatprep.subr.mxu1 %v19777_v59 }
0x281a   :  { %19007 = vmatpush3.msra.mxu1 %v13987_v50 }
0x281b   :  { %19008 = vmatprep.subr.mxu1 %v19777_v59  ;;  %v15272_v59 = vld [vmem:[%s25420_s3 + $0x42] ss:$0 sm:$0xff] }
0x281c   :  { %19009 = vmatpush3.msra.mxu1 %v13986_v46 }
0x28cd   :  { %v13956_v33 = vpop.f32.mrf.mxu1 }
0x28ce   :  { %v13963_v17 = vsel %vm13962_vm8, %v13956_v33, 0.0 }
0x28cf   :  { %13964 = vadd.xlane.f32.xlu0 %v13963_v17  ;;  %v18993_v61 = vpop.f32.mrf.mxu1 }
0x2958   :  { %v13965_v40 = vpop.xlane.xlu0 %13964 }
0x2959   :  { %v13966_v58 = vmul.f32 0.015625, %v13965_v40 }
0x295b   :  { %v13967_v1 = vsub.f32 %v13956_v33, %v13966_v58 }
0x295d   :  { %v13968_v20 = vmul.f32 %v13967_v1, %v13967_v1 }
0x295f   :  { %v13969_v54 = vsel %vm13962_vm8, %v13968_v20, 0.0 }
0x2960   :  { %13970 = vadd.xlane.f32.xlu1 %v13969_v54 }
0x29e9   :  { %v13971_v63 = vpop.xlane.xlu1 %13970 }
0x29ea   :  { %v13972_v38 = vmul.f32 0.015625, %v13971_v63 }
0x29ec   :  { %v13973_v7 = vadd.f32 1e-05, %v13972_v38 }
0x29ee   :  { %19753 = vrsqrt.f32 %v13973_v7 }
0x29fb   :  { %v19754_v30 = vpop.eup %19753 }
0x29fc   :  { %v13975_v62 = vmul.f32 %v19754_v30, %v13967_v1 }
0x29fe   :  { %v13980_v31 = vmul.f32 %v15270_v10, %v13975_v62 }
0x2a00   :  { %v13985_v39 = vadd.f32 %v15271_v48, %v13980_v31 }
0x2a02   :  { %19011 = vmatmul.mubr.msk.f32.vlgmr.msra.gmra.mxu1 %vm252_vm2, %v13985_v39 }
0x2ac2   :  { %v14068_v25 = vpop.f32.mrf.mxu1 }
0x2ac3   :  { %v14069_v4 = vadd.f32 %v15272_v59, %v14068_v25 }
0x2ac4   :  { %v19012_v34 = vpop.f32.mrf.mxu1 }
0x2ac5   :  { %14072 = vst [vmem:[#allocation2] sm:$0x3] %v14069_v4 }
0x2ac6   :  { %19766 = shalt.err (!%p19763_p4)
}
0x2ac7   :  { %14082 = dma.vmem_to_hbm [thread:$0]  %s14080_s27, 32, %s25425_s8, [#allocation3]  }
0x2ac8   :  { %19775 = dma.done.wait [#allocation3], 32  }
0x2ac9   :  { %19776 = vsyncadd [#allocation3], 4294967264 }
0x2aca   :  { %14086 = vsyncpa [#allocation3], 1 }

</bundles_post_ra>
